<compile_context>
chip_gen: v7x
topology: tpu7x:2x2x1
jax: 0.10.0
libtpu: 0.0.40
codegen_flags: <defaults>
</compile_context>

<pallas_src>
import math

import jax
import jax.numpy as jnp
from jax.experimental import pallas as pl
from jax.experimental.pallas import tpu as pltpu  # noqa: F401  (imported per template)

# Small config consistent with GRT(d_model=16, dim_feedforward=32, nhead=4)
D_MODEL = 16
DIM_FF = 32
NHEAD = 4
DH = D_MODEL // NHEAD
B, H, W = 2, 8, 8
HW = H * W

PARAM_ORDER = (
    "ftw1", "ftb1", "gn1g", "gn1b",
    "ftw2", "ftb2", "gn2g", "gn2b",
    "ftw3", "ftb3",
    "wq", "bq", "wk", "bk", "wv", "bv", "wo", "bo",
    "n1g", "n1b",
    "l1w", "l1b", "l2w", "l2b",
    "n2g", "n2b",
)

PACKED_ORDER = ("w1s", "w1l", "w2", "w3", "wqkv", "bqkv", "wo",
                "l1w", "l1b", "l2w", "vec2c", "vecc")


# ----------------------------------------------------------------------------------
# Kernel
# ----------------------------------------------------------------------------------
def _make_kernel(bsz, hw, c, nhead):
    dh = c // nhead

    def _gn(h2, gamma, beta, eps=1e-5):
        # GroupNorm(1, C): per-sample stats over all (HW, C) elements; one data pass.
        cx = h2.shape[-1]
        h3 = h2.reshape(bsz, hw, cx)
        inv_n = 1.0 / float(hw * cx)
        s1 = jnp.sum(jnp.sum(h3, axis=2, keepdims=True), axis=1, keepdims=True)
        s2 = jnp.sum(jnp.sum(h3 * h3, axis=2, keepdims=True), axis=1, keepdims=True)
        mu = s1 * inv_n
        var = jnp.maximum(s2 * inv_n - mu * mu, 0.0)
        hn = (h3 - mu) * jax.lax.rsqrt(var + eps)
        return hn.reshape(bsz * hw, cx) * gamma + beta

    def _ln(h2, gamma, beta, eps=1e-5):
        inv_n = 1.0 / float(h2.shape[-1])
        mu = jnp.sum(h2, axis=-1, keepdims=True) * inv_n
        var = jnp.maximum(jnp.sum(h2 * h2, axis=-1, keepdims=True) * inv_n - mu * mu, 0.0)
        return (h2 - mu) * jax.lax.rsqrt(var + eps) * gamma + beta

    def kernel(src_ref, low_ref, w1s_ref, w1l_ref, w2_ref, w3_ref,
               wqkv_ref, bqkv_ref, wo_ref, l1w_ref, l1b_ref, l2w_ref,
               v2c_ref, vc_ref, out_ref):
        # ---- bring (B, C, HW) inputs to token-major (B*HW, C); token = b*HW + h*W + w
        src2 = jnp.concatenate([src_ref[b].T for b in range(bsz)], axis=0)   # (B*HW, C)
        low2 = jnp.concatenate([low_ref[b].T for b in range(bsz)], axis=0)   # (B*HW, 2C)

        v2c = v2c_ref[...]                      # (6, 2C)
        vc = vc_ref[...]                        # (7, C)
        ftb1, gn1g, gn1b = v2c[0:1], v2c[1:2], v2c[2:3]
        ftb2, gn2g, gn2b = v2c[3:4], v2c[4:5], v2c[5:6]
        ftb3, bo = vc[0:1], vc[1:2]
        n1g, n1b = vc[2:3], vc[3:4]
        l2b = vc[4:5]
        n2g, n2b = vc[5:6], vc[6:7]

        # ---- feature_trans: three 1x1 convs (channel matmuls) + GroupNorm(1) + ReLU
        # concat([src, srclow]) @ W1  ==  src @ W1[:C] + srclow @ W1[C:]  (no lane concat)
        h1 = (jnp.dot(src2, w1s_ref[...], preferred_element_type=jnp.float32)
              + jnp.dot(low2, w1l_ref[...], preferred_element_type=jnp.float32)
              + ftb1)
        h1 = jnp.maximum(_gn(h1, gn1g, gn1b), 0.0)
        h2 = jnp.dot(h1, w2_ref[...], preferred_element_type=jnp.float32) + ftb2
        h2 = jnp.maximum(_gn(h2, gn2g, gn2b), 0.0)
        ft = jnp.dot(h2, w3_ref[...], preferred_element_type=jnp.float32) + ftb3
        x2 = ft + src2                                               # (B*HW, C)

        # ---- multi-head self-attention (per-head weights pre-split in the wrapper)
        wqkv = wqkv_ref[...]        # (3*NHEAD, C, DH): q heads, then k heads, then v heads
        bqkv = bqkv_ref[...]        # (3*NHEAD, 1, DH): q bias pre-scaled by 1/sqrt(DH)
        wo = wo_ref[...]            # (NHEAD, DH, C)
        attn = jnp.zeros((bsz * hw, c), jnp.float32)
        for hd in range(nhead):
            qh = (jnp.dot(x2, wqkv[hd], preferred_element_type=jnp.float32)
                  + bqkv[hd]).reshape(bsz, hw, dh)
            kh = (jnp.dot(x2, wqkv[nhead + hd], preferred_element_type=jnp.float32)
                  + bqkv[nhead + hd]).reshape(bsz, hw, dh)
            vh = (jnp.dot(x2, wqkv[2 * nhead + hd], preferred_element_type=jnp.float32)
                  + bqkv[2 * nhead + hd]).reshape(bsz, hw, dh)
            # scores / softmax strictly per sample (batch dim b keeps samples separate)
            s = jnp.einsum('bqd,bkd->bqk', qh, kh,
                           preferred_element_type=jnp.float32)       # (B, HW, HW)
            s = s - jnp.max(s, axis=-1, keepdims=True)
            e = jnp.exp(s)
            p = e * pl.reciprocal(jnp.sum(e, axis=-1, keepdims=True), approx=True)
            oh = jnp.einsum('bqk,bkd->bqd', p, vh,
                            preferred_element_type=jnp.float32)      # (B, HW, DH)
            # fold output projection per head -> no head concat needed
            attn = attn + jnp.dot(oh.reshape(bsz * hw, dh), wo[hd],
                                  preferred_element_type=jnp.float32)
        attn = attn + bo

        x2 = _ln(x2 + attn, n1g, n1b)

        # ---- feed-forward
        f = jnp.maximum(jnp.dot(x2, l1w_ref[...], preferred_element_type=jnp.float32)
                        + l1b_ref[...], 0.0)
        f = jnp.dot(f, l2w_ref[...], preferred_element_type=jnp.float32) + l2b
        x2 = _ln(x2 + f, n2g, n2b)

        # ---- emit (B, C, HW): per-sample in-kernel transpose (XLU), lane dim = HW = 64
        x3 = x2.reshape(bsz, hw, c)
        for b in range(bsz):
            out_ref[b] = x3[b].T.astype(out_ref.dtype)

    return kernel


# ----------------------------------------------------------------------------------
# Parameters
# ----------------------------------------------------------------------------------
def make_params():
    C, F = D_MODEL, DIM_FF
    shapes = {
        "ftw1": (3 * C, 2 * C), "ftb1": (1, 2 * C),
        "gn1g": (1, 2 * C), "gn1b": (1, 2 * C),
        "ftw2": (2 * C, 2 * C), "ftb2": (1, 2 * C),
        "gn2g": (1, 2 * C), "gn2b": (1, 2 * C),
        "ftw3": (2 * C, C), "ftb3": (1, C),
        "wq": (C, C), "bq": (1, C),
        "wk": (C, C), "bk": (1, C),
        "wv": (C, C), "bv": (1, C),
        "wo": (C, C), "bo": (1, C),
        "n1g": (1, C), "n1b": (1, C),
        "l1w": (C, F), "l1b": (1, F),
        "l2w": (F, C), "l2b": (1, C),
        "n2g": (1, C), "n2b": (1, C),
    }
    key = jax.random.PRNGKey(42)
    params = {}
    for i, name in enumerate(PARAM_ORDER):
        shp = shapes[name]
        if name in ("gn1g", "gn2g", "n1g", "n2g"):
            params[name] = jnp.ones(shp, jnp.float32)
        elif name in ("gn1b", "gn2b", "n1b", "n2b"):
            params[name] = jnp.zeros(shp, jnp.float32)
        else:
            params[name] = 0.05 * jax.random.normal(
                jax.random.fold_in(key, i), shp, jnp.float32)
    return params


def pack_params(p):
    """One-time repacking (outside jit): per-head QKV/O stacks, fused small vectors,
    ftw1 split, q-scale folded into Wq/bq."""
    C = D_MODEL
    scale = 1.0 / math.sqrt(DH)

    def heads_w(wmat, s=1.0):
        return (wmat * s).reshape(C, NHEAD, DH).transpose(1, 0, 2)     # (NHEAD, C, DH)

    def heads_b(bvec, s=1.0):
        return (bvec * s).reshape(1, NHEAD, DH).transpose(1, 0, 2)     # (NHEAD, 1, DH)

    return dict(
        w1s=p["ftw1"][:C],                  # (C, 2C)   src part of conv1
        w1l=p["ftw1"][C:],                  # (2C, 2C)  srclow part of conv1
        w2=p["ftw2"],                       # (2C, 2C)
        w3=p["ftw3"],                       # (2C, C)
        wqkv=jnp.concatenate(
            [heads_w(p["wq"], scale), heads_w(p["wk"]), heads_w(p["wv"])], axis=0),
        bqkv=jnp.concatenate(
            [heads_b(p["bq"], scale), heads_b(p["bk"]), heads_b(p["bv"])], axis=0),
        wo=p["wo"].reshape(NHEAD, DH, C),   # (NHEAD, DH, C)
        l1w=p["l1w"], l1b=p["l1b"], l2w=p["l2w"],
        vec2c=jnp.concatenate([p["ftb1"], p["gn1g"], p["gn1b"],
                               p["ftb2"], p["gn2g"], p["gn2b"]], axis=0),   # (6, 2C)
        vecc=jnp.concatenate([p["ftb3"], p["bo"], p["n1g"], p["n1b"],
                              p["l2b"], p["n2g"], p["n2b"]], axis=0),        # (7, C)
    )


# ----------------------------------------------------------------------------------
# Wrapper (NCHW in / NCHW out, free reshapes only)
# ----------------------------------------------------------------------------------
@jax.jit
def grt_forward(src_nchw, srclow_nchw, packed):
    b, c, h, w = src_nchw.shape
    hw = h * w
    src = src_nchw.reshape(b, c, hw)
    srclow = srclow_nchw.reshape(b, 2 * c, hw)
    flat = [packed[k] for k in PACKED_ORDER]

    out = pl.pallas_call(
        _make_kernel(b, hw, c, NHEAD),
        out_shape=jax.ShapeDtypeStruct((b, c, hw), jnp.float32),
    )(src, srclow, *flat)

    feat = out.reshape(b, c, h, w)
    return feat, srclow_nchw


# ----------------------------------------------------------------------------------
# Pure-JAX reference mirroring the torch forward (eval mode)
# ----------------------------------------------------------------------------------
def grt_reference(src_nchw, srclow_nchw, p):
    b, c, h, w = src_nchw.shape
    L = h * w
    src = jnp.transpose(src_nchw, (0, 2, 3, 1)).reshape(b, L, c)
    srclow = jnp.transpose(srclow_nchw, (0, 2, 3, 1)).reshape(b, L, 2 * c)
    x = jnp.concatenate([src, srclow], axis=-1)

    def gn(hh, g, bb, eps=1e-5):
        mu = jnp.mean(hh, axis=(1, 2), keepdims=True)
        var = jnp.mean((hh - mu) ** 2, axis=(1, 2), keepdims=True)
        return (hh - mu) / jnp.sqrt(var + eps) * g + bb

    def ln(hh, g, bb, eps=1e-5):
        mu = jnp.mean(hh, axis=-1, keepdims=True)
        var = jnp.mean((hh - mu) ** 2, axis=-1, keepdims=True)
        return (hh - mu) / jnp.sqrt(var + eps) * g + bb

    h1 = jnp.maximum(gn(x @ p["ftw1"] + p["ftb1"], p["gn1g"], p["gn1b"]), 0.0)
    h2 = jnp.maximum(gn(h1 @ p["ftw2"] + p["ftb2"], p["gn2g"], p["gn2b"]), 0.0)
    ft = h2 @ p["ftw3"] + p["ftb3"]
    xx = ft + src

    scale = 1.0 / math.sqrt(DH)
    q = ((xx @ p["wq"]) + p["bq"]) * scale
    k = (xx @ p["wk"]) + p["bk"]
    v = (xx @ p["wv"]) + p["bv"]
    qh = q.reshape(b, L, NHEAD, DH)
    kh = k.reshape(b, L, NHEAD, DH)
    vh = v.reshape(b, L, NHEAD, DH)
    s = jnp.einsum("blhd,bmhd->bhlm", qh, kh)
    a = jax.nn.softmax(s, axis=-1)
    o = jnp.einsum("bhlm,bmhd->blhd", a, vh).reshape(b, L, c)
    o = o @ p["wo"] + p["bo"]
    xx = ln(xx + o, p["n1g"], p["n1b"])
    f = jnp.maximum(xx @ p["l1w"] + p["l1b"], 0.0)
    f = f @ p["l2w"] + p["l2b"]
    xx = ln(xx + f, p["n2g"], p["n2b"])
    feat = jnp.transpose(xx.reshape(b, h, w, c), (0, 3, 1, 2))
    return feat, srclow_nchw


if __name__ == "__main__":
    key = jax.random.PRNGKey(0)
    k1, k2 = jax.random.split(key)
    src = jax.random.normal(k1, (B, D_MODEL, H, W), jnp.float32)
    srclow = jax.random.normal(k2, (B, 2 * D_MODEL, H, W), jnp.float32)
    params = make_params()
    packed = pack_params(params)   # one-time repacking outside the jitted forward

    feat, low = grt_forward(src, srclow, packed)
    feat = jax.block_until_ready(feat)

    ref_feat, _ = grt_reference(src, srclow, params)
    assert feat.shape == (B, D_MODEL, H, W)
    err = float(jnp.max(jnp.abs(feat - ref_feat)))
    assert err < 2e-3, f"mismatch vs reference: {err}"
    print("KERNEL_OK")
</pallas_src>

<mosaic_0001>
module attributes {stable_mosaic.version = 11 : i64} {
  func.func @kernel(%arg0: memref<2x16x64xf32, #tpu.memory_space<vmem>>, %arg1: memref<2x32x64xf32, #tpu.memory_space<vmem>>, %arg2: memref<16x32xf32, #tpu.memory_space<vmem>>, %arg3: memref<32x32xf32, #tpu.memory_space<vmem>>, %arg4: memref<32x32xf32, #tpu.memory_space<vmem>>, %arg5: memref<32x16xf32, #tpu.memory_space<vmem>>, %arg6: memref<12x16x4xf32, #tpu.memory_space<vmem>>, %arg7: memref<12x1x4xf32, #tpu.memory_space<vmem>>, %arg8: memref<4x4x16xf32, #tpu.memory_space<vmem>>, %arg9: memref<16x32xf32, #tpu.memory_space<vmem>>, %arg10: memref<1x32xf32, #tpu.memory_space<vmem>>, %arg11: memref<32x16xf32, #tpu.memory_space<vmem>>, %arg12: memref<6x32xf32, #tpu.memory_space<vmem>>, %arg13: memref<7x16xf32, #tpu.memory_space<vmem>>, %arg14: memref<2x16x64xf32, #tpu.memory_space<vmem>>) attributes {dimension_semantics = [], scalar_prefetch = 0 : i64, scratch_operands = 0 : i64, tpu.core_type = #tpu.core_type<tc>} {
    %c0 = arith.constant 0 : index
    %c0_0 = arith.constant 0 : index
    %c0_1 = arith.constant 0 : index
    %0 = vector.load %arg0[%c0, %c0_0, %c0_1] : memref<2x16x64xf32, #tpu.memory_space<vmem>>, vector<1x16x64xf32>
    %1 = vector.shape_cast %0 : vector<1x16x64xf32> to vector<16x64xf32>
    %2 = tpu.transpose %1, [1, 0] : vector<16x64xf32> -> vector<64x16xf32>
    %c1 = arith.constant 1 : index
    %c0_2 = arith.constant 0 : index
    %c0_3 = arith.constant 0 : index
    %3 = vector.load %arg0[%c1, %c0_2, %c0_3] : memref<2x16x64xf32, #tpu.memory_space<vmem>>, vector<1x16x64xf32>
    %4 = vector.shape_cast %3 : vector<1x16x64xf32> to vector<16x64xf32>
    %5 = tpu.transpose %4, [1, 0] : vector<16x64xf32> -> vector<64x16xf32>
    %6 = tpu.concatenate %2, %5 in 0 : vector<64x16xf32>, vector<64x16xf32> -> vector<128x16xf32>
    %c0_4 = arith.constant 0 : index
    %c0_5 = arith.constant 0 : index
    %c0_6 = arith.constant 0 : index
    %7 = vector.load %arg1[%c0_4, %c0_5, %c0_6] : memref<2x32x64xf32, #tpu.memory_space<vmem>>, vector<1x32x64xf32>
    %8 = vector.shape_cast %7 : vector<1x32x64xf32> to vector<32x64xf32>
    %9 = tpu.transpose %8, [1, 0] : vector<32x64xf32> -> vector<64x32xf32>
    %c1_7 = arith.constant 1 : index
    %c0_8 = arith.constant 0 : index
    %c0_9 = arith.constant 0 : index
    %10 = vector.load %arg1[%c1_7, %c0_8, %c0_9] : memref<2x32x64xf32, #tpu.memory_space<vmem>>, vector<1x32x64xf32>
    %11 = vector.shape_cast %10 : vector<1x32x64xf32> to vector<32x64xf32>
    %12 = tpu.transpose %11, [1, 0] : vector<32x64xf32> -> vector<64x32xf32>
    %13 = tpu.concatenate %9, %12 in 0 : vector<64x32xf32>, vector<64x32xf32> -> vector<128x32xf32>
    %c0_10 = arith.constant 0 : index
    %c0_11 = arith.constant 0 : index
    %14 = vector.load %arg12[%c0_10, %c0_11] : memref<6x32xf32, #tpu.memory_space<vmem>>, vector<6x32xf32>
    %c0_12 = arith.constant 0 : index
    %c0_13 = arith.constant 0 : index
    %15 = vector.load %arg13[%c0_12, %c0_13] : memref<7x16xf32, #tpu.memory_space<vmem>>, vector<7x16xf32>
    %16 = vector.extract_strided_slice %14 {offsets = [0, 0], sizes = [1, 32], strides = [1, 1]} : vector<6x32xf32> to vector<1x32xf32>
    %17 = vector.extract_strided_slice %14 {offsets = [1, 0], sizes = [1, 32], strides = [1, 1]} : vector<6x32xf32> to vector<1x32xf32>
    %18 = vector.extract_strided_slice %14 {offsets = [2, 0], sizes = [1, 32], strides = [1, 1]} : vector<6x32xf32> to vector<1x32xf32>
    %19 = vector.extract_strided_slice %14 {offsets = [3, 0], sizes = [1, 32], strides = [1, 1]} : vector<6x32xf32> to vector<1x32xf32>
    %20 = vector.extract_strided_slice %14 {offsets = [4, 0], sizes = [1, 32], strides = [1, 1]} : vector<6x32xf32> to vector<1x32xf32>
    %21 = vector.extract_strided_slice %14 {offsets = [5, 0], sizes = [1, 32], strides = [1, 1]} : vector<6x32xf32> to vector<1x32xf32>
    %22 = vector.extract_strided_slice %15 {offsets = [0, 0], sizes = [1, 16], strides = [1, 1]} : vector<7x16xf32> to vector<1x16xf32>
    %23 = vector.extract_strided_slice %15 {offsets = [1, 0], sizes = [1, 16], strides = [1, 1]} : vector<7x16xf32> to vector<1x16xf32>
    %24 = vector.extract_strided_slice %15 {offsets = [2, 0], sizes = [1, 16], strides = [1, 1]} : vector<7x16xf32> to vector<1x16xf32>
    %25 = vector.extract_strided_slice %15 {offsets = [3, 0], sizes = [1, 16], strides = [1, 1]} : vector<7x16xf32> to vector<1x16xf32>
    %26 = vector.extract_strided_slice %15 {offsets = [4, 0], sizes = [1, 16], strides = [1, 1]} : vector<7x16xf32> to vector<1x16xf32>
    %27 = vector.extract_strided_slice %15 {offsets = [5, 0], sizes = [1, 16], strides = [1, 1]} : vector<7x16xf32> to vector<1x16xf32>
    %28 = vector.extract_strided_slice %15 {offsets = [6, 0], sizes = [1, 16], strides = [1, 1]} : vector<7x16xf32> to vector<1x16xf32>
    %c0_14 = arith.constant 0 : index
    %c0_15 = arith.constant 0 : index
    %29 = vector.load %arg2[%c0_14, %c0_15] : memref<16x32xf32, #tpu.memory_space<vmem>>, vector<16x32xf32>
    %cst = arith.constant dense<0.000000e+00> : vector<128x32xf32>
    %30 = tpu.matmul %6, %29, %cst {dimension_numbers = #tpu.dot_dimension_numbers<[1], [0], [0], [1], [0, 0, 1, 1], [], []>} : vector<128x16xf32>, vector<16x32xf32>, vector<128x32xf32> -> vector<128x32xf32>
    %c0_16 = arith.constant 0 : index
    %c0_17 = arith.constant 0 : index
    %31 = vector.load %arg3[%c0_16, %c0_17] : memref<32x32xf32, #tpu.memory_space<vmem>>, vector<32x32xf32>
    %cst_18 = arith.constant dense<0.000000e+00> : vector<128x32xf32>
    %32 = tpu.matmul %13, %31, %cst_18 {dimension_numbers = #tpu.dot_dimension_numbers<[1], [0], [0], [1], [0, 0, 1, 1], [], []>} : vector<128x32xf32>, vector<32x32xf32>, vector<128x32xf32> -> vector<128x32xf32>
    %33 = arith.addf %30, %32 : vector<128x32xf32>
    %34 = vector.broadcast %16 : vector<1x32xf32> to vector<128x32xf32>
    %35 = arith.addf %33, %34 : vector<128x32xf32>
    %36 = vector.shape_cast %35 : vector<128x32xf32> to vector<2x64x32xf32>
    %cst_19 = arith.constant dense<0.000000e+00> : vector<2x64xf32>
    %37 = vector.multi_reduction <add>, %36, %cst_19 [2] : vector<2x64x32xf32> to vector<2x64xf32>
    %38 = vector.shape_cast %37 : vector<2x64xf32> to vector<2x64x1xf32>
    %cst_20 = arith.constant dense<0.000000e+00> : vector<2x1xf32>
    %39 = vector.multi_reduction <add>, %38, %cst_20 [1] : vector<2x64x1xf32> to vector<2x1xf32>
    %40 = vector.shape_cast %39 : vector<2x1xf32> to vector<2x1x1xf32>
    %41 = arith.mulf %36, %36 : vector<2x64x32xf32>
    %cst_21 = arith.constant dense<0.000000e+00> : vector<2x64xf32>
    %42 = vector.multi_reduction <add>, %41, %cst_21 [2] : vector<2x64x32xf32> to vector<2x64xf32>
    %43 = vector.shape_cast %42 : vector<2x64xf32> to vector<2x64x1xf32>
    %cst_22 = arith.constant dense<0.000000e+00> : vector<2x1xf32>
    %44 = vector.multi_reduction <add>, %43, %cst_22 [1] : vector<2x64x1xf32> to vector<2x1xf32>
    %45 = vector.shape_cast %44 : vector<2x1xf32> to vector<2x1x1xf32>
    %cst_23 = arith.constant 4.8828125E-4 : f32
    %46 = vector.broadcast %cst_23 : f32 to vector<2x1x1xf32>
    %47 = arith.mulf %40, %46 : vector<2x1x1xf32>
    %cst_24 = arith.constant 4.8828125E-4 : f32
    %48 = vector.broadcast %cst_24 : f32 to vector<2x1x1xf32>
    %49 = arith.mulf %45, %48 : vector<2x1x1xf32>
    %50 = arith.mulf %47, %47 : vector<2x1x1xf32>
    %51 = arith.subf %49, %50 : vector<2x1x1xf32>
    %cst_25 = arith.constant 0.000000e+00 : f32
    %52 = vector.broadcast %cst_25 : f32 to vector<2x1x1xf32>
    %53 = arith.maximumf %51, %52 : vector<2x1x1xf32>
    %54 = vector.broadcast %47 : vector<2x1x1xf32> to vector<2x64x32xf32>
    %55 = arith.subf %36, %54 : vector<2x64x32xf32>
    %cst_26 = arith.constant 9.99999974E-6 : f32
    %56 = vector.broadcast %cst_26 : f32 to vector<2x1x1xf32>
    %57 = arith.addf %53, %56 : vector<2x1x1xf32>
    %58 = math.rsqrt %57 : vector<2x1x1xf32>
    %59 = vector.broadcast %58 : vector<2x1x1xf32> to vector<2x64x32xf32>
    %60 = arith.mulf %55, %59 : vector<2x64x32xf32>
    %61 = vector.shape_cast %60 : vector<2x64x32xf32> to vector<128x32xf32>
    %62 = vector.broadcast %17 : vector<1x32xf32> to vector<128x32xf32>
    %63 = arith.mulf %61, %62 : vector<128x32xf32>
    %64 = vector.broadcast %18 : vector<1x32xf32> to vector<128x32xf32>
    %65 = arith.addf %63, %64 : vector<128x32xf32>
    %cst_27 = arith.constant 0.000000e+00 : f32
    %66 = vector.broadcast %cst_27 : f32 to vector<128x32xf32>
    %67 = arith.maximumf %65, %66 : vector<128x32xf32>
    %c0_28 = arith.constant 0 : index
    %c0_29 = arith.constant 0 : index
    %68 = vector.load %arg4[%c0_28, %c0_29] : memref<32x32xf32, #tpu.memory_space<vmem>>, vector<32x32xf32>
    %cst_30 = arith.constant dense<0.000000e+00> : vector<128x32xf32>
    %69 = tpu.matmul %67, %68, %cst_30 {dimension_numbers = #tpu.dot_dimension_numbers<[1], [0], [0], [1], [0, 0, 1, 1], [], []>} : vector<128x32xf32>, vector<32x32xf32>, vector<128x32xf32> -> vector<128x32xf32>
    %70 = vector.broadcast %19 : vector<1x32xf32> to vector<128x32xf32>
    %71 = arith.addf %69, %70 : vector<128x32xf32>
    %72 = vector.shape_cast %71 : vector<128x32xf32> to vector<2x64x32xf32>
    %cst_31 = arith.constant dense<0.000000e+00> : vector<2x64xf32>
    %73 = vector.multi_reduction <add>, %72, %cst_31 [2] : vector<2x64x32xf32> to vector<2x64xf32>
    %74 = vector.shape_cast %73 : vector<2x64xf32> to vector<2x64x1xf32>
    %cst_32 = arith.constant dense<0.000000e+00> : vector<2x1xf32>
    %75 = vector.multi_reduction <add>, %74, %cst_32 [1] : vector<2x64x1xf32> to vector<2x1xf32>
    %76 = vector.shape_cast %75 : vector<2x1xf32> to vector<2x1x1xf32>
    %77 = arith.mulf %72, %72 : vector<2x64x32xf32>
    %cst_33 = arith.constant dense<0.000000e+00> : vector<2x64xf32>
    %78 = vector.multi_reduction <add>, %77, %cst_33 [2] : vector<2x64x32xf32> to vector<2x64xf32>
    %79 = vector.shape_cast %78 : vector<2x64xf32> to vector<2x64x1xf32>
    %cst_34 = arith.constant dense<0.000000e+00> : vector<2x1xf32>
    %80 = vector.multi_reduction <add>, %79, %cst_34 [1] : vector<2x64x1xf32> to vector<2x1xf32>
    %81 = vector.shape_cast %80 : vector<2x1xf32> to vector<2x1x1xf32>
    %cst_35 = arith.constant 4.8828125E-4 : f32
    %82 = vector.broadcast %cst_35 : f32 to vector<2x1x1xf32>
    %83 = arith.mulf %76, %82 : vector<2x1x1xf32>
    %cst_36 = arith.constant 4.8828125E-4 : f32
    %84 = vector.broadcast %cst_36 : f32 to vector<2x1x1xf32>
    %85 = arith.mulf %81, %84 : vector<2x1x1xf32>
    %86 = arith.mulf %83, %83 : vector<2x1x1xf32>
    %87 = arith.subf %85, %86 : vector<2x1x1xf32>
    %cst_37 = arith.constant 0.000000e+00 : f32
    %88 = vector.broadcast %cst_37 : f32 to vector<2x1x1xf32>
    %89 = arith.maximumf %87, %88 : vector<2x1x1xf32>
    %90 = vector.broadcast %83 : vector<2x1x1xf32> to vector<2x64x32xf32>
    %91 = arith.subf %72, %90 : vector<2x64x32xf32>
    %cst_38 = arith.constant 9.99999974E-6 : f32
    %92 = vector.broadcast %cst_38 : f32 to vector<2x1x1xf32>
    %93 = arith.addf %89, %92 : vector<2x1x1xf32>
    %94 = math.rsqrt %93 : vector<2x1x1xf32>
    %95 = vector.broadcast %94 : vector<2x1x1xf32> to vector<2x64x32xf32>
    %96 = arith.mulf %91, %95 : vector<2x64x32xf32>
    %97 = vector.shape_cast %96 : vector<2x64x32xf32> to vector<128x32xf32>
    %98 = vector.broadcast %20 : vector<1x32xf32> to vector<128x32xf32>
    %99 = arith.mulf %97, %98 : vector<128x32xf32>
    %100 = vector.broadcast %21 : vector<1x32xf32> to vector<128x32xf32>
    %101 = arith.addf %99, %100 : vector<128x32xf32>
    %cst_39 = arith.constant 0.000000e+00 : f32
    %102 = vector.broadcast %cst_39 : f32 to vector<128x32xf32>
    %103 = arith.maximumf %101, %102 : vector<128x32xf32>
    %c0_40 = arith.constant 0 : index
    %c0_41 = arith.constant 0 : index
    %104 = vector.load %arg5[%c0_40, %c0_41] : memref<32x16xf32, #tpu.memory_space<vmem>>, vector<32x16xf32>
    %cst_42 = arith.constant dense<0.000000e+00> : vector<128x16xf32>
    %105 = tpu.matmul %103, %104, %cst_42 {dimension_numbers = #tpu.dot_dimension_numbers<[1], [0], [0], [1], [0, 0, 1, 1], [], []>} : vector<128x32xf32>, vector<32x16xf32>, vector<128x16xf32> -> vector<128x16xf32>
    %106 = vector.broadcast %22 : vector<1x16xf32> to vector<128x16xf32>
    %107 = arith.addf %105, %106 : vector<128x16xf32>
    %108 = arith.addf %107, %6 : vector<128x16xf32>
    %c0_43 = arith.constant 0 : index
    %c0_44 = arith.constant 0 : index
    %c0_45 = arith.constant 0 : index
    %109 = vector.load %arg6[%c0_43, %c0_44, %c0_45] : memref<12x16x4xf32, #tpu.memory_space<vmem>>, vector<12x16x4xf32>
    %c0_46 = arith.constant 0 : index
    %c0_47 = arith.constant 0 : index
    %c0_48 = arith.constant 0 : index
    %110 = vector.load %arg7[%c0_46, %c0_47, %c0_48] : memref<12x1x4xf32, #tpu.memory_space<vmem>>, vector<12x1x4xf32>
    %c0_49 = arith.constant 0 : index
    %c0_50 = arith.constant 0 : index
    %c0_51 = arith.constant 0 : index
    %111 = vector.load %arg8[%c0_49, %c0_50, %c0_51] : memref<4x4x16xf32, #tpu.memory_space<vmem>>, vector<4x4x16xf32>
    %cst_52 = arith.constant 0.000000e+00 : f32
    %112 = vector.broadcast %cst_52 : f32 to vector<128x16xf32>
    %113 = vector.extract_strided_slice %109 {offsets = [0, 0, 0], sizes = [1, 16, 4], strides = [1, 1, 1]} : vector<12x16x4xf32> to vector<1x16x4xf32>
    %114 = vector.shape_cast %113 : vector<1x16x4xf32> to vector<16x4xf32>
    %cst_53 = arith.constant dense<0.000000e+00> : vector<128x4xf32>
    %115 = tpu.matmul %108, %114, %cst_53 {dimension_numbers = #tpu.dot_dimension_numbers<[1], [0], [0], [1], [0, 0, 1, 1], [], []>} : vector<128x16xf32>, vector<16x4xf32>, vector<128x4xf32> -> vector<128x4xf32>
    %116 = vector.extract_strided_slice %110 {offsets = [0, 0, 0], sizes = [1, 1, 4], strides = [1, 1, 1]} : vector<12x1x4xf32> to vector<1x1x4xf32>
    %117 = vector.shape_cast %116 : vector<1x1x4xf32> to vector<1x4xf32>
    %118 = vector.broadcast %117 : vector<1x4xf32> to vector<128x4xf32>
    %119 = arith.addf %115, %118 : vector<128x4xf32>
    %120 = vector.shape_cast %119 : vector<128x4xf32> to vector<2x64x4xf32>
    %121 = vector.extract_strided_slice %109 {offsets = [4, 0, 0], sizes = [1, 16, 4], strides = [1, 1, 1]} : vector<12x16x4xf32> to vector<1x16x4xf32>
    %122 = vector.shape_cast %121 : vector<1x16x4xf32> to vector<16x4xf32>
    %cst_54 = arith.constant dense<0.000000e+00> : vector<128x4xf32>
    %123 = tpu.matmul %108, %122, %cst_54 {dimension_numbers = #tpu.dot_dimension_numbers<[1], [0], [0], [1], [0, 0, 1, 1], [], []>} : vector<128x16xf32>, vector<16x4xf32>, vector<128x4xf32> -> vector<128x4xf32>
    %124 = vector.extract_strided_slice %110 {offsets = [4, 0, 0], sizes = [1, 1, 4], strides = [1, 1, 1]} : vector<12x1x4xf32> to vector<1x1x4xf32>
    %125 = vector.shape_cast %124 : vector<1x1x4xf32> to vector<1x4xf32>
    %126 = vector.broadcast %125 : vector<1x4xf32> to vector<128x4xf32>
    %127 = arith.addf %123, %126 : vector<128x4xf32>
    %128 = vector.shape_cast %127 : vector<128x4xf32> to vector<2x64x4xf32>
    %129 = vector.extract_strided_slice %109 {offsets = [8, 0, 0], sizes = [1, 16, 4], strides = [1, 1, 1]} : vector<12x16x4xf32> to vector<1x16x4xf32>
    %130 = vector.shape_cast %129 : vector<1x16x4xf32> to vector<16x4xf32>
    %cst_55 = arith.constant dense<0.000000e+00> : vector<128x4xf32>
    %131 = tpu.matmul %108, %130, %cst_55 {dimension_numbers = #tpu.dot_dimension_numbers<[1], [0], [0], [1], [0, 0, 1, 1], [], []>} : vector<128x16xf32>, vector<16x4xf32>, vector<128x4xf32> -> vector<128x4xf32>
    %132 = vector.extract_strided_slice %110 {offsets = [8, 0, 0], sizes = [1, 1, 4], strides = [1, 1, 1]} : vector<12x1x4xf32> to vector<1x1x4xf32>
    %133 = vector.shape_cast %132 : vector<1x1x4xf32> to vector<1x4xf32>
    %134 = vector.broadcast %133 : vector<1x4xf32> to vector<128x4xf32>
    %135 = arith.addf %131, %134 : vector<128x4xf32>
    %136 = vector.shape_cast %135 : vector<128x4xf32> to vector<2x64x4xf32>
    "tpu.trace_start"() <{level = 10 : i32, message = "bqd,bkd->bqk"}> : () -> ()
    %cst_56 = arith.constant dense<0.000000e+00> : vector<2x64x64xf32>
    %137 = tpu.matmul %120, %128, %cst_56 {dimension_numbers = #tpu.dot_dimension_numbers<[2], [2], [1], [1], [0, 0, 0, 1, 1, 1], [0], [0]>} : vector<2x64x4xf32>, vector<2x64x4xf32>, vector<2x64x64xf32> -> vector<2x64x64xf32>
    "tpu.trace_stop"() : () -> ()
    %cst_57 = arith.constant dense<0xFF800000> : vector<2x64xf32>
    %138 = vector.multi_reduction <maximumf>, %137, %cst_57 [2] : vector<2x64x64xf32> to vector<2x64xf32>
    %139 = vector.shape_cast %138 : vector<2x64xf32> to vector<2x64x1xf32>
    %140 = vector.broadcast %139 : vector<2x64x1xf32> to vector<2x64x64xf32>
    %141 = arith.subf %137, %140 : vector<2x64x64xf32>
    %142 = math.exp %141 : vector<2x64x64xf32>
    %cst_58 = arith.constant dense<0.000000e+00> : vector<2x64xf32>
    %143 = vector.multi_reduction <add>, %142, %cst_58 [2] : vector<2x64x64xf32> to vector<2x64xf32>
    %144 = vector.shape_cast %143 : vector<2x64xf32> to vector<2x64x1xf32>
    %145 = tpu.reciprocal %144 {approx = true} : vector<2x64x1xf32> -> vector<2x64x1xf32>
    %146 = vector.broadcast %145 : vector<2x64x1xf32> to vector<2x64x64xf32>
    %147 = arith.mulf %142, %146 : vector<2x64x64xf32>
    "tpu.trace_start"() <{level = 10 : i32, message = "bqk,bkd->bqd"}> : () -> ()
    %cst_59 = arith.constant dense<0.000000e+00> : vector<2x64x4xf32>
    %148 = tpu.matmul %147, %136, %cst_59 {dimension_numbers = #tpu.dot_dimension_numbers<[2], [1], [1], [2], [0, 0, 0, 1, 1, 2], [0], [0]>} : vector<2x64x64xf32>, vector<2x64x4xf32>, vector<2x64x4xf32> -> vector<2x64x4xf32>
    "tpu.trace_stop"() : () -> ()
    %149 = vector.shape_cast %148 : vector<2x64x4xf32> to vector<128x4xf32>
    %150 = vector.extract_strided_slice %111 {offsets = [0, 0, 0], sizes = [1, 4, 16], strides = [1, 1, 1]} : vector<4x4x16xf32> to vector<1x4x16xf32>
    %151 = vector.shape_cast %150 : vector<1x4x16xf32> to vector<4x16xf32>
    %cst_60 = arith.constant dense<0.000000e+00> : vector<128x16xf32>
    %152 = tpu.matmul %149, %151, %cst_60 {dimension_numbers = #tpu.dot_dimension_numbers<[1], [0], [0], [1], [0, 0, 1, 1], [], []>} : vector<128x4xf32>, vector<4x16xf32>, vector<128x16xf32> -> vector<128x16xf32>
    %153 = arith.addf %112, %152 : vector<128x16xf32>
    %154 = vector.extract_strided_slice %109 {offsets = [1, 0, 0], sizes = [1, 16, 4], strides = [1, 1, 1]} : vector<12x16x4xf32> to vector<1x16x4xf32>
    %155 = vector.shape_cast %154 : vector<1x16x4xf32> to vector<16x4xf32>
    %cst_61 = arith.constant dense<0.000000e+00> : vector<128x4xf32>
    %156 = tpu.matmul %108, %155, %cst_61 {dimension_numbers = #tpu.dot_dimension_numbers<[1], [0], [0], [1], [0, 0, 1, 1], [], []>} : vector<128x16xf32>, vector<16x4xf32>, vector<128x4xf32> -> vector<128x4xf32>
    %157 = vector.extract_strided_slice %110 {offsets = [1, 0, 0], sizes = [1, 1, 4], strides = [1, 1, 1]} : vector<12x1x4xf32> to vector<1x1x4xf32>
    %158 = vector.shape_cast %157 : vector<1x1x4xf32> to vector<1x4xf32>
    %159 = vector.broadcast %158 : vector<1x4xf32> to vector<128x4xf32>
    %160 = arith.addf %156, %159 : vector<128x4xf32>
    %161 = vector.shape_cast %160 : vector<128x4xf32> to vector<2x64x4xf32>
    %162 = vector.extract_strided_slice %109 {offsets = [5, 0, 0], sizes = [1, 16, 4], strides = [1, 1, 1]} : vector<12x16x4xf32> to vector<1x16x4xf32>
    %163 = vector.shape_cast %162 : vector<1x16x4xf32> to vector<16x4xf32>
    %cst_62 = arith.constant dense<0.000000e+00> : vector<128x4xf32>
    %164 = tpu.matmul %108, %163, %cst_62 {dimension_numbers = #tpu.dot_dimension_numbers<[1], [0], [0], [1], [0, 0, 1, 1], [], []>} : vector<128x16xf32>, vector<16x4xf32>, vector<128x4xf32> -> vector<128x4xf32>
    %165 = vector.extract_strided_slice %110 {offsets = [5, 0, 0], sizes = [1, 1, 4], strides = [1, 1, 1]} : vector<12x1x4xf32> to vector<1x1x4xf32>
    %166 = vector.shape_cast %165 : vector<1x1x4xf32> to vector<1x4xf32>
    %167 = vector.broadcast %166 : vector<1x4xf32> to vector<128x4xf32>
    %168 = arith.addf %164, %167 : vector<128x4xf32>
    %169 = vector.shape_cast %168 : vector<128x4xf32> to vector<2x64x4xf32>
    %170 = vector.extract_strided_slice %109 {offsets = [9, 0, 0], sizes = [1, 16, 4], strides = [1, 1, 1]} : vector<12x16x4xf32> to vector<1x16x4xf32>
    %171 = vector.shape_cast %170 : vector<1x16x4xf32> to vector<16x4xf32>
    %cst_63 = arith.constant dense<0.000000e+00> : vector<128x4xf32>
    %172 = tpu.matmul %108, %171, %cst_63 {dimension_numbers = #tpu.dot_dimension_numbers<[1], [0], [0], [1], [0, 0, 1, 1], [], []>} : vector<128x16xf32>, vector<16x4xf32>, vector<128x4xf32> -> vector<128x4xf32>
    %173 = vector.extract_strided_slice %110 {offsets = [9, 0, 0], sizes = [1, 1, 4], strides = [1, 1, 1]} : vector<12x1x4xf32> to vector<1x1x4xf32>
    %174 = vector.shape_cast %173 : vector<1x1x4xf32> to vector<1x4xf32>
    %175 = vector.broadcast %174 : vector<1x4xf32> to vector<128x4xf32>
    %176 = arith.addf %172, %175 : vector<128x4xf32>
    %177 = vector.shape_cast %176 : vector<128x4xf32> to vector<2x64x4xf32>
    "tpu.trace_start"() <{level = 10 : i32, message = "bqd,bkd->bqk"}> : () -> ()
    %cst_64 = arith.constant dense<0.000000e+00> : vector<2x64x64xf32>
    %178 = tpu.matmul %161, %169, %cst_64 {dimension_numbers = #tpu.dot_dimension_numbers<[2], [2], [1], [1], [0, 0, 0, 1, 1, 1], [0], [0]>} : vector<2x64x4xf32>, vector<2x64x4xf32>, vector<2x64x64xf32> -> vector<2x64x64xf32>
    "tpu.trace_stop"() : () -> ()
    %cst_65 = arith.constant dense<0xFF800000> : vector<2x64xf32>
    %179 = vector.multi_reduction <maximumf>, %178, %cst_65 [2] : vector<2x64x64xf32> to vector<2x64xf32>
    %180 = vector.shape_cast %179 : vector<2x64xf32> to vector<2x64x1xf32>
    %181 = vector.broadcast %180 : vector<2x64x1xf32> to vector<2x64x64xf32>
    %182 = arith.subf %178, %181 : vector<2x64x64xf32>
    %183 = math.exp %182 : vector<2x64x64xf32>
    %cst_66 = arith.constant dense<0.000000e+00> : vector<2x64xf32>
    %184 = vector.multi_reduction <add>, %183, %cst_66 [2] : vector<2x64x64xf32> to vector<2x64xf32>
    %185 = vector.shape_cast %184 : vector<2x64xf32> to vector<2x64x1xf32>
    %186 = tpu.reciprocal %185 {approx = true} : vector<2x64x1xf32> -> vector<2x64x1xf32>
    %187 = vector.broadcast %186 : vector<2x64x1xf32> to vector<2x64x64xf32>
    %188 = arith.mulf %183, %187 : vector<2x64x64xf32>
    "tpu.trace_start"() <{level = 10 : i32, message = "bqk,bkd->bqd"}> : () -> ()
    %cst_67 = arith.constant dense<0.000000e+00> : vector<2x64x4xf32>
    %189 = tpu.matmul %188, %177, %cst_67 {dimension_numbers = #tpu.dot_dimension_numbers<[2], [1], [1], [2], [0, 0, 0, 1, 1, 2], [0], [0]>} : vector<2x64x64xf32>, vector<2x64x4xf32>, vector<2x64x4xf32> -> vector<2x64x4xf32>
    "tpu.trace_stop"() : () -> ()
    %190 = vector.shape_cast %189 : vector<2x64x4xf32> to vector<128x4xf32>
    %191 = vector.extract_strided_slice %111 {offsets = [1, 0, 0], sizes = [1, 4, 16], strides = [1, 1, 1]} : vector<4x4x16xf32> to vector<1x4x16xf32>
    %192 = vector.shape_cast %191 : vector<1x4x16xf32> to vector<4x16xf32>
    %cst_68 = arith.constant dense<0.000000e+00> : vector<128x16xf32>
    %193 = tpu.matmul %190, %192, %cst_68 {dimension_numbers = #tpu.dot_dimension_numbers<[1], [0], [0], [1], [0, 0, 1, 1], [], []>} : vector<128x4xf32>, vector<4x16xf32>, vector<128x16xf32> -> vector<128x16xf32>
    %194 = arith.addf %153, %193 : vector<128x16xf32>
    %195 = vector.extract_strided_slice %109 {offsets = [2, 0, 0], sizes = [1, 16, 4], strides = [1, 1, 1]} : vector<12x16x4xf32> to vector<1x16x4xf32>
    %196 = vector.shape_cast %195 : vector<1x16x4xf32> to vector<16x4xf32>
    %cst_69 = arith.constant dense<0.000000e+00> : vector<128x4xf32>
    %197 = tpu.matmul %108, %196, %cst_69 {dimension_numbers = #tpu.dot_dimension_numbers<[1], [0], [0], [1], [0, 0, 1, 1], [], []>} : vector<128x16xf32>, vector<16x4xf32>, vector<128x4xf32> -> vector<128x4xf32>
    %198 = vector.extract_strided_slice %110 {offsets = [2, 0, 0], sizes = [1, 1, 4], strides = [1, 1, 1]} : vector<12x1x4xf32> to vector<1x1x4xf32>
    %199 = vector.shape_cast %198 : vector<1x1x4xf32> to vector<1x4xf32>
    %200 = vector.broadcast %199 : vector<1x4xf32> to vector<128x4xf32>
    %201 = arith.addf %197, %200 : vector<128x4xf32>
    %202 = vector.shape_cast %201 : vector<128x4xf32> to vector<2x64x4xf32>
    %203 = vector.extract_strided_slice %109 {offsets = [6, 0, 0], sizes = [1, 16, 4], strides = [1, 1, 1]} : vector<12x16x4xf32> to vector<1x16x4xf32>
    %204 = vector.shape_cast %203 : vector<1x16x4xf32> to vector<16x4xf32>
    %cst_70 = arith.constant dense<0.000000e+00> : vector<128x4xf32>
    %205 = tpu.matmul %108, %204, %cst_70 {dimension_numbers = #tpu.dot_dimension_numbers<[1], [0], [0], [1], [0, 0, 1, 1], [], []>} : vector<128x16xf32>, vector<16x4xf32>, vector<128x4xf32> -> vector<128x4xf32>
    %206 = vector.extract_strided_slice %110 {offsets = [6, 0, 0], sizes = [1, 1, 4], strides = [1, 1, 1]} : vector<12x1x4xf32> to vector<1x1x4xf32>
    %207 = vector.shape_cast %206 : vector<1x1x4xf32> to vector<1x4xf32>
    %208 = vector.broadcast %207 : vector<1x4xf32> to vector<128x4xf32>
    %209 = arith.addf %205, %208 : vector<128x4xf32>
    %210 = vector.shape_cast %209 : vector<128x4xf32> to vector<2x64x4xf32>
    %211 = vector.extract_strided_slice %109 {offsets = [10, 0, 0], sizes = [1, 16, 4], strides = [1, 1, 1]} : vector<12x16x4xf32> to vector<1x16x4xf32>
    %212 = vector.shape_cast %211 : vector<1x16x4xf32> to vector<16x4xf32>
    %cst_71 = arith.constant dense<0.000000e+00> : vector<128x4xf32>
    %213 = tpu.matmul %108, %212, %cst_71 {dimension_numbers = #tpu.dot_dimension_numbers<[1], [0], [0], [1], [0, 0, 1, 1], [], []>} : vector<128x16xf32>, vector<16x4xf32>, vector<128x4xf32> -> vector<128x4xf32>
    %214 = vector.extract_strided_slice %110 {offsets = [10, 0, 0], sizes = [1, 1, 4], strides = [1, 1, 1]} : vector<12x1x4xf32> to vector<1x1x4xf32>
    %215 = vector.shape_cast %214 : vector<1x1x4xf32> to vector<1x4xf32>
    %216 = vector.broadcast %215 : vector<1x4xf32> to vector<128x4xf32>
    %217 = arith.addf %213, %216 : vector<128x4xf32>
    %218 = vector.shape_cast %217 : vector<128x4xf32> to vector<2x64x4xf32>
    "tpu.trace_start"() <{level = 10 : i32, message = "bqd,bkd->bqk"}> : () -> ()
    %cst_72 = arith.constant dense<0.000000e+00> : vector<2x64x64xf32>
    %219 = tpu.matmul %202, %210, %cst_72 {dimension_numbers = #tpu.dot_dimension_numbers<[2], [2], [1], [1], [0, 0, 0, 1, 1, 1], [0], [0]>} : vector<2x64x4xf32>, vector<2x64x4xf32>, vector<2x64x64xf32> -> vector<2x64x64xf32>
    "tpu.trace_stop"() : () -> ()
    %cst_73 = arith.constant dense<0xFF800000> : vector<2x64xf32>
    %220 = vector.multi_reduction <maximumf>, %219, %cst_73 [2] : vector<2x64x64xf32> to vector<2x64xf32>
    %221 = vector.shape_cast %220 : vector<2x64xf32> to vector<2x64x1xf32>
    %222 = vector.broadcast %221 : vector<2x64x1xf32> to vector<2x64x64xf32>
    %223 = arith.subf %219, %222 : vector<2x64x64xf32>
    %224 = math.exp %223 : vector<2x64x64xf32>
    %cst_74 = arith.constant dense<0.000000e+00> : vector<2x64xf32>
    %225 = vector.multi_reduction <add>, %224, %cst_74 [2] : vector<2x64x64xf32> to vector<2x64xf32>
    %226 = vector.shape_cast %225 : vector<2x64xf32> to vector<2x64x1xf32>
    %227 = tpu.reciprocal %226 {approx = true} : vector<2x64x1xf32> -> vector<2x64x1xf32>
    %228 = vector.broadcast %227 : vector<2x64x1xf32> to vector<2x64x64xf32>
    %229 = arith.mulf %224, %228 : vector<2x64x64xf32>
    "tpu.trace_start"() <{level = 10 : i32, message = "bqk,bkd->bqd"}> : () -> ()
    %cst_75 = arith.constant dense<0.000000e+00> : vector<2x64x4xf32>
    %230 = tpu.matmul %229, %218, %cst_75 {dimension_numbers = #tpu.dot_dimension_numbers<[2], [1], [1], [2], [0, 0, 0, 1, 1, 2], [0], [0]>} : vector<2x64x64xf32>, vector<2x64x4xf32>, vector<2x64x4xf32> -> vector<2x64x4xf32>
    "tpu.trace_stop"() : () -> ()
    %231 = vector.shape_cast %230 : vector<2x64x4xf32> to vector<128x4xf32>
    %232 = vector.extract_strided_slice %111 {offsets = [2, 0, 0], sizes = [1, 4, 16], strides = [1, 1, 1]} : vector<4x4x16xf32> to vector<1x4x16xf32>
    %233 = vector.shape_cast %232 : vector<1x4x16xf32> to vector<4x16xf32>
    %cst_76 = arith.constant dense<0.000000e+00> : vector<128x16xf32>
    %234 = tpu.matmul %231, %233, %cst_76 {dimension_numbers = #tpu.dot_dimension_numbers<[1], [0], [0], [1], [0, 0, 1, 1], [], []>} : vector<128x4xf32>, vector<4x16xf32>, vector<128x16xf32> -> vector<128x16xf32>
    %235 = arith.addf %194, %234 : vector<128x16xf32>
    %236 = vector.extract_strided_slice %109 {offsets = [3, 0, 0], sizes = [1, 16, 4], strides = [1, 1, 1]} : vector<12x16x4xf32> to vector<1x16x4xf32>
    %237 = vector.shape_cast %236 : vector<1x16x4xf32> to vector<16x4xf32>
    %cst_77 = arith.constant dense<0.000000e+00> : vector<128x4xf32>
    %238 = tpu.matmul %108, %237, %cst_77 {dimension_numbers = #tpu.dot_dimension_numbers<[1], [0], [0], [1], [0, 0, 1, 1], [], []>} : vector<128x16xf32>, vector<16x4xf32>, vector<128x4xf32> -> vector<128x4xf32>
    %239 = vector.extract_strided_slice %110 {offsets = [3, 0, 0], sizes = [1, 1, 4], strides = [1, 1, 1]} : vector<12x1x4xf32> to vector<1x1x4xf32>
    %240 = vector.shape_cast %239 : vector<1x1x4xf32> to vector<1x4xf32>
    %241 = vector.broadcast %240 : vector<1x4xf32> to vector<128x4xf32>
    %242 = arith.addf %238, %241 : vector<128x4xf32>
    %243 = vector.shape_cast %242 : vector<128x4xf32> to vector<2x64x4xf32>
    %244 = vector.extract_strided_slice %109 {offsets = [7, 0, 0], sizes = [1, 16, 4], strides = [1, 1, 1]} : vector<12x16x4xf32> to vector<1x16x4xf32>
    %245 = vector.shape_cast %244 : vector<1x16x4xf32> to vector<16x4xf32>
    %cst_78 = arith.constant dense<0.000000e+00> : vector<128x4xf32>
    %246 = tpu.matmul %108, %245, %cst_78 {dimension_numbers = #tpu.dot_dimension_numbers<[1], [0], [0], [1], [0, 0, 1, 1], [], []>} : vector<128x16xf32>, vector<16x4xf32>, vector<128x4xf32> -> vector<128x4xf32>
    %247 = vector.extract_strided_slice %110 {offsets = [7, 0, 0], sizes = [1, 1, 4], strides = [1, 1, 1]} : vector<12x1x4xf32> to vector<1x1x4xf32>
    %248 = vector.shape_cast %247 : vector<1x1x4xf32> to vector<1x4xf32>
    %249 = vector.broadcast %248 : vector<1x4xf32> to vector<128x4xf32>
    %250 = arith.addf %246, %249 : vector<128x4xf32>
    %251 = vector.shape_cast %250 : vector<128x4xf32> to vector<2x64x4xf32>
    %252 = vector.extract_strided_slice %109 {offsets = [11, 0, 0], sizes = [1, 16, 4], strides = [1, 1, 1]} : vector<12x16x4xf32> to vector<1x16x4xf32>
    %253 = vector.shape_cast %252 : vector<1x16x4xf32> to vector<16x4xf32>
    %cst_79 = arith.constant dense<0.000000e+00> : vector<128x4xf32>
    %254 = tpu.matmul %108, %253, %cst_79 {dimension_numbers = #tpu.dot_dimension_numbers<[1], [0], [0], [1], [0, 0, 1, 1], [], []>} : vector<128x16xf32>, vector<16x4xf32>, vector<128x4xf32> -> vector<128x4xf32>
    %255 = vector.extract_strided_slice %110 {offsets = [11, 0, 0], sizes = [1, 1, 4], strides = [1, 1, 1]} : vector<12x1x4xf32> to vector<1x1x4xf32>
    %256 = vector.shape_cast %255 : vector<1x1x4xf32> to vector<1x4xf32>
    %257 = vector.broadcast %256 : vector<1x4xf32> to vector<128x4xf32>
    %258 = arith.addf %254, %257 : vector<128x4xf32>
    %259 = vector.shape_cast %258 : vector<128x4xf32> to vector<2x64x4xf32>
    "tpu.trace_start"() <{level = 10 : i32, message = "bqd,bkd->bqk"}> : () -> ()
    %cst_80 = arith.constant dense<0.000000e+00> : vector<2x64x64xf32>
    %260 = tpu.matmul %243, %251, %cst_80 {dimension_numbers = #tpu.dot_dimension_numbers<[2], [2], [1], [1], [0, 0, 0, 1, 1, 1], [0], [0]>} : vector<2x64x4xf32>, vector<2x64x4xf32>, vector<2x64x64xf32> -> vector<2x64x64xf32>
    "tpu.trace_stop"() : () -> ()
    %cst_81 = arith.constant dense<0xFF800000> : vector<2x64xf32>
    %261 = vector.multi_reduction <maximumf>, %260, %cst_81 [2] : vector<2x64x64xf32> to vector<2x64xf32>
    %262 = vector.shape_cast %261 : vector<2x64xf32> to vector<2x64x1xf32>
    %263 = vector.broadcast %262 : vector<2x64x1xf32> to vector<2x64x64xf32>
    %264 = arith.subf %260, %263 : vector<2x64x64xf32>
    %265 = math.exp %264 : vector<2x64x64xf32>
    %cst_82 = arith.constant dense<0.000000e+00> : vector<2x64xf32>
    %266 = vector.multi_reduction <add>, %265, %cst_82 [2] : vector<2x64x64xf32> to vector<2x64xf32>
    %267 = vector.shape_cast %266 : vector<2x64xf32> to vector<2x64x1xf32>
    %268 = tpu.reciprocal %267 {approx = true} : vector<2x64x1xf32> -> vector<2x64x1xf32>
    %269 = vector.broadcast %268 : vector<2x64x1xf32> to vector<2x64x64xf32>
    %270 = arith.mulf %265, %269 : vector<2x64x64xf32>
    "tpu.trace_start"() <{level = 10 : i32, message = "bqk,bkd->bqd"}> : () -> ()
    %cst_83 = arith.constant dense<0.000000e+00> : vector<2x64x4xf32>
    %271 = tpu.matmul %270, %259, %cst_83 {dimension_numbers = #tpu.dot_dimension_numbers<[2], [1], [1], [2], [0, 0, 0, 1, 1, 2], [0], [0]>} : vector<2x64x64xf32>, vector<2x64x4xf32>, vector<2x64x4xf32> -> vector<2x64x4xf32>
    "tpu.trace_stop"() : () -> ()
    %272 = vector.shape_cast %271 : vector<2x64x4xf32> to vector<128x4xf32>
    %273 = vector.extract_strided_slice %111 {offsets = [3, 0, 0], sizes = [1, 4, 16], strides = [1, 1, 1]} : vector<4x4x16xf32> to vector<1x4x16xf32>
    %274 = vector.shape_cast %273 : vector<1x4x16xf32> to vector<4x16xf32>
    %cst_84 = arith.constant dense<0.000000e+00> : vector<128x16xf32>
    %275 = tpu.matmul %272, %274, %cst_84 {dimension_numbers = #tpu.dot_dimension_numbers<[1], [0], [0], [1], [0, 0, 1, 1], [], []>} : vector<128x4xf32>, vector<4x16xf32>, vector<128x16xf32> -> vector<128x16xf32>
    %276 = arith.addf %235, %275 : vector<128x16xf32>
    %277 = vector.broadcast %23 : vector<1x16xf32> to vector<128x16xf32>
    %278 = arith.addf %276, %277 : vector<128x16xf32>
    %279 = arith.addf %108, %278 : vector<128x16xf32>
    %cst_85 = arith.constant dense<0.000000e+00> : vector<128xf32>
    %280 = vector.multi_reduction <add>, %279, %cst_85 [1] : vector<128x16xf32> to vector<128xf32>
    %281 = vector.shape_cast %280 : vector<128xf32> to vector<128x1xf32>
    %cst_86 = arith.constant 6.250000e-02 : f32
    %282 = vector.broadcast %cst_86 : f32 to vector<128x1xf32>
    %283 = arith.mulf %281, %282 : vector<128x1xf32>
    %284 = arith.mulf %279, %279 : vector<128x16xf32>
    %cst_87 = arith.constant dense<0.000000e+00> : vector<128xf32>
    %285 = vector.multi_reduction <add>, %284, %cst_87 [1] : vector<128x16xf32> to vector<128xf32>
    %286 = vector.shape_cast %285 : vector<128xf32> to vector<128x1xf32>
    %cst_88 = arith.constant 6.250000e-02 : f32
    %287 = vector.broadcast %cst_88 : f32 to vector<128x1xf32>
    %288 = arith.mulf %286, %287 : vector<128x1xf32>
    %289 = arith.mulf %283, %283 : vector<128x1xf32>
    %290 = arith.subf %288, %289 : vector<128x1xf32>
    %cst_89 = arith.constant 0.000000e+00 : f32
    %291 = vector.broadcast %cst_89 : f32 to vector<128x1xf32>
    %292 = arith.maximumf %290, %291 : vector<128x1xf32>
    %293 = vector.broadcast %283 : vector<128x1xf32> to vector<128x16xf32>
    %294 = arith.subf %279, %293 : vector<128x16xf32>
    %cst_90 = arith.constant 9.99999974E-6 : f32
    %295 = vector.broadcast %cst_90 : f32 to vector<128x1xf32>
    %296 = arith.addf %292, %295 : vector<128x1xf32>
    %297 = math.rsqrt %296 : vector<128x1xf32>
    %298 = vector.broadcast %297 : vector<128x1xf32> to vector<128x16xf32>
    %299 = arith.mulf %294, %298 : vector<128x16xf32>
    %300 = vector.broadcast %24 : vector<1x16xf32> to vector<128x16xf32>
    %301 = arith.mulf %299, %300 : vector<128x16xf32>
    %302 = vector.broadcast %25 : vector<1x16xf32> to vector<128x16xf32>
    %303 = arith.addf %301, %302 : vector<128x16xf32>
    %c0_91 = arith.constant 0 : index
    %c0_92 = arith.constant 0 : index
    %304 = vector.load %arg9[%c0_91, %c0_92] : memref<16x32xf32, #tpu.memory_space<vmem>>, vector<16x32xf32>
    %cst_93 = arith.constant dense<0.000000e+00> : vector<128x32xf32>
    %305 = tpu.matmul %303, %304, %cst_93 {dimension_numbers = #tpu.dot_dimension_numbers<[1], [0], [0], [1], [0, 0, 1, 1], [], []>} : vector<128x16xf32>, vector<16x32xf32>, vector<128x32xf32> -> vector<128x32xf32>
    %c0_94 = arith.constant 0 : index
    %c0_95 = arith.constant 0 : index
    %306 = vector.load %arg10[%c0_94, %c0_95] : memref<1x32xf32, #tpu.memory_space<vmem>>, vector<1x32xf32>
    %307 = vector.broadcast %306 : vector<1x32xf32> to vector<128x32xf32>
    %308 = arith.addf %305, %307 : vector<128x32xf32>
    %cst_96 = arith.constant 0.000000e+00 : f32
    %309 = vector.broadcast %cst_96 : f32 to vector<128x32xf32>
    %310 = arith.maximumf %308, %309 : vector<128x32xf32>
    %c0_97 = arith.constant 0 : index
    %c0_98 = arith.constant 0 : index
    %311 = vector.load %arg11[%c0_97, %c0_98] : memref<32x16xf32, #tpu.memory_space<vmem>>, vector<32x16xf32>
    %cst_99 = arith.constant dense<0.000000e+00> : vector<128x16xf32>
    %312 = tpu.matmul %310, %311, %cst_99 {dimension_numbers = #tpu.dot_dimension_numbers<[1], [0], [0], [1], [0, 0, 1, 1], [], []>} : vector<128x32xf32>, vector<32x16xf32>, vector<128x16xf32> -> vector<128x16xf32>
    %313 = vector.broadcast %26 : vector<1x16xf32> to vector<128x16xf32>
    %314 = arith.addf %312, %313 : vector<128x16xf32>
    %315 = arith.addf %303, %314 : vector<128x16xf32>
    %cst_100 = arith.constant dense<0.000000e+00> : vector<128xf32>
    %316 = vector.multi_reduction <add>, %315, %cst_100 [1] : vector<128x16xf32> to vector<128xf32>
    %317 = vector.shape_cast %316 : vector<128xf32> to vector<128x1xf32>
    %cst_101 = arith.constant 6.250000e-02 : f32
    %318 = vector.broadcast %cst_101 : f32 to vector<128x1xf32>
    %319 = arith.mulf %317, %318 : vector<128x1xf32>
    %320 = arith.mulf %315, %315 : vector<128x16xf32>
    %cst_102 = arith.constant dense<0.000000e+00> : vector<128xf32>
    %321 = vector.multi_reduction <add>, %320, %cst_102 [1] : vector<128x16xf32> to vector<128xf32>
    %322 = vector.shape_cast %321 : vector<128xf32> to vector<128x1xf32>
    %cst_103 = arith.constant 6.250000e-02 : f32
    %323 = vector.broadcast %cst_103 : f32 to vector<128x1xf32>
    %324 = arith.mulf %322, %323 : vector<128x1xf32>
    %325 = arith.mulf %319, %319 : vector<128x1xf32>
    %326 = arith.subf %324, %325 : vector<128x1xf32>
    %cst_104 = arith.constant 0.000000e+00 : f32
    %327 = vector.broadcast %cst_104 : f32 to vector<128x1xf32>
    %328 = arith.maximumf %326, %327 : vector<128x1xf32>
    %329 = vector.broadcast %319 : vector<128x1xf32> to vector<128x16xf32>
    %330 = arith.subf %315, %329 : vector<128x16xf32>
    %cst_105 = arith.constant 9.99999974E-6 : f32
    %331 = vector.broadcast %cst_105 : f32 to vector<128x1xf32>
    %332 = arith.addf %328, %331 : vector<128x1xf32>
    %333 = math.rsqrt %332 : vector<128x1xf32>
    %334 = vector.broadcast %333 : vector<128x1xf32> to vector<128x16xf32>
    %335 = arith.mulf %330, %334 : vector<128x16xf32>
    %336 = vector.broadcast %27 : vector<1x16xf32> to vector<128x16xf32>
    %337 = arith.mulf %335, %336 : vector<128x16xf32>
    %338 = vector.broadcast %28 : vector<1x16xf32> to vector<128x16xf32>
    %339 = arith.addf %337, %338 : vector<128x16xf32>
    %340 = vector.shape_cast %339 : vector<128x16xf32> to vector<2x64x16xf32>
    %341 = vector.extract_strided_slice %340 {offsets = [0, 0, 0], sizes = [1, 64, 16], strides = [1, 1, 1]} : vector<2x64x16xf32> to vector<1x64x16xf32>
    %342 = vector.shape_cast %341 : vector<1x64x16xf32> to vector<64x16xf32>
    %343 = tpu.transpose %342, [1, 0] : vector<64x16xf32> -> vector<16x64xf32>
    %c0_106 = arith.constant 0 : index
    %c0_107 = arith.constant 0 : index
    %c0_108 = arith.constant 0 : index
    %344 = vector.load %arg14[%c0_106, %c0_107, %c0_108] : memref<2x16x64xf32, #tpu.memory_space<vmem>>, vector<1x16x64xf32>
    %345 = vector.shape_cast %344 : vector<1x16x64xf32> to vector<16x64xf32>
    %346 = vector.shape_cast %343 : vector<16x64xf32> to vector<1x16x64xf32>
    tpu.vector_store %arg14[%c0_106, %c0_107, %c0_108], %346 {strides = array<i32>} : memref<2x16x64xf32, #tpu.memory_space<vmem>>, vector<1x16x64xf32>,
    %347 = vector.extract_strided_slice %340 {offsets = [1, 0, 0], sizes = [1, 64, 16], strides = [1, 1, 1]} : vector<2x64x16xf32> to vector<1x64x16xf32>
    %348 = vector.shape_cast %347 : vector<1x64x16xf32> to vector<64x16xf32>
    %349 = tpu.transpose %348, [1, 0] : vector<64x16xf32> -> vector<16x64xf32>
    %c1_109 = arith.constant 1 : index
    %c0_110 = arith.constant 0 : index
    %c0_111 = arith.constant 0 : index
    %350 = vector.load %arg14[%c1_109, %c0_110, %c0_111] : memref<2x16x64xf32, #tpu.memory_space<vmem>>, vector<1x16x64xf32>
    %351 = vector.shape_cast %350 : vector<1x16x64xf32> to vector<16x64xf32>
    %352 = vector.shape_cast %349 : vector<16x64xf32> to vector<1x16x64xf32>
    tpu.vector_store %arg14[%c1_109, %c0_110, %c0_111], %352 {strides = array<i32>} : memref<2x16x64xf32, #tpu.memory_space<vmem>>, vector<1x16x64xf32>,
    return
  }
}

</mosaic_0001>

<bundles_post_ra>
// kernel: grt_forward.1
= control target key start
LH: loop header
LB: loop body
LE: loop exit
PB: predicated region body
PF: predicated region fallthrough
CT: control target
= control target key end

     0   :  { %vm197_vm0 = vcmask 261120   ;;  %vm391_vm1 = vcmask 130048   ;;  %v585_v53 = vlaneseq  ;;  %vm2096_vm2 = vcmask 31744   ;;  %s14658_s1 = inlined_call_operand.vmem [shape: f32[2,32,64], index: 1, kind: input, shape index: {}]   ;;  %s14659_s0 = inlined_call_operand.vmem [shape: f32[2,16,64], index: 0, kind: input, shape index: {}]   ;;  %s14660_s3 = inlined_call_operand.vmem [shape: f32[32,32], index: 3, kind: input, shape index: {}]   ;;  %s14661_s2 = inlined_call_operand.vmem [shape: f32[16,32], index: 2, kind: input, shape index: {}]   ;;  %s14662_s12 = inlined_call_operand.vmem [shape: f32[6,32], index: 12, kind: input, shape index: {}]   ;;  %s14663_s4 = inlined_call_operand.vmem [shape: f32[32,32], index: 4, kind: input, shape index: {}]   ;;  %s14664_s5 = inlined_call_operand.vmem [shape: f32[32,16], index: 5, kind: input, shape index: {}]   ;;  %s14665_s6 = inlined_call_operand.vmem [shape: f32[12,16,4], index: 6, kind: input, shape index: {}]   ;;  %s14666_s13 = inlined_call_operand.vmem [shape: f32[7,16], index: 13, kind: input, shape index: {}]   ;;  %s14667_s7 = inlined_call_operand.vmem [shape: f32[12,1,4], index: 7, kind: input, shape index: {}]   ;;  %s14668_s8 = inlined_call_operand.vmem [shape: f32[4,4,16], index: 8, kind: input, shape index: {}]   ;;  %s14669_s9 = inlined_call_operand.vmem [shape: f32[16,32], index: 9, kind: input, shape index: {}]   ;;  %s14670_s11 = inlined_call_operand.vmem [shape: f32[32,16], index: 11, kind: input, shape index: {}]   ;;  %s14671_s10 = inlined_call_operand.vmem [shape: f32[1,32], index: 10, kind: input, shape index: {}]   ;;  %s14672_s14 = inlined_call_operand.vmem [shape: f32[2,16,64], index: 14, kind: output, shape index: {}]  }
   0x1   :  { %v116_v0 = vld [vmem:[%s14658_s1] sm:$0xff]  ;;  %v117_v2 = vld [vmem:[%s14658_s1 + $0x8] sm:$0xff]  ;;  %v195_v6 = vld [vmem:[%s14660_s3 + $0x10] sm:$0xff]  ;;  %vm2403_vm4 = vcmask 523264   ;;  %vm4079_vm5 = vcmask 1043456  }
   0x2   :  { %120 = vxpose.xlu0.b32.start [1/4] (short) (narrow) %v116_v0, 64  ;;  %v47_v1 = vld [vmem:[%s14659_s0] sm:$0xff]  ;;  %v48_v3 = vld [vmem:[%s14659_s0 + $0x8] sm:$0xff]  ;;  %v196_v8 = vld [vmem:[%s14660_s3 + $0x18] sm:$0xff]  ;;  %v11684_v54 = vshrl.u32 %v585_v53, 7 }
   0x3   :  { %49 = vxpose.xlu1.b32.start [1/2] (short) (narrow) %v47_v1, 64  ;;  %v193_v4 = vld [vmem:[%s14660_s3] sm:$0xff]  ;;  %v194_v5 = vld [vmem:[%s14660_s3 + $0x8] sm:$0xff]  ;;  %v118_v9 = vld [vmem:[%s14658_s1 + $0x10] sm:$0xff]  ;;  %v10671_v10 = vpack.c.bf16 %v196_v8, %v195_v6 }
   0x4   :  { %v10667_v7 = vpack.c.bf16 %v194_v5, %v193_v4  ;;  %v119_v11 = vld [vmem:[%s14658_s1 + $0x18] sm:$0xff]  ;;  %v191_v12 = vld [vmem:[%s14661_s2] sm:$0xff]  ;;  %v192_v13 = vld [vmem:[%s14661_s2 + $0x8] sm:$0xff]  ;;  %14684 = vst [vmem:[#allocation2_spill] sm:$0xff] %v11684_v54  ;;  %v587_v55 = vsub.s32 0, %v11684_v54 }
   0x5   :  { %v10675_v14 = vpack.c.bf16 %v192_v13, %v191_v12  ;;  %v8372_v15 = vld [vmem:[%s14658_s1 + $0x20] sm:$0xff]  ;;  %v8370_v16 = vld [vmem:[%s14659_s0 + $0x10] sm:$0xff]  ;;  %v8373_v17 = vld [vmem:[%s14658_s1 + $0x28] sm:$0xff] }
   0x6   :  { %121 = vxpose.xlu0.b32.cont [2/4] (short) (narrow) %v117_v2, 64  ;;  %10668 = vmatprep.subr.bf16.mxu0 %v10667_v7  ;;  %v8371_v18 = vld [vmem:[%s14659_s0 + $0x18] sm:$0xff]  ;;  %v8374_v19 = vld [vmem:[%s14658_s1 + $0x30] sm:$0xff]  ;;  %v11690_v56 = vld [vmem:[%s14662_s12] sm:$0x3f] }
   0x7   :  { %50 = vxpose.xlu1.b32.end [2/2] (short) (narrow) %v48_v3, 64  ;;  %11075 = vmatprep.subr.bf16.mxu1 %v10667_v7  ;;  %v8375_v20 = vld [vmem:[%s14658_s1 + $0x38] sm:$0xff]  ;;  %v11695_v57 = vrot.slane %v11690_v56, %v587_v55  ;;  %vm12364_vm3 = vmpackc.low %vm2096_vm2, %vm2096_vm2 }
   0x8   :  { %10670 = vmatpush3.bf16.msra.mxu0 %v10667_v7  ;;  %11077 = vmatpush3.bf16.msra.mxu1 %v10667_v7 }
   0x9   :  { %10672 = vmatprep.subr.bf16.mxu0 %v10671_v10  ;;  %11076 = vmatprep.subr.bf16.mxu1 %v10671_v10 }
   0xa   :  { %122 = vxpose.xlu0.b32.cont [3/4] (short) (narrow) %v118_v9, 64 }
   0xc   :  { %10674 = vmatpush3.bf16.msra.mxu0 %v10671_v10  ;;  %11078 = vmatpush3.bf16.msra.mxu1 %v10671_v10 }
   0xd   :  { %10676 = vmatprep.subr.bf16.mxu0 %v10675_v14 }
   0xe   :  { %123 = vxpose.xlu0.b32.end [4/4] (short) (narrow) %v119_v11, 64 }
  0x1f   :  { %157 = vxpose.xlu0.b32.start [1/4] (short) (narrow) %v8372_v15, 64 }
  0x20   :  { %84 = vxpose.xlu1.b32.start [1/2] (short) (narrow) %v8370_v16, 64 }
  0x23   :  { %158 = vxpose.xlu0.b32.cont [2/4] (short) (narrow) %v8373_v17, 64 }
  0x24   :  { %85 = vxpose.xlu1.b32.end [2/2] (short) (narrow) %v8371_v18, 64 }
  0x27   :  { %159 = vxpose.xlu0.b32.cont [3/4] (short) (narrow) %v8374_v19, 64 }
  0x2b   :  { %160 = vxpose.xlu0.b32.end [4/4] (short) (narrow) %v8375_v20, 64 }
  0x82   :  { %v136_v21 = vpop.trf.xlu0 }
  0x83   :  { %9603 = vmatprep.mubr.msk.f32.mxu0 %vm197_vm0, %v136_v21  ;;  %v11605_v22 = vpop.trf.xlu1 }
  0x86   :  { %v137_v23 = vpop.trf.xlu0 }
  0x87   :  { %9604 = vmatmul.mubr.msk.f32.vlgmr.msra.gmra.mrb[0].mxu0 %vm197_vm0, %v137_v23  ;;  %v11608_v24 = vpop.trf.xlu1 }
  0x88   :  { %10678 = vmatpush3.bf16.msra.mxu0 %v10675_v14 }
  0x8a   :  { %v138_v25 = vpop.trf.xlu0 }
  0x8b   :  { %9606 = vmatprep.mubr.msk.f32.mxu0 %vm197_vm0, %v138_v25  ;;  %v11611_v26 = vpop.trf.xlu1 }
  0x8e   :  { %v139_v27 = vpop.trf.xlu0 }
  0x8f   :  { %9607 = vmatmul.mubr.msk.f32.gmra.mrb[2].mxu0 %vm197_vm0, %v139_v27  ;;  %v11614_v28 = vpop.trf.xlu1 }
  0x92   :  { %v140_v29 = vpop.trf.xlu0 }
  0x93   :  { %9609 = vmatprep.mubr.msk.f32.mxu0 %vm197_vm0, %v140_v29  ;;  %v11617_v30 = vpop.trf.xlu1 }
  0x96   :  { %v141_v31 = vpop.trf.xlu0 }
  0x97   :  { %9610 = vmatmul.mubr.msk.f32.gmra.mrb[4].mxu0 %vm197_vm0, %v141_v31  ;;  %v11620_v32 = vpop.trf.xlu1 }
  0x9a   :  { %v142_v33 = vpop.trf.xlu0 }
  0x9b   :  { %9612 = vmatprep.mubr.msk.f32.mxu0 %vm197_vm0, %v142_v33  ;;  %v11623_v34 = vpop.trf.xlu1 }
  0x9e   :  { %v143_v35 = vpop.trf.xlu0 }
  0x9f   :  { %9613 = vmatmul.mubr.msk.f32.gmra.mrb[6].mxu0 %vm197_vm0, %v143_v35  ;;  %v11626_v36 = vpop.trf.xlu1 }
  0xa0   :  { %9631 = vmatprep.mubr.msk.f32.mxu0 %vm391_vm1, %v11605_v22 }
  0xa2   :  { %v173_v37 = vpop.trf.xlu0 }
  0xa3   :  { %9632 = vmatmul.mubr.msk.f32.vlgmr.msra.gmra.mrb[0].mxu0 %vm391_vm1, %v11608_v24  ;;  %v11632_v38 = vpop.trf.xlu1  ;;  %9615 = vmatprep.mubr.msk.f32.mxu1 %vm197_vm0, %v173_v37 }
  0xa4   :  { %9634 = vmatprep.mubr.msk.f32.mxu0 %vm391_vm1, %v11611_v26 }
  0xa6   :  { %v174_v39 = vpop.trf.xlu0 }
  0xa7   :  { %9635 = vmatmul.mubr.msk.f32.gmra.mrb[2].mxu0 %vm391_vm1, %v11614_v28  ;;  %v11639_v40 = vpop.trf.xlu1  ;;  %9616 = vmatmul.mubr.msk.f32.vlgmr.msra.gmra.mrb[0].mxu1 %vm197_vm0, %v174_v39 }
  0xa8   :  { %9637 = vmatprep.mubr.msk.f32.mxu0 %vm391_vm1, %v11617_v30 }
  0xaa   :  { %v175_v41 = vpop.trf.xlu0 }
  0xab   :  { %9638 = vmatmul.mubr.msk.f32.gmra.mrb[4].mxu0 %vm391_vm1, %v11620_v32  ;;  %v11646_v42 = vpop.trf.xlu1  ;;  %9618 = vmatprep.mubr.msk.f32.mxu1 %vm197_vm0, %v175_v41 }
  0xac   :  { %9640 = vmatprep.mubr.msk.f32.mxu0 %vm391_vm1, %v11623_v34 }
  0xae   :  { %v176_v43 = vpop.trf.xlu0 }
  0xaf   :  { %9641 = vmatmul.mubr.msk.f32.gmra.mrb[6].mxu0 %vm391_vm1, %v11626_v36  ;;  %v11653_v44 = vpop.trf.xlu1  ;;  %9619 = vmatmul.mubr.msk.f32.gmra.mrb[2].mxu1 %vm197_vm0, %v176_v43 }
  0xb0   :  { %9643 = vmatprep.mubr.msk.f32.mxu0 %vm391_vm1, %v11632_v38 }
  0xb2   :  { %v177_v45 = vpop.trf.xlu0 }
  0xb3   :  { %9644 = vmatmul.mubr.msk.f32.gmra.mrb[8].mxu0 %vm391_vm1, %v11639_v40  ;;  %v11660_v46 = vpop.trf.xlu1  ;;  %9621 = vmatprep.mubr.msk.f32.mxu1 %vm197_vm0, %v177_v45 }
  0xb4   :  { %9646 = vmatprep.mubr.msk.f32.mxu0 %vm391_vm1, %v11646_v42 }
  0xb6   :  { %v178_v47 = vpop.trf.xlu0 }
  0xb7   :  { %9647 = vmatmul.mubr.msk.f32.gmra.mrb[10].mxu0 %vm391_vm1, %v11653_v44  ;;  %v11667_v48 = vpop.trf.xlu1  ;;  %9622 = vmatmul.mubr.msk.f32.gmra.mrb[4].mxu1 %vm197_vm0, %v178_v47 }
  0xb8   :  { %9649 = vmatprep.mubr.msk.f32.mxu0 %vm391_vm1, %v11660_v46 }
  0xba   :  { %v179_v49 = vpop.trf.xlu0 }
  0xbb   :  { %9650 = vmatmul.mubr.msk.f32.gmra.mrb[12].mxu0 %vm391_vm1, %v11667_v48  ;;  %v11674_v50 = vpop.trf.xlu1  ;;  %9624 = vmatprep.mubr.msk.f32.mxu1 %vm197_vm0, %v179_v49 }
  0xbc   :  { %9652 = vmatprep.mubr.msk.f32.mxu0 %vm391_vm1, %v11674_v50 }
  0xbe   :  { %v180_v51 = vpop.trf.xlu0 }
  0xbf   :  { %v11679_v52 = vpop.trf.xlu1  ;;  %9625 = vmatmul.mubr.msk.f32.gmra.mrb[6].mxu1 %vm197_vm0, %v180_v51 }
  0xc0   :  { %9653 = vmatmul.mubr.msk.f32.gmra.mrb[14].mxu0 %vm391_vm1, %v11679_v52 }
 0x176   :  { %v9633_v58 = vpop.f32.mrb[0].mxu0 }
 0x177   :  { %v11698_v59 = vadd.f32 %v9633_v58, %v11695_v57  ;;  %v506_v60 = vpop.f32.mrb[1].mxu0 }
 0x178   :  { %v11701_v61 = vadd.f32 %v11695_v57, %v506_v60 }
 0x179   :  { %v608_v62 = vsel %vm197_vm0, %v11698_v59, 0.0  ;;  %v680_v63 = vmul.f32 %v11698_v59, %v11698_v59 }
 0x17a   :  { %609 = vadd.xlane.f32.xlu0 %v608_v62  ;;  %v9636_v0 = vpop.f32.mrb[2].mxu0  ;;  %v605_v1 = vsel %vm197_vm0, %v11701_v61, 0.0  ;;  %v679_v2 = vmul.f32 %v11701_v61, %v11701_v61  ;;  %v9617_v3 = vpop.f32.mrb[0].mxu1 }
 0x17b   :  { %v11712_v4 = vadd.f32 %v9636_v0, %v11695_v57  ;;  %606 = vadd.xlane.f32.xlu1 %v605_v1  ;;  %v516_v5 = vpop.f32.mrb[3].mxu0  ;;  %v352_v6 = vpop.f32.mrb[1].mxu1  ;;  %v698_v8 = vsel %vm197_vm0, %v680_v63, 0.0 }
 0x17c   :  { %v11715_v7 = vadd.f32 %v11695_v57, %v516_v5  ;;  %v695_v11 = vsel %vm197_vm0, %v679_v2, 0.0 }
 0x17d   :  { %v682_v9 = vmul.f32 %v11712_v4, %v11712_v4  ;;  %v614_v17 = vsel %vm197_vm0, %v11712_v4, 0.0 }
 0x17e   :  { %699 = vadd.xlane.f32.xlu0 %v698_v8  ;;  %v9639_v10 = vpop.f32.mrb[4].mxu0  ;;  %v681_v15 = vmul.f32 %v11715_v7, %v11715_v7  ;;  %v611_v27 = vsel %vm197_vm0, %v11715_v7, 0.0 }
 0x17f   :  { %696 = vadd.xlane.f32.xlu1 %v695_v11  ;;  %v526_v12 = vpop.f32.mrb[5].mxu0  ;;  %v11722_v13 = vadd.f32 %v9639_v10, %v11695_v57  ;;  %v704_v14 = vsel %vm197_vm0, %v682_v9, 0.0 }
 0x180   :  { %v11730_v21 = vadd.f32 %v11695_v57, %v526_v12  ;;  %v701_v23 = vsel %vm197_vm0, %v681_v15, 0.0 }
 0x181   :  { %v684_v25 = vmul.f32 %v11722_v13, %v11722_v13  ;;  %v620_v43 = vsel %vm197_vm0, %v11722_v13, 0.0 }
 0x182   :  { %705 = vadd.xlane.f32.xlu0 %v704_v14  ;;  %v9642_v16 = vpop.f32.mrb[6].mxu0  ;;  %v9620_v18 = vpop.f32.mrb[2].mxu1  ;;  %v683_v41 = vmul.f32 %v11730_v21, %v11730_v21  ;;  %v617_v0 = vsel %vm197_vm0, %v11730_v21, 0.0 }
 0x183   :  { %615 = vadd.xlane.f32.xlu1 %v614_v17  ;;  %v536_v19 = vpop.f32.mrb[7].mxu0  ;;  %v362_v20 = vpop.f32.mrb[3].mxu1  ;;  %v710_v39 = vsel %vm197_vm0, %v684_v25, 0.0  ;;  %v11749_v63 = vadd.f32 %v9642_v16, %v11695_v57 }
 0x184   :  { %v11738_v37 = vadd.f32 %v11695_v57, %v536_v19  ;;  %v707_v60 = vsel %vm197_vm0, %v683_v41, 0.0 }
 0x185   :  { %v626_v10 = vsel %vm197_vm0, %v11749_v63, 0.0 }
 0x186   :  { %702 = vadd.xlane.f32.xlu0 %v701_v23  ;;  %v9645_v29 = vpop.f32.mrb[8].mxu0  ;;  %v685_v62 = vmul.f32 %v11738_v37, %v11738_v37  ;;  %v686_v23 = vmul.f32 %v11749_v63, %v11749_v63 }
 0x187   :  { %612 = vadd.xlane.f32.xlu1 %v611_v27  ;;  %v552_v31 = vadd.f32 %v9645_v29, %v9617_v3  ;;  %v546_v33 = vpop.f32.mrb[9].mxu0 }
 0x188   :  { %v547_v35 = vadd.f32 %v546_v33, %v352_v6  ;;  %v713_v9 = vsel %vm197_vm0, %v685_v62, 0.0 }
 0x189   :  { %v11754_v2 = vadd.f32 %v11695_v57, %v552_v31  ;;  %v716_v31 = vsel %vm197_vm0, %v686_v23, 0.0 }
 0x18a   :  { %711 = vadd.xlane.f32.xlu0 %v710_v39  ;;  %v9648_v45 = vpop.f32.mrb[10].mxu0  ;;  %v9623_v47 = vpop.f32.mrb[4].mxu1  ;;  %v11757_v3 = vadd.f32 %v11695_v57, %v547_v35 }
 0x18b   :  { %621 = vadd.xlane.f32.xlu1 %v620_v43  ;;  %v562_v49 = vadd.f32 %v9648_v45, %v9620_v18  ;;  %v556_v51 = vpop.f32.mrb[11].mxu0  ;;  %v372_v53 = vpop.f32.mrb[5].mxu1  ;;  %v688_v14 = vmul.f32 %v11754_v2, %v11754_v2  ;;  %v632_v39 = vsel %vm197_vm0, %v11754_v2, 0.0 }
 0x18c   :  { %v557_v58 = vadd.f32 %v556_v51, %v362_v20  ;;  %v629_v12 = vsel %vm197_vm0, %v11757_v3, 0.0  ;;  %v623_v20 = vsel %vm197_vm0, %v11738_v37, 0.0  ;;  %v687_v41 = vmul.f32 %v11757_v3, %v11757_v3 }
 0x18d   :  { %v11771_v25 = vadd.f32 %v11695_v57, %v562_v49  ;;  %v722_v29 = vsel %vm197_vm0, %v688_v14, 0.0 }
 0x18e   :  { %708 = vadd.xlane.f32.xlu0 %v707_v60  ;;  %v9651_v1 = vpop.f32.mrb[12].mxu0  ;;  %v11774_v27 = vadd.f32 %v11695_v57, %v557_v58  ;;  %v719_v49 = vsel %vm197_vm0, %v687_v41, 0.0 }
 0x18f   :  { %618 = vadd.xlane.f32.xlu1 %v617_v0  ;;  %v572_v5 = vadd.f32 %v9651_v1, %v9623_v47  ;;  %v566_v6 = vpop.f32.mrb[13].mxu0  ;;  %v690_v35 = vmul.f32 %v11771_v25, %v11771_v25  ;;  %v638_v60 = vsel %vm197_vm0, %v11771_v25, 0.0 }
 0x190   :  { %v567_v8 = vadd.f32 %v566_v6, %v372_v53  ;;  %v635_v33 = vsel %vm197_vm0, %v11774_v27, 0.0  ;;  %v689_v47 = vmul.f32 %v11774_v27, %v11774_v27 }
 0x191   :  { %v728_v43 = vsel %vm197_vm0, %v690_v35, 0.0  ;;  %v11788_v45 = vadd.f32 %v11695_v57, %v572_v5 }
 0x192   :  { %714 = vadd.xlane.f32.xlu0 %v713_v9  ;;  %v9626_v11 = vpop.f32.mrb[6].mxu1  ;;  %v11794_v51 = vadd.f32 %v11695_v57, %v567_v8  ;;  %v725_v53 = vsel %vm197_vm0, %v689_v47, 0.0 }
 0x193   :  { %627 = vadd.xlane.f32.xlu1 %v626_v10  ;;  %v9654_v15 = vpop.f32.mrb[14].mxu0  ;;  %v382_v16 = vpop.f32.mrb[7].mxu1  ;;  %v692_v58 = vmul.f32 %v11788_v45, %v11788_v45  ;;  %v644_v5 = vsel %vm197_vm0, %v11788_v45, 0.0 }
 0x194   :  { %v582_v17 = vadd.f32 %v9654_v15, %v9626_v11  ;;  %v576_v18 = vpop.f32.mrb[15].mxu0  ;;  %v691_v1 = vmul.f32 %v11794_v51, %v11794_v51  ;;  %v641_v10 = vsel %vm197_vm0, %v11794_v51, 0.0 }
 0x195   :  { %v577_v19 = vadd.f32 %v576_v18, %v382_v16  ;;  %v734_v62 = vsel %vm197_vm0, %v692_v58, 0.0  ;;  %v871_v16 = vld [vmem:[%s14663_s4] sm:$0xff] }
 0x196   :  { %630 = vadd.xlane.f32.xlu0 %v629_v12  ;;  %v731_v6 = vsel %vm197_vm0, %v691_v1, 0.0  ;;  %v11813_v9 = vadd.f32 %v11695_v57, %v582_v17  ;;  %v872_v17 = vld [vmem:[%s14663_s4 + $0x8] sm:$0xff] }
 0x197   :  { %624 = vadd.xlane.f32.xlu1 %v623_v20  ;;  %v11803_v0 = vadd.f32 %v11695_v57, %v577_v19  ;;  %v10679_v18 = vpack.c.bf16 %v872_v17, %v871_v16  ;;  %v873_v19 = vld [vmem:[%s14663_s4 + $0x10] sm:$0xff]  ;;  %v874_v20 = vld [vmem:[%s14663_s4 + $0x18] sm:$0xff] }
 0x198   :  { %v650_v12 = vsel %vm197_vm0, %v11813_v9, 0.0  ;;  %v694_v15 = vmul.f32 %v11813_v9, %v11813_v9  ;;  %v10683_v23 = vpack.c.bf16 %v874_v20, %v873_v19 }
 0x199   :  { %v693_v8 = vmul.f32 %v11803_v0, %v11803_v0  ;;  %v647_v14 = vsel %vm197_vm0, %v11803_v0, 0.0  ;;  %10680 = vmatprep.subr.bf16.mxu1 %v10679_v18 }
 0x19a   :  { %723 = vadd.xlane.f32.xlu0 %v722_v29  ;;  %v740_v57 = vsel %vm197_vm0, %v694_v15, 0.0  ;;  %10682 = vmatpush3.bf16.msra.mxu1 %v10679_v18 }
 0x19b   :  { %717 = vadd.xlane.f32.xlu1 %v716_v31  ;;  %v737_v11 = vsel %vm197_vm0, %v693_v8, 0.0  ;;  %10684 = vmatprep.subr.bf16.mxu1 %v10683_v23 }
 0x19e   :  { %636 = vadd.xlane.f32.xlu0 %v635_v33  ;;  %10686 = vmatpush3.bf16.msra.mxu1 %v10683_v23 }
 0x19f   :  { %633 = vadd.xlane.f32.xlu1 %v632_v39 }
 0x1a2   :  { %729 = vadd.xlane.f32.xlu0 %v728_v43 }
 0x1a3   :  { %720 = vadd.xlane.f32.xlu1 %v719_v49 }
 0x1a6   :  { %726 = vadd.xlane.f32.xlu0 %v725_v53 }
 0x1a7   :  { %639 = vadd.xlane.f32.xlu1 %v638_v60 }
 0x1aa   :  { %735 = vadd.xlane.f32.xlu0 %v734_v62 }
 0x1ab   :  { %645 = vadd.xlane.f32.xlu1 %v644_v5 }
 0x1ae   :  { %732 = vadd.xlane.f32.xlu0 %v731_v6 }
 0x1af   :  { %642 = vadd.xlane.f32.xlu1 %v641_v10 }
 0x1b2   :  { %738 = vadd.xlane.f32.xlu0 %v737_v11 }
 0x1b3   :  { %651 = vadd.xlane.f32.xlu1 %v650_v12 }
 0x1b7   :  { %648 = vadd.xlane.f32.xlu1 %v647_v14 }
 0x1bb   :  { %741 = vadd.xlane.f32.xlu1 %v740_v57 }
 0x207   :  { %v610_v29 = vpop.xlane.xlu0 %609 }
 0x208   :  { %v607_v31 = vpop.xlane.xlu1 %606 }
 0x209   :  { %v653_v49 = vadd.f32 %v610_v29, %v607_v31 }
 0x20b   :  { %v700_v33 = vpop.xlane.xlu0 %699 }
 0x20c   :  { %v697_v35 = vpop.xlane.xlu1 %696 }
 0x20d   :  { %v743_v53 = vadd.f32 %v700_v33, %v697_v35 }
 0x20f   :  { %v706_v39 = vpop.xlane.xlu0 %705 }
 0x210   :  { %v616_v41 = vpop.xlane.xlu1 %615 }
 0x213   :  { %v703_v43 = vpop.xlane.xlu0 %702 }
 0x214   :  { %v613_v47 = vpop.xlane.xlu1 %612  ;;  %v744_v62 = vadd.f32 %v743_v53, %v703_v43 }
 0x215   :  { %v654_v1 = vadd.f32 %v653_v49, %v613_v47 }
 0x216   :  { %v745_v8 = vadd.f32 %v744_v62, %v706_v39 }
 0x217   :  { %v712_v58 = vpop.xlane.xlu0 %711  ;;  %v655_v10 = vadd.f32 %v654_v1, %v616_v41 }
 0x218   :  { %v622_v60 = vpop.xlane.xlu1 %621 }
 0x21b   :  { %v709_v5 = vpop.xlane.xlu0 %708 }
 0x21c   :  { %v619_v6 = vpop.xlane.xlu1 %618  ;;  %v746_v11 = vadd.f32 %v745_v8, %v709_v5 }
 0x21d   :  { %v656_v12 = vadd.f32 %v655_v10, %v619_v6 }
 0x21e   :  { %v747_v57 = vadd.f32 %v746_v11, %v712_v58 }
 0x21f   :  { %v715_v14 = vpop.xlane.xlu0 %714  ;;  %v657_v17 = vadd.f32 %v656_v12, %v622_v60 }
 0x220   :  { %v628_v15 = vpop.xlane.xlu1 %627  ;;  %v748_v20 = vadd.f32 %v747_v57, %v715_v14 }
 0x223   :  { %v631_v16 = vpop.xlane.xlu0 %630 }
 0x224   :  { %v625_v18 = vpop.xlane.xlu1 %624 }
 0x225   :  { %v658_v19 = vadd.f32 %v657_v17, %v625_v18 }
 0x227   :  { %v659_v23 = vadd.f32 %v658_v19, %v628_v15  ;;  %v724_v29 = vpop.xlane.xlu0 %723 }
 0x228   :  { %v718_v31 = vpop.xlane.xlu1 %717 }
 0x229   :  { %v660_v33 = vrot.slane %v659_v23, 4  ;;  %v749_v35 = vadd.f32 %v748_v20, %v718_v31 }
 0x22b   :  { %v661_v43 = vadd.f32 %v660_v33, %v659_v23  ;;  %v750_v47 = vrot.slane %v749_v35, 4  ;;  %v637_v49 = vpop.xlane.xlu0 %636 }
 0x22c   :  { %v634_v39 = vpop.xlane.xlu1 %633 }
 0x22d   :  { %v662_v41 = vrot.slane %v661_v43, 2  ;;  %v751_v53 = vadd.f32 %v750_v47, %v749_v35  ;;  %v666_v19 = vadd.f32 %v634_v39, %v631_v16  ;;  %v14676_v16 = vsub.s32 2, %v11684_v54 }
 0x22f   :  { %v663_v62 = vadd.f32 %v662_v41, %v661_v43  ;;  %v752_v1 = vrot.slane %v751_v53, 2  ;;  %v730_v5 = vpop.xlane.xlu0 %729  ;;  %v667_v43 = vadd.f32 %v666_v19, %v637_v49 }
 0x230   :  { %v721_v58 = vpop.xlane.xlu1 %720 }
 0x231   :  { %v664_v6 = vrot.slane %v663_v62, 1  ;;  %v753_v60 = vadd.f32 %v752_v1, %v751_v53  ;;  %v756_v57 = vadd.f32 %v724_v29, %v721_v58 }
 0x233   :  { %v665_v8 = vadd.f32 %v664_v6, %v663_v62  ;;  %v754_v10 = vrot.slane %v753_v60, 1  ;;  %v727_v11 = vpop.xlane.xlu0 %726 }
 0x234   :  { %v640_v12 = vpop.xlane.xlu1 %639  ;;  %v757_v33 = vadd.f32 %v756_v57, %v727_v11 }
 0x235   :  { %v11837_v14 = vmul.f32 0.00048828125, %v665_v8  ;;  %v755_v15 = vadd.f32 %v754_v10, %v753_v60  ;;  %v668_v62 = vadd.f32 %v667_v43, %v640_v12  ;;  %v14677_v10 = vsub.s32 1, %v11684_v54 }
 0x236   :  { %v758_v1 = vadd.f32 %v757_v33, %v730_v5  ;;  %v11851_v5 = vrot.slane %v11690_v56, %v14676_v16 }
 0x237   :  { %v773_v17 = vmul.f32 %v11837_v14, %v11837_v14  ;;  %v771_v18 = vmul.f32 0.00048828125, %v755_v15  ;;  %v736_v20 = vpop.xlane.xlu0 %735  ;;  %v11846_v12 = vrot.slane %v11690_v56, %v14677_v10  ;;  %v780_v19 = vsub.f32 %v11698_v59, %v11837_v14 }
 0x238   :  { %v646_v23 = vpop.xlane.xlu1 %645  ;;  %v783_v43 = vsub.f32 %v11730_v21, %v11837_v14 }
 0x239   :  { %v775_v31 = vsub.f32 %v771_v18, %v773_v17  ;;  %v779_v18 = vsub.f32 %v11701_v61, %v11837_v14 }
 0x23b   :  { %v777_v35 = vmax.f32 %v775_v31, 0.0  ;;  %v733_v47 = vpop.xlane.xlu0 %732 }
 0x23c   :  { %v643_v41 = vpop.xlane.xlu1 %642  ;;  %v759_v6 = vadd.f32 %v758_v1, %v733_v47  ;;  %v784_v47 = vsub.f32 %v11722_v13, %v11837_v14 }
 0x23d   :  { %v795_v53 = vadd.f32 1e-05, %v777_v35  ;;  %v669_v60 = vadd.f32 %v668_v62, %v643_v41 }
 0x23e   :  { %v760_v58 = vadd.f32 %v759_v6, %v736_v20  ;;  %v781_v20 = vsub.f32 %v11715_v7, %v11837_v14 }
 0x23f   :  { %11144 = vrsqrt.f32 %v795_v53  ;;  %v670_v8 = vadd.f32 %v669_v60, %v646_v23  ;;  %v739_v39 = vpop.xlane.xlu0 %738  ;;  %v782_v23 = vsub.f32 %v11712_v4, %v11837_v14 }
 0x240   :  { %v652_v29 = vpop.xlane.xlu1 %651  ;;  %v761_v57 = vadd.f32 %v760_v58, %v739_v39 }
 0x244   :  { %v649_v15 = vpop.xlane.xlu1 %648 }
 0x245   :  { %v671_v11 = vadd.f32 %v670_v8, %v649_v15 }
 0x247   :  { %v672_v49 = vadd.f32 %v671_v11, %v652_v29 }
 0x248   :  { %v742_v17 = vpop.xlane.xlu1 %741 }
 0x249   :  { %v11145_v31 = vpop.eup %11144  ;;  %v673_v33 = vrot.slane %v672_v49, 4  ;;  %v762_v35 = vadd.f32 %v761_v57, %v742_v17  ;;  %v785_v17 = vsub.f32 %v11738_v37, %v11837_v14 }
 0x24a   :  { %v799_v41 = vmul.f32 %v11145_v31, %v779_v18  ;;  %v800_v61 = vmul.f32 %v11145_v31, %v780_v19  ;;  %v801_v53 = vmul.f32 %v11145_v31, %v781_v20  ;;  %v802_v62 = vmul.f32 %v11145_v31, %v782_v23 }
 0x24b   :  { %v674_v59 = vadd.f32 %v673_v33, %v672_v49  ;;  %v763_v1 = vrot.slane %v762_v35, 4  ;;  %v803_v6 = vmul.f32 %v11145_v31, %v783_v43  ;;  %v804_v29 = vmul.f32 %v11145_v31, %v784_v47 }
 0x24c   :  { %v819_v7 = vmul.f32 %v11846_v12, %v799_v41  ;;  %v820_v4 = vmul.f32 %v11846_v12, %v800_v61  ;;  %v821_v60 = vmul.f32 %v11846_v12, %v801_v53  ;;  %v822_v21 = vmul.f32 %v11846_v12, %v802_v62 }
 0x24d   :  { %v675_v58 = vrot.slane %v674_v59, 2  ;;  %v764_v8 = vadd.f32 %v763_v1, %v762_v35  ;;  %v823_v11 = vmul.f32 %v11846_v12, %v803_v6  ;;  %v824_v20 = vmul.f32 %v11846_v12, %v804_v29 }
 0x24e   :  { %v839_v13 = vadd.f32 %v11851_v5, %v819_v7  ;;  %v840_v39 = vadd.f32 %v11851_v5, %v820_v4  ;;  %v841_v15 = vadd.f32 %v11851_v5, %v821_v60  ;;  %v786_v23 = vsub.f32 %v11749_v63, %v11837_v14 }
 0x24f   :  { %v676_v57 = vadd.f32 %v675_v58, %v674_v59  ;;  %v765_v49 = vrot.slane %v764_v8, 2  ;;  %v842_v43 = vadd.f32 %v11851_v5, %v822_v21  ;;  %v843_v41 = vadd.f32 %v11851_v5, %v823_v11 }
 0x250   :  { %v855_v18 = vmax.f32 %v839_v13, 0.0  ;;  %v856_v19 = vmax.f32 %v840_v39, 0.0  ;;  %v857_v47 = vmax.f32 %v841_v15, 0.0  ;;  %v805_v61 = vmul.f32 %v11145_v31, %v785_v17 }
 0x251   :  { %v677_v33 = vrot.slane %v676_v57, 1  ;;  %v766_v35 = vadd.f32 %v765_v49, %v764_v8  ;;  %v806_v53 = vmul.f32 %v11145_v31, %v786_v23  ;;  %v844_v59 = vadd.f32 %v11851_v5, %v824_v20 }
 0x252   :  { %9663 = vmatprep.mubr.msk.f32.mxu1 %vm197_vm0, %v855_v18  ;;  %v825_v63 = vmul.f32 %v11846_v12, %v805_v61  ;;  %v858_v6 = vmax.f32 %v842_v43, 0.0  ;;  %v859_v4 = vmax.f32 %v843_v41, 0.0 }
 0x253   :  { %v678_v62 = vadd.f32 %v677_v33, %v676_v57  ;;  %v767_v37 = vrot.slane %v766_v35, 1  ;;  %9664 = vmatmul.mubr.msk.f32.vlgmr.msra.gmra.mrb[8].mxu1 %vm197_vm0, %v856_v19  ;;  %v826_v7 = vmul.f32 %v11846_v12, %v806_v53  ;;  %v860_v8 = vmax.f32 %v844_v59, 0.0 }
 0x254   :  { %9666 = vmatprep.mubr.msk.f32.mxu1 %vm197_vm0, %v857_v47  ;;  %v845_v60 = vadd.f32 %v11851_v5, %v825_v63 }
 0x255   :  { %v770_v14 = vmul.f32 0.00048828125, %v678_v62  ;;  %v768_v1 = vadd.f32 %v767_v37, %v766_v35  ;;  %v846_v21 = vadd.f32 %v11851_v5, %v826_v7 }
 0x256   :  { %v861_v13 = vmax.f32 %v845_v60, 0.0 }
 0x257   :  { %v774_v29 = vmul.f32 %v770_v14, %v770_v14  ;;  %v772_v31 = vmul.f32 0.00048828125, %v768_v1  ;;  %9667 = vmatmul.mubr.msk.f32.gmra.mrb[10].mxu1 %vm197_vm0, %v858_v6  ;;  %v862_v11 = vmax.f32 %v846_v21, 0.0  ;;  %v787_v57 = vsub.f32 %v11757_v3, %v770_v14 }
 0x258   :  { %9669 = vmatprep.mubr.msk.f32.mxu1 %vm197_vm0, %v859_v4  ;;  %v788_v49 = vsub.f32 %v11754_v2, %v770_v14  ;;  %v789_v17 = vsub.f32 %v11774_v27, %v770_v14  ;;  %v790_v18 = vsub.f32 %v11771_v25, %v770_v14  ;;  %v791_v20 = vsub.f32 %v11794_v51, %v770_v14 }
 0x259   :  { %v776_v58 = vsub.f32 %v772_v31, %v774_v29  ;;  %v792_v41 = vsub.f32 %v11788_v45, %v770_v14  ;;  %v793_v61 = vsub.f32 %v11803_v0, %v770_v14  ;;  %v794_v0 = vsub.f32 %v11813_v9, %v770_v14 }
 0x25b   :  { %v778_v39 = vmax.f32 %v776_v58, 0.0  ;;  %9670 = vmatmul.mubr.msk.f32.gmra.mrb[12].mxu1 %vm197_vm0, %v860_v8 }
 0x25c   :  { %9672 = vmatprep.mubr.msk.f32.mxu1 %vm197_vm0, %v861_v13 }
 0x25d   :  { %v796_v15 = vadd.f32 1e-05, %v778_v39 }
 0x25f   :  { %11146 = vrsqrt.f32 %v796_v15  ;;  %9673 = vmatmul.mubr.msk.f32.gmra.mrb[14].mxu1 %vm197_vm0, %v862_v11 }
 0x269   :  { %v11147_v19 = vpop.eup %11146 }
 0x26a   :  { %v807_v23 = vmul.f32 %v11147_v19, %v787_v57  ;;  %v808_v33 = vmul.f32 %v11147_v19, %v788_v49  ;;  %v809_v35 = vmul.f32 %v11147_v19, %v789_v17  ;;  %v810_v43 = vmul.f32 %v11147_v19, %v790_v18 }
 0x26b   :  { %v811_v47 = vmul.f32 %v11147_v19, %v791_v20  ;;  %v812_v53 = vmul.f32 %v11147_v19, %v792_v41  ;;  %v813_v62 = vmul.f32 %v11147_v19, %v793_v61  ;;  %v814_v4 = vmul.f32 %v11147_v19, %v794_v0 }
 0x26c   :  { %v827_v3 = vmul.f32 %v11846_v12, %v807_v23  ;;  %v828_v2 = vmul.f32 %v11846_v12, %v808_v33  ;;  %v829_v27 = vmul.f32 %v11846_v12, %v809_v35  ;;  %v830_v25 = vmul.f32 %v11846_v12, %v810_v43 }
 0x26d   :  { %v831_v45 = vmul.f32 %v11846_v12, %v811_v47  ;;  %v832_v7 = vmul.f32 %v11846_v12, %v812_v53  ;;  %v833_v31 = vmul.f32 %v11846_v12, %v813_v62  ;;  %v834_v14 = vmul.f32 %v11846_v12, %v814_v4 }
 0x26e   :  { %v847_v51 = vadd.f32 %v11851_v5, %v827_v3  ;;  %v848_v37 = vadd.f32 %v11851_v5, %v828_v2  ;;  %v849_v59 = vadd.f32 %v11851_v5, %v829_v27  ;;  %v850_v6 = vadd.f32 %v11851_v5, %v830_v25 }
 0x26f   :  { %v851_v29 = vadd.f32 %v11851_v5, %v831_v45  ;;  %v852_v9 = vadd.f32 %v11851_v5, %v832_v7  ;;  %v853_v21 = vadd.f32 %v11851_v5, %v833_v31  ;;  %v854_v39 = vadd.f32 %v11851_v5, %v834_v14 }
 0x270   :  { %v863_v63 = vmax.f32 %v847_v51, 0.0  ;;  %v864_v1 = vmax.f32 %v848_v37, 0.0  ;;  %v865_v60 = vmax.f32 %v849_v59, 0.0  ;;  %v866_v58 = vmax.f32 %v850_v6, 0.0 }
 0x271   :  { %v867_v8 = vmax.f32 %v851_v29, 0.0  ;;  %v868_v13 = vmax.f32 %v852_v9, 0.0  ;;  %v869_v15 = vmax.f32 %v853_v21, 0.0  ;;  %v870_v11 = vmax.f32 %v854_v39, 0.0 }
 0x272   :  { %9675 = vmatprep.mubr.msk.f32.mxu1 %vm197_vm0, %v863_v63  ;;  %v14673_v12 = vsub.s32 3, %v11684_v54 }
 0x273   :  { %9676 = vmatmul.mubr.msk.f32.gmra.mrb[16].mxu1 %vm197_vm0, %v864_v1 }
 0x274   :  { %9678 = vmatprep.mubr.msk.f32.mxu1 %vm197_vm0, %v865_v60  ;;  %v11929_v57 = vrot.slane %v11690_v56, %v14673_v12 }
 0x277   :  { %9679 = vmatmul.mubr.msk.f32.gmra.mrb[18].mxu1 %vm197_vm0, %v866_v58 }
 0x278   :  { %9681 = vmatprep.mubr.msk.f32.mxu1 %vm197_vm0, %v867_v8 }
 0x27b   :  { %9682 = vmatmul.mubr.msk.f32.gmra.mrb[20].mxu1 %vm197_vm0, %v868_v13 }
 0x27c   :  { %9684 = vmatprep.mubr.msk.f32.mxu1 %vm197_vm0, %v869_v15 }
 0x27f   :  { %9685 = vmatmul.mubr.msk.f32.gmra.mrb[22].mxu1 %vm197_vm0, %v870_v11 }
 0x326   :  { %v9665_v49 = vpop.f32.mrb[8].mxu1 }
 0x327   :  { %v11932_v17 = vadd.f32 %v9665_v49, %v11929_v57  ;;  %v993_v5 = vpop.f32.mrb[9].mxu1 }
 0x328   :  { %v11935_v18 = vadd.f32 %v993_v5, %v11929_v57 }
 0x329   :  { %v1075_v19 = vsel %vm197_vm0, %v11932_v17, 0.0  ;;  %v1147_v33 = vmul.f32 %v11932_v17, %v11932_v17 }
 0x32a   :  { %1076 = vadd.xlane.f32.xlu1 %v1075_v19  ;;  %v9668_v20 = vpop.f32.mrb[10].mxu1  ;;  %v1072_v23 = vsel %vm197_vm0, %v11935_v18, 0.0  ;;  %v1146_v56 = vmul.f32 %v11935_v18, %v11935_v18 }
 0x32b   :  { %v1003_v35 = vpop.f32.mrb[11].mxu1  ;;  %1073 = vadd.xlane.f32.xlu0 %v1072_v23  ;;  %v11947_v47 = vadd.f32 %v9668_v20, %v11929_v57  ;;  %v1165_v3 = vsel %vm197_vm0, %v1147_v33, 0.0 }
 0x32c   :  { %v1162_v43 = vsel %vm197_vm0, %v1146_v56, 0.0  ;;  %v11950_v41 = vadd.f32 %v1003_v35, %v11929_v57 }
 0x32d   :  { %v1081_v25 = vsel %vm197_vm0, %v11947_v47, 0.0  ;;  %v1149_v51 = vmul.f32 %v11947_v47, %v11947_v47 }
 0x32e   :  { %v9671_v61 = vpop.f32.mrb[12].mxu1  ;;  %1163 = vadd.xlane.f32.xlu1 %v1162_v43  ;;  %v1078_v62 = vsel %vm197_vm0, %v11950_v41, 0.0  ;;  %v1148_v63 = vmul.f32 %v11950_v41, %v11950_v41 }
 0x32f   :  { %v1013_v2 = vpop.f32.mrb[13].mxu1  ;;  %1166 = vadd.xlane.f32.xlu0 %v1165_v3  ;;  %v11954_v27 = vadd.f32 %v9671_v61, %v11929_v57  ;;  %v1171_v0 = vsel %vm197_vm0, %v1149_v51, 0.0 }
 0x330   :  { %v11963_v59 = vadd.f32 %v1013_v2, %v11929_v57  ;;  %v1168_v7 = vsel %vm197_vm0, %v1148_v63, 0.0 }
 0x331   :  { %v1087_v45 = vsel %vm197_vm0, %v11954_v27, 0.0  ;;  %v1151_v4 = vmul.f32 %v11954_v27, %v11954_v27 }
 0x332   :  { %v9674_v53 = vpop.f32.mrb[14].mxu1  ;;  %1082 = vadd.xlane.f32.xlu1 %v1081_v25  ;;  %v1084_v6 = vsel %vm197_vm0, %v11963_v59, 0.0  ;;  %v1150_v58 = vmul.f32 %v11963_v59, %v11963_v59 }
 0x333   :  { %v1023_v37 = vpop.f32.mrb[15].mxu1  ;;  %1079 = vadd.xlane.f32.xlu0 %v1078_v62  ;;  %v11971_v1 = vadd.f32 %v9674_v53, %v11929_v57  ;;  %v1177_v31 = vsel %vm197_vm0, %v1151_v4, 0.0 }
 0x334   :  { %v11979_v60 = vadd.f32 %v1023_v37, %v11929_v57  ;;  %v1174_v8 = vsel %vm197_vm0, %v1150_v58, 0.0 }
 0x335   :  { %v1093_v29 = vsel %vm197_vm0, %v11971_v1, 0.0  ;;  %v1153_v14 = vmul.f32 %v11971_v1, %v11971_v1 }
 0x336   :  { %1088 = vadd.xlane.f32.xlu1 %v1087_v45  ;;  %v1090_v9 = vsel %vm197_vm0, %v11979_v60, 0.0  ;;  %v1152_v21 = vmul.f32 %v11979_v60, %v11979_v60 }
 0x337   :  { %1172 = vadd.xlane.f32.xlu0 %v1171_v0  ;;  %v1183_v13 = vsel %vm197_vm0, %v1153_v14, 0.0 }
 0x338   :  { %v1180_v15 = vsel %vm197_vm0, %v1152_v21, 0.0 }
 0x33a   :  { %1085 = vadd.xlane.f32.xlu1 %v1084_v6 }
 0x33b   :  { %1169 = vadd.xlane.f32.xlu0 %v1168_v7 }
 0x33e   :  { %1094 = vadd.xlane.f32.xlu1 %v1093_v29 }
 0x33f   :  { %1178 = vadd.xlane.f32.xlu0 %v1177_v31 }
 0x342   :  { %1091 = vadd.xlane.f32.xlu1 %v1090_v9 }
 0x343   :  { %1175 = vadd.xlane.f32.xlu0 %v1174_v8 }
 0x346   :  { %1184 = vadd.xlane.f32.xlu1 %v1183_v13  ;;  %v9677_v39 = vpop.f32.mrb[16].mxu1 }
 0x347   :  { %v11996_v11 = vadd.f32 %v9677_v39, %v11929_v57  ;;  %1181 = vadd.xlane.f32.xlu0 %v1180_v15  ;;  %v1033_v49 = vpop.f32.mrb[17].mxu1 }
 0x348   :  { %v11999_v5 = vadd.f32 %v1033_v49, %v11929_v57 }
 0x349   :  { %v1099_v19 = vsel %vm197_vm0, %v11996_v11, 0.0  ;;  %v1155_v33 = vmul.f32 %v11996_v11, %v11996_v11 }
 0x34a   :  { %1100 = vadd.xlane.f32.xlu1 %v1099_v19  ;;  %v9680_v20 = vpop.f32.mrb[18].mxu1  ;;  %v1096_v23 = vsel %vm197_vm0, %v11999_v5, 0.0  ;;  %v1154_v56 = vmul.f32 %v11999_v5, %v11999_v5 }
 0x34b   :  { %v1043_v35 = vpop.f32.mrb[19].mxu1  ;;  %1097 = vadd.xlane.f32.xlu0 %v1096_v23  ;;  %v12011_v61 = vadd.f32 %v9680_v20, %v11929_v57  ;;  %v1189_v25 = vsel %vm197_vm0, %v1155_v33, 0.0  ;;  %v1339_v33 = vld [vmem:[%s14664_s5 + $0x8] sm:$0xff] }
 0x34c   :  { %v1186_v43 = vsel %vm197_vm0, %v1154_v56, 0.0  ;;  %v12014_v3 = vadd.f32 %v1043_v35, %v11929_v57  ;;  %v1338_v56 = vld [vmem:[%s14664_s5] sm:$0xff] }
 0x34d   :  { %v1105_v51 = vsel %vm197_vm0, %v12011_v61, 0.0  ;;  %v1157_v0 = vmul.f32 %v12011_v61, %v12011_v61  ;;  %v10687_v35 = vpack.c.bf16 %v1339_v33, %v1338_v56 }
 0x34e   :  { %v9683_v2 = vpop.f32.mrb[20].mxu1  ;;  %1187 = vadd.xlane.f32.xlu1 %v1186_v43  ;;  %v1102_v45 = vsel %vm197_vm0, %v12014_v3, 0.0  ;;  %v1156_v29 = vmul.f32 %v12014_v3, %v12014_v3  ;;  %v1340_v43 = vld [vmem:[%s14664_s5 + $0x10] sm:$0xff] }
 0x34f   :  { %v1053_v53 = vpop.f32.mrb[21].mxu1  ;;  %1190 = vadd.xlane.f32.xlu0 %v1189_v25  ;;  %v12018_v62 = vadd.f32 %v9683_v2, %v11929_v57  ;;  %v1195_v4 = vsel %vm197_vm0, %v1157_v0, 0.0  ;;  %10688 = vmatprep.subr.bf16.mxu1 %v10687_v35  ;;  %v1341_v2 = vld [vmem:[%s14664_s5 + $0x18] sm:$0xff] }
 0x350   :  { %v12027_v6 = vadd.f32 %v1053_v53, %v11929_v57  ;;  %v1192_v9 = vsel %vm197_vm0, %v1156_v29, 0.0  ;;  %10690 = vmatpush3.bf16.msra.mxu1 %v10687_v35  ;;  %v10691_v25 = vpack.c.bf16 %v1341_v2, %v1340_v43  ;;  %v1563_v53 = vld [vmem:[%s14665_s6 + $0x40] sm:$0xff] }
 0x351   :  { %v1111_v7 = vsel %vm197_vm0, %v12018_v62, 0.0  ;;  %v1159_v14 = vmul.f32 %v12018_v62, %v12018_v62 }
 0x352   :  { %v9686_v37 = vpop.f32.mrb[22].mxu1  ;;  %1106 = vadd.xlane.f32.xlu1 %v1105_v51  ;;  %v1108_v58 = vsel %vm197_vm0, %v12027_v6, 0.0  ;;  %v1158_v39 = vmul.f32 %v12027_v6, %v12027_v6  ;;  %10692 = vmatprep.subr.bf16.mxu1 %v10691_v25  ;;  %v1564_v51 = vld [vmem:[%s14665_s6 + $0x48] sm:$0xff] }
 0x353   :  { %v1063_v63 = vpop.f32.mrb[23].mxu1  ;;  %1103 = vadd.xlane.f32.xlu0 %v1102_v45  ;;  %v12035_v31 = vadd.f32 %v9686_v37, %v11929_v57  ;;  %v1201_v13 = vsel %vm197_vm0, %v1159_v14, 0.0  ;;  %v12077_v37 = vpack.c.bf16 %v1564_v51, %v1563_v53 }
 0x354   :  { %v12043_v8 = vadd.f32 %v1063_v63, %v11929_v57  ;;  %v1198_v57 = vsel %vm197_vm0, %v1158_v39, 0.0  ;;  %10694 = vmatpush3.bf16.msra.mxu1 %v10691_v25 }
 0x355   :  { %v1117_v21 = vsel %vm197_vm0, %v12035_v31, 0.0  ;;  %v1161_v49 = vmul.f32 %v12035_v31, %v12035_v31  ;;  %10700 = vmatprep.subr.bf16.mxu1 %v12077_v37 }
 0x356   :  { %1112 = vadd.xlane.f32.xlu1 %v1111_v7  ;;  %v1114_v15 = vsel %vm197_vm0, %v12043_v8, 0.0  ;;  %v1160_v19 = vmul.f32 %v12043_v8, %v12043_v8 }
 0x357   :  { %1196 = vadd.xlane.f32.xlu0 %v1195_v4  ;;  %v1207_v20 = vsel %vm197_vm0, %v1161_v49, 0.0 }
 0x358   :  { %v1204_v23 = vsel %vm197_vm0, %v1160_v19, 0.0 }
 0x35a   :  { %1109 = vadd.xlane.f32.xlu1 %v1108_v58 }
 0x35b   :  { %1193 = vadd.xlane.f32.xlu0 %v1192_v9 }
 0x35e   :  { %1118 = vadd.xlane.f32.xlu1 %v1117_v21 }
 0x35f   :  { %1202 = vadd.xlane.f32.xlu0 %v1201_v13 }
 0x362   :  { %1115 = vadd.xlane.f32.xlu1 %v1114_v15 }
 0x363   :  { %1199 = vadd.xlane.f32.xlu0 %v1198_v57 }
 0x366   :  { %1208 = vadd.xlane.f32.xlu1 %v1207_v20 }
 0x367   :  { %1205 = vadd.xlane.f32.xlu0 %v1204_v23 }
 0x3b7   :  { %v1077_v45 = vpop.xlane.xlu1 %1076 }
 0x3b8   :  { %v1074_v0 = vpop.xlane.xlu0 %1073 }
 0x3b9   :  { %v1120_v58 = vadd.f32 %v1077_v45, %v1074_v0 }
 0x3bb   :  { %v1164_v63 = vpop.xlane.xlu1 %1163 }
 0x3bc   :  { %v1167_v7 = vpop.xlane.xlu0 %1166 }
 0x3bd   :  { %v1210_v49 = vadd.f32 %v1167_v7, %v1164_v63 }
 0x3bf   :  { %v1083_v4 = vpop.xlane.xlu1 %1082 }
 0x3c0   :  { %v1080_v29 = vpop.xlane.xlu0 %1079 }
 0x3c1   :  { %v1121_v14 = vadd.f32 %v1120_v58, %v1080_v29 }
 0x3c3   :  { %v1089_v9 = vpop.xlane.xlu1 %1088  ;;  %v1122_v39 = vadd.f32 %v1121_v14, %v1083_v4 }
 0x3c4   :  { %v1173_v21 = vpop.xlane.xlu0 %1172 }
 0x3c7   :  { %v1086_v13 = vpop.xlane.xlu1 %1085 }
 0x3c8   :  { %v1170_v15 = vpop.xlane.xlu0 %1169  ;;  %v1123_v57 = vadd.f32 %v1122_v39, %v1086_v13 }
 0x3c9   :  { %v1211_v19 = vadd.f32 %v1210_v49, %v1170_v15 }
 0x3ca   :  { %v1124_v56 = vadd.f32 %v1123_v57, %v1089_v9 }
 0x3cb   :  { %v1095_v20 = vpop.xlane.xlu1 %1094  ;;  %v1212_v35 = vadd.f32 %v1211_v19, %v1173_v21 }
 0x3cc   :  { %v1179_v23 = vpop.xlane.xlu0 %1178 }
 0x3cf   :  { %v1092_v33 = vpop.xlane.xlu1 %1091 }
 0x3d0   :  { %v1125_v43 = vadd.f32 %v1124_v56, %v1092_v33  ;;  %v1176_v2 = vpop.xlane.xlu0 %1175 }
 0x3d1   :  { %v1213_v25 = vadd.f32 %v1212_v35, %v1176_v2 }
 0x3d2   :  { %v1126_v53 = vadd.f32 %v1125_v43, %v1095_v20 }
 0x3d3   :  { %v1185_v51 = vpop.xlane.xlu1 %1184  ;;  %v1214_v45 = vadd.f32 %v1213_v25, %v1179_v23 }
 0x3d4   :  { %v1127_v0 = vrot.slane %v1126_v53, 4  ;;  %v1182_v29 = vpop.xlane.xlu0 %1181 }
 0x3d5   :  { %v1215_v58 = vadd.f32 %v1214_v45, %v1182_v29 }
 0x3d6   :  { %v1128_v12 = vadd.f32 %v1127_v0, %v1126_v53 }
 0x3d7   :  { %v1216_v4 = vadd.f32 %v1215_v58, %v1185_v51  ;;  %v1101_v14 = vpop.xlane.xlu1 %1100 }
 0x3d8   :  { %v1129_v63 = vrot.slane %v1128_v12, 2  ;;  %v1098_v7 = vpop.xlane.xlu0 %1097 }
 0x3d9   :  { %v1217_v13 = vrot.slane %v1216_v4, 4  ;;  %v1133_v43 = vadd.f32 %v1101_v14, %v1098_v7 }
 0x3da   :  { %v1130_v39 = vadd.f32 %v1129_v63, %v1128_v12 }
 0x3db   :  { %v1218_v15 = vadd.f32 %v1217_v13, %v1216_v4  ;;  %v1188_v9 = vpop.xlane.xlu1 %1187 }
 0x3dc   :  { %v1131_v49 = vrot.slane %v1130_v39, 1  ;;  %v1191_v21 = vpop.xlane.xlu0 %1190 }
 0x3dd   :  { %v1219_v57 = vrot.slane %v1218_v15, 2  ;;  %v1223_v13 = vadd.f32 %v1191_v21, %v1188_v9 }
 0x3de   :  { %v1132_v19 = vadd.f32 %v1131_v49, %v1130_v39 }
 0x3df   :  { %v1220_v56 = vadd.f32 %v1219_v57, %v1218_v15  ;;  %v1107_v20 = vpop.xlane.xlu1 %1106 }
 0x3e0   :  { %v1104_v33 = vpop.xlane.xlu0 %1103  ;;  %v12080_v23 = vmul.f32 0.00048828125, %v1132_v19 }
 0x3e1   :  { %v1221_v35 = vrot.slane %v1220_v56, 1  ;;  %v1134_v53 = vadd.f32 %v1133_v43, %v1104_v33 }
 0x3e2   :  { %v1240_v12 = vmul.f32 %v12080_v23, %v12080_v23 }
 0x3e3   :  { %v1222_v2 = vadd.f32 %v1221_v35, %v1220_v56  ;;  %v1113_v25 = vpop.xlane.xlu1 %1112  ;;  %v1135_v58 = vadd.f32 %v1134_v53, %v1107_v20  ;;  %v14674_v20 = vsub.s32 5, %v11684_v54 }
 0x3e4   :  { %v1197_v51 = vpop.xlane.xlu0 %1196 }
 0x3e5   :  { %v1238_v45 = vmul.f32 0.00048828125, %v1222_v2  ;;  %v14675_v2 = vsub.s32 4, %v11684_v54 }
 0x3e7   :  { %v1242_v0 = vsub.f32 %v1238_v45, %v1240_v12  ;;  %v1110_v29 = vpop.xlane.xlu1 %1109 }
 0x3e8   :  { %v1194_v4 = vpop.xlane.xlu0 %1193  ;;  %v1136_v39 = vadd.f32 %v1135_v58, %v1110_v29  ;;  %v1246_v58 = vsub.f32 %v11935_v18, %v12080_v23 }
 0x3e9   :  { %v1244_v63 = vmax.f32 %v1242_v0, 0.0  ;;  %v1224_v49 = vadd.f32 %v1223_v13, %v1194_v4  ;;  %v11472_v0 = vld [vmem:[%s14662_s12] sm:$0x3f]  ;;  %v1247_v4 = vsub.f32 %v11932_v17, %v12080_v23 }
 0x3ea   :  { %v1137_v14 = vadd.f32 %v1136_v39, %v1113_v25  ;;  %v12091_v25 = vrot.slane %v11472_v0, %v14675_v2 }
 0x3eb   :  { %v1262_v15 = vadd.f32 1e-05, %v1244_v63  ;;  %v1119_v57 = vpop.xlane.xlu1 %1118  ;;  %v1225_v56 = vadd.f32 %v1224_v49, %v1197_v51  ;;  %v1248_v63 = vsub.f32 %v11950_v41, %v12080_v23  ;;  %v1249_v49 = vsub.f32 %v11947_v47, %v12080_v23 }
 0x3ec   :  { %v1203_v19 = vpop.xlane.xlu0 %1202  ;;  %v1251_v41 = vsub.f32 %v11954_v27, %v12080_v23 }
 0x3ed   :  { %11148 = vrsqrt.f32 %v1262_v15  ;;  %v12101_v15 = vrot.slane %v11472_v0, %v14674_v20 }
 0x3ef   :  { %v1116_v7 = vpop.xlane.xlu1 %1115 }
 0x3f0   :  { %v1138_v33 = vadd.f32 %v1137_v14, %v1116_v7  ;;  %v1200_v35 = vpop.xlane.xlu0 %1199 }
 0x3f1   :  { %v1226_v43 = vadd.f32 %v1225_v56, %v1200_v35 }
 0x3f2   :  { %v1139_v45 = vadd.f32 %v1138_v33, %v1119_v57  ;;  %v1250_v57 = vsub.f32 %v11963_v59, %v12080_v23 }
 0x3f3   :  { %v1227_v12 = vadd.f32 %v1226_v43, %v1203_v19  ;;  %v1209_v29 = vpop.xlane.xlu1 %1208 }
 0x3f4   :  { %v1140_v53 = vrot.slane %v1139_v45, 4  ;;  %v1206_v9 = vpop.xlane.xlu0 %1205 }
 0x3f5   :  { %v1228_v21 = vadd.f32 %v1227_v12, %v1206_v9 }
 0x3f6   :  { %v1141_v51 = vadd.f32 %v1140_v53, %v1139_v45 }
 0x3f7   :  { %v11149_v13 = vpop.eup %11148  ;;  %v1229_v39 = vadd.f32 %v1228_v21, %v1209_v29 }
 0x3f8   :  { %v1142_v19 = vrot.slane %v1141_v51, 2  ;;  %v1266_v18 = vmul.f32 %v11149_v13, %v1246_v58  ;;  %v1267_v14 = vmul.f32 %v11149_v13, %v1247_v4  ;;  %v1268_v7 = vmul.f32 %v11149_v13, %v1248_v63 }
 0x3f9   :  { %v1230_v17 = vrot.slane %v1229_v39, 4  ;;  %v1269_v56 = vmul.f32 %v11149_v13, %v1249_v49  ;;  %v1270_v33 = vmul.f32 %v11149_v13, %v1250_v57  ;;  %v1271_v9 = vmul.f32 %v11149_v13, %v1251_v41 }
 0x3fa   :  { %v1143_v35 = vadd.f32 %v1142_v19, %v1141_v51  ;;  %v1286_v43 = vmul.f32 %v12091_v25, %v1266_v18  ;;  %v1287_v45 = vmul.f32 %v12091_v25, %v1267_v14  ;;  %v1288_v47 = vmul.f32 %v12091_v25, %v1268_v7 }
 0x3fb   :  { %v1231_v12 = vadd.f32 %v1230_v17, %v1229_v39  ;;  %v1289_v59 = vmul.f32 %v12091_v25, %v1269_v56  ;;  %v1290_v53 = vmul.f32 %v12091_v25, %v1270_v33  ;;  %v1252_v58 = vsub.f32 %v11979_v60, %v12080_v23 }
 0x3fc   :  { %v1144_v21 = vrot.slane %v1143_v35, 1  ;;  %v1306_v0 = vadd.f32 %v12101_v15, %v1286_v43  ;;  %v1307_v29 = vadd.f32 %v12101_v15, %v1287_v45  ;;  %v1308_v27 = vadd.f32 %v12101_v15, %v1288_v47 }
 0x3fd   :  { %v1232_v51 = vrot.slane %v1231_v12, 2  ;;  %v1253_v39 = vsub.f32 %v11971_v1, %v12080_v23  ;;  %v1309_v19 = vadd.f32 %v12101_v15, %v1289_v59  ;;  %v1291_v18 = vmul.f32 %v12091_v25, %v1271_v9 }
 0x3fe   :  { %v1145_v4 = vadd.f32 %v1144_v21, %v1143_v35  ;;  %v1322_v63 = vmax.f32 %v1306_v0, 0.0  ;;  %v1323_v49 = vmax.f32 %v1307_v29, 0.0  ;;  %v1324_v14 = vmax.f32 %v1308_v27, 0.0 }
 0x3ff   :  { %v1233_v57 = vadd.f32 %v1232_v51, %v1231_v12  ;;  %v1310_v7 = vadd.f32 %v12101_v15, %v1290_v53  ;;  %v1272_v17 = vmul.f32 %v11149_v13, %v1252_v58  ;;  %v1273_v56 = vmul.f32 %v11149_v13, %v1253_v39 }
 0x400   :  { %9695 = vmatprep.mubr.msk.f32.mxu1 %vm197_vm0, %v1322_v63  ;;  %v1237_v33 = vmul.f32 0.00048828125, %v1145_v4  ;;  %v1325_v41 = vmax.f32 %v1309_v19, 0.0  ;;  %v1311_v35 = vadd.f32 %v12101_v15, %v1291_v18 }
 0x401   :  { %v1234_v60 = vrot.slane %v1233_v57, 1  ;;  %9696 = vmatmul.mubr.msk.f32.vlgmr.msra.gmra.mrb[24].mxu1 %vm197_vm0, %v1323_v49  ;;  %v1292_v1 = vmul.f32 %v12091_v25, %v1272_v17  ;;  %v1293_v43 = vmul.f32 %v12091_v25, %v1273_v56  ;;  %v1326_v45 = vmax.f32 %v1310_v7, 0.0 }
 0x402   :  { %9698 = vmatprep.mubr.msk.f32.mxu1 %vm197_vm0, %v1324_v14  ;;  %10702 = vmatpush3.bf16.msra.mxu1 %v12077_v37  ;;  %v1241_v12 = vmul.f32 %v1237_v33, %v1237_v33  ;;  %v1327_v53 = vmax.f32 %v1311_v35, 0.0  ;;  %v1254_v27 = vsub.f32 %v11999_v5, %v1237_v33  ;;  %v1255_v51 = vsub.f32 %v11996_v11, %v1237_v33 }
 0x403   :  { %v1235_v23 = vadd.f32 %v1234_v60, %v1233_v57  ;;  %v1312_v47 = vadd.f32 %v12101_v15, %v1292_v1  ;;  %v1313_v9 = vadd.f32 %v12101_v15, %v1293_v43  ;;  %v1256_v58 = vsub.f32 %v12014_v3, %v1237_v33 }
 0x404   :  { %v1257_v4 = vsub.f32 %v12011_v61, %v1237_v33  ;;  %v1258_v49 = vsub.f32 %v12027_v6, %v1237_v33  ;;  %v1259_v7 = vsub.f32 %v12018_v62, %v1237_v33  ;;  %v1260_v17 = vsub.f32 %v12043_v8, %v1237_v33 }
 0x405   :  { %v1239_v13 = vmul.f32 0.00048828125, %v1235_v23  ;;  %9699 = vmatmul.mubr.msk.f32.gmra.mrb[26].mxu1 %vm197_vm0, %v1325_v41  ;;  %v1328_v21 = vmax.f32 %v1312_v47, 0.0  ;;  %v1329_v29 = vmax.f32 %v1313_v9, 0.0  ;;  %v1261_v8 = vsub.f32 %v12035_v31, %v1237_v33 }
 0x406   :  { %9701 = vmatprep.mubr.msk.f32.mxu1 %vm197_vm0, %v1326_v45 }
 0x407   :  { %v1243_v59 = vsub.f32 %v1239_v13, %v1241_v12 }
 0x409   :  { %v1245_v0 = vmax.f32 %v1243_v59, 0.0  ;;  %9702 = vmatmul.mubr.msk.f32.gmra.mrb[28].mxu1 %vm197_vm0, %v1327_v53 }
 0x40a   :  { %9704 = vmatprep.mubr.msk.f32.mxu1 %vm197_vm0, %v1328_v21 }
 0x40b   :  { %v1263_v37 = vadd.f32 1e-05, %v1245_v0 }
 0x40d   :  { %11150 = vrsqrt.f32 %v1263_v37  ;;  %9705 = vmatmul.mubr.msk.f32.gmra.mrb[30].mxu1 %vm197_vm0, %v1329_v29 }
 0x417   :  { %v11151_v63 = vpop.eup %11150 }
 0x418   :  { %v1274_v39 = vmul.f32 %v11151_v63, %v1254_v27  ;;  %v1275_v57 = vmul.f32 %v11151_v63, %v1255_v51  ;;  %v1276_v19 = vmul.f32 %v11151_v63, %v1256_v58  ;;  %v1277_v18 = vmul.f32 %v11151_v63, %v1257_v4  ;;  %v1556_v51 = vld [vmem:[%s14665_s6 + $0x8] sm:$0xff] }
 0x419   :  { %v1278_v14 = vmul.f32 %v11151_v63, %v1258_v49  ;;  %v1279_v56 = vmul.f32 %v11151_v63, %v1259_v7  ;;  %v1280_v60 = vmul.f32 %v11151_v63, %v1260_v17  ;;  %v1281_v47 = vmul.f32 %v11151_v63, %v1261_v8  ;;  %v1572_v4 = vld [vmem:[%s14665_s6 + $0x88] sm:$0xff]  ;;  %v190_v49 = vld [vmem:[%s14666_s13] sm:$0x7f] }
 0x41a   :  { %v1294_v5 = vmul.f32 %v12091_v25, %v1274_v39  ;;  %v1295_v11 = vmul.f32 %v12091_v25, %v1275_v57  ;;  %v1296_v3 = vmul.f32 %v12091_v25, %v1276_v19  ;;  %v1297_v61 = vmul.f32 %v12091_v25, %v1277_v18 }
 0x41b   :  { %v1298_v62 = vmul.f32 %v12091_v25, %v1278_v14  ;;  %v1299_v45 = vmul.f32 %v12091_v25, %v1279_v56  ;;  %v1300_v59 = vmul.f32 %v12091_v25, %v1280_v60  ;;  %v1301_v33 = vmul.f32 %v12091_v25, %v1281_v47  ;;  %v1555_v25 = vld [vmem:[%s14665_s6] sm:$0xff] }
 0x41c   :  { %v1314_v6 = vadd.f32 %v12101_v15, %v1294_v5  ;;  %v1315_v1 = vadd.f32 %v12101_v15, %v1295_v11  ;;  %v1316_v23 = vadd.f32 %v12101_v15, %v1296_v3  ;;  %v1317_v43 = vadd.f32 %v12101_v15, %v1297_v61 }
 0x41d   :  { %v1318_v12 = vadd.f32 %v12101_v15, %v1298_v62  ;;  %v1319_v31 = vadd.f32 %v12101_v15, %v1299_v45  ;;  %v1320_v21 = vadd.f32 %v12101_v15, %v1300_v59  ;;  %v1321_v37 = vadd.f32 %v12101_v15, %v1301_v33  ;;  %v1571_v15 = vld [vmem:[%s14665_s6 + $0x80] sm:$0xff] }
 0x41e   :  { %v1330_v41 = vmax.f32 %v1314_v6, 0.0  ;;  %v1331_v35 = vmax.f32 %v1315_v1, 0.0  ;;  %v1332_v13 = vmax.f32 %v1316_v23, 0.0  ;;  %v1333_v53 = vmax.f32 %v1317_v43, 0.0 }
 0x41f   :  { %v1334_v9 = vmax.f32 %v1318_v12, 0.0  ;;  %v1335_v0 = vmax.f32 %v1319_v31, 0.0  ;;  %v1336_v29 = vmax.f32 %v1320_v21, 0.0  ;;  %v1337_v27 = vmax.f32 %v1321_v37, 0.0 }
 0x420   :  { %9707 = vmatprep.mubr.msk.f32.mxu1 %vm197_vm0, %v1330_v41  ;;  %v10695_v58 = vpack.c.bf16 %v1556_v51, %v1555_v25  ;;  %v10703_v63 = vpack.c.bf16 %v1572_v4, %v1571_v15  ;;  %v12187_v39 = vrot.slane %v190_v49, %v587_v55  ;;  %v14685_v49 = vmov 0 }
 0x421   :  { %9708 = vmatmul.mubr.msk.f32.gmra.mrb[32].mxu1 %vm197_vm0, %v1331_v35  ;;  %v14686_v49 = vsel %vm12364_vm3, 4294967295, %v14685_v49 }
 0x422   :  { %9710 = vmatprep.mubr.msk.f32.mxu1 %vm197_vm0, %v1332_v13  ;;  %10696 = vmatprep.subr.bf16.mxu0 %v10695_v58  ;;  %14687 = vst [vmem:[#allocation3_spill] sm:$0xff] %v14686_v49 }
 0x423   :  { %10698 = vmatpush3.bf16.msra.mxu0 %v10695_v58 }
 0x424   :  { %10704 = vmatprep.subr.bf16.mxu0 %v10703_v63 }
 0x425   :  { %9711 = vmatmul.mubr.msk.f32.gmra.mrb[34].mxu1 %vm197_vm0, %v1333_v53 }
 0x426   :  { %9713 = vmatprep.mubr.msk.f32.mxu1 %vm197_vm0, %v1334_v9 }
 0x429   :  { %9714 = vmatmul.mubr.msk.f32.gmra.mrb[36].mxu1 %vm197_vm0, %v1335_v0 }
 0x42a   :  { %9716 = vmatprep.mubr.msk.f32.mxu1 %vm197_vm0, %v1336_v29 }
 0x42d   :  { %9717 = vmatmul.mubr.msk.f32.gmra.mrb[38].mxu1 %vm197_vm0, %v1337_v27 }
 0x4d4   :  { %v9697_v57 = vpop.f32.mrb[24].mxu1 }
 0x4d5   :  { %v1466_v19 = vadd.f32 %v9697_v57, %v12187_v39  ;;  %v1460_v18 = vpop.f32.mrb[25].mxu1 }
 0x4d6   :  { %v1461_v14 = vadd.f32 %v1460_v18, %v12187_v39 }
 0x4d7   :  { %v12195_v5 = vadd.f32 %v1466_v19, %v11608_v24 }
 0x4d8   :  { %v12192_v7 = vadd.f32 %v1461_v14, %v11605_v22  ;;  %v9700_v17 = vpop.f32.mrb[26].mxu1 }
 0x4d9   :  { %v1476_v11 = vadd.f32 %v9700_v17, %v12187_v39  ;;  %v1470_v3 = vpop.f32.mrb[27].mxu1 }
 0x4da   :  { %v1471_v61 = vadd.f32 %v1470_v3, %v12187_v39  ;;  %9723 = vmatprep.mubr.msk.f32.mxu0 %vm391_vm1, %v12192_v7  ;;  %9751 = vmatprep.mubr.msk.f32.mxu1 %vm391_vm1, %v12192_v7 }
 0x4db   :  { %9724 = vmatmul.mubr.msk.f32.vlgmr.msra.gmra.mrb[16].mxu0 %vm391_vm1, %v12195_v5  ;;  %9752 = vmatmul.mubr.msk.f32.vlgmr.msra.gmra.mrb[40].mxu1 %vm391_vm1, %v12195_v5  ;;  %v12211_v55 = vadd.f32 %v1476_v11, %v11614_v28 }
 0x4dc   :  { %v12208_v22 = vadd.f32 %v1471_v61, %v11611_v26  ;;  %v9703_v24 = vpop.f32.mrb[28].mxu1  ;;  %10706 = vmatpush3.bf16.msra.mxu0 %v10703_v63 }
 0x4dd   :  { %v1486_v56 = vadd.f32 %v9703_v24, %v12187_v39  ;;  %v1480_v60 = vpop.f32.mrb[29].mxu1 }
 0x4de   :  { %v1481_v6 = vadd.f32 %v1480_v60, %v12187_v39  ;;  %9726 = vmatprep.mubr.msk.f32.mxu0 %vm391_vm1, %v12208_v22  ;;  %9754 = vmatprep.mubr.msk.f32.mxu1 %vm391_vm1, %v12208_v22 }
 0x4df   :  { %9727 = vmatmul.mubr.msk.f32.gmra.mrb[18].mxu0 %vm391_vm1, %v12211_v55  ;;  %9755 = vmatmul.mubr.msk.f32.gmra.mrb[42].mxu1 %vm391_vm1, %v12211_v55  ;;  %v12227_v1 = vadd.f32 %v1486_v56, %v11620_v32 }
 0x4e0   :  { %v12224_v26 = vadd.f32 %v1481_v6, %v11617_v30  ;;  %v9706_v28 = vpop.f32.mrb[30].mxu1 }
 0x4e1   :  { %v1496_v23 = vadd.f32 %v9706_v28, %v12187_v39  ;;  %v1490_v62 = vpop.f32.mrb[31].mxu1 }
 0x4e2   :  { %v1491_v8 = vadd.f32 %v1490_v62, %v12187_v39  ;;  %9729 = vmatprep.mubr.msk.f32.mxu0 %vm391_vm1, %v12224_v26  ;;  %9757 = vmatprep.mubr.msk.f32.mxu1 %vm391_vm1, %v12224_v26 }
 0x4e3   :  { %9730 = vmatmul.mubr.msk.f32.gmra.mrb[20].mxu0 %vm391_vm1, %v12227_v1  ;;  %9758 = vmatmul.mubr.msk.f32.gmra.mrb[44].mxu1 %vm391_vm1, %v12227_v1  ;;  %v12243_v32 = vadd.f32 %v1496_v23, %v11626_v36 }
 0x4e4   :  { %v12240_v30 = vadd.f32 %v1491_v8, %v11623_v34 }
 0x4e6   :  { %9732 = vmatprep.mubr.msk.f32.mxu0 %vm391_vm1, %v12240_v30  ;;  %9760 = vmatprep.mubr.msk.f32.mxu1 %vm391_vm1, %v12240_v30 }
 0x4e7   :  { %9733 = vmatmul.mubr.msk.f32.gmra.mrb[22].mxu0 %vm391_vm1, %v12243_v32  ;;  %9761 = vmatmul.mubr.msk.f32.gmra.mrb[46].mxu1 %vm391_vm1, %v12243_v32 }
 0x4f4   :  { %v9709_v41 = vpop.f32.mrb[32].mxu1 }
 0x4f5   :  { %v1506_v35 = vadd.f32 %v9709_v41, %v12187_v39  ;;  %v1500_v34 = vpop.f32.mrb[33].mxu1 }
 0x4f6   :  { %v1501_v43 = vadd.f32 %v1500_v34, %v12187_v39 }
 0x4f7   :  { %v12259_v47 = vadd.f32 %v1506_v35, %v11639_v40 }
 0x4f8   :  { %v12256_v36 = vadd.f32 %v1501_v43, %v11632_v38  ;;  %v9712_v45 = vpop.f32.mrb[34].mxu1 }
 0x4f9   :  { %v1516_v13 = vadd.f32 %v9712_v45, %v12187_v39  ;;  %v1510_v12 = vpop.f32.mrb[35].mxu1 }
 0x4fa   :  { %v1511_v59 = vadd.f32 %v1510_v12, %v12187_v39  ;;  %9735 = vmatprep.mubr.msk.f32.mxu0 %vm391_vm1, %v12256_v36  ;;  %9763 = vmatprep.mubr.msk.f32.mxu1 %vm391_vm1, %v12256_v36 }
 0x4fb   :  { %9736 = vmatmul.mubr.msk.f32.gmra.mrb[24].mxu0 %vm391_vm1, %v12259_v47  ;;  %9764 = vmatmul.mubr.msk.f32.gmra.mrb[48].mxu1 %vm391_vm1, %v12259_v47  ;;  %v12275_v53 = vadd.f32 %v1516_v13, %v11653_v44 }
 0x4fc   :  { %v12272_v38 = vadd.f32 %v1511_v59, %v11646_v42  ;;  %v9715_v40 = vpop.f32.mrb[36].mxu1 }
 0x4fd   :  { %v1526_v31 = vadd.f32 %v9715_v40, %v12187_v39  ;;  %v1520_v33 = vpop.f32.mrb[37].mxu1 }
 0x4fe   :  { %v1521_v9 = vadd.f32 %v1520_v33, %v12187_v39  ;;  %9738 = vmatprep.mubr.msk.f32.mxu0 %vm391_vm1, %v12272_v38  ;;  %9766 = vmatprep.mubr.msk.f32.mxu1 %vm391_vm1, %v12272_v38 }
 0x4ff   :  { %9739 = vmatmul.mubr.msk.f32.gmra.mrb[26].mxu0 %vm391_vm1, %v12275_v53  ;;  %9767 = vmatmul.mubr.msk.f32.gmra.mrb[50].mxu1 %vm391_vm1, %v12275_v53  ;;  %v12291_v21 = vadd.f32 %v1526_v31, %v11667_v48 }
 0x500   :  { %v12288_v42 = vadd.f32 %v1521_v9, %v11660_v46  ;;  %v9718_v44 = vpop.f32.mrb[38].mxu1 }
 0x501   :  { %v1536_v0 = vadd.f32 %v9718_v44, %v12187_v39  ;;  %v1530_v37 = vpop.f32.mrb[39].mxu1 }
 0x502   :  { %v1531_v29 = vadd.f32 %v1530_v37, %v12187_v39  ;;  %9741 = vmatprep.mubr.msk.f32.mxu0 %vm391_vm1, %v12288_v42  ;;  %9769 = vmatprep.mubr.msk.f32.mxu1 %vm391_vm1, %v12288_v42 }
 0x503   :  { %9742 = vmatmul.mubr.msk.f32.gmra.mrb[28].mxu0 %vm391_vm1, %v12291_v21  ;;  %9770 = vmatmul.mubr.msk.f32.gmra.mrb[52].mxu1 %vm391_vm1, %v12291_v21  ;;  %v12307_v48 = vadd.f32 %v1536_v0, %v11679_v52  ;;  %v12357_v52 = vld [vmem:[%s14667_s7] ss:$0 sm:$0xff] }
 0x504   :  { %v12304_v46 = vadd.f32 %v1531_v29, %v11674_v50  ;;  %v12352_v50 = vld [vmem:[%s14667_s7 + $0x4] ss:$0 sm:$0xff] }
 0x506   :  { %9744 = vmatprep.mubr.msk.f32.mxu0 %vm391_vm1, %v12304_v46  ;;  %9772 = vmatprep.mubr.msk.f32.mxu1 %vm391_vm1, %v12304_v46 }
 0x507   :  { %9745 = vmatmul.mubr.msk.f32.gmra.mrb[30].mxu0 %vm391_vm1, %v12307_v48  ;;  %9773 = vmatmul.mubr.msk.f32.gmra.mrb[54].mxu1 %vm391_vm1, %v12307_v48 }
 0x508   :  { %9779 = vmatprep.mubr.msk.f32.mxu0 %vm391_vm1, %v12192_v7 }
 0x50b   :  { %9780 = vmatmul.mubr.msk.f32.vlgmr.msra.gmra.mrb[32].mxu0 %vm391_vm1, %v12195_v5 }
 0x50c   :  { %9782 = vmatprep.mubr.msk.f32.mxu0 %vm391_vm1, %v12208_v22 }
 0x50f   :  { %9783 = vmatmul.mubr.msk.f32.gmra.mrb[34].mxu0 %vm391_vm1, %v12211_v55 }
 0x510   :  { %9785 = vmatprep.mubr.msk.f32.mxu0 %vm391_vm1, %v12224_v26 }
 0x513   :  { %9786 = vmatmul.mubr.msk.f32.gmra.mrb[36].mxu0 %vm391_vm1, %v12227_v1 }
 0x514   :  { %9788 = vmatprep.mubr.msk.f32.mxu0 %vm391_vm1, %v12240_v30 }
 0x517   :  { %9789 = vmatmul.mubr.msk.f32.gmra.mrb[38].mxu0 %vm391_vm1, %v12243_v32 }
 0x518   :  { %9791 = vmatprep.mubr.msk.f32.mxu0 %vm391_vm1, %v12256_v36 }
 0x51b   :  { %9792 = vmatmul.mubr.msk.f32.gmra.mrb[40].mxu0 %vm391_vm1, %v12259_v47 }
 0x51c   :  { %9794 = vmatprep.mubr.msk.f32.mxu0 %vm391_vm1, %v12272_v38 }
 0x51f   :  { %9795 = vmatmul.mubr.msk.f32.gmra.mrb[42].mxu0 %vm391_vm1, %v12275_v53 }
 0x520   :  { %9797 = vmatprep.mubr.msk.f32.mxu0 %vm391_vm1, %v12288_v42 }
 0x523   :  { %9798 = vmatmul.mubr.msk.f32.gmra.mrb[44].mxu0 %vm391_vm1, %v12291_v21 }
 0x524   :  { %9800 = vmatprep.mubr.msk.f32.mxu0 %vm391_vm1, %v12304_v46 }
 0x527   :  { %9801 = vmatmul.mubr.msk.f32.gmra.mrb[46].mxu0 %vm391_vm1, %v12307_v48 }
 0x5ae   :  { %v9725_v27 = vpop.f32.mrb[16].mxu0  ;;  %v9753_v25 = vpop.f32.mrb[40].mxu1 }
 0x5af   :  { %v1872_v51 = vadd.f32 %v9753_v25, %v12352_v50  ;;  %v1715_v58 = vpop.f32.mrb[17].mxu0  ;;  %v1866_v15 = vpop.f32.mrb[41].mxu1  ;;  %v1721_v0 = vadd.f32 %v9725_v27, %v12357_v52 }
 0x5b0   :  { %v1716_v4 = vadd.f32 %v12357_v52, %v1715_v58  ;;  %v1867_v63 = vadd.f32 %v12352_v50, %v1866_v15 }
 0x5b2   :  { %v10707_v39 = vpack.c.bf16 %v1872_v51, %v1867_v63  ;;  %v9728_v57 = vpop.f32.mrb[18].mxu0  ;;  %v9756_v19 = vpop.f32.mrb[42].mxu1  ;;  %9819 = vmatprep.mubr.msk.f32.mxu1 %vm2096_vm2, %v1716_v4 }
 0x5b3   :  { %v1882_v18 = vadd.f32 %v9756_v19, %v12352_v50  ;;  %v1725_v14 = vpop.f32.mrb[19].mxu0  ;;  %v1876_v17 = vpop.f32.mrb[43].mxu1  ;;  %v1731_v27 = vadd.f32 %v9728_v57, %v12357_v52 }
 0x5b4   :  { %v1877_v11 = vadd.f32 %v12352_v50, %v1876_v17  ;;  %10709 = vmatprep.subr.msk.bf16.mxu1 %vm12364_vm3, %v10707_v39  ;;  %v1726_v51 = vadd.f32 %v12357_v52, %v1725_v14 }
 0x5b5   :  { %10712 = vmatpush3.bf16.xpose.msk.msra.mxu1 %vm12364_vm3, %v10707_v39 }
 0x5b6   :  { %v10713_v3 = vpack.c.bf16 %v1882_v18, %v1877_v11  ;;  %v9731_v61 = vpop.f32.mrb[20].mxu0  ;;  %v9759_v24 = vpop.f32.mrb[44].mxu1 }
 0x5b7   :  { %v1892_v56 = vadd.f32 %v9759_v24, %v12352_v50  ;;  %v1735_v60 = vpop.f32.mrb[21].mxu0  ;;  %v1886_v6 = vpop.f32.mrb[45].mxu1  ;;  %v1741_v57 = vadd.f32 %v9731_v61, %v12357_v52  ;;  %v12444_v61 = vld [vmem:[%s14667_s7 + $0x8] ss:$0 sm:$0xff] }
 0x5b8   :  { %v1887_v28 = vadd.f32 %v12352_v50, %v1886_v6  ;;  %10715 = vmatprep.subr.msk.bf16.mxu1 %vm12364_vm3, %v10713_v3  ;;  %v1736_v11 = vadd.f32 %v12357_v52, %v1735_v60 }
 0x5ba   :  { %v10719_v23 = vpack.c.bf16 %v1892_v56, %v1887_v28  ;;  %v12379_v62 = vpop.f32.mrb[22].mxu0  ;;  %v9762_v8 = vpop.f32.mrb[46].mxu1 }
 0x5bb   :  { %v1902_v41 = vadd.f32 %v9762_v8, %v12352_v50  ;;  %v1745_v35 = vpop.f32.mrb[23].mxu0  ;;  %v1896_v34 = vpop.f32.mrb[47].mxu1 }
 0x5bc   :  { %v1897_v43 = vadd.f32 %v12352_v50, %v1896_v34  ;;  %v1746_v34 = vadd.f32 %v12357_v52, %v1745_v35  ;;  %v1751_v35 = vadd.f32 %v12379_v62, %v12357_v52 }
 0x5bd   :  { %10718 = vmatpush3.bf16.xpose.msk.msra.mxu1 %vm12364_vm3, %v10713_v3 }
 0x5be   :  { %v10725_v45 = vpack.c.bf16 %v1902_v41, %v1897_v43  ;;  %10721 = vmatprep.subr.msk.bf16.mxu1 %vm12364_vm3, %v10719_v23 }
 0x5c5   :  { %10724 = vmatpush3.bf16.xpose.msk.msra.mxu1 %vm12364_vm3, %v10719_v23 }
 0x5c6   :  { %10727 = vmatprep.subr.msk.bf16.mxu1 %vm12364_vm3, %v10725_v45 }
 0x5cd   :  { %10730 = vmatpush3.bf16.xpose.msk.msra.mxu1 %vm12364_vm3, %v10725_v45 }
 0x5ce   :  { %v9737_v13 = vpop.f32.mrb[24].mxu0  ;;  %v9765_v12 = vpop.f32.mrb[48].mxu1 }
 0x5cf   :  { %v12394_v59 = vadd.f32 %v9737_v13, %v12357_v52  ;;  %v1912_v40 = vadd.f32 %v9765_v12, %v12352_v50  ;;  %v1755_v31 = vpop.f32.mrb[25].mxu0  ;;  %v1906_v33 = vpop.f32.mrb[49].mxu1 }
 0x5d0   :  { %v1756_v9 = vadd.f32 %v12357_v52, %v1755_v31  ;;  %v1907_v44 = vadd.f32 %v12352_v50, %v1906_v33 }
 0x5d2   :  { %v10731_v37 = vpack.c.bf16 %v1912_v40, %v1907_v44  ;;  %v9740_v29 = vpop.f32.mrb[26].mxu0  ;;  %v9768_v25 = vpop.f32.mrb[50].mxu1  ;;  %9847 = vmatprep.mubr.msk.f32.mxu0 %vm2096_vm2, %v1756_v9 }
 0x5d3   :  { %v12403_v58 = vadd.f32 %v9740_v29, %v12357_v52  ;;  %v1922_v15 = vadd.f32 %v9768_v25, %v12352_v50  ;;  %v1765_v4 = vpop.f32.mrb[27].mxu0  ;;  %v1916_v63 = vpop.f32.mrb[51].mxu1 }
 0x5d4   :  { %v12407_v39 = vadd.f32 %v12357_v52, %v1765_v4  ;;  %v1917_v19 = vadd.f32 %v12352_v50, %v1916_v63  ;;  %9820 = vmatmul.mubr.msk.f32.vlgmr.msra.gmra.mrb[56].mxu1 %vm2096_vm2, %v1721_v0  ;;  %10733 = vmatprep.subr.msk.bf16.mxu0 %vm12364_vm3, %v10731_v37 }
 0x5d5   :  { %9822 = vmatprep.mubr.msk.f32.mxu1 %vm2096_vm2, %v1726_v51  ;;  %10736 = vmatpush3.bf16.xpose.msk.msra.mxu0 %vm12364_vm3, %v10731_v37 }
 0x5d6   :  { %v10737_v18 = vpack.c.bf16 %v1922_v15, %v1917_v19  ;;  %v9743_v14 = vpop.f32.mrb[28].mxu0  ;;  %v9771_v17 = vpop.f32.mrb[52].mxu1  ;;  %v1557_v19 = vld [vmem:[%s14665_s6 + $0x10] sm:$0xff] }
 0x5d7   :  { %v12419_v3 = vadd.f32 %v9743_v14, %v12357_v52  ;;  %v1932_v24 = vadd.f32 %v9771_v17, %v12352_v50  ;;  %v1775_v56 = vpop.f32.mrb[29].mxu0  ;;  %v1926_v6 = vpop.f32.mrb[53].mxu1 }
 0x5d8   :  { %v12423_v28 = vadd.f32 %v12357_v52, %v1775_v56  ;;  %v1927_v23 = vadd.f32 %v12352_v50, %v1926_v6  ;;  %9823 = vmatmul.mubr.msk.f32.gmra.mrb[58].mxu1 %vm2096_vm2, %v1731_v27  ;;  %10739 = vmatprep.subr.msk.bf16.mxu0 %vm12364_vm3, %v10737_v18  ;;  %v1558_v27 = vld [vmem:[%s14665_s6 + $0x18] sm:$0xff] }
 0x5d9   :  { %9825 = vmatprep.mubr.msk.f32.mxu1 %vm2096_vm2, %v1736_v11  ;;  %v10787_v11 = vpack.c.bf16 %v1558_v27, %v1557_v19 }
 0x5da   :  { %v10743_v60 = vpack.c.bf16 %v1932_v24, %v1927_v23  ;;  %v9746_v8 = vpop.f32.mrb[30].mxu0  ;;  %v9774_v41 = vpop.f32.mrb[54].mxu1 }
 0x5db   :  { %v12433_v43 = vadd.f32 %v9746_v8, %v12357_v52  ;;  %v1942_v45 = vadd.f32 %v9774_v41, %v12352_v50  ;;  %v1785_v13 = vpop.f32.mrb[31].mxu0  ;;  %v1936_v12 = vpop.f32.mrb[55].mxu1  ;;  %v1573_v41 = vld [vmem:[%s14665_s6 + $0x90] sm:$0xff] }
 0x5dc   :  { %v12437_v40 = vadd.f32 %v12357_v52, %v1785_v13  ;;  %v1937_v31 = vadd.f32 %v12352_v50, %v1936_v12  ;;  %9826 = vmatmul.mubr.msk.f32.gmra.mrb[60].mxu1 %vm2096_vm2, %v1741_v57 }
 0x5dd   :  { %9828 = vmatprep.mubr.msk.f32.mxu1 %vm2096_vm2, %v1746_v34  ;;  %10742 = vmatpush3.bf16.xpose.msk.msra.mxu0 %vm12364_vm3, %v10737_v18  ;;  %v1574_v34 = vld [vmem:[%s14665_s6 + $0x98] sm:$0xff] }
 0x5de   :  { %v10749_v33 = vpack.c.bf16 %v1942_v45, %v1937_v31  ;;  %v9781_v9 = vpop.f32.mrb[32].mxu0  ;;  %10745 = vmatprep.subr.msk.bf16.mxu0 %vm12364_vm3, %v10743_v60  ;;  %v10795_v31 = vpack.c.bf16 %v1574_v34, %v1573_v41 }
 0x5df   :  { %v2023_v50 = vadd.f32 %v9781_v9, %v12444_v61  ;;  %v2017_v44 = vpop.f32.mrb[33].mxu0 }
 0x5e0   :  { %v2018_v0 = vadd.f32 %v12444_v61, %v2017_v44  ;;  %9829 = vmatmul.mubr.msk.f32.gmra.mrb[62].mxu1 %vm2096_vm2, %v1751_v35 }
 0x5e2   :  { %v10755_v37 = vpack.c.bf16 %v2023_v50, %v2018_v0  ;;  %v9784_v29 = vpop.f32.mrb[34].mxu0 }
 0x5e3   :  { %v2033_v25 = vadd.f32 %v9784_v29, %v12444_v61  ;;  %v2027_v51 = vpop.f32.mrb[35].mxu0 }
 0x5e4   :  { %v2028_v15 = vadd.f32 %v12444_v61, %v2027_v51  ;;  %10756 = vmatprep.subr.bf16.mxu1 %v10755_v37 }
 0x5e5   :  { %10748 = vmatpush3.bf16.xpose.msk.msra.mxu0 %vm12364_vm3, %v10743_v60  ;;  %10758 = vmatpush3.bf16.msra.mxu1 %v10755_v37 }
 0x5e6   :  { %v10759_v52 = vpack.c.bf16 %v2033_v25, %v2028_v15  ;;  %v9787_v62 = vpop.f32.mrb[36].mxu0  ;;  %10751 = vmatprep.subr.msk.bf16.mxu0 %vm12364_vm3, %v10749_v33 }
 0x5e7   :  { %v2043_v4 = vadd.f32 %v9787_v62, %v12444_v61  ;;  %v2037_v63 = vpop.f32.mrb[37].mxu0 }
 0x5e8   :  { %v2038_v18 = vadd.f32 %v12444_v61, %v2037_v63  ;;  %10760 = vmatprep.subr.bf16.mxu1 %v10759_v52 }
 0x5e9   :  { %10762 = vmatpush3.bf16.msra.mxu1 %v10759_v52 }
 0x5ea   :  { %v10763_v14 = vpack.c.bf16 %v2043_v4, %v2038_v18  ;;  %v9790_v17 = vpop.f32.mrb[38].mxu0 }
 0x5eb   :  { %v2053_v24 = vadd.f32 %v9790_v17, %v12444_v61  ;;  %v2047_v56 = vpop.f32.mrb[39].mxu0 }
 0x5ec   :  { %v2048_v6 = vadd.f32 %v12444_v61, %v2047_v56  ;;  %10764 = vmatprep.subr.bf16.mxu1 %v10763_v14 }
 0x5ed   :  { %10754 = vmatpush3.bf16.xpose.msk.msra.mxu0 %vm12364_vm3, %v10749_v33  ;;  %10766 = vmatpush3.bf16.msra.mxu1 %v10763_v14 }
 0x5ee   :  { %v10767_v23 = vpack.c.bf16 %v2053_v24, %v2048_v6  ;;  %v9793_v57 = vpop.f32.mrb[40].mxu0  ;;  %10788 = vmatprep.subr.bf16.mxu0 %v10787_v11 }
 0x5ef   :  { %v2063_v60 = vadd.f32 %v9793_v57, %v12444_v61  ;;  %v2057_v8 = vpop.f32.mrb[41].mxu0 }
 0x5f0   :  { %v2058_v45 = vadd.f32 %v12444_v61, %v2057_v8  ;;  %10768 = vmatprep.subr.bf16.mxu1 %v10767_v23 }
 0x5f1   :  { %10770 = vmatpush3.bf16.msra.mxu1 %v10767_v23 }
 0x5f2   :  { %v12482_v13 = vpack.c.bf16 %v2063_v60, %v2058_v45  ;;  %v9796_v12 = vpop.f32.mrb[42].mxu0 }
 0x5f3   :  { %v2073_v35 = vadd.f32 %v9796_v12, %v12444_v61  ;;  %v2067_v33 = vpop.f32.mrb[43].mxu0 }
 0x5f4   :  { %v2068_v9 = vadd.f32 %v12444_v61, %v2067_v33  ;;  %9848 = vmatmul.mubr.msk.f32.vlgmr.msra.gmra.mrb[48].mxu0 %vm2096_vm2, %v12394_v59  ;;  %10772 = vmatprep.subr.bf16.mxu1 %v12482_v13 }
 0x5f5   :  { %9850 = vmatprep.mubr.msk.f32.mxu0 %vm2096_vm2, %v12407_v39  ;;  %10790 = vmatpush3.bf16.msra.mxu0 %v10787_v11 }
 0x5f6   :  { %v12491_v50 = vpack.c.bf16 %v2073_v35, %v2068_v9  ;;  %v9799_v44 = vpop.f32.mrb[44].mxu0  ;;  %10796 = vmatprep.subr.bf16.mxu0 %v10795_v31 }
 0x5f7   :  { %v2083_v0 = vadd.f32 %v9799_v44, %v12444_v61  ;;  %v2077_v37 = vpop.f32.mrb[45].mxu0 }
 0x5f8   :  { %v2078_v29 = vadd.f32 %v12444_v61, %v2077_v37  ;;  %9851 = vmatmul.mubr.msk.f32.gmra.mrb[50].mxu0 %vm2096_vm2, %v12403_v58  ;;  %v8539_v37 = vld [vmem:[%s14667_s7 + $0x1] ss:$0 sm:$0xff] }
 0x5f9   :  { %9853 = vmatprep.mubr.msk.f32.mxu0 %vm2096_vm2, %v12423_v28 }
 0x5fa   :  { %v12499_v59 = vpack.c.bf16 %v2083_v0, %v2078_v29  ;;  %v9802_v25 = vpop.f32.mrb[46].mxu0 }
 0x5fb   :  { %v2093_v39 = vadd.f32 %v9802_v25, %v12444_v61  ;;  %v2087_v51 = vpop.f32.mrb[47].mxu0 }
 0x5fc   :  { %v2088_v15 = vadd.f32 %v12444_v61, %v2087_v51  ;;  %9854 = vmatmul.mubr.msk.f32.gmra.mrb[52].mxu0 %vm2096_vm2, %v12419_v3 }
 0x5fd   :  { %9856 = vmatprep.mubr.msk.f32.mxu0 %vm2096_vm2, %v12437_v40 }
 0x5fe   :  { %v12507_v52 = vpack.c.bf16 %v2093_v39, %v2088_v15 }
 0x600   :  { %9857 = vmatmul.mubr.msk.f32.gmra.mrb[54].mxu0 %vm2096_vm2, %v12433_v43 }
 0x601   :  { %9919 = vmatprep.mubr.msk.f32.mxu0 %vm391_vm1, %v12192_v7 }
 0x604   :  { %9920 = vmatmul.mubr.msk.f32.vlgmr.msra.gmra.mrb[56].mxu0 %vm391_vm1, %v12195_v5 }
 0x605   :  { %9922 = vmatprep.mubr.msk.f32.mxu0 %vm391_vm1, %v12208_v22  ;;  %10798 = vmatpush3.bf16.msra.mxu0 %v10795_v31 }
 0x608   :  { %9923 = vmatmul.mubr.msk.f32.gmra.mrb[58].mxu0 %vm391_vm1, %v12211_v55 }
 0x609   :  { %9925 = vmatprep.mubr.msk.f32.mxu0 %vm391_vm1, %v12224_v26 }
 0x60c   :  { %9926 = vmatmul.mubr.msk.f32.gmra.mrb[60].mxu0 %vm391_vm1, %v12227_v1 }
 0x60d   :  { %9928 = vmatprep.mubr.msk.f32.mxu0 %vm391_vm1, %v12240_v30 }
 0x610   :  { %9929 = vmatmul.mubr.msk.f32.gmra.mrb[62].mxu0 %vm391_vm1, %v12243_v32 }
 0x611   :  { %9931 = vmatprep.mubr.msk.f32.mxu0 %vm391_vm1, %v12256_v36 }
 0x614   :  { %9932 = vmatmul.mubr.msk.f32.gmra.mrb[64].mxu0 %vm391_vm1, %v12259_v47 }
 0x615   :  { %9934 = vmatprep.mubr.msk.f32.mxu0 %vm391_vm1, %v12272_v38 }
 0x618   :  { %9935 = vmatmul.mubr.msk.f32.gmra.mrb[66].mxu0 %vm391_vm1, %v12275_v53 }
 0x619   :  { %9937 = vmatprep.mubr.msk.f32.mxu0 %vm391_vm1, %v12288_v42 }
 0x61c   :  { %9938 = vmatmul.mubr.msk.f32.gmra.mrb[68].mxu0 %vm391_vm1, %v12291_v21 }
 0x61d   :  { %9940 = vmatprep.mubr.msk.f32.mxu0 %vm391_vm1, %v12304_v46 }
 0x620   :  { %9941 = vmatmul.mubr.msk.f32.gmra.mrb[70].mxu0 %vm391_vm1, %v12307_v48 }
 0x621   :  { %9975 = vmatprep.mubr.msk.f32.mxu0 %vm391_vm1, %v12192_v7 }
 0x624   :  { %9976 = vmatmul.mubr.msk.f32.vlgmr.msra.gmra.mrb[72].mxu0 %vm391_vm1, %v12195_v5 }
 0x625   :  { %9978 = vmatprep.mubr.msk.f32.mxu0 %vm391_vm1, %v12208_v22 }
 0x628   :  { %9979 = vmatmul.mubr.msk.f32.gmra.mrb[74].mxu0 %vm391_vm1, %v12211_v55 }
 0x629   :  { %9981 = vmatprep.mubr.msk.f32.mxu0 %vm391_vm1, %v12224_v26 }
 0x62c   :  { %9982 = vmatmul.mubr.msk.f32.gmra.mrb[76].mxu0 %vm391_vm1, %v12227_v1 }
 0x62d   :  { %9984 = vmatprep.mubr.msk.f32.mxu0 %vm391_vm1, %v12240_v30 }
 0x630   :  { %9985 = vmatmul.mubr.msk.f32.gmra.mrb[78].mxu0 %vm391_vm1, %v12243_v32 }
 0x631   :  { %9987 = vmatprep.mubr.msk.f32.mxu0 %vm391_vm1, %v12256_v36 }
 0x634   :  { %9988 = vmatmul.mubr.msk.f32.gmra.mrb[80].mxu0 %vm391_vm1, %v12259_v47 }
 0x635   :  { %9990 = vmatprep.mubr.msk.f32.mxu0 %vm391_vm1, %v12272_v38 }
 0x638   :  { %9991 = vmatmul.mubr.msk.f32.gmra.mrb[82].mxu0 %vm391_vm1, %v12275_v53 }
 0x639   :  { %9993 = vmatprep.mubr.msk.f32.mxu0 %vm391_vm1, %v12288_v42 }
 0x63c   :  { %9994 = vmatmul.mubr.msk.f32.gmra.mrb[84].mxu0 %vm391_vm1, %v12291_v21 }
 0x63d   :  { %9996 = vmatprep.mubr.msk.f32.mxu0 %vm391_vm1, %v12304_v46 }
 0x640   :  { %9997 = vmatmul.mubr.msk.f32.gmra.mrb[86].mxu0 %vm391_vm1, %v12307_v48 }
 0x6a7   :  { %v12575_v58 = vpop.f32.mrb[56].mxu1 }
 0x6a8   :  { %v12577_v3 = vpop.f32.mrb[57].mxu1  ;;  %v2407_v28 = vsel %vm2403_vm4, %v12575_v58, -inf }
 0x6a9   :  { %2408 = vmax.xlane.f32.xlu1 %v2407_v28  ;;  %v2404_v43 = vsel %vm2403_vm4, %v12577_v3, -inf }
 0x6aa   :  { %2405 = vmax.xlane.f32.xlu0 %v2404_v43 }
 0x6ab   :  { %v12583_v40 = vpop.f32.mrb[58].mxu1 }
 0x6ac   :  { %v12585_v61 = vpop.f32.mrb[59].mxu1  ;;  %v2413_v62 = vsel %vm2403_vm4, %v12583_v40, -inf }
 0x6ad   :  { %2414 = vmax.xlane.f32.xlu1 %v2413_v62  ;;  %v2410_v4 = vsel %vm2403_vm4, %v12585_v61, -inf }
 0x6ae   :  { %2411 = vmax.xlane.f32.xlu0 %v2410_v4 }
 0x6af   :  { %v12591_v63 = vpop.f32.mrb[60].mxu1 }
 0x6b0   :  { %v12593_v19 = vpop.f32.mrb[61].mxu1  ;;  %v2419_v27 = vsel %vm2403_vm4, %v12591_v63, -inf }
 0x6b1   :  { %2420 = vmax.xlane.f32.xlu1 %v2419_v27  ;;  %v2416_v18 = vsel %vm2403_vm4, %v12593_v19, -inf }
 0x6b2   :  { %2417 = vmax.xlane.f32.xlu0 %v2416_v18 }
 0x6b3   :  { %v12599_v14 = vpop.f32.mrb[62].mxu1 }
 0x6b4   :  { %v12601_v17 = vpop.f32.mrb[63].mxu1  ;;  %v2425_v11 = vsel %vm2403_vm4, %v12599_v14, -inf }
 0x6b5   :  { %2426 = vmax.xlane.f32.xlu1 %v2425_v11  ;;  %v2422_v24 = vsel %vm2403_vm4, %v12601_v17, -inf }
 0x6b6   :  { %2423 = vmax.xlane.f32.xlu0 %v2422_v24 }
 0x6c7   :  { %v12607_v56 = vpop.f32.mrb[48].mxu0 }
 0x6c8   :  { %v12609_v6 = vpop.f32.mrb[49].mxu0  ;;  %v2431_v23 = vsel %vm2403_vm4, %v12607_v56, -inf }
 0x6c9   :  { %2432 = vmax.xlane.f32.xlu1 %v2431_v23  ;;  %v2428_v57 = vsel %vm2403_vm4, %v12609_v6, -inf }
 0x6ca   :  { %2429 = vmax.xlane.f32.xlu0 %v2428_v57 }
 0x6cb   :  { %v12615_v60 = vpop.f32.mrb[50].mxu0 }
 0x6cc   :  { %v12617_v8 = vpop.f32.mrb[51].mxu0  ;;  %v2437_v41 = vsel %vm2403_vm4, %v12615_v60, -inf }
 0x6cd   :  { %2438 = vmax.xlane.f32.xlu1 %v2437_v41  ;;  %v2434_v34 = vsel %vm2403_vm4, %v12617_v8, -inf }
 0x6ce   :  { %2435 = vmax.xlane.f32.xlu0 %v2434_v34 }
 0x6cf   :  { %v12623_v45 = vpop.f32.mrb[52].mxu0 }
 0x6d0   :  { %v12625_v12 = vpop.f32.mrb[53].mxu0  ;;  %v2443_v31 = vsel %vm2403_vm4, %v12623_v45, -inf }
 0x6d1   :  { %2444 = vmax.xlane.f32.xlu1 %v2443_v31  ;;  %v2440_v35 = vsel %vm2403_vm4, %v12625_v12, -inf }
 0x6d2   :  { %2441 = vmax.xlane.f32.xlu0 %v2440_v35 }
 0x6d3   :  { %v12631_v33 = vpop.f32.mrb[54].mxu0 }
 0x6d4   :  { %v12633_v9 = vpop.f32.mrb[55].mxu0  ;;  %v2449_v44 = vsel %vm2403_vm4, %v12631_v33, -inf }
 0x6d5   :  { %2450 = vmax.xlane.f32.xlu1 %v2449_v44  ;;  %v2446_v0 = vsel %vm2403_vm4, %v12633_v9, -inf }
 0x6d6   :  { %2447 = vmax.xlane.f32.xlu0 %v2446_v0 }
 0x6d7   :  { %v9921_v29 = vpop.f32.mrb[56].mxu0 }
 0x6d8   :  { %v12642_v25 = vadd.f32 %v9921_v29, %v8539_v37  ;;  %v2910_v39 = vpop.f32.mrb[57].mxu0 }
 0x6d9   :  { %v12644_v51 = vadd.f32 %v8539_v37, %v2910_v39 }
 0x6db   :  { %v9924_v15 = vpop.f32.mrb[58].mxu0 }
 0x6dc   :  { %v12646_v28 = vadd.f32 %v9924_v15, %v8539_v37  ;;  %v2920_v43 = vpop.f32.mrb[59].mxu0 }
 0x6dd   :  { %v12648_v62 = vadd.f32 %v8539_v37, %v2920_v43 }
 0x6df   :  { %v9927_v4 = vpop.f32.mrb[60].mxu0 }
 0x6e0   :  { %v12650_v27 = vadd.f32 %v9927_v4, %v8539_v37  ;;  %v2930_v18 = vpop.f32.mrb[61].mxu0 }
 0x6e1   :  { %v12652_v11 = vadd.f32 %v8539_v37, %v2930_v18 }
 0x6e2   :  { %14688 = vst [vmem:[#allocation4_spill] sm:$0xff] %v12650_v27 }
 0x6e3   :  { %v9930_v24 = vpop.f32.mrb[62].mxu0 }
 0x6e4   :  { %v12654_v23 = vadd.f32 %v9930_v24, %v8539_v37  ;;  %v2940_v57 = vpop.f32.mrb[63].mxu0 }
 0x6e5   :  { %v12656_v41 = vadd.f32 %v8539_v37, %v2940_v57 }
 0x6e6   :  { %14689 = vst [vmem:[#allocation5_spill] sm:$0xff] %v12654_v23 }
 0x6e7   :  { %14690 = vst [vmem:[#allocation6_spill] sm:$0xff] %v12656_v41  ;;  %v9933_v34 = vpop.f32.mrb[64].mxu0 }
 0x6e8   :  { %v12658_v31 = vadd.f32 %v9933_v34, %v8539_v37  ;;  %v2950_v35 = vpop.f32.mrb[65].mxu0 }
 0x6e9   :  { %v2951_v44 = vadd.f32 %v8539_v37, %v2950_v35  ;;  %v8573_v35 = vld [vmem:[%s14667_s7 + $0x9] ss:$0 sm:$0xff] }
 0x6ea   :  { %14691 = vst [vmem:[#allocation7_spill] sm:$0xff] %v12658_v31 }
 0x6eb   :  { %v9936_v0 = vpop.f32.mrb[66].mxu0  ;;  %10043 = vmatprep.mubr.msk.f32.mxu0 %vm2096_vm2, %v2951_v44 }
 0x6ec   :  { %v12661_v29 = vadd.f32 %v9936_v0, %v8539_v37  ;;  %v2960_v39 = vpop.f32.mrb[67].mxu0 }
 0x6ed   :  { %v12663_v15 = vadd.f32 %v8539_v37, %v2960_v39 }
 0x6ee   :  { %14692 = vst [vmem:[#allocation8_spill] sm:$0xff] %v12661_v29 }
 0x6ef   :  { %14693 = vst [vmem:[#allocation9_spill] sm:$0xff] %v12663_v15  ;;  %v9939_v43 = vpop.f32.mrb[68].mxu0 }
 0x6f0   :  { %v12665_v4 = vadd.f32 %v9939_v43, %v8539_v37  ;;  %v2970_v18 = vpop.f32.mrb[69].mxu0 }
 0x6f1   :  { %v12667_v24 = vadd.f32 %v8539_v37, %v2970_v18 }
 0x6f2   :  { %14694 = vst [vmem:[#allocation10_spill] sm:$0xff] %v12665_v4 }
 0x6f3   :  { %14695 = vst [vmem:[#allocation11_spill] sm:$0xff] %v12667_v24  ;;  %v9942_v57 = vpop.f32.mrb[70].mxu0 }
 0x6f4   :  { %v12669_v20 = vadd.f32 %v9942_v57, %v8539_v37  ;;  %v2980_v34 = vpop.f32.mrb[71].mxu0 }
 0x6f5   :  { %v12671_v2 = vadd.f32 %v8539_v37, %v2980_v34 }
 0x6f6   :  { %14696 = vst [vmem:[#allocation12_spill] sm:$0xff] %v12669_v20 }
 0x6f7   :  { %14697 = vst [vmem:[#allocation13_spill] sm:$0xff] %v12671_v2  ;;  %v9977_v44 = vpop.f32.mrb[72].mxu0 }
 0x6f8   :  { %v3218_v0 = vadd.f32 %v9977_v44, %v8573_v35  ;;  %v3212_v39 = vpop.f32.mrb[73].mxu0 }
 0x6f9   :  { %v3213_v16 = vadd.f32 %v8573_v35, %v3212_v39 }
 0x6fb   :  { %v12676_v10 = vpack.c.bf16 %v3218_v0, %v3213_v16  ;;  %v9980_v43 = vpop.f32.mrb[74].mxu0 }
 0x6fc   :  { %v3228_v54 = vadd.f32 %v9980_v43, %v8573_v35  ;;  %v3222_v18 = vpop.f32.mrb[75].mxu0 }
 0x6fd   :  { %v3223_v4 = vadd.f32 %v8573_v35, %v3222_v18 }
 0x6ff   :  { %v12678_v24 = vpack.c.bf16 %v3228_v54, %v3223_v4  ;;  %v9983_v57 = vpop.f32.mrb[76].mxu0 }
 0x700   :  { %v3238_v20 = vadd.f32 %v9983_v57, %v8573_v35  ;;  %v3232_v37 = vpop.f32.mrb[77].mxu0 }
 0x701   :  { %v3233_v34 = vadd.f32 %v8573_v35, %v3232_v37 }
 0x703   :  { %v12680_v2 = vpack.c.bf16 %v3238_v20, %v3233_v34  ;;  %v9986_v29 = vpop.f32.mrb[78].mxu0 }
 0x704   :  { %v3248_v15 = vadd.f32 %v9986_v29, %v8573_v35  ;;  %v3242_v31 = vpop.f32.mrb[79].mxu0 }
 0x705   :  { %14698 = vst [vmem:[#allocation14_spill] sm:$0xff] %v12680_v2  ;;  %v3243_v44 = vadd.f32 %v8573_v35, %v3242_v31 }
 0x707   :  { %v12682_v23 = vpack.c.bf16 %v3248_v15, %v3243_v44  ;;  %v9989_v16 = vpop.f32.mrb[80].mxu0 }
 0x708   :  { %v3258_v0 = vadd.f32 %v9989_v16, %v8573_v35  ;;  %v3252_v39 = vpop.f32.mrb[81].mxu0 }
 0x709   :  { %14699 = vst [vmem:[#allocation15_spill] sm:$0xff] %v12682_v23  ;;  %v3253_v43 = vadd.f32 %v8573_v35, %v3252_v39 }
 0x70b   :  { %v12684_v41 = vpack.c.bf16 %v3258_v0, %v3253_v43  ;;  %v9992_v54 = vpop.f32.mrb[82].mxu0 }
 0x70c   :  { %v3268_v4 = vadd.f32 %v9992_v54, %v8573_v35  ;;  %v3262_v18 = vpop.f32.mrb[83].mxu0 }
 0x70d   :  { %v3263_v57 = vadd.f32 %v8573_v35, %v3262_v18 }
 0x70f   :  { %v12686_v27 = vpack.c.bf16 %v3268_v4, %v3263_v57  ;;  %v9995_v20 = vpop.f32.mrb[84].mxu0 }
 0x710   :  { %v3278_v37 = vadd.f32 %v9995_v20, %v8573_v35  ;;  %v3272_v34 = vpop.f32.mrb[85].mxu0 }
 0x711   :  { %v3273_v29 = vadd.f32 %v8573_v35, %v3272_v34 }
 0x713   :  { %v12688_v2 = vpack.c.bf16 %v3278_v37, %v3273_v29  ;;  %v9998_v31 = vpop.f32.mrb[86].mxu0 }
 0x714   :  { %v3288_v15 = vadd.f32 %v9998_v31, %v8573_v35  ;;  %v3282_v44 = vpop.f32.mrb[87].mxu0 }
 0x715   :  { %v3283_v16 = vadd.f32 %v8573_v35, %v3282_v44 }
 0x717   :  { %v12690_v23 = vpack.c.bf16 %v3288_v15, %v3283_v16 }
 0x736   :  { %v2409_v0 = vpop.xlane.xlu1 %2408 }
 0x737   :  { %v2453_v39 = vsub.f32 %v12575_v58, %v2409_v0  ;;  %v2406_v43 = vpop.xlane.xlu0 %2405 }
 0x738   :  { %v2452_v54 = vsub.f32 %v12577_v3, %v2406_v43 }
 0x739   :  { %v2470_v4 = vmul.f32 1.442695, %v2453_v39 }
 0x73a   :  { %v2468_v18 = vmul.f32 1.442695, %v2452_v54  ;;  %v2415_v57 = vpop.xlane.xlu1 %2414 }
 0x73b   :  { %11152 = vpow2.f32 %v2470_v4  ;;  %v2455_v20 = vsub.f32 %v12583_v40, %v2415_v57  ;;  %v2412_v37 = vpop.xlane.xlu0 %2411 }
 0x73c   :  { %11154 = vpow2.f32 %v2468_v18  ;;  %v2454_v34 = vsub.f32 %v12585_v61, %v2412_v37 }
 0x73d   :  { %v2474_v29 = vmul.f32 1.442695, %v2455_v20 }
 0x73e   :  { %v2472_v35 = vmul.f32 1.442695, %v2454_v34  ;;  %v2421_v31 = vpop.xlane.xlu1 %2420 }
 0x73f   :  { %11156 = vpow2.f32 %v2474_v29  ;;  %v2457_v15 = vsub.f32 %v12591_v63, %v2421_v31  ;;  %v2418_v58 = vpop.xlane.xlu0 %2417 }
 0x740   :  { %11158 = vpow2.f32 %v2472_v35  ;;  %v2456_v3 = vsub.f32 %v12593_v19, %v2418_v58 }
 0x741   :  { %v2478_v44 = vmul.f32 1.442695, %v2457_v15 }
 0x742   :  { %v2476_v16 = vmul.f32 1.442695, %v2456_v3  ;;  %v2427_v0 = vpop.xlane.xlu1 %2426 }
 0x743   :  { %11160 = vpow2.f32 %v2478_v44  ;;  %v2459_v40 = vsub.f32 %v12599_v14, %v2427_v0  ;;  %v2424_v39 = vpop.xlane.xlu0 %2423 }
 0x744   :  { %11162 = vpow2.f32 %v2476_v16  ;;  %v2458_v61 = vsub.f32 %v12601_v17, %v2424_v39 }
 0x745   :  { %v12700_v43 = vpop.eup %11152  ;;  %v2482_v54 = vmul.f32 1.442695, %v2459_v40 }
 0x746   :  { %v12702_v4 = vpop.eup %11154  ;;  %v2480_v63 = vmul.f32 1.442695, %v2458_v61  ;;  %v2503_v18 = vsel %vm2403_vm4, %v12700_v43, 0.0 }
 0x747   :  { %11164 = vpow2.f32 %v2482_v54  ;;  %2504 = vadd.xlane.f32.xlu1 %v2503_v18  ;;  %v2500_v19 = vsel %vm2403_vm4, %v12702_v4, 0.0 }
 0x748   :  { %11166 = vpow2.f32 %v2480_v63  ;;  %2501 = vadd.xlane.f32.xlu0 %v2500_v19 }
 0x749   :  { %v12708_v14 = vpop.eup %11156 }
 0x74a   :  { %v12710_v57 = vpop.eup %11158  ;;  %v2509_v17 = vsel %vm2403_vm4, %v12708_v14, 0.0 }
 0x74b   :  { %2510 = vadd.xlane.f32.xlu1 %v2509_v17  ;;  %v2506_v20 = vsel %vm2403_vm4, %v12710_v57, 0.0 }
 0x74c   :  { %2507 = vadd.xlane.f32.xlu0 %v2506_v20 }
 0x74d   :  { %v12716_v37 = vpop.eup %11160 }
 0x74e   :  { %v12718_v34 = vpop.eup %11162  ;;  %v2515_v29 = vsel %vm2403_vm4, %v12716_v37, 0.0 }
 0x74f   :  { %2516 = vadd.xlane.f32.xlu1 %v2515_v29  ;;  %v2512_v35 = vsel %vm2403_vm4, %v12718_v34, 0.0 }
 0x750   :  { %2513 = vadd.xlane.f32.xlu0 %v2512_v35 }
 0x751   :  { %v12724_v31 = vpop.eup %11164 }
 0x752   :  { %v12726_v15 = vpop.eup %11166  ;;  %v2521_v58 = vsel %vm2403_vm4, %v12724_v31, 0.0 }
 0x753   :  { %2522 = vadd.xlane.f32.xlu1 %v2521_v58  ;;  %v2518_v3 = vsel %vm2403_vm4, %v12726_v15, 0.0 }
 0x754   :  { %2519 = vadd.xlane.f32.xlu0 %v2518_v3 }
 0x756   :  { %v2433_v44 = vpop.xlane.xlu1 %2432 }
 0x757   :  { %v2461_v16 = vsub.f32 %v12607_v56, %v2433_v44  ;;  %v2430_v0 = vpop.xlane.xlu0 %2429 }
 0x758   :  { %v2460_v40 = vsub.f32 %v12609_v6, %v2430_v0 }
 0x759   :  { %v2486_v39 = vmul.f32 1.442695, %v2461_v16 }
 0x75a   :  { %v2484_v61 = vmul.f32 1.442695, %v2460_v40  ;;  %v2439_v54 = vpop.xlane.xlu1 %2438 }
 0x75b   :  { %11168 = vpow2.f32 %v2486_v39  ;;  %v2463_v63 = vsub.f32 %v12615_v60, %v2439_v54  ;;  %v2436_v18 = vpop.xlane.xlu0 %2435 }
 0x75c   :  { %11170 = vpow2.f32 %v2484_v61  ;;  %v2462_v19 = vsub.f32 %v12617_v8, %v2436_v18 }
 0x75d   :  { %v2490_v17 = vmul.f32 1.442695, %v2463_v63 }
 0x75e   :  { %v2488_v20 = vmul.f32 1.442695, %v2462_v19  ;;  %v2445_v29 = vpop.xlane.xlu1 %2444 }
 0x75f   :  { %11172 = vpow2.f32 %v2490_v17  ;;  %v2465_v35 = vsub.f32 %v12623_v45, %v2445_v29  ;;  %v2442_v56 = vpop.xlane.xlu0 %2441 }
 0x760   :  { %11174 = vpow2.f32 %v2488_v20  ;;  %v2464_v6 = vsub.f32 %v12625_v12, %v2442_v56 }
 0x761   :  { %v2494_v58 = vmul.f32 1.442695, %v2465_v35 }
 0x762   :  { %v2492_v3 = vmul.f32 1.442695, %v2464_v6  ;;  %v2451_v44 = vpop.xlane.xlu1 %2450 }
 0x763   :  { %11176 = vpow2.f32 %v2494_v58  ;;  %v2467_v60 = vsub.f32 %v12631_v33, %v2451_v44  ;;  %v2448_v16 = vpop.xlane.xlu0 %2447 }
 0x764   :  { %11178 = vpow2.f32 %v2492_v3  ;;  %v2466_v8 = vsub.f32 %v12633_v9, %v2448_v16 }
 0x765   :  { %v12740_v0 = vpop.eup %11168  ;;  %v2498_v40 = vmul.f32 1.442695, %v2467_v60 }
 0x766   :  { %v12742_v39 = vpop.eup %11170  ;;  %v2496_v45 = vmul.f32 1.442695, %v2466_v8  ;;  %v2527_v61 = vsel %vm2403_vm4, %v12740_v0, 0.0 }
 0x767   :  { %11180 = vpow2.f32 %v2498_v40  ;;  %2528 = vadd.xlane.f32.xlu1 %v2527_v61  ;;  %v2524_v12 = vsel %vm2403_vm4, %v12742_v39, 0.0 }
 0x768   :  { %11182 = vpow2.f32 %v2496_v45  ;;  %2525 = vadd.xlane.f32.xlu0 %v2524_v12 }
 0x769   :  { %v12748_v33 = vpop.eup %11172 }
 0x76a   :  { %v12750_v54 = vpop.eup %11174  ;;  %v2533_v9 = vsel %vm2403_vm4, %v12748_v33, 0.0 }
 0x76b   :  { %2534 = vadd.xlane.f32.xlu1 %v2533_v9  ;;  %v2530_v63 = vsel %vm2403_vm4, %v12750_v54, 0.0 }
 0x76c   :  { %2531 = vadd.xlane.f32.xlu0 %v2530_v63 }
 0x76d   :  { %v12756_v18 = vpop.eup %11176 }
 0x76e   :  { %v12758_v19 = vpop.eup %11178  ;;  %v2539_v17 = vsel %vm2403_vm4, %v12756_v18, 0.0 }
 0x76f   :  { %2540 = vadd.xlane.f32.xlu1 %v2539_v17  ;;  %v2536_v20 = vsel %vm2403_vm4, %v12758_v19, 0.0 }
 0x770   :  { %2537 = vadd.xlane.f32.xlu0 %v2536_v20 }
 0x771   :  { %v12764_v29 = vpop.eup %11180 }
 0x772   :  { %v12766_v35 = vpop.eup %11182  ;;  %v2545_v56 = vsel %vm2403_vm4, %v12764_v29, 0.0 }
 0x773   :  { %2546 = vadd.xlane.f32.xlu1 %v2545_v56  ;;  %v2542_v6 = vsel %vm2403_vm4, %v12766_v35, 0.0 }
 0x774   :  { %2543 = vadd.xlane.f32.xlu0 %v2542_v6 }
 0x7d4   :  { %v2505_v58 = vpop.xlane.xlu1 %2504 }
 0x7d5   :  { %11184 = vrcp.f32 %v2505_v58  ;;  %v2502_v3 = vpop.xlane.xlu0 %2501 }
 0x7d6   :  { %11186 = vrcp.f32 %v2502_v3 }
 0x7d8   :  { %v2511_v44 = vpop.xlane.xlu1 %2510 }
 0x7d9   :  { %11188 = vrcp.f32 %v2511_v44  ;;  %v2508_v60 = vpop.xlane.xlu0 %2507 }
 0x7da   :  { %11190 = vrcp.f32 %v2508_v60 }
 0x7dc   :  { %v2517_v16 = vpop.xlane.xlu1 %2516 }
 0x7dd   :  { %11192 = vrcp.f32 %v2517_v16  ;;  %v2514_v8 = vpop.xlane.xlu0 %2513 }
 0x7de   :  { %11194 = vrcp.f32 %v2514_v8 }
 0x7df   :  { %v11185_v40 = vpop.eup %11184 }
 0x7e0   :  { %v11187_v45 = vpop.eup %11186  ;;  %v2523_v61 = vpop.xlane.xlu1 %2522  ;;  %v2565_v63 = vmul.f32 %v11185_v40, %v12700_v43 }
 0x7e1   :  { %11196 = vrcp.f32 %v2523_v61  ;;  %v2520_v12 = vpop.xlane.xlu0 %2519  ;;  %v2564_v9 = vmul.f32 %v11187_v45, %v12702_v4 }
 0x7e2   :  { %11198 = vrcp.f32 %v2520_v12 }
 0x7e3   :  { %v11189_v17 = vpop.eup %11188  ;;  %9875 = vmatprep.mubr.msk.f32.mxu1 %vm2403_vm4, %v2564_v9 }
 0x7e4   :  { %v11191_v20 = vpop.eup %11190  ;;  %9876 = vmatmul.mubr.msk.f32.vlgmr.msra.gmra.mrb[64].mxu1 %vm2403_vm4, %v2565_v63  ;;  %v2567_v6 = vmul.f32 %v11189_v17, %v12708_v14  ;;  %v1565_v14 = vld [vmem:[%s14665_s6 + $0x50] sm:$0xff] }
 0x7e5   :  { %10774 = vmatpush3.bf16.msra.mxu1 %v12482_v13  ;;  %v2566_v56 = vmul.f32 %v11191_v20, %v12710_v57  ;;  %v1566_v57 = vld [vmem:[%s14665_s6 + $0x58] sm:$0xff] }
 0x7e6   :  { %10776 = vmatprep.subr.bf16.mxu1 %v12491_v50 }
 0x7e7   :  { %v11193_v58 = vpop.eup %11192  ;;  %9878 = vmatprep.mubr.msk.f32.mxu1 %vm2403_vm4, %v2566_v56 }
 0x7e8   :  { %v11195_v4 = vpop.eup %11194  ;;  %9879 = vmatmul.mubr.msk.f32.gmra.mrb[66].mxu1 %vm2403_vm4, %v2567_v6  ;;  %v2569_v13 = vmul.f32 %v11193_v58, %v12716_v37 }
 0x7e9   :  { %10778 = vmatpush3.bf16.msra.mxu1 %v12491_v50  ;;  %v2568_v43 = vmul.f32 %v11195_v4, %v12718_v34  ;;  %v10791_v34 = vpack.c.bf16 %v1566_v57, %v1565_v14 }
 0x7ea   :  { %10780 = vmatprep.subr.bf16.mxu1 %v12499_v59 }
 0x7eb   :  { %v11197_v3 = vpop.eup %11196  ;;  %9881 = vmatprep.mubr.msk.f32.mxu1 %vm2403_vm4, %v2568_v43 }
 0x7ec   :  { %v11199_v44 = vpop.eup %11198  ;;  %9882 = vmatmul.mubr.msk.f32.gmra.mrb[68].mxu1 %vm2403_vm4, %v2569_v13  ;;  %v2571_v37 = vmul.f32 %v11197_v3, %v12724_v31 }
 0x7ed   :  { %10782 = vmatpush3.bf16.msra.mxu1 %v12499_v59  ;;  %v2570_v50 = vmul.f32 %v11199_v44, %v12726_v15 }
 0x7ee   :  { %10784 = vmatprep.subr.bf16.mxu1 %v12507_v52 }
 0x7ef   :  { %9884 = vmatprep.mubr.msk.f32.mxu1 %vm2403_vm4, %v2570_v50 }
 0x7f0   :  { %9885 = vmatmul.mubr.msk.f32.gmra.mrb[70].mxu1 %vm2403_vm4, %v2571_v37 }
 0x7f1   :  { %10786 = vmatpush3.bf16.msra.mxu1 %v12507_v52 }
 0x7f2   :  { %10792 = vmatprep.subr.bf16.mxu1 %v10791_v34 }
 0x7f4   :  { %v2529_v60 = vpop.xlane.xlu1 %2528 }
 0x7f5   :  { %11200 = vrcp.f32 %v2529_v60  ;;  %v2526_v16 = vpop.xlane.xlu0 %2525 }
 0x7f6   :  { %11202 = vrcp.f32 %v2526_v16 }
 0x7f8   :  { %v2535_v8 = vpop.xlane.xlu1 %2534 }
 0x7f9   :  { %11204 = vrcp.f32 %v2535_v8  ;;  %v2532_v59 = vpop.xlane.xlu0 %2531 }
 0x7fa   :  { %11206 = vrcp.f32 %v2532_v59  ;;  %v8556_v59 = vld [vmem:[%s14667_s7 + $0x5] ss:$0 sm:$0xff] }
 0x7fc   :  { %v2541_v15 = vpop.xlane.xlu1 %2540 }
 0x7fd   :  { %11208 = vrcp.f32 %v2541_v15  ;;  %v2538_v40 = vpop.xlane.xlu0 %2537 }
 0x7fe   :  { %11210 = vrcp.f32 %v2538_v40 }
 0x7ff   :  { %v11201_v31 = vpop.eup %11200 }
 0x800   :  { %v11203_v45 = vpop.eup %11202  ;;  %v2547_v61 = vpop.xlane.xlu1 %2546  ;;  %v2573_v9 = vmul.f32 %v11201_v31, %v12740_v0 }
 0x801   :  { %11212 = vrcp.f32 %v2547_v61  ;;  %v2544_v12 = vpop.xlane.xlu0 %2543  ;;  %v2572_v52 = vmul.f32 %v11203_v45, %v12742_v39 }
 0x802   :  { %11214 = vrcp.f32 %v2544_v12 }
 0x803   :  { %v11205_v63 = vpop.eup %11204  ;;  %9903 = vmatprep.mubr.msk.f32.mxu1 %vm2403_vm4, %v2572_v52 }
 0x804   :  { %v11207_v17 = vpop.eup %11206  ;;  %9904 = vmatmul.mubr.msk.f32.vlgmr.msra.gmra.mrb[72].mxu1 %vm2403_vm4, %v2573_v9  ;;  %v2575_v56 = vmul.f32 %v11205_v63, %v12748_v33 }
 0x805   :  { %10794 = vmatpush3.bf16.msra.mxu1 %v10791_v34  ;;  %v2574_v20 = vmul.f32 %v11207_v17, %v12750_v54 }
 0x807   :  { %v11209_v6 = vpop.eup %11208  ;;  %9906 = vmatprep.mubr.msk.f32.mxu1 %vm2403_vm4, %v2574_v20 }
 0x808   :  { %v11211_v58 = vpop.eup %11210  ;;  %9907 = vmatmul.mubr.msk.f32.gmra.mrb[74].mxu1 %vm2403_vm4, %v2575_v56  ;;  %v2577_v39 = vmul.f32 %v11209_v6, %v12756_v18 }
 0x809   :  { %v2576_v0 = vmul.f32 %v11211_v58, %v12758_v19 }
 0x80b   :  { %v11213_v4 = vpop.eup %11212  ;;  %9909 = vmatprep.mubr.msk.f32.mxu1 %vm2403_vm4, %v2576_v0 }
 0x80c   :  { %v11215_v43 = vpop.eup %11214  ;;  %9910 = vmatmul.mubr.msk.f32.gmra.mrb[76].mxu1 %vm2403_vm4, %v2577_v39  ;;  %v2579_v33 = vmul.f32 %v11213_v4, %v12764_v29 }
 0x80d   :  { %v2578_v54 = vmul.f32 %v11215_v43, %v12766_v35 }
 0x80f   :  { %9912 = vmatprep.mubr.msk.f32.mxu1 %vm2403_vm4, %v2578_v54 }
 0x810   :  { %9913 = vmatmul.mubr.msk.f32.gmra.mrb[78].mxu1 %vm2403_vm4, %v2579_v33 }
 0x811   :  { %9947 = vmatprep.mubr.msk.f32.mxu1 %vm391_vm1, %v12192_v7 }
 0x814   :  { %9948 = vmatmul.mubr.msk.f32.vlgmr.msra.gmra.mrb[80].mxu1 %vm391_vm1, %v12195_v5 }
 0x815   :  { %9950 = vmatprep.mubr.msk.f32.mxu1 %vm391_vm1, %v12208_v22 }
 0x818   :  { %9951 = vmatmul.mubr.msk.f32.gmra.mrb[82].mxu1 %vm391_vm1, %v12211_v55 }
 0x819   :  { %9953 = vmatprep.mubr.msk.f32.mxu1 %vm391_vm1, %v12224_v26 }
 0x81c   :  { %9954 = vmatmul.mubr.msk.f32.gmra.mrb[84].mxu1 %vm391_vm1, %v12227_v1 }
 0x81d   :  { %9956 = vmatprep.mubr.msk.f32.mxu1 %vm391_vm1, %v12240_v30 }
 0x820   :  { %9957 = vmatmul.mubr.msk.f32.gmra.mrb[86].mxu1 %vm391_vm1, %v12243_v32 }
 0x821   :  { %9959 = vmatprep.mubr.msk.f32.mxu1 %vm391_vm1, %v12256_v36 }
 0x824   :  { %9960 = vmatmul.mubr.msk.f32.gmra.mrb[88].mxu1 %vm391_vm1, %v12259_v47 }
 0x825   :  { %9962 = vmatprep.mubr.msk.f32.mxu1 %vm391_vm1, %v12272_v38 }
 0x828   :  { %9963 = vmatmul.mubr.msk.f32.gmra.mrb[90].mxu1 %vm391_vm1, %v12275_v53 }
 0x829   :  { %9965 = vmatprep.mubr.msk.f32.mxu1 %vm391_vm1, %v12288_v42 }
 0x82c   :  { %9966 = vmatmul.mubr.msk.f32.gmra.mrb[92].mxu1 %vm391_vm1, %v12291_v21 }
 0x82d   :  { %9968 = vmatprep.mubr.msk.f32.mxu1 %vm391_vm1, %v12304_v46 }
 0x830   :  { %9969 = vmatmul.mubr.msk.f32.gmra.mrb[94].mxu1 %vm391_vm1, %v12307_v48 }
 0x831   :  { %10015 = vmatprep.mubr.msk.f32.mxu1 %vm2096_vm2, %v12644_v51 }
 0x8b7   :  { %v12851_v18 = vpop.f32.mrb[64].mxu1 }
 0x8b8   :  { %v12853_v19 = vpop.f32.mrb[65].mxu1 }
 0x8bb   :  { %v12855_v29 = vpop.f32.mrb[66].mxu1 }
 0x8bc   :  { %v12857_v35 = vpop.f32.mrb[67].mxu1 }
 0x8bf   :  { %v12859_v13 = vpop.f32.mrb[68].mxu1 }
 0x8c0   :  { %v12861_v3 = vpop.f32.mrb[69].mxu1 }
 0x8c3   :  { %v12863_v14 = vpop.f32.mrb[70].mxu1 }
 0x8c4   :  { %v12865_v57 = vpop.f32.mrb[71].mxu1 }
 0x8d7   :  { %v12867_v44 = vpop.f32.mrb[72].mxu1 }
 0x8d8   :  { %v12869_v50 = vpop.f32.mrb[73].mxu1 }
 0x8db   :  { %v12871_v51 = vpop.f32.mrb[74].mxu1 }
 0x8dc   :  { %14700 = vst [vmem:[#allocation16_spill] sm:$0xff] %v12871_v51  ;;  %v12873_v37 = vpop.f32.mrb[75].mxu1 }
 0x8df   :  { %v12875_v34 = vpop.f32.mrb[76].mxu1 }
 0x8e0   :  { %14701 = vst [vmem:[#allocation17_spill] sm:$0xff] %v12875_v34  ;;  %v12877_v60 = vpop.f32.mrb[77].mxu1 }
 0x8e1   :  { %14702 = vst [vmem:[#allocation18_spill] sm:$0xff] %v12877_v60 }
 0x8e3   :  { %v12879_v16 = vpop.f32.mrb[78].mxu1 }
 0x8e4   :  { %14703 = vst [vmem:[#allocation19_spill] sm:$0xff] %v12879_v16  ;;  %v12881_v8 = vpop.f32.mrb[79].mxu1 }
 0x8e5   :  { %14704 = vst [vmem:[#allocation20_spill] sm:$0xff] %v12881_v8 }
 0x8e7   :  { %v9949_v15 = vpop.f32.mrb[80].mxu1 }
 0x8e8   :  { %v3067_v40 = vadd.f32 %v9949_v15, %v8556_v59  ;;  %v3061_v31 = vpop.f32.mrb[81].mxu1 }
 0x8e9   :  { %v3062_v45 = vadd.f32 %v8556_v59, %v3061_v31 }
 0x8eb   :  { %v10799_v61 = vpack.c.bf16 %v3067_v40, %v3062_v45  ;;  %v9952_v12 = vpop.f32.mrb[82].mxu1 }
 0x8ec   :  { %v3077_v52 = vadd.f32 %v9952_v12, %v8556_v59  ;;  %v3071_v9 = vpop.f32.mrb[83].mxu1 }
 0x8ed   :  { %v3072_v63 = vadd.f32 %v8556_v59, %v3071_v9  ;;  %10801 = vmatprep.subr.msk.bf16.mxu1 %vm12364_vm3, %v10799_v61 }
 0x8ee   :  { %10804 = vmatpush3.bf16.xpose.msk.msra.mxu1 %vm12364_vm3, %v10799_v61 }
 0x8ef   :  { %v10805_v17 = vpack.c.bf16 %v3077_v52, %v3072_v63  ;;  %v9955_v20 = vpop.f32.mrb[84].mxu1 }
 0x8f0   :  { %v3087_v56 = vadd.f32 %v9955_v20, %v8556_v59  ;;  %v3081_v6 = vpop.f32.mrb[85].mxu1 }
 0x8f1   :  { %v3082_v58 = vadd.f32 %v8556_v59, %v3081_v6  ;;  %10807 = vmatprep.subr.msk.bf16.mxu1 %vm12364_vm3, %v10805_v17 }
 0x8f3   :  { %v10811_v0 = vpack.c.bf16 %v3087_v56, %v3082_v58  ;;  %v9958_v39 = vpop.f32.mrb[86].mxu1 }
 0x8f4   :  { %v3097_v4 = vadd.f32 %v9958_v39, %v8556_v59  ;;  %v3091_v43 = vpop.f32.mrb[87].mxu1 }
 0x8f5   :  { %v3092_v54 = vadd.f32 %v8556_v59, %v3091_v43 }
 0x8f6   :  { %10810 = vmatpush3.bf16.xpose.msk.msra.mxu1 %vm12364_vm3, %v10805_v17 }
 0x8f7   :  { %v10817_v33 = vpack.c.bf16 %v3097_v4, %v3092_v54  ;;  %v9961_v15 = vpop.f32.mrb[88].mxu1  ;;  %10813 = vmatprep.subr.msk.bf16.mxu1 %vm12364_vm3, %v10811_v0 }
 0x8f8   :  { %v3107_v40 = vadd.f32 %v9961_v15, %v8556_v59  ;;  %v3101_v31 = vpop.f32.mrb[89].mxu1 }
 0x8f9   :  { %v3102_v45 = vadd.f32 %v8556_v59, %v3101_v31  ;;  %v14714_v31 = vld [vmem:[#allocation10_spill] sm:$0xff] }
 0x8fb   :  { %v10823_v61 = vpack.c.bf16 %v3107_v40, %v3102_v45  ;;  %v9964_v12 = vpop.f32.mrb[90].mxu1  ;;  %v14713_v40 = vld [vmem:[#allocation11_spill] sm:$0xff]  ;;  %v14715_v45 = vld [vmem:[#allocation13_spill] sm:$0xff] }
 0x8fc   :  { %v3117_v52 = vadd.f32 %v9964_v12, %v8556_v59  ;;  %v3111_v9 = vpop.f32.mrb[91].mxu1 }
 0x8fd   :  { %v3112_v63 = vadd.f32 %v8556_v59, %v3111_v9  ;;  %10825 = vmatprep.subr.msk.bf16.mxu0 %vm12364_vm3, %v10823_v61 }
 0x8fe   :  { %10816 = vmatpush3.bf16.xpose.msk.msra.mxu1 %vm12364_vm3, %v10811_v0  ;;  %10828 = vmatpush3.bf16.xpose.msk.msra.mxu0 %vm12364_vm3, %v10823_v61  ;;  %v14716_v61 = vld [vmem:[#allocation12_spill] sm:$0xff] }
 0x8ff   :  { %v10829_v17 = vpack.c.bf16 %v3117_v52, %v3112_v63  ;;  %v9967_v20 = vpop.f32.mrb[92].mxu1  ;;  %10819 = vmatprep.subr.msk.bf16.mxu1 %vm12364_vm3, %v10817_v33 }
 0x900   :  { %v3127_v56 = vadd.f32 %v9967_v20, %v8556_v59  ;;  %v3121_v6 = vpop.f32.mrb[93].mxu1 }
 0x901   :  { %v3122_v58 = vadd.f32 %v8556_v59, %v3121_v6  ;;  %10831 = vmatprep.subr.msk.bf16.mxu0 %vm12364_vm3, %v10829_v17 }
 0x903   :  { %v10835_v39 = vpack.c.bf16 %v3127_v56, %v3122_v58  ;;  %v9970_v4 = vpop.f32.mrb[94].mxu1 }
 0x904   :  { %v3137_v43 = vadd.f32 %v9970_v4, %v8556_v59  ;;  %v3131_v54 = vpop.f32.mrb[95].mxu1 }
 0x905   :  { %v3132_v15 = vadd.f32 %v8556_v59, %v3131_v54  ;;  %v14707_v59 = vld [vmem:[#allocation6_spill] sm:$0xff] }
 0x906   :  { %10822 = vmatpush3.bf16.xpose.msk.msra.mxu1 %vm12364_vm3, %v10817_v33  ;;  %10834 = vmatpush3.bf16.xpose.msk.msra.mxu0 %vm12364_vm3, %v10829_v17  ;;  %v14712_v33 = vld [vmem:[#allocation8_spill] sm:$0xff] }
 0x907   :  { %v10841_v0 = vpack.c.bf16 %v3137_v43, %v3132_v15  ;;  %10837 = vmatprep.subr.msk.bf16.mxu0 %vm12364_vm3, %v10835_v39  ;;  %10848 = vmatprep.subr.bf16.mxu1 %v12676_v10 }
 0x90d   :  { %10016 = vmatmul.mubr.msk.f32.vlgmr.msra.gmra.mrb[96].mxu1 %vm2096_vm2, %v12642_v25  ;;  %v14705_v25 = vld [vmem:[#allocation14_spill] sm:$0xff] }
 0x90e   :  { %10018 = vmatprep.mubr.msk.f32.mxu1 %vm2096_vm2, %v12648_v62  ;;  %10840 = vmatpush3.bf16.xpose.msk.msra.mxu0 %vm12364_vm3, %v10835_v39  ;;  %v14706_v62 = vld [vmem:[#allocation4_spill] sm:$0xff] }
 0x90f   :  { %10850 = vmatpush3.bf16.msra.mxu1 %v12676_v10  ;;  %10843 = vmatprep.subr.msk.bf16.mxu0 %vm12364_vm3, %v10841_v0  ;;  %v14708_v10 = vld [vmem:[#allocation15_spill] sm:$0xff] }
 0x910   :  { %10852 = vmatprep.subr.bf16.mxu1 %v12678_v24 }
 0x911   :  { %10019 = vmatmul.mubr.msk.f32.gmra.mrb[98].mxu1 %vm2096_vm2, %v12646_v28  ;;  %v14709_v28 = vld [vmem:[#allocation5_spill] sm:$0xff] }
 0x912   :  { %10021 = vmatprep.mubr.msk.f32.mxu1 %vm2096_vm2, %v12652_v11  ;;  %v14710_v11 = vld [vmem:[#allocation7_spill] sm:$0xff] }
 0x913   :  { %10854 = vmatpush3.bf16.msra.mxu1 %v12678_v24  ;;  %v14711_v24 = vld [vmem:[#allocation9_spill] sm:$0xff] }
 0x914   :  { %10856 = vmatprep.subr.bf16.mxu1 %v14705_v25 }
 0x915   :  { %10022 = vmatmul.mubr.msk.f32.gmra.mrb[100].mxu1 %vm2096_vm2, %v14706_v62 }
 0x916   :  { %10024 = vmatprep.mubr.msk.f32.mxu1 %vm2096_vm2, %v14707_v59  ;;  %10846 = vmatpush3.bf16.xpose.msk.msra.mxu0 %vm12364_vm3, %v10841_v0 }
 0x917   :  { %10858 = vmatpush3.bf16.msra.mxu1 %v14705_v25 }
 0x918   :  { %10860 = vmatprep.subr.bf16.mxu1 %v14708_v10 }
 0x919   :  { %10025 = vmatmul.mubr.msk.f32.gmra.mrb[102].mxu1 %vm2096_vm2, %v14709_v28 }
 0x91b   :  { %10862 = vmatpush3.bf16.msra.mxu1 %v14708_v10 }
 0x91c   :  { %10864 = vmatprep.subr.bf16.mxu1 %v12684_v41 }
 0x91d   :  { %10044 = vmatmul.mubr.msk.f32.vlgmr.msra.gmra.mrb[88].mxu0 %vm2096_vm2, %v14710_v11 }
 0x91e   :  { %10046 = vmatprep.mubr.msk.f32.mxu0 %vm2096_vm2, %v14711_v24 }
 0x921   :  { %10047 = vmatmul.mubr.msk.f32.gmra.mrb[90].mxu0 %vm2096_vm2, %v14712_v33 }
 0x922   :  { %10049 = vmatprep.mubr.msk.f32.mxu0 %vm2096_vm2, %v14713_v40 }
 0x925   :  { %10050 = vmatmul.mubr.msk.f32.gmra.mrb[92].mxu0 %vm2096_vm2, %v14714_v31 }
 0x926   :  { %10052 = vmatprep.mubr.msk.f32.mxu0 %vm2096_vm2, %v14715_v45 }
 0x929   :  { %10053 = vmatmul.mubr.msk.f32.gmra.mrb[94].mxu0 %vm2096_vm2, %v14716_v61 }
 0x9e0   :  { %v10017_v12 = vpop.f32.mrb[96].mxu1 }
 0x9e1   :  { %v3405_v52 = vpop.f32.mrb[97].mxu1  ;;  %v3600_v9 = vsel %vm2403_vm4, %v10017_v12, -inf }
 0x9e2   :  { %3601 = vmax.xlane.f32.xlu1 %v3600_v9  ;;  %v3597_v63 = vsel %vm2403_vm4, %v3405_v52, -inf }
 0x9e3   :  { %3598 = vmax.xlane.f32.xlu0 %v3597_v63 }
 0x9e4   :  { %v10020_v17 = vpop.f32.mrb[98].mxu1 }
 0x9e5   :  { %v3415_v20 = vpop.f32.mrb[99].mxu1  ;;  %v3606_v56 = vsel %vm2403_vm4, %v10020_v17, -inf }
 0x9e6   :  { %3607 = vmax.xlane.f32.xlu1 %v3606_v56  ;;  %v3603_v6 = vsel %vm2403_vm4, %v3415_v20, -inf }
 0x9e7   :  { %3604 = vmax.xlane.f32.xlu0 %v3603_v6 }
 0x9e8   :  { %v10023_v58 = vpop.f32.mrb[100].mxu1 }
 0x9e9   :  { %v3425_v39 = vpop.f32.mrb[101].mxu1  ;;  %v3612_v4 = vsel %vm2403_vm4, %v10023_v58, -inf }
 0x9ea   :  { %3613 = vmax.xlane.f32.xlu1 %v3612_v4  ;;  %v3609_v43 = vsel %vm2403_vm4, %v3425_v39, -inf }
 0x9eb   :  { %3610 = vmax.xlane.f32.xlu0 %v3609_v43 }
 0x9ec   :  { %v10026_v54 = vpop.f32.mrb[102].mxu1 }
 0x9ed   :  { %v3435_v15 = vpop.f32.mrb[103].mxu1  ;;  %v3618_v0 = vsel %vm2403_vm4, %v10026_v54, -inf }
 0x9ee   :  { %3619 = vmax.xlane.f32.xlu1 %v3618_v0  ;;  %v3615_v25 = vsel %vm2403_vm4, %v3435_v15, -inf }
 0x9ef   :  { %3616 = vmax.xlane.f32.xlu0 %v3615_v25 }
 0x9f0   :  { %v12963_v62 = vpop.f32.mrb[88].mxu0 }
 0x9f1   :  { %v12965_v59 = vpop.f32.mrb[89].mxu0  ;;  %v3624_v10 = vsel %vm2403_vm4, %v12963_v62, -inf }
 0x9f2   :  { %3625 = vmax.xlane.f32.xlu1 %v3624_v10  ;;  %v3621_v28 = vsel %vm2403_vm4, %v12965_v59, -inf }
 0x9f3   :  { %3622 = vmax.xlane.f32.xlu0 %v3621_v28 }
 0x9f4   :  { %v12971_v11 = vpop.f32.mrb[90].mxu0 }
 0x9f5   :  { %v12973_v24 = vpop.f32.mrb[91].mxu0  ;;  %v3630_v33 = vsel %vm2403_vm4, %v12971_v11, -inf }
 0x9f6   :  { %3631 = vmax.xlane.f32.xlu1 %v3630_v33  ;;  %v3627_v40 = vsel %vm2403_vm4, %v12973_v24, -inf }
 0x9f7   :  { %3628 = vmax.xlane.f32.xlu0 %v3627_v40 }
 0x9f8   :  { %v12979_v31 = vpop.f32.mrb[92].mxu0 }
 0x9f9   :  { %v12981_v45 = vpop.f32.mrb[93].mxu0  ;;  %v3636_v61 = vsel %vm2403_vm4, %v12979_v31, -inf }
 0x9fa   :  { %3637 = vmax.xlane.f32.xlu1 %v3636_v61  ;;  %v3633_v9 = vsel %vm2403_vm4, %v12981_v45, -inf }
 0x9fb   :  { %3634 = vmax.xlane.f32.xlu0 %v3633_v9 }
 0x9fc   :  { %v12987_v63 = vpop.f32.mrb[94].mxu0 }
 0x9fd   :  { %v12989_v56 = vpop.f32.mrb[95].mxu0  ;;  %v3642_v6 = vsel %vm2403_vm4, %v12987_v63, -inf }
 0x9fe   :  { %3643 = vmax.xlane.f32.xlu1 %v3642_v6  ;;  %v3639_v4 = vsel %vm2403_vm4, %v12989_v56, -inf }
 0x9ff   :  { %3640 = vmax.xlane.f32.xlu0 %v3639_v4 }
 0xa6f   :  { %v3602_v43 = vpop.xlane.xlu1 %3601 }
 0xa70   :  { %v3646_v0 = vsub.f32 %v10017_v12, %v3602_v43  ;;  %v3599_v25 = vpop.xlane.xlu0 %3598 }
 0xa71   :  { %v3645_v10 = vsub.f32 %v3405_v52, %v3599_v25 }
 0xa72   :  { %v3663_v28 = vmul.f32 1.442695, %v3646_v0 }
 0xa73   :  { %v3661_v33 = vmul.f32 1.442695, %v3645_v10  ;;  %v3608_v40 = vpop.xlane.xlu1 %3607 }
 0xa74   :  { %11216 = vpow2.f32 %v3663_v28  ;;  %v3648_v61 = vsub.f32 %v10020_v17, %v3608_v40  ;;  %v3605_v9 = vpop.xlane.xlu0 %3604 }
 0xa75   :  { %11218 = vpow2.f32 %v3661_v33  ;;  %v3647_v49 = vsub.f32 %v3415_v20, %v3605_v9 }
 0xa76   :  { %v3667_v16 = vmul.f32 1.442695, %v3648_v61 }
 0xa77   :  { %v3665_v8 = vmul.f32 1.442695, %v3647_v49  ;;  %v3614_v34 = vpop.xlane.xlu1 %3613 }
 0xa78   :  { %11220 = vpow2.f32 %v3667_v16  ;;  %v3650_v6 = vsub.f32 %v10023_v58, %v3614_v34  ;;  %v3611_v60 = vpop.xlane.xlu0 %3610 }
 0xa79   :  { %11222 = vpow2.f32 %v3665_v8  ;;  %v3649_v4 = vsub.f32 %v3425_v39, %v3611_v60 }
 0xa7a   :  { %v3671_v51 = vmul.f32 1.442695, %v3650_v6 }
 0xa7b   :  { %v3669_v12 = vmul.f32 1.442695, %v3649_v4  ;;  %v3620_v43 = vpop.xlane.xlu1 %3619 }
 0xa7c   :  { %11224 = vpow2.f32 %v3671_v51  ;;  %v3652_v52 = vsub.f32 %v10026_v54, %v3620_v43  ;;  %v3617_v0 = vpop.xlane.xlu0 %3616 }
 0xa7d   :  { %11226 = vpow2.f32 %v3669_v12  ;;  %v3651_v25 = vsub.f32 %v3435_v15, %v3617_v0 }
 0xa7e   :  { %v12995_v17 = vpop.eup %11216  ;;  %v3675_v10 = vmul.f32 1.442695, %v3652_v52 }
 0xa7f   :  { %v12997_v20 = vpop.eup %11218  ;;  %v3673_v49 = vmul.f32 1.442695, %v3651_v25  ;;  %v3626_v28 = vpop.xlane.xlu1 %3625  ;;  %v3696_v34 = vsel %vm2403_vm4, %v12995_v17, 0.0 }
 0xa80   :  { %11228 = vpow2.f32 %v3675_v10  ;;  %v3654_v60 = vsub.f32 %v12963_v62, %v3626_v28  ;;  %3697 = vadd.xlane.f32.xlu1 %v3696_v34  ;;  %v3623_v16 = vpop.xlane.xlu0 %3622  ;;  %v3693_v51 = vsel %vm2403_vm4, %v12997_v20, 0.0 }
 0xa81   :  { %11230 = vpow2.f32 %v3673_v49  ;;  %v3653_v8 = vsub.f32 %v12965_v59, %v3623_v16  ;;  %3694 = vadd.xlane.f32.xlu0 %v3693_v51 }
 0xa82   :  { %v13005_v58 = vpop.eup %11220  ;;  %v3679_v39 = vmul.f32 1.442695, %v3654_v60 }
 0xa83   :  { %v13007_v54 = vpop.eup %11222  ;;  %v3677_v15 = vmul.f32 1.442695, %v3653_v8  ;;  %v3632_v33 = vpop.xlane.xlu1 %3631  ;;  %v3702_v40 = vsel %vm2403_vm4, %v13005_v58, 0.0 }
 0xa84   :  { %11232 = vpow2.f32 %v3679_v39  ;;  %v3656_v62 = vsub.f32 %v12971_v11, %v3632_v33  ;;  %3703 = vadd.xlane.f32.xlu1 %v3702_v40  ;;  %v3629_v61 = vpop.xlane.xlu0 %3628  ;;  %v3699_v9 = vsel %vm2403_vm4, %v13007_v54, 0.0 }
 0xa85   :  { %11234 = vpow2.f32 %v3677_v15  ;;  %v3655_v59 = vsub.f32 %v12973_v24, %v3629_v61  ;;  %3700 = vadd.xlane.f32.xlu0 %v3699_v9 }
 0xa86   :  { %v13015_v6 = vpop.eup %11224  ;;  %v3683_v4 = vmul.f32 1.442695, %v3656_v62 }
 0xa87   :  { %v13017_v12 = vpop.eup %11226  ;;  %v3681_v43 = vmul.f32 1.442695, %v3655_v59  ;;  %v3638_v52 = vpop.xlane.xlu1 %3637  ;;  %v3708_v0 = vsel %vm2403_vm4, %v13015_v6, 0.0 }
 0xa88   :  { %11236 = vpow2.f32 %v3683_v4  ;;  %v3658_v11 = vsub.f32 %v12979_v31, %v3638_v52  ;;  %3709 = vadd.xlane.f32.xlu1 %v3708_v0  ;;  %v3635_v25 = vpop.xlane.xlu0 %3634  ;;  %v3705_v10 = vsel %vm2403_vm4, %v13017_v12, 0.0 }
 0xa89   :  { %11238 = vpow2.f32 %v3681_v43  ;;  %v3657_v24 = vsub.f32 %v12981_v45, %v3635_v25  ;;  %3706 = vadd.xlane.f32.xlu0 %v3705_v10 }
 0xa8a   :  { %v13025_v49 = vpop.eup %11228  ;;  %v3687_v28 = vmul.f32 1.442695, %v3658_v11 }
 0xa8b   :  { %v13027_v34 = vpop.eup %11230  ;;  %v3685_v60 = vmul.f32 1.442695, %v3657_v24  ;;  %v3644_v16 = vpop.xlane.xlu1 %3643  ;;  %v3714_v51 = vsel %vm2403_vm4, %v13025_v49, 0.0 }
 0xa8c   :  { %11240 = vpow2.f32 %v3687_v28  ;;  %v3660_v31 = vsub.f32 %v12987_v63, %v3644_v16  ;;  %3715 = vadd.xlane.f32.xlu1 %v3714_v51  ;;  %v3641_v8 = vpop.xlane.xlu0 %3640  ;;  %v3711_v39 = vsel %vm2403_vm4, %v13027_v34, 0.0 }
 0xa8d   :  { %11242 = vpow2.f32 %v3685_v60  ;;  %v3659_v45 = vsub.f32 %v12989_v56, %v3641_v8  ;;  %3712 = vadd.xlane.f32.xlu0 %v3711_v39 }
 0xa8e   :  { %v13035_v15 = vpop.eup %11232  ;;  %v3691_v33 = vmul.f32 1.442695, %v3660_v31 }
 0xa8f   :  { %v13037_v40 = vpop.eup %11234  ;;  %v3689_v62 = vmul.f32 1.442695, %v3659_v45  ;;  %v3720_v61 = vsel %vm2403_vm4, %v13035_v15, 0.0 }
 0xa90   :  { %11244 = vpow2.f32 %v3691_v33  ;;  %3721 = vadd.xlane.f32.xlu1 %v3720_v61  ;;  %v3717_v63 = vsel %vm2403_vm4, %v13037_v40, 0.0 }
 0xa91   :  { %11246 = vpow2.f32 %v3689_v62  ;;  %3718 = vadd.xlane.f32.xlu0 %v3717_v63 }
 0xa92   :  { %v13043_v9 = vpop.eup %11236 }
 0xa93   :  { %v13045_v56 = vpop.eup %11238  ;;  %v3726_v59 = vsel %vm2403_vm4, %v13043_v9, 0.0 }
 0xa94   :  { %3727 = vadd.xlane.f32.xlu1 %v3726_v59  ;;  %v3723_v4 = vsel %vm2403_vm4, %v13045_v56, 0.0 }
 0xa95   :  { %3724 = vadd.xlane.f32.xlu0 %v3723_v4 }
 0xa96   :  { %v13051_v43 = vpop.eup %11240 }
 0xa97   :  { %v13053_v52 = vpop.eup %11242  ;;  %v3732_v0 = vsel %vm2403_vm4, %v13051_v43, 0.0 }
 0xa98   :  { %3733 = vadd.xlane.f32.xlu1 %v3732_v0  ;;  %v3729_v11 = vsel %vm2403_vm4, %v13053_v52, 0.0 }
 0xa99   :  { %3730 = vadd.xlane.f32.xlu0 %v3729_v11 }
 0xa9a   :  { %v13059_v25 = vpop.eup %11244 }
 0xa9b   :  { %v13061_v10 = vpop.eup %11246  ;;  %v3738_v24 = vsel %vm2403_vm4, %v13059_v25, 0.0 }
 0xa9c   :  { %3739 = vadd.xlane.f32.xlu1 %v3738_v24  ;;  %v3735_v28 = vsel %vm2403_vm4, %v13061_v10, 0.0 }
 0xa9d   :  { %3736 = vadd.xlane.f32.xlu0 %v3735_v28 }
 0xb0d   :  { %v3698_v60 = vpop.xlane.xlu1 %3697 }
 0xb0e   :  { %11248 = vrcp.f32 %v3698_v60  ;;  %v3695_v16 = vpop.xlane.xlu0 %3694 }
 0xb0f   :  { %11250 = vrcp.f32 %v3695_v16 }
 0xb11   :  { %v3704_v51 = vpop.xlane.xlu1 %3703 }
 0xb12   :  { %11252 = vrcp.f32 %v3704_v51  ;;  %v3701_v31 = vpop.xlane.xlu0 %3700 }
 0xb13   :  { %11254 = vrcp.f32 %v3701_v31 }
 0xb15   :  { %v3710_v8 = vpop.xlane.xlu1 %3709 }
 0xb16   :  { %11256 = vrcp.f32 %v3710_v8  ;;  %v3707_v39 = vpop.xlane.xlu0 %3706  ;;  %v1560_v8 = vld [vmem:[%s14665_s6 + $0x28] sm:$0xff] }
 0xb17   :  { %11258 = vrcp.f32 %v3707_v39 }
 0xb18   :  { %v11249_v45 = vpop.eup %11248 }
 0xb19   :  { %v11251_v33 = vpop.eup %11250  ;;  %v3716_v62 = vpop.xlane.xlu1 %3715  ;;  %v3758_v59 = vmul.f32 %v11249_v45, %v12995_v17 }
 0xb1a   :  { %11260 = vrcp.f32 %v3716_v62  ;;  %v3713_v61 = vpop.xlane.xlu0 %3712  ;;  %v3757_v63 = vmul.f32 %v11251_v33, %v12997_v20 }
 0xb1b   :  { %11262 = vrcp.f32 %v3713_v61  ;;  %v1567_v61 = vld [vmem:[%s14665_s6 + $0x60] sm:$0xff] }
 0xb1c   :  { %v11253_v4 = vpop.eup %11252  ;;  %10071 = vmatprep.mubr.msk.f32.mxu1 %vm2403_vm4, %v3757_v63 }
 0xb1d   :  { %v11255_v0 = vpop.eup %11254  ;;  %v3722_v11 = vpop.xlane.xlu1 %3721  ;;  %10072 = vmatmul.mubr.msk.f32.vlgmr.msra.gmra.mrb[104].mxu1 %vm2403_vm4, %v3758_v59  ;;  %v3760_v20 = vmul.f32 %v11253_v4, %v13005_v58  ;;  %v1559_v58 = vld [vmem:[%s14665_s6 + $0x20] sm:$0xff] }
 0xb1e   :  { %11264 = vrcp.f32 %v3722_v11  ;;  %10866 = vmatpush3.bf16.msra.mxu1 %v12684_v41  ;;  %v3719_v24 = vpop.xlane.xlu0 %3718  ;;  %v3759_v28 = vmul.f32 %v11255_v0, %v13007_v54  ;;  %v10879_v33 = vpack.c.bf16 %v1560_v8, %v1559_v58 }
 0xb1f   :  { %10868 = vmatprep.subr.bf16.mxu1 %v12686_v27  ;;  %11266 = vrcp.f32 %v3719_v24 }
 0xb20   :  { %v11257_v17 = vpop.eup %11256  ;;  %10074 = vmatprep.mubr.msk.f32.mxu1 %vm2403_vm4, %v3759_v28 }
 0xb21   :  { %v11259_v60 = vpop.eup %11258  ;;  %v3728_v16 = vpop.xlane.xlu1 %3727  ;;  %10075 = vmatmul.mubr.msk.f32.gmra.mrb[106].mxu1 %vm2403_vm4, %v3760_v20  ;;  %v3762_v54 = vmul.f32 %v11257_v17, %v13015_v6 }
 0xb22   :  { %11268 = vrcp.f32 %v3728_v16  ;;  %10870 = vmatpush3.bf16.msra.mxu1 %v12686_v27  ;;  %v3725_v51 = vpop.xlane.xlu0 %3724  ;;  %v3761_v41 = vmul.f32 %v11259_v60, %v13017_v12 }
 0xb23   :  { %10872 = vmatprep.subr.bf16.mxu1 %v12688_v2  ;;  %11270 = vrcp.f32 %v3725_v51 }
 0xb24   :  { %v11261_v31 = vpop.eup %11260  ;;  %10077 = vmatprep.mubr.msk.f32.mxu1 %vm2403_vm4, %v3761_v41 }
 0xb25   :  { %v11263_v27 = vpop.eup %11262  ;;  %v3734_v39 = vpop.xlane.xlu1 %3733  ;;  %10078 = vmatmul.mubr.msk.f32.gmra.mrb[108].mxu1 %vm2403_vm4, %v3762_v54  ;;  %v3764_v45 = vmul.f32 %v11261_v31, %v13025_v49 }
 0xb26   :  { %11272 = vrcp.f32 %v3734_v39  ;;  %10874 = vmatpush3.bf16.msra.mxu1 %v12688_v2  ;;  %v3731_v12 = vpop.xlane.xlu0 %3730  ;;  %v3763_v6 = vmul.f32 %v11263_v27, %v13027_v34  ;;  %v1568_v2 = vld [vmem:[%s14665_s6 + $0x68] sm:$0xff] }
 0xb27   :  { %10876 = vmatprep.subr.bf16.mxu1 %v12690_v23  ;;  %11274 = vrcp.f32 %v3731_v12  ;;  %v10883_v0 = vpack.c.bf16 %v1568_v2, %v1567_v61 }
 0xb28   :  { %v11265_v62 = vpop.eup %11264  ;;  %10080 = vmatprep.mubr.msk.f32.mxu1 %vm2403_vm4, %v3763_v6 }
 0xb29   :  { %v11267_v63 = vpop.eup %11266  ;;  %v3740_v59 = vpop.xlane.xlu1 %3739  ;;  %10081 = vmatmul.mubr.msk.f32.gmra.mrb[110].mxu1 %vm2403_vm4, %v3764_v45  ;;  %v3766_v4 = vmul.f32 %v11265_v62, %v13035_v15 }
 0xb2a   :  { %11276 = vrcp.f32 %v3740_v59  ;;  %10878 = vmatpush3.bf16.msra.mxu1 %v12690_v23  ;;  %v3737_v49 = vpop.xlane.xlu0 %3736  ;;  %v3765_v34 = vmul.f32 %v11267_v63, %v13037_v40 }
 0xb2b   :  { %11278 = vrcp.f32 %v3737_v49  ;;  %10880 = vmatprep.subr.bf16.mxu1 %v10879_v33  ;;  %v13216_v49 = vld [vmem:[%s14667_s7 + $0x2] ss:$0 sm:$0xff] }
 0xb2c   :  { %v11269_v11 = vpop.eup %11268  ;;  %10099 = vmatprep.mubr.msk.f32.mxu1 %vm2403_vm4, %v3765_v34 }
 0xb2d   :  { %v11271_v24 = vpop.eup %11270  ;;  %10100 = vmatmul.mubr.msk.f32.vlgmr.msra.gmra.mrb[112].mxu1 %vm2403_vm4, %v3766_v4  ;;  %v3768_v20 = vmul.f32 %v11269_v11, %v13043_v9 }
 0xb2e   :  { %10882 = vmatpush3.bf16.msra.mxu1 %v10879_v33  ;;  %v3767_v28 = vmul.f32 %v11271_v24, %v13045_v56 }
 0xb2f   :  { %10884 = vmatprep.subr.bf16.mxu1 %v10883_v0 }
 0xb30   :  { %v11273_v23 = vpop.eup %11272  ;;  %10102 = vmatprep.mubr.msk.f32.mxu1 %vm2403_vm4, %v3767_v28 }
 0xb31   :  { %v11275_v40 = vpop.eup %11274  ;;  %10103 = vmatmul.mubr.msk.f32.gmra.mrb[114].mxu1 %vm2403_vm4, %v3768_v20  ;;  %v3770_v17 = vmul.f32 %v11273_v23, %v13051_v43  ;;  %v1592_v43 = vld [vmem:[%s14668_s8 + $0x4] sm:$0xf] }
 0xb32   :  { %v3769_v15 = vmul.f32 %v11275_v40, %v13053_v52  ;;  %10111 = vmatprep.subr.msk.mxu0 %vm4079_vm5, %v1592_v43  ;;  %v1591_v52 = vld [vmem:[%s14668_s8] sm:$0xf] }
 0xb33   :  { %10112 = vmatpush3.msk.msra.mxu0 %vm4079_vm5, %v1592_v43  ;;  %v14718_v43 = vld [vmem:[#allocation18_spill] sm:$0xff] }
 0xb34   :  { %v11277_v60 = vpop.eup %11276  ;;  %10105 = vmatprep.mubr.msk.f32.mxu1 %vm2403_vm4, %v3769_v15  ;;  %10137 = vmatprep.subr.msk.mxu0 %vm4079_vm5, %v1591_v52 }
 0xb35   :  { %v11279_v16 = vpop.eup %11278  ;;  %10106 = vmatmul.mubr.msk.f32.gmra.mrb[116].mxu1 %vm2403_vm4, %v3770_v17  ;;  %v3772_v9 = vmul.f32 %v11277_v60, %v13059_v25  ;;  %v1575_v25 = vld [vmem:[%s14665_s6 + $0xa0] sm:$0xff] }
 0xb36   :  { %v3771_v56 = vmul.f32 %v11279_v16, %v13061_v10  ;;  %v1576_v10 = vld [vmem:[%s14665_s6 + $0xa8] sm:$0xff] }
 0xb37   :  { %v10887_v54 = vpack.c.bf16 %v1576_v10, %v1575_v25  ;;  %v14719_v10 = vld [vmem:[#allocation17_spill] sm:$0xff] }
 0xb38   :  { %10108 = vmatprep.mubr.msk.f32.mxu1 %vm2403_vm4, %v3771_v56 }
 0xb39   :  { %10109 = vmatmul.mubr.msk.f32.gmra.mrb[118].mxu1 %vm2403_vm4, %v3772_v9 }
 0xb3a   :  { %10167 = vmatprep.mubr.msk.f32.mxu1 %vm391_vm1, %v12192_v7 }
 0xb3d   :  { %10168 = vmatmul.mubr.msk.f32.vlgmr.msra.gmra.mrb[120].mxu1 %vm391_vm1, %v12195_v5 }
 0xb3e   :  { %10170 = vmatprep.mubr.msk.f32.mxu1 %vm391_vm1, %v12208_v22  ;;  %10886 = vmatpush3.bf16.msra.mxu1 %v10883_v0 }
 0xb41   :  { %10171 = vmatmul.mubr.msk.f32.gmra.mrb[122].mxu1 %vm391_vm1, %v12211_v55 }
 0xb42   :  { %10173 = vmatprep.mubr.msk.f32.mxu1 %vm391_vm1, %v12224_v26 }
 0xb45   :  { %10174 = vmatmul.mubr.msk.f32.gmra.mrb[124].mxu1 %vm391_vm1, %v12227_v1 }
 0xb46   :  { %10176 = vmatprep.mubr.msk.f32.mxu1 %vm391_vm1, %v12240_v30 }
 0xb49   :  { %10177 = vmatmul.mubr.msk.f32.gmra.mrb[126].mxu1 %vm391_vm1, %v12243_v32 }
 0xb4a   :  { %10179 = vmatprep.mubr.msk.f32.mxu1 %vm391_vm1, %v12256_v36 }
 0xb4d   :  { %10180 = vmatmul.mubr.msk.f32.gmra.mrb[128].mxu1 %vm391_vm1, %v12259_v47 }
 0xb4e   :  { %10182 = vmatprep.mubr.msk.f32.mxu1 %vm391_vm1, %v12272_v38 }
 0xb51   :  { %10183 = vmatmul.mubr.msk.f32.gmra.mrb[130].mxu1 %vm391_vm1, %v12275_v53 }
 0xb52   :  { %10185 = vmatprep.mubr.msk.f32.mxu1 %vm391_vm1, %v12288_v42 }
 0xb55   :  { %10186 = vmatmul.mubr.msk.f32.gmra.mrb[132].mxu1 %vm391_vm1, %v12291_v21 }
 0xb56   :  { %10188 = vmatprep.mubr.msk.f32.mxu1 %vm391_vm1, %v12304_v46 }
 0xb59   :  { %10189 = vmatmul.mubr.msk.f32.gmra.mrb[134].mxu1 %vm391_vm1, %v12307_v48 }
 0xb5a   :  { %10195 = vmatprep.mubr.msk.f32.mxu1 %vm391_vm1, %v12192_v7 }
 0xb5d   :  { %10196 = vmatmul.mubr.msk.f32.vlgmr.msra.gmra.mrb[136].mxu1 %vm391_vm1, %v12195_v5 }
 0xb5e   :  { %10198 = vmatprep.mubr.msk.f32.mxu1 %vm391_vm1, %v12208_v22 }
 0xb61   :  { %10199 = vmatmul.mubr.msk.f32.gmra.mrb[138].mxu1 %vm391_vm1, %v12211_v55 }
 0xb62   :  { %10201 = vmatprep.mubr.msk.f32.mxu1 %vm391_vm1, %v12224_v26 }
 0xb65   :  { %10202 = vmatmul.mubr.msk.f32.gmra.mrb[140].mxu1 %vm391_vm1, %v12227_v1 }
 0xb66   :  { %10204 = vmatprep.mubr.msk.f32.mxu1 %vm391_vm1, %v12240_v30 }
 0xb69   :  { %10205 = vmatmul.mubr.msk.f32.gmra.mrb[142].mxu1 %vm391_vm1, %v12243_v32 }
 0xb6a   :  { %10207 = vmatprep.mubr.msk.f32.mxu1 %vm391_vm1, %v12256_v36 }
 0xb6d   :  { %10208 = vmatmul.mubr.msk.f32.gmra.mrb[144].mxu1 %vm391_vm1, %v12259_v47 }
 0xb6e   :  { %10210 = vmatprep.mubr.msk.f32.mxu1 %vm391_vm1, %v12272_v38 }
 0xb71   :  { %10211 = vmatmul.mubr.msk.f32.gmra.mrb[146].mxu1 %vm391_vm1, %v12275_v53 }
 0xb72   :  { %10213 = vmatprep.mubr.msk.f32.mxu1 %vm391_vm1, %v12288_v42 }
 0xb75   :  { %10214 = vmatmul.mubr.msk.f32.gmra.mrb[148].mxu1 %vm391_vm1, %v12291_v21 }
 0xb76   :  { %10216 = vmatprep.mubr.msk.f32.mxu1 %vm391_vm1, %v12304_v46 }
 0xb79   :  { %10217 = vmatmul.mubr.msk.f32.gmra.mrb[150].mxu1 %vm391_vm1, %v12307_v48 }
 0xbf0   :  { %v10073_v51 = vpop.f32.mrb[104].mxu1 }
 0xbf1   :  { %v3863_v41 = vpop.f32.mrb[105].mxu1 }
 0xbf2   :  { %10113 = vmatprep.mubr.msk.f32.mxu0 %vm2096_vm2, %v3863_v41 }
 0xbf3   :  { %10114 = vmatmul.mubr.msk.f32.vlgmr.msra.gmra.mrb[96].mxu0 %vm2096_vm2, %v10073_v51  ;;  %v14720_v51 = vld [vmem:[#allocation20_spill] sm:$0xff] }
 0xbf4   :  { %v10076_v31 = vpop.f32.mrb[106].mxu1  ;;  %10138 = vmatpush3.msk.msra.mxu0 %vm4079_vm5, %v1591_v52 }
 0xbf5   :  { %v3873_v58 = vpop.f32.mrb[107].mxu1  ;;  %10888 = vmatprep.subr.bf16.mxu0 %v10887_v54 }
 0xbf6   :  { %10116 = vmatprep.mubr.msk.f32.mxu0 %vm2096_vm2, %v3873_v58 }
 0xbf7   :  { %10117 = vmatmul.mubr.msk.f32.gmra.mrb[98].mxu0 %vm2096_vm2, %v10076_v31 }
 0xbf8   :  { %v10079_v8 = vpop.f32.mrb[108].mxu1 }
 0xbf9   :  { %v3883_v27 = vpop.f32.mrb[109].mxu1 }
 0xbfa   :  { %10119 = vmatprep.mubr.msk.f32.mxu0 %vm2096_vm2, %v3883_v27  ;;  %v14721_v27 = vld [vmem:[#allocation19_spill] sm:$0xff] }
 0xbfb   :  { %10120 = vmatmul.mubr.msk.f32.gmra.mrb[100].mxu0 %vm2096_vm2, %v10079_v8  ;;  %v13298_v8 = vld [vmem:[%s14667_s7 + $0x6] ss:$0 sm:$0xff] }
 0xbfc   :  { %v10082_v39 = vpop.f32.mrb[110].mxu1 }
 0xbfd   :  { %v3893_v12 = vpop.f32.mrb[111].mxu1 }
 0xbfe   :  { %10122 = vmatprep.mubr.msk.f32.mxu0 %vm2096_vm2, %v3893_v12 }
 0xbff   :  { %10123 = vmatmul.mubr.msk.f32.gmra.mrb[102].mxu0 %vm2096_vm2, %v10082_v39 }
 0xc00   :  { %v10101_v6 = vpop.f32.mrb[112].mxu1 }
 0xc01   :  { %v3992_v45 = vpop.f32.mrb[113].mxu1 }
 0xc02   :  { %10125 = vmatprep.mubr.msk.f32.mxu0 %vm2096_vm2, %v3992_v45 }
 0xc03   :  { %10126 = vmatmul.mubr.msk.f32.gmra.mrb[104].mxu0 %vm2096_vm2, %v10101_v6 }
 0xc04   :  { %v10104_v33 = vpop.f32.mrb[114].mxu1 }
 0xc05   :  { %v4002_v62 = vpop.f32.mrb[115].mxu1 }
 0xc06   :  { %10128 = vmatprep.mubr.msk.f32.mxu0 %vm2096_vm2, %v4002_v62 }
 0xc07   :  { %10129 = vmatmul.mubr.msk.f32.gmra.mrb[106].mxu0 %vm2096_vm2, %v10104_v33 }
 0xc08   :  { %v10107_v61 = vpop.f32.mrb[116].mxu1 }
 0xc09   :  { %v4012_v2 = vpop.f32.mrb[117].mxu1 }
 0xc0a   :  { %10131 = vmatprep.mubr.msk.f32.mxu0 %vm2096_vm2, %v4012_v2 }
 0xc0b   :  { %10132 = vmatmul.mubr.msk.f32.gmra.mrb[108].mxu0 %vm2096_vm2, %v10107_v61 }
 0xc0c   :  { %v10110_v63 = vpop.f32.mrb[118].mxu1 }
 0xc0d   :  { %v4022_v59 = vpop.f32.mrb[119].mxu1 }
 0xc0e   :  { %10134 = vmatprep.mubr.msk.f32.mxu0 %vm2096_vm2, %v4022_v59 }
 0xc0f   :  { %10135 = vmatmul.mubr.msk.f32.gmra.mrb[110].mxu0 %vm2096_vm2, %v10110_v63 }
 0xc10   :  { %10139 = vmatprep.mubr.msk.f32.mxu0 %vm2096_vm2, %v12853_v19  ;;  %v10169_v34 = vpop.f32.mrb[120].mxu1 }
 0xc11   :  { %v13222_v4 = vadd.f32 %v10169_v34, %v13216_v49  ;;  %v4496_v0 = vpop.f32.mrb[121].mxu1 }
 0xc12   :  { %v4497_v11 = vadd.f32 %v13216_v49, %v4496_v0 }
 0xc13   :  { %10140 = vmatmul.mubr.msk.f32.vlgmr.msra.gmra.mrb[96].mxu0 %vm2096_vm2, %v12851_v18 }
 0xc14   :  { %10142 = vmatprep.mubr.msk.f32.mxu0 %vm2096_vm2, %v12857_v35  ;;  %v10172_v24 = vpop.f32.mrb[122].mxu1  ;;  %10263 = vmatprep.mubr.msk.f32.mxu1 %vm2096_vm2, %v4497_v11 }
 0xc15   :  { %v13231_v28 = vadd.f32 %v10172_v24, %v13216_v49  ;;  %v4506_v19 = vpop.f32.mrb[123].mxu1  ;;  %10890 = vmatpush3.bf16.msra.mxu0 %v10887_v54 }
 0xc16   :  { %v13234_v20 = vadd.f32 %v13216_v49, %v4506_v19 }
 0xc17   :  { %10143 = vmatmul.mubr.msk.f32.gmra.mrb[98].mxu0 %vm2096_vm2, %v12855_v29 }
 0xc18   :  { %10145 = vmatprep.mubr.msk.f32.mxu0 %vm2096_vm2, %v12861_v3  ;;  %v10175_v18 = vpop.f32.mrb[124].mxu1 }
 0xc19   :  { %v13241_v35 = vadd.f32 %v10175_v18, %v13216_v49  ;;  %v4516_v23 = vpop.f32.mrb[125].mxu1 }
 0xc1a   :  { %v13244_v40 = vadd.f32 %v13216_v49, %v4516_v23 }
 0xc1b   :  { %10146 = vmatmul.mubr.msk.f32.gmra.mrb[100].mxu0 %vm2096_vm2, %v12859_v13 }
 0xc1c   :  { %10148 = vmatprep.mubr.msk.f32.mxu0 %vm2096_vm2, %v12865_v57  ;;  %v10178_v15 = vpop.f32.mrb[126].mxu1 }
 0xc1d   :  { %v13251_v29 = vadd.f32 %v10178_v15, %v13216_v49  ;;  %v4526_v17 = vpop.f32.mrb[127].mxu1 }
 0xc1e   :  { %v13254_v3 = vadd.f32 %v13216_v49, %v4526_v17 }
 0xc1f   :  { %10149 = vmatmul.mubr.msk.f32.gmra.mrb[102].mxu0 %vm2096_vm2, %v12863_v14 }
 0xc20   :  { %10151 = vmatprep.mubr.msk.f32.mxu0 %vm2096_vm2, %v12869_v50  ;;  %v10181_v60 = vpop.f32.mrb[128].mxu1  ;;  %v14717_v50 = vld [vmem:[#allocation16_spill] sm:$0xff] }
 0xc21   :  { %v13261_v13 = vadd.f32 %v10181_v60, %v13216_v49  ;;  %v13263_v16 = vpop.f32.mrb[129].mxu1 }
 0xc23   :  { %10152 = vmatmul.mubr.msk.f32.gmra.mrb[104].mxu0 %vm2096_vm2, %v12867_v44 }
 0xc24   :  { %10154 = vmatprep.mubr.msk.f32.mxu0 %vm2096_vm2, %v12873_v37  ;;  %v10184_v57 = vpop.f32.mrb[130].mxu1 }
 0xc25   :  { %v13270_v56 = vadd.f32 %v10184_v57, %v13216_v49  ;;  %v4546_v14 = vpop.f32.mrb[131].mxu1 }
 0xc26   :  { %v13273_v9 = vadd.f32 %v13216_v49, %v4546_v14 }
 0xc27   :  { %10155 = vmatmul.mubr.msk.f32.gmra.mrb[106].mxu0 %vm2096_vm2, %v14717_v50 }
 0xc28   :  { %10157 = vmatprep.mubr.msk.f32.mxu0 %vm2096_vm2, %v14718_v43  ;;  %v10187_v52 = vpop.f32.mrb[132].mxu1 }
 0xc29   :  { %v13280_v44 = vadd.f32 %v10187_v52, %v13216_v49  ;;  %v4556_v25 = vpop.f32.mrb[133].mxu1 }
 0xc2a   :  { %v13283_v37 = vadd.f32 %v13216_v49, %v4556_v25 }
 0xc2b   :  { %10158 = vmatmul.mubr.msk.f32.gmra.mrb[108].mxu0 %vm2096_vm2, %v14719_v10 }
 0xc2c   :  { %10160 = vmatprep.mubr.msk.f32.mxu0 %vm2096_vm2, %v14720_v51  ;;  %v10190_v41 = vpop.f32.mrb[134].mxu1 }
 0xc2d   :  { %v13290_v54 = vadd.f32 %v10190_v41, %v13216_v49  ;;  %v4566_v31 = vpop.f32.mrb[135].mxu1 }
 0xc2e   :  { %v13293_v58 = vadd.f32 %v13216_v49, %v4566_v31 }
 0xc2f   :  { %10161 = vmatmul.mubr.msk.f32.gmra.mrb[110].mxu0 %vm2096_vm2, %v14721_v27 }
 0xc30   :  { %v10197_v39 = vpop.f32.mrb[136].mxu1  ;;  %10223 = vmatprep.mubr.msk.f32.mxu0 %vm391_vm1, %v12192_v7 }
 0xc31   :  { %v4653_v12 = vadd.f32 %v10197_v39, %v13298_v8  ;;  %v4647_v6 = vpop.f32.mrb[137].mxu1 }
 0xc32   :  { %v4648_v45 = vadd.f32 %v13298_v8, %v4647_v6 }
 0xc33   :  { %10224 = vmatmul.mubr.msk.f32.vlgmr.msra.gmra.mrb[112].mxu0 %vm391_vm1, %v12195_v5 }
 0xc34   :  { %v10891_v33 = vpack.c.bf16 %v4653_v12, %v4648_v45  ;;  %v10200_v62 = vpop.f32.mrb[138].mxu1  ;;  %10226 = vmatprep.mubr.msk.f32.mxu0 %vm391_vm1, %v12208_v22 }
 0xc35   :  { %v4663_v61 = vadd.f32 %v10200_v62, %v13298_v8  ;;  %v4657_v2 = vpop.f32.mrb[139].mxu1 }
 0xc36   :  { %v4658_v63 = vadd.f32 %v13298_v8, %v4657_v2  ;;  %10893 = vmatprep.subr.msk.bf16.mxu1 %vm12364_vm3, %v10891_v33 }
 0xc37   :  { %10227 = vmatmul.mubr.msk.f32.gmra.mrb[114].mxu0 %vm391_vm1, %v12211_v55  ;;  %10896 = vmatpush3.bf16.xpose.msk.msra.mxu1 %vm12364_vm3, %v10891_v33 }
 0xc38   :  { %v10897_v34 = vpack.c.bf16 %v4663_v61, %v4658_v63  ;;  %v10203_v0 = vpop.f32.mrb[140].mxu1  ;;  %10229 = vmatprep.mubr.msk.f32.mxu0 %vm391_vm1, %v12224_v26  ;;  %v4537_v63 = vadd.f32 %v13216_v49, %v13263_v16  ;;  %v8706_v49 = vld [vmem:[%s14667_s7 + $0xa] ss:$0 sm:$0xff] }
 0xc39   :  { %v4673_v11 = vadd.f32 %v10203_v0, %v13298_v8  ;;  %v4667_v24 = vpop.f32.mrb[141].mxu1 }
 0xc3a   :  { %v4668_v19 = vadd.f32 %v13298_v8, %v4667_v24  ;;  %10899 = vmatprep.subr.msk.bf16.mxu1 %vm12364_vm3, %v10897_v34 }
 0xc3b   :  { %10230 = vmatmul.mubr.msk.f32.gmra.mrb[116].mxu0 %vm391_vm1, %v12227_v1 }
 0xc3c   :  { %v10903_v18 = vpack.c.bf16 %v4673_v11, %v4668_v19  ;;  %v10206_v23 = vpop.f32.mrb[142].mxu1  ;;  %10232 = vmatprep.mubr.msk.f32.mxu0 %vm391_vm1, %v12240_v30 }
 0xc3d   :  { %v4683_v15 = vadd.f32 %v10206_v23, %v13298_v8  ;;  %v4677_v17 = vpop.f32.mrb[143].mxu1 }
 0xc3e   :  { %v4678_v60 = vadd.f32 %v13298_v8, %v4677_v17 }
 0xc3f   :  { %10233 = vmatmul.mubr.msk.f32.gmra.mrb[118].mxu0 %vm391_vm1, %v12243_v32  ;;  %10902 = vmatpush3.bf16.xpose.msk.msra.mxu1 %vm12364_vm3, %v10897_v34 }
 0xc40   :  { %v10909_v57 = vpack.c.bf16 %v4683_v15, %v4678_v60  ;;  %v10209_v14 = vpop.f32.mrb[144].mxu1  ;;  %10235 = vmatprep.mubr.msk.f32.mxu0 %vm391_vm1, %v12256_v36  ;;  %10905 = vmatprep.subr.msk.bf16.mxu1 %vm12364_vm3, %v10903_v18 }
 0xc41   :  { %v4693_v50 = vadd.f32 %v10209_v14, %v13298_v8  ;;  %v4687_v43 = vpop.f32.mrb[145].mxu1 }
 0xc42   :  { %v4688_v52 = vadd.f32 %v13298_v8, %v4687_v43 }
 0xc43   :  { %10236 = vmatmul.mubr.msk.f32.gmra.mrb[120].mxu0 %vm391_vm1, %v12259_v47 }
 0xc44   :  { %v10915_v25 = vpack.c.bf16 %v4693_v50, %v4688_v52  ;;  %v10212_v10 = vpop.f32.mrb[146].mxu1  ;;  %10238 = vmatprep.mubr.msk.f32.mxu0 %vm391_vm1, %v12272_v38 }
 0xc45   :  { %v4703_v51 = vadd.f32 %v10212_v10, %v13298_v8  ;;  %v4697_v41 = vpop.f32.mrb[147].mxu1 }
 0xc46   :  { %v4698_v31 = vadd.f32 %v13298_v8, %v4697_v41  ;;  %10917 = vmatprep.subr.msk.bf16.mxu0 %vm12364_vm3, %v10915_v25 }
 0xc47   :  { %10239 = vmatmul.mubr.msk.f32.gmra.mrb[122].mxu0 %vm391_vm1, %v12275_v53  ;;  %10908 = vmatpush3.bf16.xpose.msk.msra.mxu1 %vm12364_vm3, %v10903_v18 }
 0xc48   :  { %v10921_v27 = vpack.c.bf16 %v4703_v51, %v4698_v31  ;;  %10920 = vmatpush3.bf16.xpose.msk.msra.mxu0 %vm12364_vm3, %v10915_v25  ;;  %v10215_v39 = vpop.f32.mrb[148].mxu1  ;;  %10241 = vmatprep.mubr.msk.f32.mxu0 %vm391_vm1, %v12288_v42 }
 0xc49   :  { %v4713_v12 = vadd.f32 %v10215_v39, %v13298_v8  ;;  %10911 = vmatprep.subr.msk.bf16.mxu1 %vm12364_vm3, %v10909_v57  ;;  %v4707_v6 = vpop.f32.mrb[149].mxu1 }
 0xc4a   :  { %v4708_v45 = vadd.f32 %v13298_v8, %v4707_v6  ;;  %10923 = vmatprep.subr.msk.bf16.mxu0 %vm12364_vm3, %v10921_v27 }
 0xc4b   :  { %10242 = vmatmul.mubr.msk.f32.gmra.mrb[124].mxu0 %vm391_vm1, %v12291_v21 }
 0xc4c   :  { %v10927_v33 = vpack.c.bf16 %v4713_v12, %v4708_v45  ;;  %v10218_v62 = vpop.f32.mrb[150].mxu1  ;;  %10244 = vmatprep.mubr.msk.f32.mxu0 %vm391_vm1, %v12304_v46 }
 0xc4d   :  { %v4723_v61 = vadd.f32 %v10218_v62, %v13298_v8  ;;  %v4717_v2 = vpop.f32.mrb[151].mxu1 }
 0xc4e   :  { %v4718_v34 = vadd.f32 %v13298_v8, %v4717_v2 }
 0xc4f   :  { %10245 = vmatmul.mubr.msk.f32.gmra.mrb[126].mxu0 %vm391_vm1, %v12307_v48  ;;  %10914 = vmatpush3.bf16.xpose.msk.msra.mxu1 %vm12364_vm3, %v10909_v57 }
 0xc50   :  { %v10933_v0 = vpack.c.bf16 %v4723_v61, %v4718_v34  ;;  %10926 = vmatpush3.bf16.xpose.msk.msra.mxu0 %vm12364_vm3, %v10921_v27  ;;  %10291 = vmatprep.mubr.msk.f32.mxu0 %vm2096_vm2, %v4537_v63 }
 0xc51   :  { %10929 = vmatprep.subr.msk.bf16.mxu0 %vm12364_vm3, %v10927_v33 }
 0xc56   :  { %10264 = vmatmul.mubr.msk.f32.vlgmr.msra.gmra.mrb[152].mxu1 %vm2096_vm2, %v13222_v4 }
 0xc57   :  { %10266 = vmatprep.mubr.msk.f32.mxu1 %vm2096_vm2, %v13234_v20 }
 0xc58   :  { %10932 = vmatpush3.bf16.xpose.msk.msra.mxu0 %vm12364_vm3, %v10927_v33 }
 0xc59   :  { %10935 = vmatprep.subr.msk.bf16.mxu0 %vm12364_vm3, %v10933_v0 }
 0xc5a   :  { %10267 = vmatmul.mubr.msk.f32.gmra.mrb[154].mxu1 %vm2096_vm2, %v13231_v28 }
 0xc5b   :  { %10269 = vmatprep.mubr.msk.f32.mxu1 %vm2096_vm2, %v13244_v40 }
 0xc5e   :  { %10270 = vmatmul.mubr.msk.f32.gmra.mrb[156].mxu1 %vm2096_vm2, %v13241_v35 }
 0xc5f   :  { %10272 = vmatprep.mubr.msk.f32.mxu1 %vm2096_vm2, %v13254_v3 }
 0xc60   :  { %10938 = vmatpush3.bf16.xpose.msk.msra.mxu0 %vm12364_vm3, %v10933_v0 }
 0xc62   :  { %10273 = vmatmul.mubr.msk.f32.gmra.mrb[158].mxu1 %vm2096_vm2, %v13251_v29 }
 0xc67   :  { %10292 = vmatmul.mubr.msk.f32.vlgmr.msra.gmra.mrb[128].mxu0 %vm2096_vm2, %v13261_v13 }
 0xc68   :  { %10294 = vmatprep.mubr.msk.f32.mxu0 %vm2096_vm2, %v13273_v9 }
 0xc6b   :  { %10295 = vmatmul.mubr.msk.f32.gmra.mrb[130].mxu0 %vm2096_vm2, %v13270_v56 }
 0xc6c   :  { %10297 = vmatprep.mubr.msk.f32.mxu0 %vm2096_vm2, %v13283_v37 }
 0xc6f   :  { %10298 = vmatmul.mubr.msk.f32.gmra.mrb[132].mxu0 %vm2096_vm2, %v13280_v44 }
 0xc70   :  { %10300 = vmatprep.mubr.msk.f32.mxu0 %vm2096_vm2, %v13293_v58 }
 0xc73   :  { %10301 = vmatmul.mubr.msk.f32.gmra.mrb[134].mxu0 %vm2096_vm2, %v13290_v54 }
 0xd06   :  { %v10225_v4 = vpop.f32.mrb[112].mxu0 }
 0xd07   :  { %v4804_v28 = vadd.f32 %v10225_v4, %v8706_v49  ;;  %v4798_v20 = vpop.f32.mrb[113].mxu0 }
 0xd08   :  { %v4799_v35 = vadd.f32 %v8706_v49, %v4798_v20 }
 0xd0a   :  { %v10939_v40 = vpack.c.bf16 %v4804_v28, %v4799_v35  ;;  %v10228_v29 = vpop.f32.mrb[114].mxu0 }
 0xd0b   :  { %v4814_v3 = vadd.f32 %v10228_v29, %v8706_v49  ;;  %v4808_v13 = vpop.f32.mrb[115].mxu0 }
 0xd0c   :  { %v4809_v16 = vadd.f32 %v8706_v49, %v4808_v13  ;;  %10940 = vmatprep.subr.bf16.mxu1 %v10939_v40 }
 0xd0d   :  { %10942 = vmatpush3.bf16.msra.mxu1 %v10939_v40 }
 0xd0e   :  { %v10943_v56 = vpack.c.bf16 %v4814_v3, %v4809_v16  ;;  %v10231_v9 = vpop.f32.mrb[116].mxu0 }
 0xd0f   :  { %v4824_v44 = vadd.f32 %v10231_v9, %v8706_v49  ;;  %v4818_v37 = vpop.f32.mrb[117].mxu0 }
 0xd10   :  { %v4819_v54 = vadd.f32 %v8706_v49, %v4818_v37  ;;  %10944 = vmatprep.subr.bf16.mxu1 %v10943_v56 }
 0xd11   :  { %10946 = vmatpush3.bf16.msra.mxu1 %v10943_v56 }
 0xd12   :  { %v10947_v58 = vpack.c.bf16 %v4824_v44, %v4819_v54  ;;  %v10234_v8 = vpop.f32.mrb[118].mxu0 }
 0xd13   :  { %v4834_v11 = vadd.f32 %v10234_v8, %v8706_v49  ;;  %v4828_v24 = vpop.f32.mrb[119].mxu0 }
 0xd14   :  { %v4829_v19 = vadd.f32 %v8706_v49, %v4828_v24  ;;  %10948 = vmatprep.subr.bf16.mxu1 %v10947_v58 }
 0xd15   :  { %10950 = vmatpush3.bf16.msra.mxu1 %v10947_v58 }
 0xd16   :  { %v10951_v18 = vpack.c.bf16 %v4834_v11, %v4829_v19  ;;  %v10237_v23 = vpop.f32.mrb[120].mxu0 }
 0xd17   :  { %v4844_v15 = vadd.f32 %v10237_v23, %v8706_v49  ;;  %v4838_v17 = vpop.f32.mrb[121].mxu0 }
 0xd18   :  { %v4839_v60 = vadd.f32 %v8706_v49, %v4838_v17  ;;  %10952 = vmatprep.subr.bf16.mxu1 %v10951_v18 }
 0xd19   :  { %10954 = vmatpush3.bf16.msra.mxu1 %v10951_v18 }
 0xd1a   :  { %v13416_v57 = vpack.c.bf16 %v4844_v15, %v4839_v60  ;;  %v10240_v14 = vpop.f32.mrb[122].mxu0 }
 0xd1b   :  { %v4854_v50 = vadd.f32 %v10240_v14, %v8706_v49  ;;  %v4848_v43 = vpop.f32.mrb[123].mxu0 }
 0xd1c   :  { %v4849_v52 = vadd.f32 %v8706_v49, %v4848_v43  ;;  %10956 = vmatprep.subr.bf16.mxu1 %v13416_v57 }
 0xd1e   :  { %v13419_v25 = vpack.c.bf16 %v4854_v50, %v4849_v52  ;;  %v10243_v10 = vpop.f32.mrb[124].mxu0 }
 0xd1f   :  { %v4864_v51 = vadd.f32 %v10243_v10, %v8706_v49  ;;  %v4858_v41 = vpop.f32.mrb[125].mxu0 }
 0xd20   :  { %v4859_v31 = vadd.f32 %v8706_v49, %v4858_v41 }
 0xd22   :  { %v13421_v27 = vpack.c.bf16 %v4864_v51, %v4859_v31  ;;  %v10246_v39 = vpop.f32.mrb[126].mxu0 }
 0xd23   :  { %v4874_v12 = vadd.f32 %v10246_v39, %v8706_v49  ;;  %v4868_v6 = vpop.f32.mrb[127].mxu0 }
 0xd24   :  { %v4869_v45 = vadd.f32 %v8706_v49, %v4868_v6 }
 0xd26   :  { %v13423_v33 = vpack.c.bf16 %v4874_v12, %v4869_v45 }
 0xd29   :  { %v10265_v62 = vpop.f32.mrb[152].mxu1 }
 0xd2a   :  { %v4991_v61 = vpop.f32.mrb[153].mxu1  ;;  %v5186_v2 = vsel %vm2403_vm4, %v10265_v62, -inf }
 0xd2b   :  { %5187 = vmax.xlane.f32.xlu1 %v5186_v2  ;;  %v5183_v63 = vsel %vm2403_vm4, %v4991_v61, -inf }
 0xd2c   :  { %5184 = vmax.xlane.f32.xlu0 %v5183_v63 }
 0xd2d   :  { %v10268_v34 = vpop.f32.mrb[154].mxu1 }
 0xd2e   :  { %v5001_v0 = vpop.f32.mrb[155].mxu1  ;;  %v5192_v4 = vsel %vm2403_vm4, %v10268_v34, -inf }
 0xd2f   :  { %5193 = vmax.xlane.f32.xlu1 %v5192_v4  ;;  %v5189_v28 = vsel %vm2403_vm4, %v5001_v0, -inf }
 0xd30   :  { %5190 = vmax.xlane.f32.xlu0 %v5189_v28 }
 0xd31   :  { %v10271_v20 = vpop.f32.mrb[156].mxu1 }
 0xd32   :  { %v5011_v49 = vpop.f32.mrb[157].mxu1  ;;  %v5198_v35 = vsel %vm2403_vm4, %v10271_v20, -inf }
 0xd33   :  { %5199 = vmax.xlane.f32.xlu1 %v5198_v35  ;;  %v5195_v40 = vsel %vm2403_vm4, %v5011_v49, -inf }
 0xd34   :  { %5196 = vmax.xlane.f32.xlu0 %v5195_v40 }
 0xd35   :  { %v10274_v29 = vpop.f32.mrb[158].mxu1 }
 0xd36   :  { %v5021_v3 = vpop.f32.mrb[159].mxu1  ;;  %v5204_v13 = vsel %vm2403_vm4, %v10274_v29, -inf }
 0xd37   :  { %5205 = vmax.xlane.f32.xlu1 %v5204_v13  ;;  %v5201_v16 = vsel %vm2403_vm4, %v5021_v3, -inf }
 0xd38   :  { %5202 = vmax.xlane.f32.xlu0 %v5201_v16 }
 0xd3a   :  { %v13433_v56 = vpop.f32.mrb[128].mxu0 }
 0xd3b   :  { %v13435_v9 = vpop.f32.mrb[129].mxu0  ;;  %v5210_v44 = vsel %vm2403_vm4, %v13433_v56, -inf }
 0xd3c   :  { %5211 = vmax.xlane.f32.xlu1 %v5210_v44  ;;  %v5207_v37 = vsel %vm2403_vm4, %v13435_v9, -inf }
 0xd3d   :  { %5208 = vmax.xlane.f32.xlu0 %v5207_v37 }
 0xd3e   :  { %v13441_v54 = vpop.f32.mrb[130].mxu0 }
 0xd3f   :  { %v13443_v58 = vpop.f32.mrb[131].mxu0  ;;  %v5216_v8 = vsel %vm2403_vm4, %v13441_v54, -inf }
 0xd40   :  { %5217 = vmax.xlane.f32.xlu1 %v5216_v8  ;;  %v5213_v11 = vsel %vm2403_vm4, %v13443_v58, -inf }
 0xd41   :  { %5214 = vmax.xlane.f32.xlu0 %v5213_v11 }
 0xd42   :  { %v13449_v24 = vpop.f32.mrb[132].mxu0 }
 0xd43   :  { %v13451_v19 = vpop.f32.mrb[133].mxu0  ;;  %v5222_v18 = vsel %vm2403_vm4, %v13449_v24, -inf }
 0xd44   :  { %5223 = vmax.xlane.f32.xlu1 %v5222_v18  ;;  %v5219_v23 = vsel %vm2403_vm4, %v13451_v19, -inf }
 0xd45   :  { %5220 = vmax.xlane.f32.xlu0 %v5219_v23 }
 0xd46   :  { %v13457_v15 = vpop.f32.mrb[134].mxu0 }
 0xd47   :  { %v13459_v17 = vpop.f32.mrb[135].mxu0  ;;  %v5228_v60 = vsel %vm2403_vm4, %v13457_v15, -inf }
 0xd48   :  { %5229 = vmax.xlane.f32.xlu1 %v5228_v60  ;;  %v5225_v14 = vsel %vm2403_vm4, %v13459_v17, -inf }
 0xd49   :  { %5226 = vmax.xlane.f32.xlu0 %v5225_v14 }
 0xdb8   :  { %v5188_v50 = vpop.xlane.xlu1 %5187 }
 0xdb9   :  { %v5232_v43 = vsub.f32 %v10265_v62, %v5188_v50  ;;  %v5185_v52 = vpop.xlane.xlu0 %5184 }
 0xdba   :  { %v5231_v10 = vsub.f32 %v4991_v61, %v5185_v52 }
 0xdbb   :  { %v5249_v51 = vmul.f32 1.442695, %v5232_v43 }
 0xdbc   :  { %v5247_v41 = vmul.f32 1.442695, %v5231_v10  ;;  %v5194_v31 = vpop.xlane.xlu1 %5193 }
 0xdbd   :  { %11280 = vpow2.f32 %v5249_v51  ;;  %v5234_v39 = vsub.f32 %v10268_v34, %v5194_v31  ;;  %v5191_v12 = vpop.xlane.xlu0 %5190 }
 0xdbe   :  { %11282 = vpow2.f32 %v5247_v41  ;;  %v5233_v6 = vsub.f32 %v5001_v0, %v5191_v12 }
 0xdbf   :  { %v5253_v45 = vmul.f32 1.442695, %v5234_v39 }
 0xdc0   :  { %v5251_v2 = vmul.f32 1.442695, %v5233_v6  ;;  %v5200_v63 = vpop.xlane.xlu1 %5199 }
 0xdc1   :  { %11284 = vpow2.f32 %v5253_v45  ;;  %v5236_v4 = vsub.f32 %v10271_v20, %v5200_v63  ;;  %v5197_v28 = vpop.xlane.xlu0 %5196 }
 0xdc2   :  { %11286 = vpow2.f32 %v5251_v2  ;;  %v5235_v35 = vsub.f32 %v5011_v49, %v5197_v28 }
 0xdc3   :  { %v5257_v40 = vmul.f32 1.442695, %v5236_v4 }
 0xdc4   :  { %v5255_v62 = vmul.f32 1.442695, %v5235_v35  ;;  %v5206_v13 = vpop.xlane.xlu1 %5205 }
 0xdc5   :  { %11288 = vpow2.f32 %v5257_v40  ;;  %v5238_v61 = vsub.f32 %v10274_v29, %v5206_v13  ;;  %v5203_v16 = vpop.xlane.xlu0 %5202 }
 0xdc6   :  { %11290 = vpow2.f32 %v5255_v62  ;;  %v5237_v44 = vsub.f32 %v5021_v3, %v5203_v16 }
 0xdc7   :  { %v13465_v34 = vpop.eup %11280  ;;  %v5261_v37 = vmul.f32 1.442695, %v5238_v61 }
 0xdc8   :  { %v13467_v0 = vpop.eup %11282  ;;  %v5259_v8 = vmul.f32 1.442695, %v5237_v44  ;;  %v5282_v20 = vsel %vm2403_vm4, %v13465_v34, 0.0 }
 0xdc9   :  { %11292 = vpow2.f32 %v5261_v37  ;;  %v5212_v11 = vpop.xlane.xlu1 %5211  ;;  %5283 = vadd.xlane.f32.xlu1 %v5282_v20  ;;  %v5279_v49 = vsel %vm2403_vm4, %v13467_v0, 0.0 }
 0xdca   :  { %11294 = vpow2.f32 %v5259_v8  ;;  %v5240_v29 = vsub.f32 %v13433_v56, %v5212_v11  ;;  %v5209_v18 = vpop.xlane.xlu0 %5208  ;;  %5280 = vadd.xlane.f32.xlu0 %v5279_v49 }
 0xdcb   :  { %v13474_v3 = vpop.eup %11284  ;;  %v5239_v23 = vsub.f32 %v13435_v9, %v5209_v18 }
 0xdcc   :  { %v13477_v60 = vpop.eup %11286  ;;  %v5265_v14 = vmul.f32 1.442695, %v5240_v29  ;;  %v5288_v50 = vsel %vm2403_vm4, %v13474_v3, 0.0 }
 0xdcd   :  { %v5263_v43 = vmul.f32 1.442695, %v5239_v23  ;;  %v5218_v52 = vpop.xlane.xlu1 %5217  ;;  %5289 = vadd.xlane.f32.xlu1 %v5288_v50  ;;  %v5285_v10 = vsel %vm2403_vm4, %v13477_v60, 0.0 }
 0xdce   :  { %11296 = vpow2.f32 %v5265_v14  ;;  %v5242_v56 = vsub.f32 %v13441_v54, %v5218_v52  ;;  %v5215_v51 = vpop.xlane.xlu0 %5214  ;;  %5286 = vadd.xlane.f32.xlu0 %v5285_v10 }
 0xdcf   :  { %v13484_v41 = vpop.eup %11288  ;;  %11298 = vpow2.f32 %v5263_v43  ;;  %v5241_v9 = vsub.f32 %v13443_v58, %v5215_v51 }
 0xdd0   :  { %v13487_v31 = vpop.eup %11290  ;;  %v5269_v39 = vmul.f32 1.442695, %v5242_v56  ;;  %v5294_v12 = vsel %vm2403_vm4, %v13484_v41, 0.0 }
 0xdd1   :  { %v5267_v6 = vmul.f32 1.442695, %v5241_v9  ;;  %v5224_v45 = vpop.xlane.xlu1 %5223  ;;  %5295 = vadd.xlane.f32.xlu1 %v5294_v12  ;;  %v5291_v2 = vsel %vm2403_vm4, %v13487_v31, 0.0  ;;  %v1593_v9 = vld [vmem:[%s14668_s8 + $0x8] sm:$0xf] }
 0xdd2   :  { %11300 = vpow2.f32 %v5269_v39  ;;  %v5244_v54 = vsub.f32 %v13449_v24, %v5224_v45  ;;  %v5221_v63 = vpop.xlane.xlu0 %5220  ;;  %5292 = vadd.xlane.f32.xlu0 %v5291_v2  ;;  %10359 = vmatprep.subr.msk.mxu0 %vm4079_vm5, %v1593_v9 }
 0xdd3   :  { %v13494_v4 = vpop.eup %11292  ;;  %11302 = vpow2.f32 %v5267_v6  ;;  %v5243_v58 = vsub.f32 %v13451_v19, %v5221_v63  ;;  %10360 = vmatpush3.msk.msra.mxu0 %vm4079_vm5, %v1593_v9  ;;  %v1577_v9 = vld [vmem:[%s14665_s6 + $0xb0] sm:$0xff] }
 0xdd4   :  { %v13497_v28 = vpop.eup %11294  ;;  %v5273_v35 = vmul.f32 1.442695, %v5244_v54  ;;  %v5300_v40 = vsel %vm2403_vm4, %v13494_v4, 0.0 }
 0xdd5   :  { %v5271_v62 = vmul.f32 1.442695, %v5243_v58  ;;  %v5230_v13 = vpop.xlane.xlu1 %5229  ;;  %5301 = vadd.xlane.f32.xlu1 %v5300_v40  ;;  %v5297_v61 = vsel %vm2403_vm4, %v13497_v28, 0.0 }
 0xdd6   :  { %11304 = vpow2.f32 %v5273_v35  ;;  %v5246_v24 = vsub.f32 %v13457_v15, %v5230_v13  ;;  %v5227_v16 = vpop.xlane.xlu0 %5226  ;;  %5298 = vadd.xlane.f32.xlu0 %v5297_v61 }
 0xdd7   :  { %11306 = vpow2.f32 %v5271_v62  ;;  %v5245_v19 = vsub.f32 %v13459_v17, %v5227_v16 }
 0xdd8   :  { %v13505_v44 = vpop.eup %11296  ;;  %v5277_v37 = vmul.f32 1.442695, %v5246_v24 }
 0xdd9   :  { %v13507_v8 = vpop.eup %11298  ;;  %v5275_v20 = vmul.f32 1.442695, %v5245_v19  ;;  %v5306_v11 = vsel %vm2403_vm4, %v13505_v44, 0.0 }
 0xdda   :  { %11308 = vpow2.f32 %v5277_v37  ;;  %5307 = vadd.xlane.f32.xlu1 %v5306_v11  ;;  %v5303_v49 = vsel %vm2403_vm4, %v13507_v8, 0.0 }
 0xddb   :  { %11310 = vpow2.f32 %v5275_v20  ;;  %5304 = vadd.xlane.f32.xlu0 %v5303_v49 }
 0xddc   :  { %v13513_v15 = vpop.eup %11300 }
 0xddd   :  { %v13515_v29 = vpop.eup %11302  ;;  %v5312_v17 = vsel %vm2403_vm4, %v13513_v15, 0.0 }
 0xdde   :  { %5313 = vadd.xlane.f32.xlu1 %v5312_v17  ;;  %v5309_v18 = vsel %vm2403_vm4, %v13515_v29, 0.0 }
 0xddf   :  { %5310 = vadd.xlane.f32.xlu0 %v5309_v18 }
 0xde0   :  { %v13521_v23 = vpop.eup %11304 }
 0xde1   :  { %v13523_v14 = vpop.eup %11306  ;;  %v5318_v50 = vsel %vm2403_vm4, %v13521_v23, 0.0 }
 0xde2   :  { %5319 = vadd.xlane.f32.xlu1 %v5318_v50  ;;  %v5315_v43 = vsel %vm2403_vm4, %v13523_v14, 0.0 }
 0xde3   :  { %5316 = vadd.xlane.f32.xlu0 %v5315_v43 }
 0xde4   :  { %v13529_v52 = vpop.eup %11308 }
 0xde5   :  { %v13531_v10 = vpop.eup %11310  ;;  %v5324_v56 = vsel %vm2403_vm4, %v13529_v52, 0.0 }
 0xde6   :  { %5325 = vadd.xlane.f32.xlu1 %v5324_v56  ;;  %v5321_v51 = vsel %vm2403_vm4, %v13531_v10, 0.0 }
 0xde7   :  { %5322 = vadd.xlane.f32.xlu0 %v5321_v51 }
 0xe56   :  { %v5284_v39 = vpop.xlane.xlu1 %5283 }
 0xe57   :  { %11312 = vrcp.f32 %v5284_v39  ;;  %v5281_v12 = vpop.xlane.xlu0 %5280 }
 0xe58   :  { %11314 = vrcp.f32 %v5281_v12 }
 0xe5a   :  { %v5290_v6 = vpop.xlane.xlu1 %5289 }
 0xe5b   :  { %11316 = vrcp.f32 %v5290_v6  ;;  %v5287_v45 = vpop.xlane.xlu0 %5286 }
 0xe5c   :  { %11318 = vrcp.f32 %v5287_v45 }
 0xe5e   :  { %v5296_v2 = vpop.xlane.xlu1 %5295 }
 0xe5f   :  { %11320 = vrcp.f32 %v5296_v2  ;;  %v5293_v54 = vpop.xlane.xlu0 %5292 }
 0xe60   :  { %11322 = vrcp.f32 %v5293_v54 }
 0xe61   :  { %v11313_v63 = vpop.eup %11312 }
 0xe62   :  { %v11315_v58 = vpop.eup %11314  ;;  %v5302_v35 = vpop.xlane.xlu1 %5301  ;;  %v5344_v13 = vmul.f32 %v11313_v63, %v13465_v34 }
 0xe63   :  { %11324 = vrcp.f32 %v5302_v35  ;;  %v5299_v40 = vpop.xlane.xlu0 %5298  ;;  %v5343_v62 = vmul.f32 %v11315_v58, %v13467_v0 }
 0xe64   :  { %11326 = vrcp.f32 %v5299_v40 }
 0xe65   :  { %v11317_v61 = vpop.eup %11316  ;;  %10319 = vmatprep.mubr.msk.f32.mxu1 %vm2403_vm4, %v5343_v62 }
 0xe66   :  { %v11319_v24 = vpop.eup %11318  ;;  %10320 = vmatmul.mubr.msk.f32.vlgmr.msra.gmra.mrb[160].mxu1 %vm2403_vm4, %v5344_v13  ;;  %v5346_v0 = vmul.f32 %v11317_v61, %v13474_v3  ;;  %v1561_v3 = vld [vmem:[%s14665_s6 + $0x30] sm:$0xff] }
 0xe67   :  { %v5308_v16 = vpop.xlane.xlu1 %5307  ;;  %10958 = vmatpush3.bf16.msra.mxu1 %v13416_v57  ;;  %v5345_v19 = vmul.f32 %v11319_v24, %v13477_v60 }
 0xe68   :  { %11328 = vrcp.f32 %v5308_v16  ;;  %v5305_v37 = vpop.xlane.xlu0 %5304  ;;  %10960 = vmatprep.subr.bf16.mxu1 %v13419_v25 }
 0xe69   :  { %v11321_v20 = vpop.eup %11320  ;;  %11330 = vrcp.f32 %v5305_v37  ;;  %10322 = vmatprep.mubr.msk.f32.mxu1 %vm2403_vm4, %v5345_v19 }
 0xe6a   :  { %v11323_v34 = vpop.eup %11322  ;;  %10323 = vmatmul.mubr.msk.f32.gmra.mrb[162].mxu1 %vm2403_vm4, %v5346_v0  ;;  %v5348_v49 = vmul.f32 %v11321_v20, %v13484_v41 }
 0xe6b   :  { %v5314_v11 = vpop.xlane.xlu1 %5313  ;;  %10962 = vmatpush3.bf16.msra.mxu1 %v13419_v25  ;;  %v5347_v57 = vmul.f32 %v11323_v34, %v13487_v31  ;;  %v1562_v25 = vld [vmem:[%s14665_s6 + $0x38] sm:$0xff] }
 0xe6c   :  { %11332 = vrcp.f32 %v5314_v11  ;;  %v5311_v60 = vpop.xlane.xlu0 %5310  ;;  %10964 = vmatprep.subr.bf16.mxu1 %v13421_v27  ;;  %v10971_v56 = vpack.c.bf16 %v1562_v25, %v1561_v3  ;;  %v8788_v25 = vld [vmem:[%s14667_s7 + $0x3] ss:$0 sm:$0xff] }
 0xe6d   :  { %v11325_v17 = vpop.eup %11324  ;;  %11334 = vrcp.f32 %v5311_v60  ;;  %10325 = vmatprep.mubr.msk.f32.mxu1 %vm2403_vm4, %v5347_v57 }
 0xe6e   :  { %v11327_v18 = vpop.eup %11326  ;;  %10326 = vmatmul.mubr.msk.f32.gmra.mrb[164].mxu1 %vm2403_vm4, %v5348_v49  ;;  %v5350_v43 = vmul.f32 %v11325_v17, %v13494_v4 }
 0xe6f   :  { %v5320_v31 = vpop.xlane.xlu1 %5319  ;;  %10966 = vmatpush3.bf16.msra.mxu1 %v13421_v27  ;;  %v5349_v41 = vmul.f32 %v11327_v18, %v13497_v28  ;;  %v1578_v27 = vld [vmem:[%s14665_s6 + $0xb8] sm:$0xff] }
 0xe70   :  { %11336 = vrcp.f32 %v5320_v31  ;;  %v5317_v50 = vpop.xlane.xlu0 %5316  ;;  %10968 = vmatprep.subr.bf16.mxu1 %v13423_v33  ;;  %v10979_v45 = vpack.c.bf16 %v1578_v27, %v1577_v9 }
 0xe71   :  { %11338 = vrcp.f32 %v5317_v50  ;;  %10328 = vmatprep.mubr.msk.f32.mxu1 %vm2403_vm4, %v5349_v41 }
 0xe72   :  { %v11329_v51 = vpop.eup %11328  ;;  %10329 = vmatmul.mubr.msk.f32.gmra.mrb[166].mxu1 %vm2403_vm4, %v5350_v43 }
 0xe73   :  { %v11331_v28 = vpop.eup %11330  ;;  %v5326_v39 = vpop.xlane.xlu1 %5325  ;;  %10970 = vmatpush3.bf16.msra.mxu1 %v13423_v33  ;;  %v5352_v6 = vmul.f32 %v11329_v51, %v13505_v44 }
 0xe74   :  { %11340 = vrcp.f32 %v5326_v39  ;;  %v5323_v4 = vpop.xlane.xlu0 %5322  ;;  %v5351_v12 = vmul.f32 %v11331_v28, %v13507_v8  ;;  %10972 = vmatprep.subr.bf16.mxu1 %v10971_v56 }
 0xe75   :  { %11342 = vrcp.f32 %v5323_v4 }
 0xe76   :  { %v11333_v2 = vpop.eup %11332  ;;  %10347 = vmatprep.mubr.msk.f32.mxu1 %vm2403_vm4, %v5351_v12 }
 0xe77   :  { %v11335_v54 = vpop.eup %11334  ;;  %10348 = vmatmul.mubr.msk.f32.vlgmr.msra.gmra.mrb[168].mxu1 %vm2403_vm4, %v5352_v6  ;;  %v5354_v33 = vmul.f32 %v11333_v2, %v13513_v15 }
 0xe78   :  { %v5353_v63 = vmul.f32 %v11335_v54, %v13515_v29  ;;  %10974 = vmatpush3.bf16.msra.mxu1 %v10971_v56 }
 0xe79   :  { %10980 = vmatprep.subr.bf16.mxu1 %v10979_v45 }
 0xe7a   :  { %v11337_v58 = vpop.eup %11336  ;;  %10350 = vmatprep.mubr.msk.f32.mxu1 %vm2403_vm4, %v5353_v63 }
 0xe7b   :  { %v11339_v8 = vpop.eup %11338  ;;  %10351 = vmatmul.mubr.msk.f32.gmra.mrb[170].mxu1 %vm2403_vm4, %v5354_v33  ;;  %v5356_v35 = vmul.f32 %v11337_v58, %v13521_v23  ;;  %v1569_v23 = vld [vmem:[%s14665_s6 + $0x70] sm:$0xff] }
 0xe7c   :  { %v5355_v44 = vmul.f32 %v11339_v8, %v13523_v14  ;;  %v1570_v14 = vld [vmem:[%s14665_s6 + $0x78] sm:$0xff] }
 0xe7e   :  { %v11341_v40 = vpop.eup %11340  ;;  %10353 = vmatprep.mubr.msk.f32.mxu1 %vm2403_vm4, %v5355_v44 }
 0xe7f   :  { %v11343_v62 = vpop.eup %11342  ;;  %10354 = vmatmul.mubr.msk.f32.gmra.mrb[172].mxu1 %vm2403_vm4, %v5356_v35  ;;  %v5358_v15 = vmul.f32 %v11341_v40, %v13529_v52  ;;  %v10975_v52 = vpack.c.bf16 %v1570_v14, %v1569_v23 }
 0xe80   :  { %v5357_v29 = vmul.f32 %v11343_v62, %v13531_v10 }
 0xe81   :  { %10976 = vmatprep.subr.bf16.mxu0 %v10975_v52 }
 0xe82   :  { %10356 = vmatprep.mubr.msk.f32.mxu1 %vm2403_vm4, %v5357_v29 }
 0xe83   :  { %10357 = vmatmul.mubr.msk.f32.gmra.mrb[174].mxu1 %vm2403_vm4, %v5358_v15 }
 0xe84   :  { %10389 = vmatprep.mubr.msk.f32.mxu1 %vm391_vm1, %v12192_v7 }
 0xe87   :  { %10390 = vmatmul.mubr.msk.f32.vlgmr.msra.gmra.mrb[176].mxu1 %vm391_vm1, %v12195_v5 }
 0xe88   :  { %10392 = vmatprep.mubr.msk.f32.mxu1 %vm391_vm1, %v12208_v22  ;;  %10982 = vmatpush3.bf16.msra.mxu1 %v10979_v45 }
 0xe8b   :  { %10393 = vmatmul.mubr.msk.f32.gmra.mrb[178].mxu1 %vm391_vm1, %v12211_v55 }
 0xe8c   :  { %10395 = vmatprep.mubr.msk.f32.mxu1 %vm391_vm1, %v12224_v26 }
 0xe8f   :  { %10396 = vmatmul.mubr.msk.f32.gmra.mrb[180].mxu1 %vm391_vm1, %v12227_v1 }
 0xe90   :  { %10398 = vmatprep.mubr.msk.f32.mxu1 %vm391_vm1, %v12240_v30 }
 0xe93   :  { %10399 = vmatmul.mubr.msk.f32.gmra.mrb[182].mxu1 %vm391_vm1, %v12243_v32 }
 0xe94   :  { %10401 = vmatprep.mubr.msk.f32.mxu1 %vm391_vm1, %v12256_v36 }
 0xe97   :  { %10402 = vmatmul.mubr.msk.f32.gmra.mrb[184].mxu1 %vm391_vm1, %v12259_v47 }
 0xe98   :  { %10404 = vmatprep.mubr.msk.f32.mxu1 %vm391_vm1, %v12272_v38 }
 0xe9b   :  { %10405 = vmatmul.mubr.msk.f32.gmra.mrb[186].mxu1 %vm391_vm1, %v12275_v53 }
 0xe9c   :  { %10407 = vmatprep.mubr.msk.f32.mxu1 %vm391_vm1, %v12288_v42 }
 0xe9f   :  { %10408 = vmatmul.mubr.msk.f32.gmra.mrb[188].mxu1 %vm391_vm1, %v12291_v21 }
 0xea0   :  { %10410 = vmatprep.mubr.msk.f32.mxu1 %vm391_vm1, %v12304_v46 }
 0xea3   :  { %10411 = vmatmul.mubr.msk.f32.gmra.mrb[190].mxu1 %vm391_vm1, %v12307_v48 }
 0xea4   :  { %10445 = vmatprep.mubr.msk.f32.mxu1 %vm391_vm1, %v12192_v7 }
 0xea7   :  { %10446 = vmatmul.mubr.msk.f32.vlgmr.msra.gmra.mrb[192].mxu1 %vm391_vm1, %v12195_v5 }
 0xea8   :  { %10448 = vmatprep.mubr.msk.f32.mxu1 %vm391_vm1, %v12208_v22 }
 0xeab   :  { %10449 = vmatmul.mubr.msk.f32.gmra.mrb[194].mxu1 %vm391_vm1, %v12211_v55 }
 0xeac   :  { %10451 = vmatprep.mubr.msk.f32.mxu1 %vm391_vm1, %v12224_v26 }
 0xeaf   :  { %10452 = vmatmul.mubr.msk.f32.gmra.mrb[196].mxu1 %vm391_vm1, %v12227_v1 }
 0xeb0   :  { %10454 = vmatprep.mubr.msk.f32.mxu1 %vm391_vm1, %v12240_v30 }
 0xeb3   :  { %10455 = vmatmul.mubr.msk.f32.gmra.mrb[198].mxu1 %vm391_vm1, %v12243_v32 }
 0xeb4   :  { %10457 = vmatprep.mubr.msk.f32.mxu1 %vm391_vm1, %v12256_v36 }
 0xeb7   :  { %10458 = vmatmul.mubr.msk.f32.gmra.mrb[200].mxu1 %vm391_vm1, %v12259_v47 }
 0xeb8   :  { %10460 = vmatprep.mubr.msk.f32.mxu1 %vm391_vm1, %v12272_v38 }
 0xebb   :  { %10461 = vmatmul.mubr.msk.f32.gmra.mrb[202].mxu1 %vm391_vm1, %v12275_v53 }
 0xebc   :  { %10463 = vmatprep.mubr.msk.f32.mxu1 %vm391_vm1, %v12288_v42 }
 0xebf   :  { %10464 = vmatmul.mubr.msk.f32.gmra.mrb[204].mxu1 %vm391_vm1, %v12291_v21 }
 0xec0   :  { %10466 = vmatprep.mubr.msk.f32.mxu1 %vm391_vm1, %v12304_v46 }
 0xec3   :  { %10467 = vmatmul.mubr.msk.f32.gmra.mrb[206].mxu1 %vm391_vm1, %v12307_v48 }
 0xf39   :  { %v10321_v10 = vpop.f32.mrb[160].mxu1 }
 0xf3a   :  { %v5449_v13 = vpop.f32.mrb[161].mxu1 }
 0xf3b   :  { %10361 = vmatprep.mubr.msk.f32.mxu0 %vm2096_vm2, %v5449_v13 }
 0xf3c   :  { %10362 = vmatmul.mubr.msk.f32.vlgmr.msra.gmra.mrb[96].mxu0 %vm2096_vm2, %v10321_v10 }
 0xf3d   :  { %v10324_v61 = vpop.f32.mrb[162].mxu1  ;;  %10978 = vmatpush3.bf16.msra.mxu0 %v10975_v52 }
 0xf3e   :  { %v5459_v24 = vpop.f32.mrb[163].mxu1 }
 0xf3f   :  { %10364 = vmatprep.mubr.msk.f32.mxu0 %vm2096_vm2, %v5459_v24 }
 0xf40   :  { %10365 = vmatmul.mubr.msk.f32.gmra.mrb[98].mxu0 %vm2096_vm2, %v10324_v61  ;;  %v8822_v61 = vld [vmem:[%s14667_s7 + $0xb] ss:$0 sm:$0xff] }
 0xf41   :  { %v10327_v16 = vpop.f32.mrb[164].mxu1 }
 0xf42   :  { %v5469_v19 = vpop.f32.mrb[165].mxu1 }
 0xf43   :  { %10367 = vmatprep.mubr.msk.f32.mxu0 %vm2096_vm2, %v5469_v19 }
 0xf44   :  { %10368 = vmatmul.mubr.msk.f32.gmra.mrb[100].mxu0 %vm2096_vm2, %v10327_v16 }
 0xf45   :  { %v10330_v37 = vpop.f32.mrb[166].mxu1 }
 0xf46   :  { %v5479_v0 = vpop.f32.mrb[167].mxu1 }
 0xf47   :  { %10370 = vmatprep.mubr.msk.f32.mxu0 %vm2096_vm2, %v5479_v0 }
 0xf48   :  { %10371 = vmatmul.mubr.msk.f32.gmra.mrb[102].mxu0 %vm2096_vm2, %v10330_v37 }
 0xf4a   :  { %v10349_v20 = vpop.f32.mrb[168].mxu1 }
 0xf4b   :  { %v5578_v34 = vpop.f32.mrb[169].mxu1 }
 0xf4c   :  { %10373 = vmatprep.mubr.msk.f32.mxu0 %vm2096_vm2, %v5578_v34 }
 0xf4d   :  { %10374 = vmatmul.mubr.msk.f32.gmra.mrb[104].mxu0 %vm2096_vm2, %v10349_v20 }
 0xf4e   :  { %v10352_v11 = vpop.f32.mrb[170].mxu1 }
 0xf4f   :  { %v5588_v57 = vpop.f32.mrb[171].mxu1 }
 0xf50   :  { %10376 = vmatprep.mubr.msk.f32.mxu0 %vm2096_vm2, %v5588_v57 }
 0xf51   :  { %10377 = vmatmul.mubr.msk.f32.gmra.mrb[106].mxu0 %vm2096_vm2, %v10352_v11 }
 0xf52   :  { %v10355_v60 = vpop.f32.mrb[172].mxu1 }
 0xf53   :  { %v5598_v49 = vpop.f32.mrb[173].mxu1 }
 0xf54   :  { %10379 = vmatprep.mubr.msk.f32.mxu0 %vm2096_vm2, %v5598_v49 }
 0xf55   :  { %10380 = vmatmul.mubr.msk.f32.gmra.mrb[108].mxu0 %vm2096_vm2, %v10355_v60 }
 0xf56   :  { %v10358_v17 = vpop.f32.mrb[174].mxu1 }
 0xf57   :  { %v5608_v3 = vpop.f32.mrb[175].mxu1 }
 0xf58   :  { %10382 = vmatprep.mubr.msk.f32.mxu0 %vm2096_vm2, %v5608_v3 }
 0xf59   :  { %10383 = vmatmul.mubr.msk.f32.gmra.mrb[110].mxu0 %vm2096_vm2, %v10358_v17 }
 0xf5a   :  { %v10391_v18 = vpop.f32.mrb[176].mxu1  ;;  %10417 = vmatprep.mubr.msk.f32.mxu0 %vm391_vm1, %v12192_v7 }
 0xf5b   :  { %v13684_v31 = vadd.f32 %v10391_v18, %v8788_v25  ;;  %v5901_v41 = vpop.f32.mrb[177].mxu1 }
 0xf5c   :  { %v5902_v10 = vadd.f32 %v8788_v25, %v5901_v41 }
 0xf5d   :  { %10418 = vmatmul.mubr.msk.f32.vlgmr.msra.gmra.mrb[136].mxu0 %vm391_vm1, %v12195_v5 }
 0xf5e   :  { %v10394_v50 = vpop.f32.mrb[178].mxu1  ;;  %10420 = vmatprep.mubr.msk.f32.mxu0 %vm391_vm1, %v12208_v22 }
 0xf5f   :  { %v13690_v43 = vadd.f32 %v10394_v50, %v8788_v25  ;;  %v5911_v56 = vpop.f32.mrb[179].mxu1 }
 0xf60   :  { %v13692_v51 = vadd.f32 %v8788_v25, %v5911_v56 }
 0xf61   :  { %10421 = vmatmul.mubr.msk.f32.gmra.mrb[138].mxu0 %vm391_vm1, %v12211_v55 }
 0xf62   :  { %v10397_v9 = vpop.f32.mrb[180].mxu1  ;;  %10423 = vmatprep.mubr.msk.f32.mxu0 %vm391_vm1, %v12224_v26 }
 0xf63   :  { %v13698_v27 = vadd.f32 %v10397_v9, %v8788_v25  ;;  %v5921_v28 = vpop.f32.mrb[181].mxu1 }
 0xf64   :  { %v13700_v39 = vadd.f32 %v8788_v25, %v5921_v28 }
 0xf65   :  { %10424 = vmatmul.mubr.msk.f32.gmra.mrb[140].mxu0 %vm391_vm1, %v12227_v1 }
 0xf66   :  { %v10400_v4 = vpop.f32.mrb[182].mxu1  ;;  %10426 = vmatprep.mubr.msk.f32.mxu0 %vm391_vm1, %v12240_v30 }
 0xf67   :  { %v13706_v12 = vadd.f32 %v10400_v4, %v8788_v25  ;;  %v5931_v6 = vpop.f32.mrb[183].mxu1 }
 0xf68   :  { %v13708_v45 = vadd.f32 %v8788_v25, %v5931_v6 }
 0xf69   :  { %10427 = vmatmul.mubr.msk.f32.gmra.mrb[142].mxu0 %vm391_vm1, %v12243_v32 }
 0xf6a   :  { %v10403_v2 = vpop.f32.mrb[184].mxu1  ;;  %10429 = vmatprep.mubr.msk.f32.mxu0 %vm391_vm1, %v12256_v36 }
 0xf6b   :  { %v13714_v54 = vadd.f32 %v10403_v2, %v8788_v25  ;;  %v5941_v63 = vpop.f32.mrb[185].mxu1 }
 0xf6c   :  { %v5942_v33 = vadd.f32 %v8788_v25, %v5941_v63 }
 0xf6d   :  { %10430 = vmatmul.mubr.msk.f32.gmra.mrb[144].mxu0 %vm391_vm1, %v12259_v47 }
 0xf6e   :  { %v10406_v58 = vpop.f32.mrb[186].mxu1  ;;  %10432 = vmatprep.mubr.msk.f32.mxu0 %vm391_vm1, %v12272_v38  ;;  %10513 = vmatprep.mubr.msk.f32.mxu1 %vm2096_vm2, %v5942_v33 }
 0xf6f   :  { %v13721_v8 = vadd.f32 %v10406_v58, %v8788_v25  ;;  %v5951_v44 = vpop.f32.mrb[187].mxu1 }
 0xf70   :  { %v13723_v35 = vadd.f32 %v8788_v25, %v5951_v44 }
 0xf71   :  { %10433 = vmatmul.mubr.msk.f32.gmra.mrb[146].mxu0 %vm391_vm1, %v12275_v53 }
 0xf72   :  { %v10409_v40 = vpop.f32.mrb[188].mxu1  ;;  %10435 = vmatprep.mubr.msk.f32.mxu0 %vm391_vm1, %v12288_v42 }
 0xf73   :  { %v13729_v62 = vadd.f32 %v10409_v40, %v8788_v25  ;;  %v5961_v29 = vpop.f32.mrb[189].mxu1 }
 0xf74   :  { %v13731_v15 = vadd.f32 %v8788_v25, %v5961_v29 }
 0xf75   :  { %10436 = vmatmul.mubr.msk.f32.gmra.mrb[148].mxu0 %vm391_vm1, %v12291_v21 }
 0xf76   :  { %v10412_v23 = vpop.f32.mrb[190].mxu1  ;;  %10438 = vmatprep.mubr.msk.f32.mxu0 %vm391_vm1, %v12304_v46 }
 0xf77   :  { %v13737_v14 = vadd.f32 %v10412_v23, %v8788_v25  ;;  %v5971_v52 = vpop.f32.mrb[191].mxu1 }
 0xf78   :  { %v13739_v13 = vadd.f32 %v8788_v25, %v5971_v52 }
 0xf79   :  { %10439 = vmatmul.mubr.msk.f32.gmra.mrb[150].mxu0 %vm391_vm1, %v12307_v48 }
 0xf7a   :  { %v10447_v24 = vpop.f32.mrb[192].mxu1  ;;  %10485 = vmatprep.mubr.msk.f32.mxu0 %vm2096_vm2, %v5902_v10 }
 0xf7b   :  { %v6209_v16 = vadd.f32 %v10447_v24, %v8822_v61  ;;  %v6203_v19 = vpop.f32.mrb[193].mxu1 }
 0xf7c   :  { %v6204_v37 = vadd.f32 %v8822_v61, %v6203_v19 }
 0xf7e   :  { %v13747_v0 = vpack.c.bf16 %v6209_v16, %v6204_v37  ;;  %v10450_v20 = vpop.f32.mrb[194].mxu1 }
 0xf7f   :  { %v6219_v34 = vadd.f32 %v10450_v20, %v8822_v61  ;;  %v6213_v11 = vpop.f32.mrb[195].mxu1 }
 0xf80   :  { %v6214_v57 = vadd.f32 %v8822_v61, %v6213_v11 }
 0xf82   :  { %v13749_v60 = vpack.c.bf16 %v6219_v34, %v6214_v57  ;;  %v10453_v49 = vpop.f32.mrb[196].mxu1 }
 0xf83   :  { %v6229_v17 = vadd.f32 %v10453_v49, %v8822_v61  ;;  %v6223_v3 = vpop.f32.mrb[197].mxu1  ;;  %v8805_v49 = vld [vmem:[%s14667_s7 + $0x7] ss:$0 sm:$0xff] }
 0xf84   :  { %v6224_v25 = vadd.f32 %v8822_v61, %v6223_v3 }
 0xf86   :  { %v13751_v18 = vpack.c.bf16 %v6229_v17, %v6224_v25  ;;  %v10456_v41 = vpop.f32.mrb[198].mxu1 }
 0xf87   :  { %v6239_v50 = vadd.f32 %v10456_v41, %v8822_v61  ;;  %v6233_v56 = vpop.f32.mrb[199].mxu1 }
 0xf88   :  { %v6234_v9 = vadd.f32 %v8822_v61, %v6233_v56 }
 0xf8a   :  { %v13753_v28 = vpack.c.bf16 %v6239_v50, %v6234_v9  ;;  %v10459_v4 = vpop.f32.mrb[200].mxu1 }
 0xf8b   :  { %v6249_v6 = vadd.f32 %v10459_v4, %v8822_v61  ;;  %v6243_v2 = vpop.f32.mrb[201].mxu1 }
 0xf8c   :  { %v6244_v63 = vadd.f32 %v8822_v61, %v6243_v2 }
 0xf8e   :  { %v13755_v33 = vpack.c.bf16 %v6249_v6, %v6244_v63  ;;  %v10462_v58 = vpop.f32.mrb[202].mxu1 }
 0xf8f   :  { %v6259_v44 = vadd.f32 %v10462_v58, %v8822_v61  ;;  %v6253_v40 = vpop.f32.mrb[203].mxu1 }
 0xf90   :  { %v6254_v29 = vadd.f32 %v8822_v61, %v6253_v40 }
 0xf92   :  { %v13757_v23 = vpack.c.bf16 %v6259_v44, %v6254_v29  ;;  %v10465_v52 = vpop.f32.mrb[204].mxu1 }
 0xf93   :  { %v6269_v10 = vadd.f32 %v10465_v52, %v8822_v61  ;;  %v6263_v24 = vpop.f32.mrb[205].mxu1 }
 0xf94   :  { %v6264_v16 = vadd.f32 %v8822_v61, %v6263_v24 }
 0xf96   :  { %v13759_v19 = vpack.c.bf16 %v6269_v10, %v6264_v16  ;;  %v10468_v37 = vpop.f32.mrb[206].mxu1 }
 0xf97   :  { %v6279_v20 = vadd.f32 %v10468_v37, %v8822_v61  ;;  %v6273_v34 = vpop.f32.mrb[207].mxu1 }
 0xf98   :  { %v6274_v11 = vadd.f32 %v8822_v61, %v6273_v34 }
 0xf9a   :  { %v13761_v57 = vpack.c.bf16 %v6279_v20, %v6274_v11 }
0x1030   :  { %v10419_v17 = vpop.f32.mrb[136].mxu0 }
0x1031   :  { %v6058_v3 = vadd.f32 %v10419_v17, %v8805_v49  ;;  %v6052_v25 = vpop.f32.mrb[137].mxu0 }
0x1032   :  { %v6053_v41 = vadd.f32 %v8805_v49, %v6052_v25 }
0x1034   :  { %v10983_v50 = vpack.c.bf16 %v6058_v3, %v6053_v41  ;;  %v10422_v56 = vpop.f32.mrb[138].mxu0 }
0x1035   :  { %v6068_v9 = vadd.f32 %v10422_v56, %v8805_v49  ;;  %v6062_v4 = vpop.f32.mrb[139].mxu0 }
0x1036   :  { %v6063_v6 = vadd.f32 %v8805_v49, %v6062_v4  ;;  %10985 = vmatprep.subr.msk.bf16.mxu0 %vm12364_vm3, %v10983_v50 }
0x1037   :  { %10988 = vmatpush3.bf16.xpose.msk.msra.mxu0 %vm12364_vm3, %v10983_v50 }
0x1038   :  { %v10989_v61 = vpack.c.bf16 %v6068_v9, %v6063_v6  ;;  %v10425_v2 = vpop.f32.mrb[140].mxu0 }
0x1039   :  { %v6078_v63 = vadd.f32 %v10425_v2, %v8805_v49  ;;  %v6072_v58 = vpop.f32.mrb[141].mxu0 }
0x103a   :  { %v6073_v44 = vadd.f32 %v8805_v49, %v6072_v58  ;;  %10991 = vmatprep.subr.msk.bf16.mxu0 %vm12364_vm3, %v10989_v61 }
0x103c   :  { %v10995_v40 = vpack.c.bf16 %v6078_v63, %v6073_v44  ;;  %v10428_v29 = vpop.f32.mrb[142].mxu0 }
0x103d   :  { %v6088_v52 = vadd.f32 %v10428_v29, %v8805_v49  ;;  %v6082_v10 = vpop.f32.mrb[143].mxu0 }
0x103e   :  { %v6083_v24 = vadd.f32 %v8805_v49, %v6082_v10 }
0x103f   :  { %10994 = vmatpush3.bf16.xpose.msk.msra.mxu0 %vm12364_vm3, %v10989_v61 }
0x1040   :  { %v11001_v16 = vpack.c.bf16 %v6088_v52, %v6083_v24  ;;  %v10431_v37 = vpop.f32.mrb[144].mxu0  ;;  %10997 = vmatprep.subr.msk.bf16.mxu0 %vm12364_vm3, %v10995_v40 }
0x1041   :  { %v6098_v20 = vadd.f32 %v10431_v37, %v8805_v49  ;;  %v6092_v34 = vpop.f32.mrb[145].mxu0 }
0x1042   :  { %v6093_v11 = vadd.f32 %v8805_v49, %v6092_v34 }
0x1044   :  { %v11007_v17 = vpack.c.bf16 %v6098_v20, %v6093_v11  ;;  %v10434_v3 = vpop.f32.mrb[146].mxu0 }
0x1045   :  { %v6108_v25 = vadd.f32 %v10434_v3, %v8805_v49  ;;  %v6102_v41 = vpop.f32.mrb[147].mxu0 }
0x1046   :  { %v6103_v50 = vadd.f32 %v8805_v49, %v6102_v41  ;;  %11009 = vmatprep.subr.msk.bf16.mxu1 %vm12364_vm3, %v11007_v17 }
0x1047   :  { %11000 = vmatpush3.bf16.xpose.msk.msra.mxu0 %vm12364_vm3, %v10995_v40  ;;  %11012 = vmatpush3.bf16.xpose.msk.msra.mxu1 %vm12364_vm3, %v11007_v17 }
0x1048   :  { %v11013_v56 = vpack.c.bf16 %v6108_v25, %v6103_v50  ;;  %v10437_v9 = vpop.f32.mrb[148].mxu0  ;;  %11003 = vmatprep.subr.msk.bf16.mxu0 %vm12364_vm3, %v11001_v16 }
0x1049   :  { %v6118_v4 = vadd.f32 %v10437_v9, %v8805_v49  ;;  %v6112_v6 = vpop.f32.mrb[149].mxu0 }
0x104a   :  { %v6113_v61 = vadd.f32 %v8805_v49, %v6112_v6  ;;  %11015 = vmatprep.subr.msk.bf16.mxu1 %vm12364_vm3, %v11013_v56 }
0x104c   :  { %v11019_v2 = vpack.c.bf16 %v6118_v4, %v6113_v61  ;;  %v10440_v63 = vpop.f32.mrb[150].mxu0 }
0x104d   :  { %v6128_v58 = vadd.f32 %v10440_v63, %v8805_v49  ;;  %v6122_v44 = vpop.f32.mrb[151].mxu0 }
0x104e   :  { %v6123_v29 = vadd.f32 %v8805_v49, %v6122_v44 }
0x104f   :  { %11006 = vmatpush3.bf16.xpose.msk.msra.mxu0 %vm12364_vm3, %v11001_v16  ;;  %11018 = vmatpush3.bf16.xpose.msk.msra.mxu1 %vm12364_vm3, %v11013_v56 }
0x1050   :  { %v11025_v40 = vpack.c.bf16 %v6128_v58, %v6123_v29  ;;  %11021 = vmatprep.subr.msk.bf16.mxu1 %vm12364_vm3, %v11019_v2  ;;  %11032 = vmatprep.subr.bf16.mxu0 %v13747_v0 }
0x1056   :  { %10486 = vmatmul.mubr.msk.f32.vlgmr.msra.gmra.mrb[152].mxu0 %vm2096_vm2, %v13684_v31 }
0x1057   :  { %10488 = vmatprep.mubr.msk.f32.mxu0 %vm2096_vm2, %v13692_v51  ;;  %11024 = vmatpush3.bf16.xpose.msk.msra.mxu1 %vm12364_vm3, %v11019_v2 }
0x1058   :  { %11034 = vmatpush3.bf16.msra.mxu0 %v13747_v0  ;;  %11027 = vmatprep.subr.msk.bf16.mxu1 %vm12364_vm3, %v11025_v40 }
0x1059   :  { %11036 = vmatprep.subr.bf16.mxu0 %v13749_v60 }
0x105a   :  { %10489 = vmatmul.mubr.msk.f32.gmra.mrb[154].mxu0 %vm2096_vm2, %v13690_v43 }
0x105b   :  { %10491 = vmatprep.mubr.msk.f32.mxu0 %vm2096_vm2, %v13700_v39 }
0x105c   :  { %11038 = vmatpush3.bf16.msra.mxu0 %v13749_v60 }
0x105d   :  { %11040 = vmatprep.subr.bf16.mxu0 %v13751_v18 }
0x105e   :  { %10492 = vmatmul.mubr.msk.f32.gmra.mrb[156].mxu0 %vm2096_vm2, %v13698_v27 }
0x105f   :  { %10494 = vmatprep.mubr.msk.f32.mxu0 %vm2096_vm2, %v13708_v45  ;;  %11030 = vmatpush3.bf16.xpose.msk.msra.mxu1 %vm12364_vm3, %v11025_v40 }
0x1060   :  { %11042 = vmatpush3.bf16.msra.mxu0 %v13751_v18  ;;  %11048 = vmatprep.subr.bf16.mxu1 %v13755_v33 }
0x1061   :  { %11044 = vmatprep.subr.bf16.mxu0 %v13753_v28 }
0x1062   :  { %10495 = vmatmul.mubr.msk.f32.gmra.mrb[158].mxu0 %vm2096_vm2, %v13706_v12 }
0x1064   :  { %11046 = vmatpush3.bf16.msra.mxu0 %v13753_v28 }
0x1066   :  { %10514 = vmatmul.mubr.msk.f32.vlgmr.msra.gmra.mrb[208].mxu1 %vm2096_vm2, %v13714_v54 }
0x1067   :  { %10516 = vmatprep.mubr.msk.f32.mxu1 %vm2096_vm2, %v13723_v35  ;;  %11050 = vmatpush3.bf16.msra.mxu1 %v13755_v33 }
0x1068   :  { %11052 = vmatprep.subr.bf16.mxu1 %v13757_v23 }
0x106a   :  { %10517 = vmatmul.mubr.msk.f32.gmra.mrb[210].mxu1 %vm2096_vm2, %v13721_v8 }
0x106b   :  { %10519 = vmatprep.mubr.msk.f32.mxu1 %vm2096_vm2, %v13731_v15  ;;  %11054 = vmatpush3.bf16.msra.mxu1 %v13757_v23 }
0x106c   :  { %11056 = vmatprep.subr.bf16.mxu1 %v13759_v19 }
0x106e   :  { %10520 = vmatmul.mubr.msk.f32.gmra.mrb[212].mxu1 %vm2096_vm2, %v13729_v62 }
0x106f   :  { %10522 = vmatprep.mubr.msk.f32.mxu1 %vm2096_vm2, %v13739_v13  ;;  %11058 = vmatpush3.bf16.msra.mxu1 %v13759_v19 }
0x1070   :  { %11060 = vmatprep.subr.bf16.mxu1 %v13761_v57 }
0x1072   :  { %10523 = vmatmul.mubr.msk.f32.gmra.mrb[214].mxu1 %vm2096_vm2, %v13737_v14 }
0x1073   :  { %11062 = vmatpush3.bf16.msra.mxu1 %v13761_v57 }
0x1129   :  { %v10487_v59 = vpop.f32.mrb[152].mxu0 }
0x112a   :  { %v6396_v31 = vpop.f32.mrb[153].mxu0  ;;  %v6591_v43 = vsel %vm2403_vm4, %v10487_v59, -inf }
0x112b   :  { %6592 = vmax.xlane.f32.xlu1 %v6591_v43  ;;  %v6588_v51 = vsel %vm2403_vm4, %v6396_v31, -inf }
0x112c   :  { %6589 = vmax.xlane.f32.xlu0 %v6588_v51 }
0x112d   :  { %v10490_v27 = vpop.f32.mrb[154].mxu0 }
0x112e   :  { %v6406_v39 = vpop.f32.mrb[155].mxu0  ;;  %v6597_v12 = vsel %vm2403_vm4, %v10490_v27, -inf }
0x112f   :  { %6598 = vmax.xlane.f32.xlu1 %v6597_v12  ;;  %v6594_v45 = vsel %vm2403_vm4, %v6406_v39, -inf }
0x1130   :  { %6595 = vmax.xlane.f32.xlu0 %v6594_v45 }
0x1131   :  { %v10493_v54 = vpop.f32.mrb[156].mxu0 }
0x1132   :  { %v6416_v8 = vpop.f32.mrb[157].mxu0  ;;  %v6603_v35 = vsel %vm2403_vm4, %v10493_v54, -inf }
0x1133   :  { %6604 = vmax.xlane.f32.xlu1 %v6603_v35  ;;  %v6600_v62 = vsel %vm2403_vm4, %v6416_v8, -inf }
0x1134   :  { %6601 = vmax.xlane.f32.xlu0 %v6600_v62 }
0x1135   :  { %v10496_v15 = vpop.f32.mrb[158].mxu0 }
0x1136   :  { %v6426_v14 = vpop.f32.mrb[159].mxu0  ;;  %v6609_v13 = vsel %vm2403_vm4, %v10496_v15, -inf }
0x1137   :  { %6610 = vmax.xlane.f32.xlu1 %v6609_v13  ;;  %v6606_v0 = vsel %vm2403_vm4, %v6426_v14, -inf }
0x1138   :  { %6607 = vmax.xlane.f32.xlu0 %v6606_v0 }
0x1139   :  { %v13850_v60 = vpop.f32.mrb[208].mxu1 }
0x113a   :  { %v13852_v18 = vpop.f32.mrb[209].mxu1  ;;  %v6615_v28 = vsel %vm2403_vm4, %v13850_v60, -inf }
0x113b   :  { %6616 = vmax.xlane.f32.xlu1 %v6615_v28  ;;  %v6612_v33 = vsel %vm2403_vm4, %v13852_v18, -inf }
0x113c   :  { %6613 = vmax.xlane.f32.xlu0 %v6612_v33 }
0x113d   :  { %v13858_v23 = vpop.f32.mrb[210].mxu1 }
0x113e   :  { %v13860_v19 = vpop.f32.mrb[211].mxu1  ;;  %v6621_v57 = vsel %vm2403_vm4, %v13858_v23, -inf }
0x113f   :  { %6622 = vmax.xlane.f32.xlu1 %v6621_v57  ;;  %v6618_v49 = vsel %vm2403_vm4, %v13860_v19, -inf }
0x1140   :  { %6619 = vmax.xlane.f32.xlu0 %v6618_v49 }
0x1141   :  { %v13866_v52 = vpop.f32.mrb[212].mxu1 }
0x1142   :  { %v13868_v10 = vpop.f32.mrb[213].mxu1  ;;  %v6627_v24 = vsel %vm2403_vm4, %v13866_v52, -inf }
0x1143   :  { %6628 = vmax.xlane.f32.xlu1 %v6627_v24  ;;  %v6624_v16 = vsel %vm2403_vm4, %v13868_v10, -inf }
0x1144   :  { %6625 = vmax.xlane.f32.xlu0 %v6624_v16 }
0x1145   :  { %v13874_v37 = vpop.f32.mrb[214].mxu1 }
0x1146   :  { %v13876_v20 = vpop.f32.mrb[215].mxu1  ;;  %v6633_v34 = vsel %vm2403_vm4, %v13874_v37, -inf }
0x1147   :  { %6634 = vmax.xlane.f32.xlu1 %v6633_v34  ;;  %v6630_v11 = vsel %vm2403_vm4, %v13876_v20, -inf }
0x1148   :  { %6631 = vmax.xlane.f32.xlu0 %v6630_v11 }
0x11b8   :  { %v6593_v17 = vpop.xlane.xlu1 %6592 }
0x11b9   :  { %v6637_v3 = vsub.f32 %v10487_v59, %v6593_v17  ;;  %v6590_v25 = vpop.xlane.xlu0 %6589 }
0x11ba   :  { %v6636_v41 = vsub.f32 %v6396_v31, %v6590_v25 }
0x11bb   :  { %v6654_v50 = vmul.f32 1.442695, %v6637_v3 }
0x11bc   :  { %v6652_v56 = vmul.f32 1.442695, %v6636_v41  ;;  %v6599_v9 = vpop.xlane.xlu1 %6598 }
0x11bd   :  { %11344 = vpow2.f32 %v6654_v50  ;;  %v6639_v4 = vsub.f32 %v10490_v27, %v6599_v9  ;;  %v6596_v6 = vpop.xlane.xlu0 %6595 }
0x11be   :  { %11346 = vpow2.f32 %v6652_v56  ;;  %v6638_v61 = vsub.f32 %v6406_v39, %v6596_v6 }
0x11bf   :  { %v6658_v2 = vmul.f32 1.442695, %v6639_v4 }
0x11c0   :  { %v6656_v63 = vmul.f32 1.442695, %v6638_v61  ;;  %v6605_v58 = vpop.xlane.xlu1 %6604 }
0x11c1   :  { %11348 = vpow2.f32 %v6658_v2  ;;  %v6641_v44 = vsub.f32 %v10493_v54, %v6605_v58  ;;  %v6602_v29 = vpop.xlane.xlu0 %6601 }
0x11c2   :  { %11350 = vpow2.f32 %v6656_v63  ;;  %v6640_v40 = vsub.f32 %v6416_v8, %v6602_v29 }
0x11c3   :  { %v6662_v43 = vmul.f32 1.442695, %v6641_v44 }
0x11c4   :  { %v6660_v59 = vmul.f32 1.442695, %v6640_v40  ;;  %v6611_v51 = vpop.xlane.xlu1 %6610 }
0x11c5   :  { %11352 = vpow2.f32 %v6662_v43  ;;  %v6643_v31 = vsub.f32 %v10496_v15, %v6611_v51  ;;  %v6608_v12 = vpop.xlane.xlu0 %6607 }
0x11c6   :  { %11354 = vpow2.f32 %v6660_v59  ;;  %v6642_v45 = vsub.f32 %v6426_v14, %v6608_v12 }
0x11c7   :  { %v13882_v27 = vpop.eup %11344  ;;  %v6666_v35 = vmul.f32 1.442695, %v6643_v31 }
0x11c8   :  { %v13884_v39 = vpop.eup %11346  ;;  %v6664_v62 = vmul.f32 1.442695, %v6642_v45  ;;  %v6617_v13 = vpop.xlane.xlu1 %6616  ;;  %v6687_v54 = vsel %vm2403_vm4, %v13882_v27, 0.0 }
0x11c9   :  { %11356 = vpow2.f32 %v6666_v35  ;;  %v6645_v8 = vsub.f32 %v13850_v60, %v6617_v13  ;;  %6688 = vadd.xlane.f32.xlu1 %v6687_v54  ;;  %v6614_v0 = vpop.xlane.xlu0 %6613  ;;  %v6684_v15 = vsel %vm2403_vm4, %v13884_v39, 0.0 }
0x11ca   :  { %11358 = vpow2.f32 %v6664_v62  ;;  %v6644_v14 = vsub.f32 %v13852_v18, %v6614_v0  ;;  %6685 = vadd.xlane.f32.xlu0 %v6684_v15 }
0x11cb   :  { %v13892_v28 = vpop.eup %11348  ;;  %v6670_v33 = vmul.f32 1.442695, %v6645_v8 }
0x11cc   :  { %v13894_v57 = vpop.eup %11350  ;;  %v6668_v49 = vmul.f32 1.442695, %v6644_v14  ;;  %v6623_v24 = vpop.xlane.xlu1 %6622  ;;  %v6693_v16 = vsel %vm2403_vm4, %v13892_v28, 0.0 }
0x11cd   :  { %11360 = vpow2.f32 %v6670_v33  ;;  %v6647_v60 = vsub.f32 %v13858_v23, %v6623_v24  ;;  %6694 = vadd.xlane.f32.xlu1 %v6693_v16  ;;  %v6620_v34 = vpop.xlane.xlu0 %6619  ;;  %v6690_v11 = vsel %vm2403_vm4, %v13894_v57, 0.0  ;;  %v1594_v24 = vld [vmem:[%s14668_s8 + $0xc] sm:$0xf] }
0x11ce   :  { %11362 = vpow2.f32 %v6668_v49  ;;  %v6646_v18 = vsub.f32 %v13860_v19, %v6620_v34  ;;  %6691 = vadd.xlane.f32.xlu0 %v6690_v11  ;;  %10581 = vmatprep.subr.msk.mxu0 %vm4079_vm5, %v1594_v24 }
0x11cf   :  { %v13902_v17 = vpop.eup %11352  ;;  %v6674_v3 = vmul.f32 1.442695, %v6647_v60 }
0x11d0   :  { %v13904_v25 = vpop.eup %11354  ;;  %v6672_v41 = vmul.f32 1.442695, %v6646_v18  ;;  %v6629_v50 = vpop.xlane.xlu1 %6628  ;;  %v6699_v56 = vsel %vm2403_vm4, %v13902_v17, 0.0 }
0x11d1   :  { %11364 = vpow2.f32 %v6674_v3  ;;  %v6649_v23 = vsub.f32 %v13866_v52, %v6629_v50  ;;  %6700 = vadd.xlane.f32.xlu1 %v6699_v56  ;;  %v6626_v9 = vpop.xlane.xlu0 %6625  ;;  %v6696_v4 = vsel %vm2403_vm4, %v13904_v25, 0.0 }
0x11d2   :  { %11366 = vpow2.f32 %v6672_v41  ;;  %v6648_v19 = vsub.f32 %v13868_v10, %v6626_v9  ;;  %6697 = vadd.xlane.f32.xlu0 %v6696_v4 }
0x11d3   :  { %v13912_v6 = vpop.eup %11356  ;;  %v6678_v61 = vmul.f32 1.442695, %v6649_v23 }
0x11d4   :  { %v13914_v2 = vpop.eup %11358  ;;  %v6676_v63 = vmul.f32 1.442695, %v6648_v19  ;;  %v6635_v58 = vpop.xlane.xlu1 %6634  ;;  %v6705_v44 = vsel %vm2403_vm4, %v13912_v6, 0.0 }
0x11d5   :  { %11368 = vpow2.f32 %v6678_v61  ;;  %v6651_v52 = vsub.f32 %v13874_v37, %v6635_v58  ;;  %6706 = vadd.xlane.f32.xlu1 %v6705_v44  ;;  %v6632_v29 = vpop.xlane.xlu0 %6631  ;;  %v6702_v40 = vsel %vm2403_vm4, %v13914_v2, 0.0 }
0x11d6   :  { %11370 = vpow2.f32 %v6676_v63  ;;  %v6650_v10 = vsub.f32 %v13876_v20, %v6632_v29  ;;  %6703 = vadd.xlane.f32.xlu0 %v6702_v40 }
0x11d7   :  { %v13922_v43 = vpop.eup %11360  ;;  %v6682_v59 = vmul.f32 1.442695, %v6651_v52 }
0x11d8   :  { %v13924_v51 = vpop.eup %11362  ;;  %v6680_v31 = vmul.f32 1.442695, %v6650_v10  ;;  %v6711_v12 = vsel %vm2403_vm4, %v13922_v43, 0.0 }
0x11d9   :  { %11372 = vpow2.f32 %v6682_v59  ;;  %6712 = vadd.xlane.f32.xlu1 %v6711_v12  ;;  %v6708_v37 = vsel %vm2403_vm4, %v13924_v51, 0.0 }
0x11da   :  { %11374 = vpow2.f32 %v6680_v31  ;;  %6709 = vadd.xlane.f32.xlu0 %v6708_v37 }
0x11db   :  { %v13930_v45 = vpop.eup %11364 }
0x11dc   :  { %v13932_v20 = vpop.eup %11366  ;;  %v6717_v35 = vsel %vm2403_vm4, %v13930_v45, 0.0 }
0x11dd   :  { %6718 = vadd.xlane.f32.xlu1 %v6717_v35  ;;  %v6714_v62 = vsel %vm2403_vm4, %v13932_v20, 0.0 }
0x11de   :  { %6715 = vadd.xlane.f32.xlu0 %v6714_v62 }
0x11df   :  { %v13938_v13 = vpop.eup %11368 }
0x11e0   :  { %v13940_v54 = vpop.eup %11370  ;;  %v6723_v8 = vsel %vm2403_vm4, %v13938_v13, 0.0 }
0x11e1   :  { %6724 = vadd.xlane.f32.xlu1 %v6723_v8  ;;  %v6720_v0 = vsel %vm2403_vm4, %v13940_v54, 0.0 }
0x11e2   :  { %6721 = vadd.xlane.f32.xlu0 %v6720_v0 }
0x11e3   :  { %v13946_v15 = vpop.eup %11372 }
0x11e4   :  { %v13948_v14 = vpop.eup %11374  ;;  %v6729_v33 = vsel %vm2403_vm4, %v13946_v15, 0.0 }
0x11e5   :  { %6730 = vadd.xlane.f32.xlu1 %v6729_v33  ;;  %v6726_v49 = vsel %vm2403_vm4, %v13948_v14, 0.0 }
0x11e6   :  { %6727 = vadd.xlane.f32.xlu0 %v6726_v49 }
0x1256   :  { %v6689_v16 = vpop.xlane.xlu1 %6688 }
0x1257   :  { %11376 = vrcp.f32 %v6689_v16  ;;  %v6686_v60 = vpop.xlane.xlu0 %6685 }
0x1258   :  { %11378 = vrcp.f32 %v6686_v60 }
0x125a   :  { %v6695_v34 = vpop.xlane.xlu1 %6694 }
0x125b   :  { %11380 = vrcp.f32 %v6695_v34  ;;  %v6692_v11 = vpop.xlane.xlu0 %6691 }
0x125c   :  { %11382 = vrcp.f32 %v6692_v11 }
0x125e   :  { %v6701_v18 = vpop.xlane.xlu1 %6700 }
0x125f   :  { %11384 = vrcp.f32 %v6701_v18  ;;  %v6698_v3 = vpop.xlane.xlu0 %6697 }
0x1260   :  { %11386 = vrcp.f32 %v6698_v3 }
0x1261   :  { %v11377_v41 = vpop.eup %11376 }
0x1262   :  { %v11379_v50 = vpop.eup %11378  ;;  %v6707_v56 = vpop.xlane.xlu1 %6706  ;;  %v6749_v4 = vmul.f32 %v11377_v41, %v13882_v27 }
0x1263   :  { %11388 = vrcp.f32 %v6707_v56  ;;  %v6704_v23 = vpop.xlane.xlu0 %6703  ;;  %v6748_v9 = vmul.f32 %v11379_v50, %v13884_v39 }
0x1264   :  { %11390 = vrcp.f32 %v6704_v23 }
0x1265   :  { %v11381_v19 = vpop.eup %11380  ;;  %10541 = vmatprep.mubr.msk.f32.mxu0 %vm2403_vm4, %v6748_v9 }
0x1266   :  { %v11383_v61 = vpop.eup %11382  ;;  %v6713_v63 = vpop.xlane.xlu1 %6712  ;;  %10542 = vmatmul.mubr.msk.f32.vlgmr.msra.gmra.mrb[160].mxu0 %vm2403_vm4, %v6749_v4  ;;  %v6751_v52 = vmul.f32 %v11381_v19, %v13892_v28 }
0x1267   :  { %11392 = vrcp.f32 %v6713_v63  ;;  %v6710_v58 = vpop.xlane.xlu0 %6709  ;;  %v6750_v44 = vmul.f32 %v11383_v61, %v13894_v57  ;;  %10582 = vmatpush3.msk.msra.mxu0 %vm4079_vm5, %v1594_v24 }
0x1268   :  { %11394 = vrcp.f32 %v6710_v58 }
0x1269   :  { %v11385_v39 = vpop.eup %11384  ;;  %10544 = vmatprep.mubr.msk.f32.mxu0 %vm2403_vm4, %v6750_v44  ;;  %v14010_v44 = vld [vmem:[%s14666_s13] sm:$0x7f] }
0x126a   :  { %v11387_v27 = vpop.eup %11386  ;;  %v6719_v29 = vpop.xlane.xlu1 %6718  ;;  %10545 = vmatmul.mubr.msk.f32.gmra.mrb[162].mxu0 %vm2403_vm4, %v6751_v52  ;;  %v6753_v59 = vmul.f32 %v11385_v39, %v13902_v17  ;;  %v14723_v52 = vld [vmem:[#allocation2_spill] sm:$0xff] }
0x126b   :  { %11396 = vrcp.f32 %v6719_v29  ;;  %v6716_v40 = vpop.xlane.xlu0 %6715  ;;  %v6752_v10 = vmul.f32 %v11387_v27, %v13904_v25  ;;  %v14724_v39 = vsub.s32 1, %v14723_v52 }
0x126c   :  { %11398 = vrcp.f32 %v6716_v40 }
0x126d   :  { %v11389_v57 = vpop.eup %11388  ;;  %10547 = vmatprep.mubr.msk.f32.mxu0 %vm2403_vm4, %v6752_v10  ;;  %v14015_v27 = vrot.slane %v14010_v44, %v14724_v39 }
0x126e   :  { %v11391_v31 = vpop.eup %11390  ;;  %v6725_v12 = vpop.xlane.xlu1 %6724  ;;  %10548 = vmatmul.mubr.msk.f32.gmra.mrb[164].mxu0 %vm2403_vm4, %v6753_v59  ;;  %v6755_v35 = vmul.f32 %v11389_v57, %v13912_v6 }
0x126f   :  { %11400 = vrcp.f32 %v6725_v12  ;;  %v6722_v28 = vpop.xlane.xlu0 %6721  ;;  %v6754_v37 = vmul.f32 %v11391_v31, %v13914_v2 }
0x1270   :  { %11402 = vrcp.f32 %v6722_v28 }
0x1271   :  { %v11393_v62 = vpop.eup %11392  ;;  %10550 = vmatprep.mubr.msk.f32.mxu0 %vm2403_vm4, %v6754_v37 }
0x1272   :  { %v11395_v25 = vpop.eup %11394  ;;  %v6731_v8 = vpop.xlane.xlu1 %6730  ;;  %10551 = vmatmul.mubr.msk.f32.gmra.mrb[166].mxu0 %vm2403_vm4, %v6755_v35  ;;  %v6757_v33 = vmul.f32 %v11393_v62, %v13922_v43 }
0x1273   :  { %11404 = vrcp.f32 %v6731_v8  ;;  %v6728_v17 = vpop.xlane.xlu0 %6727  ;;  %v6756_v0 = vmul.f32 %v11395_v25, %v13924_v51 }
0x1274   :  { %11406 = vrcp.f32 %v6728_v17 }
0x1275   :  { %v11397_v49 = vpop.eup %11396  ;;  %10569 = vmatprep.mubr.msk.f32.mxu1 %vm2403_vm4, %v6756_v0 }
0x1276   :  { %v11399_v2 = vpop.eup %11398  ;;  %10570 = vmatmul.mubr.msk.f32.vlgmr.msra.gmra.mrb[216].mxu1 %vm2403_vm4, %v6757_v33  ;;  %v6759_v24 = vmul.f32 %v11397_v49, %v13930_v45 }
0x1277   :  { %v6758_v6 = vmul.f32 %v11399_v2, %v13932_v20 }
0x1279   :  { %v11401_v16 = vpop.eup %11400  ;;  %10572 = vmatprep.mubr.msk.f32.mxu1 %vm2403_vm4, %v6758_v6 }
0x127a   :  { %v11403_v60 = vpop.eup %11402  ;;  %10573 = vmatmul.mubr.msk.f32.gmra.mrb[218].mxu1 %vm2403_vm4, %v6759_v24  ;;  %v6761_v43 = vmul.f32 %v11401_v16, %v13938_v13 }
0x127b   :  { %v6760_v51 = vmul.f32 %v11403_v60, %v13940_v54 }
0x127d   :  { %v11405_v34 = vpop.eup %11404  ;;  %10575 = vmatprep.mubr.msk.f32.mxu1 %vm2403_vm4, %v6760_v51 }
0x127e   :  { %v11407_v11 = vpop.eup %11406  ;;  %10576 = vmatmul.mubr.msk.f32.gmra.mrb[220].mxu1 %vm2403_vm4, %v6761_v43  ;;  %v6763_v45 = vmul.f32 %v11405_v34, %v13946_v15 }
0x127f   :  { %v6762_v20 = vmul.f32 %v11407_v11, %v13948_v14 }
0x1281   :  { %10578 = vmatprep.mubr.msk.f32.mxu1 %vm2403_vm4, %v6762_v20 }
0x1282   :  { %10579 = vmatmul.mubr.msk.f32.gmra.mrb[222].mxu1 %vm2403_vm4, %v6763_v45 }
0x1339   :  { %v10543_v18 = vpop.f32.mrb[160].mxu0 }
0x133a   :  { %v6854_v3 = vpop.f32.mrb[161].mxu0 }
0x133b   :  { %10583 = vmatprep.mubr.msk.f32.mxu0 %vm2096_vm2, %v6854_v3 }
0x133c   :  { %10584 = vmatmul.mubr.msk.f32.vlgmr.msra.gmra.mrb[96].mxu0 %vm2096_vm2, %v10543_v18 }
0x133d   :  { %v10546_v13 = vpop.f32.mrb[162].mxu0 }
0x133e   :  { %v6864_v54 = vpop.f32.mrb[163].mxu0 }
0x133f   :  { %10586 = vmatprep.mubr.msk.f32.mxu0 %vm2096_vm2, %v6864_v54 }
0x1340   :  { %10587 = vmatmul.mubr.msk.f32.gmra.mrb[98].mxu0 %vm2096_vm2, %v10546_v13 }
0x1341   :  { %v10549_v41 = vpop.f32.mrb[164].mxu0 }
0x1342   :  { %v6874_v14 = vpop.f32.mrb[165].mxu0 }
0x1343   :  { %10589 = vmatprep.mubr.msk.f32.mxu0 %vm2096_vm2, %v6874_v14 }
0x1344   :  { %10590 = vmatmul.mubr.msk.f32.gmra.mrb[100].mxu0 %vm2096_vm2, %v10549_v41 }
0x1345   :  { %v10552_v15 = vpop.f32.mrb[166].mxu0 }
0x1346   :  { %v6884_v50 = vpop.f32.mrb[167].mxu0 }
0x1347   :  { %10592 = vmatprep.mubr.msk.f32.mxu0 %vm2096_vm2, %v6884_v50 }
0x1348   :  { %10593 = vmatmul.mubr.msk.f32.gmra.mrb[102].mxu0 %vm2096_vm2, %v10552_v15 }
0x1349   :  { %v10571_v56 = vpop.f32.mrb[216].mxu1 }
0x134a   :  { %v6983_v23 = vpop.f32.mrb[217].mxu1 }
0x134b   :  { %10595 = vmatprep.mubr.msk.f32.mxu0 %vm2096_vm2, %v6983_v23 }
0x134c   :  { %10596 = vmatmul.mubr.msk.f32.gmra.mrb[104].mxu0 %vm2096_vm2, %v10571_v56 }
0x134d   :  { %v10574_v9 = vpop.f32.mrb[218].mxu1 }
0x134e   :  { %v6993_v4 = vpop.f32.mrb[219].mxu1 }
0x134f   :  { %10598 = vmatprep.mubr.msk.f32.mxu0 %vm2096_vm2, %v6993_v4 }
0x1350   :  { %10599 = vmatmul.mubr.msk.f32.gmra.mrb[106].mxu0 %vm2096_vm2, %v10574_v9 }
0x1351   :  { %v10577_v19 = vpop.f32.mrb[220].mxu1 }
0x1352   :  { %v7003_v61 = vpop.f32.mrb[221].mxu1 }
0x1353   :  { %10601 = vmatprep.mubr.msk.f32.mxu0 %vm2096_vm2, %v7003_v61 }
0x1354   :  { %10602 = vmatmul.mubr.msk.f32.gmra.mrb[108].mxu0 %vm2096_vm2, %v10577_v19 }
0x1355   :  { %v10580_v63 = vpop.f32.mrb[222].mxu1 }
0x1356   :  { %v7013_v58 = vpop.f32.mrb[223].mxu1 }
0x1357   :  { %10604 = vmatprep.mubr.msk.f32.mxu0 %vm2096_vm2, %v7013_v58 }
0x1358   :  { %10605 = vmatmul.mubr.msk.f32.gmra.mrb[110].mxu0 %vm2096_vm2, %v10580_v63 }
0x140f   :  { %v10585_v29 = vpop.f32.mrb[96].mxu0 }
0x1410   :  { %v7239_v40 = vadd.f32 %v10585_v29, %v14015_v27  ;;  %v7139_v10 = vpop.f32.mrb[97].mxu0 }
0x1411   :  { %v7238_v59 = vadd.f32 %v14015_v27, %v7139_v10 }
0x1412   :  { %v14020_v57 = vadd.f32 %v7239_v40, %v12195_v5 }
0x1413   :  { %v14023_v31 = vadd.f32 %v7238_v59, %v12192_v7  ;;  %v10588_v12 = vpop.f32.mrb[98].mxu0 }
0x1414   :  { %v7241_v28 = vadd.f32 %v10588_v12, %v14015_v27  ;;  %v7149_v37 = vpop.f32.mrb[99].mxu0  ;;  %v7273_v35 = vsel %vm391_vm1, %v14020_v57, 0.0  ;;  %v7335_v62 = vmul.f32 %v14020_v57, %v14020_v57 }
0x1415   :  { %v7240_v25 = vadd.f32 %v14015_v27, %v7149_v37  ;;  %7274 = vadd.xlane.f32.xlu1 %v7273_v35  ;;  %v7270_v5 = vsel %vm391_vm1, %v14023_v31, 0.0  ;;  %v7334_v7 = vmul.f32 %v14023_v31, %v14023_v31 }
0x1416   :  { %7271 = vadd.xlane.f32.xlu0 %v7270_v5  ;;  %v14036_v17 = vadd.f32 %v7241_v28, %v12211_v55  ;;  %v7353_v33 = vsel %vm391_vm1, %v7335_v62, 0.0 }
0x1417   :  { %v10591_v8 = vpop.f32.mrb[100].mxu0  ;;  %v14040_v49 = vadd.f32 %v7240_v25, %v12208_v22  ;;  %v7350_v2 = vsel %vm391_vm1, %v7334_v7, 0.0 }
0x1418   :  { %v7159_v0 = vpop.f32.mrb[101].mxu0  ;;  %v7243_v24 = vadd.f32 %v10591_v8, %v14015_v27  ;;  %v7279_v60 = vsel %vm391_vm1, %v14036_v17, 0.0  ;;  %v7337_v55 = vmul.f32 %v14036_v17, %v14036_v17 }
0x1419   :  { %7354 = vadd.xlane.f32.xlu1 %v7353_v33  ;;  %v7242_v51 = vadd.f32 %v14015_v27, %v7159_v0  ;;  %v7276_v22 = vsel %vm391_vm1, %v14040_v49, 0.0  ;;  %v7336_v43 = vmul.f32 %v14040_v49, %v14040_v49 }
0x141a   :  { %7351 = vadd.xlane.f32.xlu0 %v7350_v2  ;;  %v14054_v11 = vadd.f32 %v7243_v24, %v12227_v1  ;;  %v7359_v45 = vsel %vm391_vm1, %v7337_v55, 0.0 }
0x141b   :  { %v10594_v6 = vpop.f32.mrb[102].mxu0  ;;  %v14058_v18 = vadd.f32 %v7242_v51, %v12224_v26  ;;  %v7356_v3 = vsel %vm391_vm1, %v7336_v43, 0.0  ;;  %v7566_v43 = vld [vmem:[%s14669_s9] sm:$0xff] }
0x141c   :  { %v7169_v16 = vpop.f32.mrb[103].mxu0  ;;  %v7245_v54 = vadd.f32 %v10594_v6, %v14015_v27  ;;  %v7285_v14 = vsel %vm391_vm1, %v14054_v11, 0.0  ;;  %v7339_v1 = vmul.f32 %v14054_v11, %v14054_v11 }
0x141d   :  { %7280 = vadd.xlane.f32.xlu1 %v7279_v60  ;;  %v7244_v15 = vadd.f32 %v14015_v27, %v7169_v16  ;;  %v7282_v26 = vsel %vm391_vm1, %v14058_v18, 0.0  ;;  %v7338_v50 = vmul.f32 %v14058_v18, %v14058_v18 }
0x141e   :  { %7277 = vadd.xlane.f32.xlu0 %v7276_v22  ;;  %v14072_v23 = vadd.f32 %v7245_v54, %v12243_v32  ;;  %v7365_v4 = vsel %vm391_vm1, %v7339_v1, 0.0 }
0x141f   :  { %v10597_v34 = vpop.f32.mrb[104].mxu0  ;;  %v14076_v19 = vadd.f32 %v7244_v15, %v12240_v30  ;;  %v7362_v61 = vsel %vm391_vm1, %v7338_v50, 0.0 }
0x1420   :  { %v7179_v20 = vpop.f32.mrb[105].mxu0  ;;  %v7247_v58 = vadd.f32 %v10597_v34, %v14015_v27  ;;  %v7291_v29 = vsel %vm391_vm1, %v14072_v23, 0.0  ;;  %v7341_v32 = vmul.f32 %v14072_v23, %v14072_v23  ;;  %v7567_v34 = vld [vmem:[%s14669_s9 + $0x8] sm:$0xff] }
0x1421   :  { %7360 = vadd.xlane.f32.xlu1 %v7359_v45  ;;  %v7246_v40 = vadd.f32 %v14015_v27, %v7179_v20  ;;  %v7288_v30 = vsel %vm391_vm1, %v14076_v19, 0.0  ;;  %v7340_v10 = vmul.f32 %v14076_v19, %v14076_v19  ;;  %v11063_v20 = vpack.c.bf16 %v7567_v34, %v7566_v43 }
0x1422   :  { %7357 = vadd.xlane.f32.xlu0 %v7356_v3  ;;  %v14090_v59 = vadd.f32 %v7247_v58, %v12259_v47  ;;  %v7371_v12 = vsel %vm391_vm1, %v7341_v32, 0.0 }
0x1423   :  { %v10600_v13 = vpop.f32.mrb[106].mxu0  ;;  %v14094_v28 = vadd.f32 %v7246_v40, %v12256_v36  ;;  %v7368_v37 = vsel %vm391_vm1, %v7340_v10, 0.0  ;;  %11064 = vmatprep.subr.bf16.mxu1 %v11063_v20 }
0x1424   :  { %v7189_v41 = vpop.f32.mrb[107].mxu0  ;;  %v7249_v35 = vadd.f32 %v10600_v13, %v14015_v27  ;;  %v7297_v62 = vsel %vm391_vm1, %v14090_v59, 0.0  ;;  %v7343_v25 = vmul.f32 %v14090_v59, %v14090_v59  ;;  %11066 = vmatpush3.bf16.msra.mxu1 %v11063_v20 }
0x1425   :  { %7286 = vadd.xlane.f32.xlu1 %v7285_v14  ;;  %v7248_v47 = vadd.f32 %v14015_v27, %v7189_v41  ;;  %v7294_v5 = vsel %vm391_vm1, %v14094_v28, 0.0  ;;  %v7342_v36 = vmul.f32 %v14094_v28, %v14094_v28 }
0x1426   :  { %7283 = vadd.xlane.f32.xlu0 %v7282_v26  ;;  %v14108_v7 = vadd.f32 %v7249_v35, %v12275_v53  ;;  %v7377_v8 = vsel %vm391_vm1, %v7343_v25, 0.0 }
0x1427   :  { %v10603_v56 = vpop.f32.mrb[108].mxu0  ;;  %v14112_v0 = vadd.f32 %v7248_v47, %v12272_v38  ;;  %v7374_v33 = vsel %vm391_vm1, %v7342_v36, 0.0 }
0x1428   :  { %v7199_v9 = vpop.f32.mrb[109].mxu0  ;;  %v7251_v2 = vadd.f32 %v10603_v56, %v14015_v27  ;;  %v7303_v6 = vsel %vm391_vm1, %v14108_v7, 0.0  ;;  %v7345_v24 = vmul.f32 %v14108_v7, %v14108_v7 }
0x1429   :  { %7366 = vadd.xlane.f32.xlu1 %v7365_v4  ;;  %v7250_v53 = vadd.f32 %v14015_v27, %v7199_v9  ;;  %v7300_v16 = vsel %vm391_vm1, %v14112_v0, 0.0  ;;  %v7344_v38 = vmul.f32 %v14112_v0, %v14112_v0  ;;  %v7784_v9 = vld [vmem:[%s14670_s11] sm:$0xff]  ;;  %v7785_v4 = vld [vmem:[%s14670_s11 + $0x8] sm:$0xff] }
0x142a   :  { %7363 = vadd.xlane.f32.xlu0 %v7362_v61  ;;  %v14126_v60 = vadd.f32 %v7251_v2, %v12291_v21  ;;  %v7383_v55 = vsel %vm391_vm1, %v7345_v24, 0.0  ;;  %v11067_v61 = vpack.c.bf16 %v7785_v4, %v7784_v9 }
0x142b   :  { %v10606_v63 = vpop.f32.mrb[110].mxu0  ;;  %v14130_v51 = vadd.f32 %v7250_v53, %v12288_v42  ;;  %v7380_v22 = vsel %vm391_vm1, %v7344_v38, 0.0 }
0x142c   :  { %v7209_v39 = vpop.f32.mrb[111].mxu0  ;;  %v7253_v21 = vadd.f32 %v10606_v63, %v14015_v27  ;;  %v7309_v45 = vsel %vm391_vm1, %v14126_v60, 0.0  ;;  %v7347_v42 = vmul.f32 %v14126_v60, %v14126_v60  ;;  %11068 = vmatprep.subr.bf16.mxu0 %v11067_v61 }
0x142d   :  { %7292 = vadd.xlane.f32.xlu1 %v7291_v29  ;;  %v7252_v3 = vadd.f32 %v14015_v27, %v7209_v39  ;;  %v7306_v13 = vsel %vm391_vm1, %v14130_v51, 0.0  ;;  %v7346_v54 = vmul.f32 %v14130_v51, %v14130_v51  ;;  %11070 = vmatpush3.bf16.msra.mxu0 %v11067_v61 }
0x142e   :  { %7289 = vadd.xlane.f32.xlu0 %v7288_v30  ;;  %v14150_v41 = vadd.f32 %v7253_v21, %v12307_v48  ;;  %v7389_v14 = vsel %vm391_vm1, %v7347_v42, 0.0 }
0x142f   :  { %v14154_v1 = vadd.f32 %v7252_v3, %v12304_v46  ;;  %v7386_v27 = vsel %vm391_vm1, %v7346_v54, 0.0 }
0x1430   :  { %v7315_v15 = vsel %vm391_vm1, %v14150_v41, 0.0  ;;  %v7349_v26 = vmul.f32 %v14150_v41, %v14150_v41 }
0x1431   :  { %7372 = vadd.xlane.f32.xlu1 %v7371_v12  ;;  %v7312_v48 = vsel %vm391_vm1, %v14154_v1, 0.0  ;;  %v7348_v50 = vmul.f32 %v14154_v1, %v14154_v1 }
0x1432   :  { %7369 = vadd.xlane.f32.xlu0 %v7368_v37  ;;  %v7395_v46 = vsel %vm391_vm1, %v7349_v26, 0.0 }
0x1433   :  { %v7392_v56 = vsel %vm391_vm1, %v7348_v50, 0.0 }
0x1435   :  { %7298 = vadd.xlane.f32.xlu1 %v7297_v62 }
0x1436   :  { %7295 = vadd.xlane.f32.xlu0 %v7294_v5 }
0x1439   :  { %7378 = vadd.xlane.f32.xlu1 %v7377_v8 }
0x143a   :  { %7375 = vadd.xlane.f32.xlu0 %v7374_v33 }
0x143d   :  { %7304 = vadd.xlane.f32.xlu1 %v7303_v6 }
0x143e   :  { %7301 = vadd.xlane.f32.xlu0 %v7300_v16 }
0x1441   :  { %7384 = vadd.xlane.f32.xlu1 %v7383_v55 }
0x1442   :  { %7381 = vadd.xlane.f32.xlu0 %v7380_v22 }
0x1445   :  { %7310 = vadd.xlane.f32.xlu1 %v7309_v45 }
0x1446   :  { %7307 = vadd.xlane.f32.xlu0 %v7306_v13 }
0x1449   :  { %7390 = vadd.xlane.f32.xlu1 %v7389_v14 }
0x144a   :  { %7387 = vadd.xlane.f32.xlu0 %v7386_v27 }
0x144d   :  { %7316 = vadd.xlane.f32.xlu1 %v7315_v15  ;;  %v14725_v15 = vsub.s32 2, %v14723_v52 }
0x144e   :  { %7313 = vadd.xlane.f32.xlu0 %v7312_v48 }
0x144f   :  { %v14188_v26 = vrot.slane %v14010_v44, %v14725_v15 }
0x1451   :  { %7396 = vadd.xlane.f32.xlu1 %v7395_v46 }
0x1452   :  { %7393 = vadd.xlane.f32.xlu0 %v7392_v56 }
0x14a2   :  { %v7275_v63 = vpop.xlane.xlu1 %7274 }
0x14a3   :  { %v7319_v58 = vmul.f32 0.0625, %v7275_v63  ;;  %v7272_v39 = vpop.xlane.xlu0 %7271 }
0x14a4   :  { %v7318_v29 = vmul.f32 0.0625, %v7272_v39 }
0x14a5   :  { %v7415_v40 = vmul.f32 %v7319_v58, %v7319_v58  ;;  %v7463_v56 = vsub.f32 %v14020_v57, %v7319_v58 }
0x14a6   :  { %v7355_v32 = vpop.xlane.xlu1 %7354  ;;  %v7414_v12 = vmul.f32 %v7318_v29, %v7318_v29  ;;  %v7462_v63 = vsub.f32 %v14023_v31, %v7318_v29 }
0x14a7   :  { %v7399_v30 = vmul.f32 0.0625, %v7355_v32  ;;  %v7352_v10 = vpop.xlane.xlu0 %7351 }
0x14a8   :  { %v7398_v37 = vmul.f32 0.0625, %v7352_v10 }
0x14a9   :  { %v7431_v35 = vsub.f32 %v7399_v30, %v7415_v40 }
0x14aa   :  { %v7430_v62 = vsub.f32 %v7398_v37, %v7414_v12  ;;  %v7281_v25 = vpop.xlane.xlu1 %7280  ;;  %v14726_v12 = vsub.s32 3, %v14723_v52 }
0x14ab   :  { %v7447_v47 = vmax.f32 %v7431_v35, 0.0  ;;  %v14173_v5 = vmul.f32 0.0625, %v7281_v25  ;;  %v7278_v36 = vpop.xlane.xlu0 %7277 }
0x14ac   :  { %v7446_v8 = vmax.f32 %v7430_v62, 0.0  ;;  %v14175_v33 = vmul.f32 0.0625, %v7278_v36  ;;  %v14199_v37 = vrot.slane %v14010_v44, %v14726_v12 }
0x14ad   :  { %v7479_v2 = vadd.f32 1e-05, %v7447_v47  ;;  %v7417_v53 = vmul.f32 %v14173_v5, %v14173_v5 }
0x14ae   :  { %v7478_v6 = vadd.f32 1e-05, %v7446_v8  ;;  %v7361_v24 = vpop.xlane.xlu1 %7360  ;;  %v7416_v55 = vmul.f32 %v14175_v33, %v14175_v33  ;;  %v7465_v8 = vsub.f32 %v14036_v17, %v14173_v5  ;;  %v7464_v5 = vsub.f32 %v14040_v49, %v14175_v33 }
0x14af   :  { %11408 = vrsqrt.f32 %v7479_v2  ;;  %v7401_v16 = vmul.f32 0.0625, %v7361_v24  ;;  %v7358_v38 = vpop.xlane.xlu0 %7357 }
0x14b0   :  { %11410 = vrsqrt.f32 %v7478_v6  ;;  %v7400_v22 = vmul.f32 0.0625, %v7358_v38 }
0x14b1   :  { %v7433_v43 = vsub.f32 %v7401_v16, %v7417_v53 }
0x14b2   :  { %v7432_v34 = vsub.f32 %v7400_v22, %v7416_v55  ;;  %v7287_v20 = vpop.xlane.xlu1 %7286 }
0x14b3   :  { %v7449_v21 = vmax.f32 %v7433_v43, 0.0  ;;  %v14181_v45 = vmul.f32 0.0625, %v7287_v20  ;;  %v7284_v42 = vpop.xlane.xlu0 %7283 }
0x14b4   :  { %v7448_v3 = vmax.f32 %v7432_v34, 0.0  ;;  %v14183_v13 = vmul.f32 0.0625, %v7284_v42 }
0x14b5   :  { %v7481_v54 = vadd.f32 1e-05, %v7449_v21  ;;  %v7419_v48 = vmul.f32 %v14181_v45, %v14181_v45 }
0x14b6   :  { %v7480_v14 = vadd.f32 1e-05, %v7448_v3  ;;  %v7367_v27 = vpop.xlane.xlu1 %7366  ;;  %v7418_v9 = vmul.f32 %v14183_v13, %v14183_v13 }
0x14b7   :  { %11412 = vrsqrt.f32 %v7481_v54  ;;  %v7403_v50 = vmul.f32 0.0625, %v7367_v27  ;;  %v7364_v46 = vpop.xlane.xlu0 %7363 }
0x14b8   :  { %11414 = vrsqrt.f32 %v7480_v14  ;;  %v7402_v4 = vmul.f32 0.0625, %v7364_v46 }
0x14b9   :  { %v11409_v61 = vpop.eup %11408  ;;  %v7435_v39 = vsub.f32 %v7403_v50, %v7419_v48 }
0x14ba   :  { %v11411_v32 = vpop.eup %11410  ;;  %v7511_v40 = vmul.f32 %v11409_v61, %v7463_v56  ;;  %v7434_v30 = vsub.f32 %v7402_v4, %v7418_v9  ;;  %v7293_v10 = vpop.xlane.xlu1 %7292  ;;  %v7467_v56 = vsub.f32 %v14054_v11, %v14181_v45  ;;  %v7466_v45 = vsub.f32 %v14058_v18, %v14183_v13 }
0x14bb   :  { %v7451_v35 = vmax.f32 %v7435_v39, 0.0  ;;  %v14201_v57 = vmul.f32 0.0625, %v7293_v10  ;;  %v7290_v58 = vpop.xlane.xlu0 %7289  ;;  %v7510_v62 = vmul.f32 %v11411_v32, %v7462_v63 }
0x14bc   :  { %v7531_v25 = vmul.f32 %v14188_v26, %v7511_v40  ;;  %v7450_v47 = vmax.f32 %v7434_v30, 0.0  ;;  %v14204_v36 = vmul.f32 0.0625, %v7290_v58 }
0x14bd   :  { %v7483_v31 = vadd.f32 1e-05, %v7451_v35  ;;  %v7530_v29 = vmul.f32 %v14188_v26, %v7510_v62  ;;  %v7421_v24 = vmul.f32 %v14201_v57, %v14201_v57 }
0x14be   :  { %v7482_v2 = vadd.f32 1e-05, %v7450_v47  ;;  %v7373_v6 = vpop.xlane.xlu1 %7372  ;;  %v7420_v55 = vmul.f32 %v14204_v36, %v14204_v36  ;;  %v14217_v43 = vadd.f32 %v14199_v37, %v7531_v25 }
0x14bf   :  { %11416 = vrsqrt.f32 %v7483_v31  ;;  %v7405_v53 = vmul.f32 0.0625, %v7373_v6  ;;  %v7370_v16 = vpop.xlane.xlu0 %7369  ;;  %v14212_v38 = vadd.f32 %v14199_v37, %v7530_v29 }
0x14c0   :  { %11418 = vrsqrt.f32 %v7482_v2  ;;  %v7404_v22 = vmul.f32 0.0625, %v7370_v16 }
0x14c1   :  { %v11413_v17 = vpop.eup %11412  ;;  %v7437_v34 = vsub.f32 %v7405_v53, %v7421_v24  ;;  %10611 = vmatprep.mubr.msk.f32.mxu1 %vm391_vm1, %v14212_v38  ;;  %v7469_v53 = vsub.f32 %v14072_v23, %v14201_v57  ;;  %v7468_v57 = vsub.f32 %v14076_v19, %v14204_v36 }
0x14c2   :  { %v11415_v20 = vpop.eup %11414  ;;  %v7436_v21 = vsub.f32 %v7404_v22, %v7420_v55  ;;  %v7299_v42 = vpop.xlane.xlu1 %7298  ;;  %10612 = vmatmul.mubr.msk.f32.vlgmr.msra.gmra.mrb[224].mxu1 %vm391_vm1, %v14217_v43  ;;  %v7513_v3 = vmul.f32 %v11413_v17, %v7465_v8 }
0x14c3   :  { %v7453_v54 = vmax.f32 %v7437_v34, 0.0  ;;  %v14225_v14 = vmul.f32 0.0625, %v7299_v42  ;;  %v7296_v27 = vpop.xlane.xlu0 %7295  ;;  %v7512_v15 = vmul.f32 %v11415_v20, %v7464_v5 }
0x14c4   :  { %v7452_v48 = vmax.f32 %v7436_v21, 0.0  ;;  %v14227_v50 = vmul.f32 0.0625, %v7296_v27  ;;  %v7533_v49 = vmul.f32 %v14188_v26, %v7513_v3 }
0x14c5   :  { %v7485_v33 = vadd.f32 1e-05, %v7453_v54  ;;  %v7532_v46 = vmul.f32 %v14188_v26, %v7512_v15  ;;  %v7423_v61 = vmul.f32 %v14225_v14, %v14225_v14 }
0x14c6   :  { %v7484_v9 = vadd.f32 1e-05, %v7452_v48  ;;  %v7379_v4 = vpop.xlane.xlu1 %7378  ;;  %v7422_v40 = vmul.f32 %v14227_v50, %v14227_v50  ;;  %v14241_v10 = vadd.f32 %v14199_v37, %v7533_v49 }
0x14c7   :  { %11420 = vrsqrt.f32 %v7485_v33  ;;  %v7407_v63 = vmul.f32 0.0625, %v7379_v4  ;;  %v7376_v39 = vpop.xlane.xlu0 %7375  ;;  %v14236_v32 = vadd.f32 %v14199_v37, %v7532_v46 }
0x14c8   :  { %11422 = vrsqrt.f32 %v7484_v9  ;;  %v7406_v30 = vmul.f32 0.0625, %v7376_v39 }
0x14c9   :  { %v11417_v11 = vpop.eup %11416  ;;  %v7439_v12 = vsub.f32 %v7407_v63, %v7423_v61  ;;  %10614 = vmatprep.mubr.msk.f32.mxu1 %vm391_vm1, %v14236_v32  ;;  %v7471_v63 = vsub.f32 %v14090_v59, %v14225_v14  ;;  %v7470_v14 = vsub.f32 %v14094_v28, %v14227_v50 }
0x14ca   :  { %v11419_v35 = vpop.eup %11418  ;;  %v7438_v58 = vsub.f32 %v7406_v30, %v7422_v40  ;;  %v7305_v62 = vpop.xlane.xlu1 %7304  ;;  %10615 = vmatmul.mubr.msk.f32.gmra.mrb[226].mxu1 %vm391_vm1, %v14241_v10  ;;  %v7515_v25 = vmul.f32 %v11417_v11, %v7467_v56 }
0x14cb   :  { %v7455_v47 = vmax.f32 %v7439_v12, 0.0  ;;  %v14249_v31 = vmul.f32 0.0625, %v7305_v62  ;;  %v7302_v29 = vpop.xlane.xlu0 %7301  ;;  %v7514_v8 = vmul.f32 %v11419_v35, %v7466_v45 }
0x14cc   :  { %v7454_v2 = vmax.f32 %v7438_v58, 0.0  ;;  %v14251_v6 = vmul.f32 0.0625, %v7302_v29  ;;  %v7535_v18 = vmul.f32 %v14188_v26, %v7515_v25 }
0x14cd   :  { %v7487_v13 = vadd.f32 1e-05, %v7455_v47  ;;  %v7534_v24 = vmul.f32 %v14188_v26, %v7514_v8  ;;  %v7425_v22 = vmul.f32 %v14249_v31, %v14249_v31 }
0x14ce   :  { %v7486_v16 = vadd.f32 1e-05, %v7454_v2  ;;  %v7385_v55 = vpop.xlane.xlu1 %7384  ;;  %v7424_v20 = vmul.f32 %v14251_v6, %v14251_v6  ;;  %v14265_v42 = vadd.f32 %v14199_v37, %v7535_v18 }
0x14cf   :  { %11424 = vrsqrt.f32 %v7487_v13  ;;  %v7409_v17 = vmul.f32 0.0625, %v7385_v55  ;;  %v7382_v5 = vpop.xlane.xlu0 %7381  ;;  %v14260_v34 = vadd.f32 %v14199_v37, %v7534_v24 }
0x14d0   :  { %11426 = vrsqrt.f32 %v7486_v16  ;;  %v7408_v21 = vmul.f32 0.0625, %v7382_v5 }
0x14d1   :  { %v11421_v23 = vpop.eup %11420  ;;  %v7441_v3 = vsub.f32 %v7409_v17, %v7425_v22  ;;  %10617 = vmatprep.mubr.msk.f32.mxu1 %vm391_vm1, %v14260_v34  ;;  %v7473_v17 = vsub.f32 %v14108_v7, %v14249_v31 }
0x14d2   :  { %v11423_v54 = vpop.eup %11422  ;;  %v7440_v27 = vsub.f32 %v7408_v21, %v7424_v20  ;;  %v7311_v15 = vpop.xlane.xlu1 %7310  ;;  %10618 = vmatmul.mubr.msk.f32.gmra.mrb[228].mxu1 %vm391_vm1, %v14265_v42  ;;  %v7517_v48 = vmul.f32 %v11421_v23, %v7469_v53 }
0x14d3   :  { %v7457_v49 = vmax.f32 %v7441_v3, 0.0  ;;  %v14273_v33 = vmul.f32 0.0625, %v7311_v15  ;;  %v7308_v46 = vpop.xlane.xlu0 %7307  ;;  %v7516_v56 = vmul.f32 %v11423_v54, %v7468_v57 }
0x14d4   :  { %v7456_v9 = vmax.f32 %v7440_v27, 0.0  ;;  %v14275_v4 = vmul.f32 0.0625, %v7308_v46  ;;  %v7537_v19 = vmul.f32 %v14188_v26, %v7517_v48 }
0x14d5   :  { %v7489_v36 = vadd.f32 1e-05, %v7457_v49  ;;  %v7536_v61 = vmul.f32 %v14188_v26, %v7516_v56  ;;  %v7427_v30 = vmul.f32 %v14273_v33, %v14273_v33  ;;  %v7472_v49 = vsub.f32 %v14112_v0, %v14251_v6 }
0x14d6   :  { %v7488_v39 = vadd.f32 1e-05, %v7456_v9  ;;  %v7391_v40 = vpop.xlane.xlu1 %7390  ;;  %v7426_v35 = vmul.f32 %v14275_v4, %v14275_v4  ;;  %v14289_v62 = vadd.f32 %v14199_v37, %v7537_v19  ;;  %v7475_v6 = vsub.f32 %v14126_v60, %v14273_v33 }
0x14d7   :  { %11428 = vrsqrt.f32 %v7489_v36  ;;  %v7411_v11 = vmul.f32 0.0625, %v7391_v40  ;;  %v7388_v45 = vpop.xlane.xlu0 %7387  ;;  %v14284_v12 = vadd.f32 %v14199_v37, %v7536_v61 }
0x14d8   :  { %11430 = vrsqrt.f32 %v7488_v39  ;;  %v7410_v58 = vmul.f32 0.0625, %v7388_v45  ;;  %v7474_v45 = vsub.f32 %v14130_v51, %v14275_v4 }
0x14d9   :  { %v11425_v59 = vpop.eup %11424  ;;  %v7443_v25 = vsub.f32 %v7411_v11, %v7427_v30  ;;  %10620 = vmatprep.mubr.msk.f32.mxu1 %vm391_vm1, %v14284_v12 }
0x14da   :  { %v11427_v47 = vpop.eup %11426  ;;  %v7442_v29 = vsub.f32 %v7410_v58, %v7426_v35  ;;  %v7317_v8 = vpop.xlane.xlu1 %7316  ;;  %10621 = vmatmul.mubr.msk.f32.gmra.mrb[230].mxu1 %vm391_vm1, %v14289_v62  ;;  %v7519_v2 = vmul.f32 %v11425_v59, %v7471_v63 }
0x14db   :  { %v7459_v18 = vmax.f32 %v7443_v25, 0.0  ;;  %v7333_v13 = vmul.f32 0.0625, %v7317_v8  ;;  %v7314_v24 = vpop.xlane.xlu0 %7313  ;;  %v7518_v53 = vmul.f32 %v11427_v47, %v7470_v14 }
0x14dc   :  { %v7458_v16 = vmax.f32 %v7442_v29, 0.0  ;;  %v7332_v55 = vmul.f32 0.0625, %v7314_v24  ;;  %v7539_v22 = vmul.f32 %v14188_v26, %v7519_v2 }
0x14dd   :  { %v7491_v28 = vadd.f32 1e-05, %v7459_v18  ;;  %v7538_v50 = vmul.f32 %v14188_v26, %v7518_v53  ;;  %v7429_v21 = vmul.f32 %v7333_v13, %v7333_v13  ;;  %v7477_v25 = vsub.f32 %v14150_v41, %v7333_v13 }
0x14de   :  { %v7490_v5 = vadd.f32 1e-05, %v7458_v16  ;;  %v7397_v20 = vpop.xlane.xlu1 %7396  ;;  %v7428_v54 = vmul.f32 %v7332_v55, %v7332_v55  ;;  %v14305_v15 = vadd.f32 %v14199_v37, %v7539_v22  ;;  %v7476_v47 = vsub.f32 %v14154_v1, %v7332_v55  ;;  %v7786_v1 = vld [vmem:[%s14670_s11 + $0x10] sm:$0xff] }
0x14df   :  { %11432 = vrsqrt.f32 %v7491_v28  ;;  %v7413_v23 = vmul.f32 0.0625, %v7397_v20  ;;  %v7394_v57 = vpop.xlane.xlu0 %7393  ;;  %v14302_v3 = vadd.f32 %v14199_v37, %v7538_v50 }
0x14e0   :  { %11434 = vrsqrt.f32 %v7490_v5  ;;  %v7412_v27 = vmul.f32 0.0625, %v7394_v57 }
0x14e1   :  { %v11429_v48 = vpop.eup %11428  ;;  %v7445_v7 = vsub.f32 %v7413_v23, %v7429_v21  ;;  %10623 = vmatprep.mubr.msk.f32.mxu1 %vm391_vm1, %v14302_v3 }
0x14e2   :  { %v11431_v31 = vpop.eup %11430  ;;  %v7444_v46 = vsub.f32 %v7412_v27, %v7428_v54  ;;  %10624 = vmatmul.mubr.msk.f32.gmra.mrb[232].mxu1 %vm391_vm1, %v14305_v15  ;;  %v7521_v56 = vmul.f32 %v11429_v48, %v7473_v17 }
0x14e3   :  { %v7461_v9 = vmax.f32 %v7445_v7, 0.0  ;;  %v7520_v19 = vmul.f32 %v11431_v31, %v7472_v49 }
0x14e4   :  { %v7460_v36 = vmax.f32 %v7444_v46, 0.0  ;;  %v7541_v61 = vmul.f32 %v14188_v26, %v7521_v56 }
0x14e5   :  { %v7493_v63 = vadd.f32 1e-05, %v7461_v9  ;;  %v7540_v39 = vmul.f32 %v14188_v26, %v7520_v19 }
0x14e6   :  { %v7492_v40 = vadd.f32 1e-05, %v7460_v36  ;;  %v14321_v30 = vadd.f32 %v14199_v37, %v7541_v61 }
0x14e7   :  { %11436 = vrsqrt.f32 %v7493_v63  ;;  %v14316_v0 = vadd.f32 %v14199_v37, %v7540_v39 }
0x14e8   :  { %11438 = vrsqrt.f32 %v7492_v40 }
0x14e9   :  { %v11433_v11 = vpop.eup %11432  ;;  %10626 = vmatprep.mubr.msk.f32.mxu1 %vm391_vm1, %v14316_v0 }
0x14ea   :  { %v11435_v35 = vpop.eup %11434  ;;  %10627 = vmatmul.mubr.msk.f32.gmra.mrb[234].mxu1 %vm391_vm1, %v14321_v30  ;;  %v7523_v58 = vmul.f32 %v11433_v11, %v7475_v6 }
0x14eb   :  { %v7522_v59 = vmul.f32 %v11435_v35, %v7474_v45 }
0x14ec   :  { %v7543_v14 = vmul.f32 %v14188_v26, %v7523_v58 }
0x14ed   :  { %v7542_v60 = vmul.f32 %v14188_v26, %v7522_v59 }
0x14ee   :  { %v14336_v51 = vadd.f32 %v14199_v37, %v7543_v14 }
0x14ef   :  { %v14332_v33 = vadd.f32 %v14199_v37, %v7542_v60 }
0x14f1   :  { %v11437_v4 = vpop.eup %11436  ;;  %10629 = vmatprep.mubr.msk.f32.mxu1 %vm391_vm1, %v14332_v33 }
0x14f2   :  { %v11439_v29 = vpop.eup %11438  ;;  %10630 = vmatmul.mubr.msk.f32.gmra.mrb[236].mxu1 %vm391_vm1, %v14336_v51  ;;  %v7525_v8 = vmul.f32 %v11437_v4, %v7477_v25 }
0x14f3   :  { %v7524_v2 = vmul.f32 %v11439_v29, %v7476_v47 }
0x14f4   :  { %v7545_v18 = vmul.f32 %v14188_v26, %v7525_v8 }
0x14f5   :  { %v7544_v24 = vmul.f32 %v14188_v26, %v7524_v2  ;;  %v7787_v26 = vld [vmem:[%s14670_s11 + $0x18] sm:$0xff] }
0x14f6   :  { %v14349_v13 = vadd.f32 %v14199_v37, %v7545_v18  ;;  %v11071_v53 = vpack.c.bf16 %v7787_v26, %v7786_v1 }
0x14f7   :  { %v14346_v41 = vadd.f32 %v14199_v37, %v7544_v24  ;;  %v8904_v37 = vld [vmem:[%s14671_s10] ss:$0 sm:$0xff] }
0x14f8   :  { %11072 = vmatprep.subr.bf16.mxu0 %v11071_v53 }
0x14f9   :  { %10632 = vmatprep.mubr.msk.f32.mxu1 %vm391_vm1, %v14346_v41  ;;  %11074 = vmatpush3.bf16.msra.mxu0 %v11071_v53 }
0x14fa   :  { %10633 = vmatmul.mubr.msk.f32.gmra.mrb[238].mxu1 %vm391_vm1, %v14349_v13 }
0x1595   :  { %v10613_v16 = vpop.f32.mrb[224].mxu1 }
0x1596   :  { %v7695_v55 = vadd.f32 %v10613_v16, %v8904_v37  ;;  %v7689_v22 = vpop.f32.mrb[225].mxu1 }
0x1597   :  { %v7690_v28 = vadd.f32 %v8904_v37, %v7689_v22 }
0x1598   :  { %v7769_v17 = vmax.f32 %v7695_v55, 0.0 }
0x1599   :  { %v7768_v50 = vmax.f32 %v7690_v28, 0.0  ;;  %v14727_v28 = vsub.s32 4, %v14723_v52 }
0x159b   :  { %10643 = vmatprep.mubr.msk.f32.mxu0 %vm197_vm0, %v7768_v50  ;;  %v14383_v50 = vrot.slane %v14010_v44, %v14727_v28 }
0x159c   :  { %10644 = vmatmul.mubr.msk.f32.vlgmr.msra.gmra.mrb[168].mxu0 %vm197_vm0, %v7769_v17 }
0x159d   :  { %v10616_v5 = vpop.f32.mrb[226].mxu1 }
0x159e   :  { %v7705_v20 = vadd.f32 %v10616_v5, %v8904_v37  ;;  %v7699_v21 = vpop.f32.mrb[227].mxu1 }
0x159f   :  { %v7700_v23 = vadd.f32 %v8904_v37, %v7699_v21 }
0x15a0   :  { %v7771_v54 = vmax.f32 %v7705_v20, 0.0 }
0x15a1   :  { %v7770_v57 = vmax.f32 %v7700_v23, 0.0 }
0x15a3   :  { %10646 = vmatprep.mubr.msk.f32.mxu0 %vm197_vm0, %v7770_v57 }
0x15a4   :  { %10647 = vmatmul.mubr.msk.f32.gmra.mrb[170].mxu0 %vm197_vm0, %v7771_v54 }
0x15a5   :  { %v10619_v27 = vpop.f32.mrb[228].mxu1 }
0x15a6   :  { %v7715_v48 = vadd.f32 %v10619_v27, %v8904_v37  ;;  %v7709_v49 = vpop.f32.mrb[229].mxu1 }
0x15a7   :  { %v7710_v7 = vadd.f32 %v8904_v37, %v7709_v49 }
0x15a8   :  { %v7773_v46 = vmax.f32 %v7715_v48, 0.0 }
0x15a9   :  { %v7772_v31 = vmax.f32 %v7710_v7, 0.0 }
0x15ab   :  { %10649 = vmatprep.mubr.msk.f32.mxu0 %vm197_vm0, %v7772_v31 }
0x15ac   :  { %10650 = vmatmul.mubr.msk.f32.gmra.mrb[172].mxu0 %vm197_vm0, %v7773_v46 }
0x15ad   :  { %v10622_v56 = vpop.f32.mrb[230].mxu1 }
0x15ae   :  { %v7725_v9 = vadd.f32 %v10622_v56, %v8904_v37  ;;  %v7719_v19 = vpop.f32.mrb[231].mxu1 }
0x15af   :  { %v7720_v36 = vadd.f32 %v8904_v37, %v7719_v19 }
0x15b0   :  { %v7775_v63 = vmax.f32 %v7725_v9, 0.0 }
0x15b1   :  { %v7774_v61 = vmax.f32 %v7720_v36, 0.0 }
0x15b3   :  { %10652 = vmatprep.mubr.msk.f32.mxu0 %vm197_vm0, %v7774_v61 }
0x15b4   :  { %10653 = vmatmul.mubr.msk.f32.gmra.mrb[174].mxu0 %vm197_vm0, %v7775_v63 }
0x15b5   :  { %v10625_v39 = vpop.f32.mrb[232].mxu1 }
0x15b6   :  { %v7735_v40 = vadd.f32 %v10625_v39, %v8904_v37  ;;  %v7729_v6 = vpop.f32.mrb[233].mxu1 }
0x15b7   :  { %v7730_v11 = vadd.f32 %v8904_v37, %v7729_v6 }
0x15b8   :  { %v7777_v35 = vmax.f32 %v7735_v40, 0.0 }
0x15b9   :  { %v7776_v45 = vmax.f32 %v7730_v11, 0.0 }
0x15bb   :  { %10655 = vmatprep.mubr.msk.f32.mxu0 %vm197_vm0, %v7776_v45 }
0x15bc   :  { %10656 = vmatmul.mubr.msk.f32.gmra.mrb[176].mxu0 %vm197_vm0, %v7777_v35 }
0x15bd   :  { %v10628_v58 = vpop.f32.mrb[234].mxu1 }
0x15be   :  { %v7745_v59 = vadd.f32 %v10628_v58, %v8904_v37  ;;  %v7739_v14 = vpop.f32.mrb[235].mxu1 }
0x15bf   :  { %v7740_v60 = vadd.f32 %v8904_v37, %v7739_v14 }
0x15c0   :  { %v7779_v4 = vmax.f32 %v7745_v59, 0.0 }
0x15c1   :  { %v7778_v25 = vmax.f32 %v7740_v60, 0.0 }
0x15c3   :  { %10658 = vmatprep.mubr.msk.f32.mxu0 %vm197_vm0, %v7778_v25 }
0x15c4   :  { %10659 = vmatmul.mubr.msk.f32.gmra.mrb[178].mxu0 %vm197_vm0, %v7779_v4 }
0x15c5   :  { %v10631_v47 = vpop.f32.mrb[236].mxu1 }
0x15c6   :  { %v7755_v29 = vadd.f32 %v10631_v47, %v8904_v37  ;;  %v7749_v8 = vpop.f32.mrb[237].mxu1 }
0x15c7   :  { %v7750_v2 = vadd.f32 %v8904_v37, %v7749_v8 }
0x15c8   :  { %v7781_v24 = vmax.f32 %v7755_v29, 0.0 }
0x15c9   :  { %v7780_v18 = vmax.f32 %v7750_v2, 0.0 }
0x15cb   :  { %10661 = vmatprep.mubr.msk.f32.mxu0 %vm197_vm0, %v7780_v18 }
0x15cc   :  { %10662 = vmatmul.mubr.msk.f32.gmra.mrb[180].mxu0 %vm197_vm0, %v7781_v24 }
0x15cd   :  { %v10634_v1 = vpop.f32.mrb[238].mxu1 }
0x15ce   :  { %v7765_v26 = vadd.f32 %v10634_v1, %v8904_v37  ;;  %v7759_v53 = vpop.f32.mrb[239].mxu1 }
0x15cf   :  { %v7760_v16 = vadd.f32 %v8904_v37, %v7759_v53 }
0x15d0   :  { %v7783_v22 = vmax.f32 %v7765_v26, 0.0 }
0x15d1   :  { %v7782_v55 = vmax.f32 %v7760_v16, 0.0 }
0x15d3   :  { %10664 = vmatprep.mubr.msk.f32.mxu0 %vm197_vm0, %v7782_v55 }
0x15d4   :  { %10665 = vmatmul.mubr.msk.f32.gmra.mrb[182].mxu0 %vm197_vm0, %v7783_v22 }
0x166f   :  { %v10645_v17 = vpop.f32.mrb[168].mxu0 }
0x1670   :  { %v7912_v5 = vadd.f32 %v10645_v17, %v14383_v50  ;;  %v7906_v20 = vpop.f32.mrb[169].mxu0 }
0x1671   :  { %v7907_v21 = vadd.f32 %v7906_v20, %v14383_v50 }
0x1672   :  { %v14388_v23 = vadd.f32 %v7912_v5, %v14217_v43 }
0x1673   :  { %v14391_v37 = vadd.f32 %v7907_v21, %v14212_v38 }
0x1674   :  { %v8004_v57 = vsel %vm391_vm1, %v14388_v23, 0.0  ;;  %v8066_v48 = vmul.f32 %v14388_v23, %v14388_v23 }
0x1675   :  { %8005 = vadd.xlane.f32.xlu0 %v8004_v57  ;;  %v8001_v44 = vsel %vm391_vm1, %v14391_v37, 0.0  ;;  %v8065_v38 = vmul.f32 %v14391_v37, %v14391_v37 }
0x1676   :  { %v8084_v43 = vsel %vm391_vm1, %v8066_v48, 0.0 }
0x1677   :  { %v10648_v54 = vpop.f32.mrb[170].mxu0  ;;  %v8081_v9 = vsel %vm391_vm1, %v8065_v38, 0.0 }
0x1678   :  { %v7916_v27 = vpop.f32.mrb[171].mxu0  ;;  %v7922_v49 = vadd.f32 %v10648_v54, %v14383_v50 }
0x1679   :  { %8002 = vadd.xlane.f32.xlu0 %v8001_v44  ;;  %v7917_v46 = vadd.f32 %v7916_v27, %v14383_v50 }
0x167a   :  { %v14404_v31 = vadd.f32 %v7922_v49, %v14241_v10 }
0x167b   :  { %v14409_v19 = vadd.f32 %v7917_v46, %v14236_v32 }
0x167c   :  { %v8010_v36 = vsel %vm391_vm1, %v14404_v31, 0.0  ;;  %v8068_v10 = vmul.f32 %v14404_v31, %v14404_v31 }
0x167d   :  { %8085 = vadd.xlane.f32.xlu0 %v8084_v43  ;;  %v8007_v39 = vsel %vm391_vm1, %v14409_v19, 0.0  ;;  %v8067_v32 = vmul.f32 %v14409_v19, %v14409_v19 }
0x167e   :  { %v8090_v6 = vsel %vm391_vm1, %v8068_v10, 0.0 }
0x167f   :  { %v10651_v7 = vpop.f32.mrb[172].mxu0  ;;  %v8087_v14 = vsel %vm391_vm1, %v8067_v32, 0.0 }
0x1680   :  { %v7926_v56 = vpop.f32.mrb[173].mxu0  ;;  %v7932_v40 = vadd.f32 %v10651_v7, %v14383_v50 }
0x1681   :  { %8082 = vadd.xlane.f32.xlu0 %v8081_v9  ;;  %v7927_v35 = vadd.f32 %v7926_v56, %v14383_v50 }
0x1682   :  { %v14422_v45 = vadd.f32 %v7932_v40, %v14265_v42 }
0x1683   :  { %v14432_v4 = vadd.f32 %v7927_v35, %v14260_v34 }
0x1684   :  { %v8016_v42 = vsel %vm391_vm1, %v14422_v45, 0.0 }
0x1685   :  { %8011 = vadd.xlane.f32.xlu0 %v8010_v36  ;;  %v8069_v1 = vmul.f32 %v14432_v4, %v14432_v4 }
0x1687   :  { %v10654_v61 = vpop.f32.mrb[174].mxu0  ;;  %v8093_v5 = vsel %vm391_vm1, %v8069_v1, 0.0 }
0x1688   :  { %v7936_v63 = vpop.f32.mrb[175].mxu0  ;;  %v7942_v24 = vadd.f32 %v10654_v61, %v14383_v50 }
0x1689   :  { %8008 = vadd.xlane.f32.xlu0 %v8007_v39  ;;  %v7937_v28 = vadd.f32 %v7936_v63, %v14383_v50 }
0x168a   :  { %v14458_v22 = vadd.f32 %v7942_v24, %v14289_v62 }
0x168b   :  { %v14470_v62 = vadd.f32 %v7937_v28, %v14284_v12 }
0x168c   :  { %v8072_v63 = vmul.f32 %v14458_v22, %v14458_v22 }
0x168d   :  { %8091 = vadd.xlane.f32.xlu0 %v8090_v6  ;;  %v8019_v38 = vsel %vm391_vm1, %v14470_v62, 0.0 }
0x168e   :  { %v8102_v40 = vsel %vm391_vm1, %v8072_v63, 0.0  ;;  %v8279_v63 = vsub.s32 6, %v14723_v52 }
0x168f   :  { %v10657_v11 = vpop.f32.mrb[176].mxu0 }
0x1690   :  { %v7952_v58 = vadd.f32 %v10657_v11, %v14383_v50  ;;  %v7946_v59 = vpop.f32.mrb[177].mxu0 }
0x1691   :  { %v7947_v60 = vadd.f32 %v7946_v59, %v14383_v50  ;;  %8088 = vadd.xlane.f32.xlu0 %v8087_v14 }
0x1692   :  { %v14429_v25 = vadd.f32 %v7952_v58, %v14305_v15  ;;  %v8013_v15 = vsel %vm391_vm1, %v14432_v4, 0.0 }
0x1693   :  { %v14435_v47 = vadd.f32 %v7947_v60, %v14302_v3  ;;  %v8070_v3 = vmul.f32 %v14422_v45, %v14422_v45 }
0x1694   :  { %v8028_v29 = vsel %vm391_vm1, %v14429_v25, 0.0  ;;  %v8074_v18 = vmul.f32 %v14429_v25, %v14429_v25 }
0x1695   :  { %8017 = vadd.xlane.f32.xlu0 %v8016_v42  ;;  %8029 = vadd.xlane.f32.xlu1 %v8028_v29  ;;  %v8025_v34 = vsel %vm391_vm1, %v14435_v47, 0.0  ;;  %v8096_v53 = vsel %vm391_vm1, %v8070_v3, 0.0  ;;  %v8073_v55 = vmul.f32 %v14435_v47, %v14435_v47 }
0x1696   :  { %v8108_v16 = vsel %vm391_vm1, %v8074_v18, 0.0 }
0x1697   :  { %v10660_v8 = vpop.f32.mrb[178].mxu0  ;;  %v8105_v27 = vsel %vm391_vm1, %v8073_v55, 0.0 }
0x1698   :  { %v7956_v2 = vpop.f32.mrb[179].mxu0  ;;  %v7962_v26 = vadd.f32 %v10660_v8, %v14383_v50 }
0x1699   :  { %8014 = vadd.xlane.f32.xlu0 %v8013_v15  ;;  %8026 = vadd.xlane.f32.xlu1 %v8025_v34  ;;  %v7957_v21 = vadd.f32 %v7956_v2, %v14383_v50 }
0x169a   :  { %v14463_v20 = vadd.f32 %v7962_v26, %v14321_v30  ;;  %v8022_v30 = vsel %vm391_vm1, %v14458_v22, 0.0 }
0x169b   :  { %v14473_v48 = vadd.f32 %v7957_v21, %v14316_v0  ;;  %v8071_v0 = vmul.f32 %v14470_v62, %v14470_v62 }
0x169c   :  { %v8034_v49 = vsel %vm391_vm1, %v14463_v20, 0.0  ;;  %v8076_v56 = vmul.f32 %v14463_v20, %v14463_v20 }
0x169d   :  { %8097 = vadd.xlane.f32.xlu0 %v8096_v53  ;;  %8109 = vadd.xlane.f32.xlu1 %v8108_v16  ;;  %v8031_v12 = vsel %vm391_vm1, %v14473_v48, 0.0  ;;  %v8099_v36 = vsel %vm391_vm1, %v8071_v0, 0.0  ;;  %v8075_v39 = vmul.f32 %v14473_v48, %v14473_v48 }
0x169e   :  { %v8114_v61 = vsel %vm391_vm1, %v8076_v56, 0.0 }
0x169f   :  { %v10663_v17 = vpop.f32.mrb[180].mxu0 }
0x16a0   :  { %v7972_v57 = vadd.f32 %v10663_v17, %v14383_v50  ;;  %v7966_v54 = vpop.f32.mrb[181].mxu0 }
0x16a1   :  { %v7967_v44 = vadd.f32 %v7966_v54, %v14383_v50  ;;  %8094 = vadd.xlane.f32.xlu0 %v8093_v5  ;;  %8106 = vadd.xlane.f32.xlu1 %v8105_v27 }
0x16a2   :  { %v14496_v10 = vadd.f32 %v7972_v57, %v14336_v51 }
0x16a3   :  { %v14501_v6 = vadd.f32 %v7967_v44, %v14332_v33 }
0x16a4   :  { %v8040_v32 = vsel %vm391_vm1, %v14496_v10, 0.0  ;;  %v8078_v51 = vmul.f32 %v14496_v10, %v14496_v10 }
0x16a5   :  { %8023 = vadd.xlane.f32.xlu0 %v8022_v30  ;;  %8035 = vadd.xlane.f32.xlu1 %v8034_v49  ;;  %v8037_v11 = vsel %vm391_vm1, %v14501_v6, 0.0  ;;  %v8077_v58 = vmul.f32 %v14501_v6, %v14501_v6 }
0x16a6   :  { %v8120_v35 = vsel %vm391_vm1, %v8078_v51, 0.0 }
0x16a7   :  { %v10666_v43 = vpop.f32.mrb[182].mxu0  ;;  %v8117_v59 = vsel %vm391_vm1, %v8077_v58, 0.0  ;;  %v14728_v58 = vsub.s32 5, %v14723_v52 }
0x16a8   :  { %v7982_v7 = vadd.f32 %v10666_v43, %v14383_v50  ;;  %v7976_v46 = vpop.f32.mrb[183].mxu0 }
0x16a9   :  { %v7977_v9 = vadd.f32 %v7976_v46, %v14383_v50  ;;  %8020 = vadd.xlane.f32.xlu0 %v8019_v38  ;;  %8032 = vadd.xlane.f32.xlu1 %v8031_v12  ;;  %v8111_v50 = vsel %vm391_vm1, %v8075_v39, 0.0 }
0x16aa   :  { %v14513_v33 = vadd.f32 %v7982_v7, %v14349_v13 }
0x16ab   :  { %v14517_v14 = vadd.f32 %v7977_v9, %v14346_v41 }
0x16ac   :  { %v8046_v60 = vsel %vm391_vm1, %v14513_v33, 0.0  ;;  %v8080_v8 = vmul.f32 %v14513_v33, %v14513_v33 }
0x16ad   :  { %8100 = vadd.xlane.f32.xlu0 %v8099_v36  ;;  %8115 = vadd.xlane.f32.xlu1 %v8114_v61  ;;  %v8043_v42 = vsel %vm391_vm1, %v14517_v14, 0.0  ;;  %v8079_v29 = vmul.f32 %v14517_v14, %v14517_v14 }
0x16ae   :  { %v8126_v41 = vsel %vm391_vm1, %v8080_v8, 0.0 }
0x16af   :  { %v8123_v13 = vsel %vm391_vm1, %v8079_v29, 0.0 }
0x16b1   :  { %8103 = vadd.xlane.f32.xlu0 %v8102_v40  ;;  %8112 = vadd.xlane.f32.xlu1 %v8111_v50 }
0x16b5   :  { %8041 = vadd.xlane.f32.xlu1 %v8040_v32 }
0x16b9   :  { %8038 = vadd.xlane.f32.xlu1 %v8037_v11 }
0x16bd   :  { %8121 = vadd.xlane.f32.xlu1 %v8120_v35  ;;  %v11474_v35 = vld [vmem:[%s14666_s13] sm:$0x7f] }
0x16c1   :  { %8118 = vadd.xlane.f32.xlu1 %v8117_v59  ;;  %v14545_v59 = vrot.slane %v11474_v35, %v14728_v58 }
0x16c5   :  { %8047 = vadd.xlane.f32.xlu1 %v8046_v60 }
0x16c9   :  { %8044 = vadd.xlane.f32.xlu1 %v8043_v42  ;;  %v14548_v42 = vrot.slane %v11474_v35, %v8279_v63 }
0x16cd   :  { %8124 = vadd.xlane.f32.xlu1 %v8123_v13 }
0x16d1   :  { %8127 = vadd.xlane.f32.xlu1 %v8126_v41 }
0x1702   :  { %v8006_v2 = vpop.xlane.xlu0 %8005 }
0x1703   :  { %v8050_v34 = vmul.f32 0.0625, %v8006_v2 }
0x1705   :  { %v8146_v18 = vmul.f32 %v8050_v34, %v8050_v34  ;;  %v8194_v36 = vsub.f32 %v14388_v23, %v8050_v34 }
0x1706   :  { %v8003_v15 = vpop.xlane.xlu0 %8002 }
0x1707   :  { %v8049_v24 = vmul.f32 0.0625, %v8003_v15 }
0x1709   :  { %v8145_v16 = vmul.f32 %v8049_v24, %v8049_v24  ;;  %v8193_v61 = vsub.f32 %v14391_v37, %v8049_v24 }
0x170a   :  { %v8086_v3 = vpop.xlane.xlu0 %8085 }
0x170b   :  { %v8130_v1 = vmul.f32 0.0625, %v8086_v3 }
0x170d   :  { %v8162_v26 = vsub.f32 %v8130_v1, %v8146_v18 }
0x170e   :  { %v8083_v53 = vpop.xlane.xlu0 %8082 }
0x170f   :  { %v8178_v55 = vmax.f32 %v8162_v26, 0.0  ;;  %v8129_v28 = vmul.f32 0.0625, %v8083_v53 }
0x1711   :  { %v8210_v17 = vadd.f32 1e-05, %v8178_v55  ;;  %v8161_v5 = vsub.f32 %v8129_v28, %v8145_v16 }
0x1712   :  { %v8012_v21 = vpop.xlane.xlu0 %8011 }
0x1713   :  { %v8177_v57 = vmax.f32 %v8161_v5, 0.0  ;;  %11440 = vrsqrt.f32 %v8210_v17  ;;  %v14529_v44 = vmul.f32 0.0625, %v8012_v21 }
0x1715   :  { %v8209_v54 = vadd.f32 1e-05, %v8177_v57  ;;  %v8148_v49 = vmul.f32 %v14529_v44, %v14529_v44 }
0x1716   :  { %v8009_v27 = vpop.xlane.xlu0 %8008 }
0x1717   :  { %11442 = vrsqrt.f32 %v8209_v54  ;;  %v14533_v43 = vmul.f32 0.0625, %v8009_v27 }
0x1719   :  { %v8147_v0 = vmul.f32 %v14533_v43, %v14533_v43 }
0x171a   :  { %v8092_v30 = vpop.xlane.xlu0 %8091 }
0x171b   :  { %v8132_v38 = vmul.f32 0.0625, %v8092_v30 }
0x171d   :  { %v8164_v7 = vsub.f32 %v8132_v38, %v8148_v49  ;;  %v11441_v12 = vpop.eup %11440 }
0x171e   :  { %v8089_v46 = vpop.xlane.xlu0 %8088  ;;  %v8242_v60 = vmul.f32 %v11441_v12, %v8194_v36  ;;  %v8195_v12 = vsub.f32 %v14409_v19, %v14533_v43 }
0x171f   :  { %v8180_v56 = vmax.f32 %v8164_v7, 0.0  ;;  %v8131_v9 = vmul.f32 0.0625, %v8089_v46  ;;  %v8196_v46 = vsub.f32 %v14404_v31, %v14529_v44 }
0x1720   :  { %v8262_v2 = vmul.f32 %v14545_v59, %v8242_v60 }
0x1721   :  { %v11443_v39 = vpop.eup %11442  ;;  %v8212_v40 = vadd.f32 1e-05, %v8180_v56  ;;  %v8163_v50 = vsub.f32 %v8131_v9, %v8147_v0 }
0x1722   :  { %v8030_v32 = vpop.xlane.xlu1 %8029  ;;  %v8018_v11 = vpop.xlane.xlu0 %8017  ;;  %v8241_v51 = vmul.f32 %v11443_v39, %v8193_v61  ;;  %v8282_v1 = vadd.f32 %v14548_v42, %v8262_v2 }
0x1723   :  { %v8179_v23 = vmax.f32 %v8163_v50, 0.0  ;;  %11444 = vrsqrt.f32 %v8212_v40  ;;  %v14552_v15 = vmul.f32 0.0625, %v8030_v32  ;;  %v14554_v52 = vmul.f32 0.0625, %v8018_v11 }
0x1724   :  { %v8261_v37 = vmul.f32 %v14545_v59, %v8241_v51 }
0x1725   :  { %v8211_v29 = vadd.f32 1e-05, %v8179_v23  ;;  %v8154_v26 = vmul.f32 %v14552_v15, %v14552_v15  ;;  %v8150_v53 = vmul.f32 %v14554_v52, %v14554_v52 }
0x1726   :  { %v8027_v13 = vpop.xlane.xlu1 %8026  ;;  %v8015_v8 = vpop.xlane.xlu0 %8014  ;;  %v8281_v41 = vadd.f32 %v14548_v42, %v8261_v37 }
0x1727   :  { %11446 = vrsqrt.f32 %v8211_v29  ;;  %v14556_v34 = vmul.f32 0.0625, %v8027_v13  ;;  %v14558_v3 = vmul.f32 0.0625, %v8015_v8 }
0x1728   :  { %8297 = vxpose.xlu0.b32.start [1/8] (short) (narrow) %v8281_v41, 16 }
0x1729   :  { %v8153_v5 = vmul.f32 %v14556_v34, %v14556_v34  ;;  %v8149_v21 = vmul.f32 %v14558_v3, %v14558_v3 }
0x172a   :  { %v8110_v18 = vpop.xlane.xlu1 %8109  ;;  %v8098_v24 = vpop.xlane.xlu0 %8097 }
0x172b   :  { %v8138_v16 = vmul.f32 0.0625, %v8110_v18  ;;  %v8134_v55 = vmul.f32 0.0625, %v8098_v24 }
0x172c   :  { %8298 = vxpose.xlu0.b32.cont [2/8] (short) (narrow) %v8282_v1, 16 }
0x172d   :  { %v8170_v28 = vsub.f32 %v8138_v16, %v8154_v26  ;;  %v8166_v17 = vsub.f32 %v8134_v55, %v8150_v53  ;;  %v11445_v27 = vpop.eup %11444 }
0x172e   :  { %v8107_v57 = vpop.xlane.xlu1 %8106  ;;  %v8095_v54 = vpop.xlane.xlu0 %8094  ;;  %v8244_v50 = vmul.f32 %v11445_v27, %v8196_v46 }
0x172f   :  { %v8186_v30 = vmax.f32 %v8170_v28, 0.0  ;;  %v8182_v49 = vmax.f32 %v8166_v17, 0.0  ;;  %v8137_v38 = vmul.f32 0.0625, %v8107_v57  ;;  %v8133_v7 = vmul.f32 0.0625, %v8095_v54 }
0x1730   :  { %v8264_v43 = vmul.f32 %v14545_v59, %v8244_v50 }
0x1731   :  { %v11447_v0 = vpop.eup %11446  ;;  %v8218_v56 = vadd.f32 1e-05, %v8186_v30  ;;  %v8169_v9 = vsub.f32 %v8137_v38, %v8153_v5  ;;  %v8165_v36 = vsub.f32 %v8133_v7, %v8149_v21  ;;  %v8214_v61 = vadd.f32 1e-05, %v8182_v49 }
0x1732   :  { %v8036_v63 = vpop.xlane.xlu1 %8035  ;;  %v8024_v39 = vpop.xlane.xlu0 %8023  ;;  %v8243_v40 = vmul.f32 %v11447_v0, %v8195_v12  ;;  %v8284_v41 = vadd.f32 %v14548_v42, %v8264_v43  ;;  %v8202_v49 = vsub.f32 %v14429_v25, %v14552_v15  ;;  %v8201_v38 = vsub.f32 %v14435_v47, %v14556_v34 }
0x1733   :  { %v8185_v32 = vmax.f32 %v8169_v9, 0.0  ;;  %v8181_v11 = vmax.f32 %v8165_v36, 0.0  ;;  %11448 = vrsqrt.f32 %v8218_v56  ;;  %v14576_v60 = vmul.f32 0.0625, %v8036_v63 }
0x1734   :  { %v8263_v51 = vmul.f32 %v14545_v59, %v8243_v40  ;;  %11450 = vrsqrt.f32 %v8214_v61  ;;  %v14580_v37 = vmul.f32 0.0625, %v8024_v39  ;;  %v8198_v36 = vsub.f32 %v14422_v45, %v14554_v52 }
0x1735   :  { %v8217_v35 = vadd.f32 1e-05, %v8185_v32  ;;  %v8213_v58 = vadd.f32 1e-05, %v8181_v11  ;;  %v8156_v2 = vmul.f32 %v14576_v60, %v14576_v60  ;;  %v8197_v61 = vsub.f32 %v14432_v4, %v14558_v3 }
0x1736   :  { %v8033_v31 = vpop.xlane.xlu1 %8032  ;;  %v8021_v44 = vpop.xlane.xlu0 %8020  ;;  %v8283_v19 = vadd.f32 %v14548_v42, %v8263_v51  ;;  %v8152_v16 = vmul.f32 %v14580_v37, %v14580_v37 }
0x1737   :  { %11452 = vrsqrt.f32 %v8217_v35  ;;  %v14578_v23 = vmul.f32 0.0625, %v8021_v44  ;;  %v14582_v29 = vmul.f32 0.0625, %v8033_v31 }
0x1738   :  { %11454 = vrsqrt.f32 %v8213_v58  ;;  %8299 = vxpose.xlu0.b32.cont [3/8] (short) (narrow) %v8283_v19, 16 }
0x1739   :  { %v8151_v18 = vmul.f32 %v14578_v23, %v14578_v23  ;;  %v8155_v55 = vmul.f32 %v14582_v29, %v14582_v29 }
0x173a   :  { %v8116_v13 = vpop.xlane.xlu1 %8115  ;;  %v8101_v8 = vpop.xlane.xlu0 %8100 }
0x173b   :  { %v8140_v24 = vmul.f32 0.0625, %v8116_v13  ;;  %v8135_v1 = vmul.f32 0.0625, %v8101_v8 }
0x173c   :  { %8300 = vxpose.xlu0.b32.cont [4/8] (short) (narrow) %v8284_v41, 16  ;;  %v8199_v41 = vsub.f32 %v14470_v62, %v14578_v23 }
0x173d   :  { %v8172_v26 = vsub.f32 %v8140_v24, %v8156_v2  ;;  %v8167_v53 = vsub.f32 %v8135_v1, %v8151_v18  ;;  %v11449_v5 = vpop.eup %11448 }
0x173e   :  { %v8113_v28 = vpop.xlane.xlu1 %8112  ;;  %v8104_v17 = vpop.xlane.xlu0 %8103  ;;  %v8250_v40 = vmul.f32 %v11449_v5, %v8202_v49 }
0x173f   :  { %v8188_v21 = vmax.f32 %v8172_v26, 0.0  ;;  %v8183_v57 = vmax.f32 %v8167_v53, 0.0  ;;  %v8139_v54 = vmul.f32 0.0625, %v8113_v28  ;;  %v8136_v27 = vmul.f32 0.0625, %v8104_v17  ;;  %v11451_v30 = vpop.eup %11450 }
0x1740   :  { %v8246_v34 = vmul.f32 %v11451_v30, %v8198_v36  ;;  %v8270_v4 = vmul.f32 %v14545_v59, %v8250_v40  ;;  %v8204_v28 = vsub.f32 %v14463_v20, %v14576_v60  ;;  %v8203_v17 = vsub.f32 %v14473_v48, %v14582_v29 }
0x1741   :  { %v11453_v7 = vpop.eup %11452  ;;  %v8220_v46 = vadd.f32 1e-05, %v8188_v21  ;;  %v8215_v12 = vadd.f32 1e-05, %v8183_v57  ;;  %v8171_v0 = vsub.f32 %v8139_v54, %v8155_v55  ;;  %v8168_v56 = vsub.f32 %v8136_v27, %v8152_v16 }
0x1742   :  { %v11455_v9 = vpop.eup %11454  ;;  %v8042_v63 = vpop.xlane.xlu1 %8041  ;;  %v8249_v39 = vmul.f32 %v11453_v7, %v8201_v38  ;;  %v8266_v58 = vmul.f32 %v14545_v59, %v8246_v34  ;;  %v8290_v44 = vadd.f32 %v14548_v42, %v8270_v4  ;;  %v8200_v54 = vsub.f32 %v14458_v22, %v14580_v37 }
0x1743   :  { %v8187_v50 = vmax.f32 %v8171_v0, 0.0  ;;  %v8184_v25 = vmax.f32 %v8168_v56, 0.0  ;;  %11456 = vrsqrt.f32 %v8215_v12  ;;  %v8245_v15 = vmul.f32 %v11455_v9, %v8197_v61 }
0x1744   :  { %v8269_v47 = vmul.f32 %v14545_v59, %v8249_v39  ;;  %11458 = vrsqrt.f32 %v8220_v46  ;;  %v14605_v52 = vmul.f32 0.0625, %v8042_v63  ;;  %v8286_v8 = vadd.f32 %v14548_v42, %v8266_v58 }
0x1745   :  { %v8219_v32 = vadd.f32 1e-05, %v8187_v50  ;;  %v8216_v11 = vadd.f32 1e-05, %v8184_v25  ;;  %v8265_v45 = vmul.f32 %v14545_v59, %v8245_v15 }
0x1746   :  { %v8039_v51 = vpop.xlane.xlu1 %8038  ;;  %v8289_v35 = vadd.f32 %v14548_v42, %v8269_v47  ;;  %v8158_v19 = vmul.f32 %v14605_v52, %v14605_v52  ;;  %v8206_v34 = vsub.f32 %v14496_v10, %v14605_v52 }
0x1747   :  { %11460 = vrsqrt.f32 %v8219_v32  ;;  %v8285_v3 = vadd.f32 %v14548_v42, %v8265_v45  ;;  %v8061_v43 = vmul.f32 0.0625, %v8039_v51 }
0x1748   :  { %11462 = vrsqrt.f32 %v8216_v11  ;;  %8331 = vxpose.xlu1.b32.start [1/8] (short) (narrow) %v8289_v35, 16 }
0x1749   :  { %8301 = vxpose.xlu0.b32.cont [5/8] (short) (narrow) %v8285_v3, 16  ;;  %v8157_v26 = vmul.f32 %v8061_v43, %v8061_v43  ;;  %v8205_v32 = vsub.f32 %v14501_v6, %v8061_v43 }
0x174a   :  { %v8122_v31 = vpop.xlane.xlu1 %8121 }
0x174b   :  { %v8142_v13 = vmul.f32 0.0625, %v8122_v31 }
0x174c   :  { %8332 = vxpose.xlu1.b32.cont [2/8] (short) (narrow) %v8290_v44, 16 }
0x174d   :  { %v8174_v2 = vsub.f32 %v8142_v13, %v8158_v19  ;;  %v11457_v18 = vpop.eup %11456  ;;  %8302 = vxpose.xlu0.b32.cont [6/8] (short) (narrow) %v8286_v8, 16 }
0x174e   :  { %v8119_v24 = vpop.xlane.xlu1 %8118  ;;  %v11459_v1 = vpop.eup %11458  ;;  %v8247_v55 = vmul.f32 %v11457_v18, %v8199_v41 }
0x174f   :  { %v8190_v53 = vmax.f32 %v8174_v2, 0.0  ;;  %v8141_v16 = vmul.f32 0.0625, %v8119_v24  ;;  %v8252_v49 = vmul.f32 %v11459_v1, %v8204_v28 }
0x1750   :  { %v8267_v62 = vmul.f32 %v14545_v59, %v8247_v55 }
0x1751   :  { %v11461_v5 = vpop.eup %11460  ;;  %v8222_v21 = vadd.f32 1e-05, %v8190_v53  ;;  %v8173_v57 = vsub.f32 %v8141_v16, %v8157_v26  ;;  %v8272_v0 = vmul.f32 %v14545_v59, %v8252_v49 }
0x1752   :  { %v11463_v23 = vpop.eup %11462  ;;  %v8048_v27 = vpop.xlane.xlu1 %8047  ;;  %v8251_v30 = vmul.f32 %v11461_v5, %v8203_v17  ;;  %v8287_v7 = vadd.f32 %v14548_v42, %v8267_v62 }
0x1753   :  { %v8189_v38 = vmax.f32 %v8173_v57, 0.0  ;;  %v8248_v60 = vmul.f32 %v11463_v23, %v8200_v54  ;;  %11464 = vrsqrt.f32 %v8222_v21  ;;  %v8292_v9 = vadd.f32 %v14548_v42, %v8272_v0 }
0x1754   :  { %v8271_v20 = vmul.f32 %v14545_v59, %v8251_v30  ;;  %8303 = vxpose.xlu0.b32.cont [7/8] (short) (narrow) %v8287_v7, 16  ;;  %v8064_v36 = vmul.f32 0.0625, %v8048_v27 }
0x1755   :  { %v8221_v48 = vadd.f32 1e-05, %v8189_v38  ;;  %v8268_v12 = vmul.f32 %v14545_v59, %v8248_v60 }
0x1756   :  { %v8045_v29 = vpop.xlane.xlu1 %8044  ;;  %v8291_v46 = vadd.f32 %v14548_v42, %v8271_v20  ;;  %v8160_v25 = vmul.f32 %v8064_v36, %v8064_v36  ;;  %v8208_v13 = vsub.f32 %v14513_v33, %v8064_v36 }
0x1757   :  { %11466 = vrsqrt.f32 %v8221_v48  ;;  %v8063_v22 = vmul.f32 0.0625, %v8045_v29  ;;  %v8288_v37 = vadd.f32 %v14548_v42, %v8268_v12 }
0x1758   :  { %8333 = vxpose.xlu1.b32.cont [3/8] (short) (narrow) %v8291_v46, 16 }
0x1759   :  { %8304 = vxpose.xlu0.b32.end [8/8] (short) (narrow) %v8288_v37, 16  ;;  %v8159_v61 = vmul.f32 %v8063_v22, %v8063_v22  ;;  %v8207_v6 = vsub.f32 %v14517_v14, %v8063_v22 }
0x175a   :  { %v8125_v56 = vpop.xlane.xlu1 %8124 }
0x175b   :  { %v8143_v63 = vmul.f32 0.0625, %v8125_v56 }
0x175c   :  { %8334 = vxpose.xlu1.b32.cont [4/8] (short) (narrow) %v8292_v9, 16 }
0x175d   :  { %v8175_v39 = vsub.f32 %v8143_v63, %v8159_v61  ;;  %v11465_v50 = vpop.eup %11464 }
0x175e   :  { %v8128_v40 = vpop.xlane.xlu1 %8127  ;;  %v8254_v4 = vmul.f32 %v11465_v50, %v8206_v34 }
0x175f   :  { %v8191_v47 = vmax.f32 %v8175_v39, 0.0  ;;  %v8144_v15 = vmul.f32 0.0625, %v8128_v40 }
0x1760   :  { %v8274_v19 = vmul.f32 %v14545_v59, %v8254_v4 }
0x1761   :  { %v11467_v11 = vpop.eup %11466  ;;  %v8223_v51 = vadd.f32 1e-05, %v8191_v47  ;;  %v8176_v35 = vsub.f32 %v8144_v15, %v8160_v25 }
0x1762   :  { %v8253_v45 = vmul.f32 %v11467_v11, %v8205_v32  ;;  %v8294_v10 = vadd.f32 %v14548_v42, %v8274_v19 }
0x1763   :  { %11468 = vrsqrt.f32 %v8223_v51  ;;  %v8192_v3 = vmax.f32 %v8176_v35, 0.0 }
0x1764   :  { %v8273_v58 = vmul.f32 %v14545_v59, %v8253_v45 }
0x1765   :  { %v8224_v31 = vadd.f32 1e-05, %v8192_v3 }
0x1766   :  { %v8293_v44 = vadd.f32 %v14548_v42, %v8273_v58 }
0x1767   :  { %11470 = vrsqrt.f32 %v8224_v31 }
0x1768   :  { %8335 = vxpose.xlu1.b32.cont [5/8] (short) (narrow) %v8293_v44, 16 }
0x176c   :  { %8336 = vxpose.xlu1.b32.cont [6/8] (short) (narrow) %v8294_v10, 16 }
0x176d   :  { %v11469_v52 = vpop.eup %11468 }
0x176e   :  { %v8255_v43 = vmul.f32 %v11469_v52, %v8207_v6 }
0x1770   :  { %v8275_v8 = vmul.f32 %v14545_v59, %v8255_v43 }
0x1771   :  { %v11471_v41 = vpop.eup %11470 }
0x1772   :  { %v8295_v2 = vadd.f32 %v14548_v42, %v8275_v8  ;;  %v8256_v18 = vmul.f32 %v11471_v41, %v8208_v13 }
0x1774   :  { %8337 = vxpose.xlu1.b32.cont [7/8] (short) (narrow) %v8295_v2, 16  ;;  %v8276_v24 = vmul.f32 %v14545_v59, %v8256_v18 }
0x1776   :  { %v8296_v1 = vadd.f32 %v14548_v42, %v8276_v24 }
0x1778   :  { %8338 = vxpose.xlu1.b32.end [8/8] (short) (narrow) %v8296_v1, 16 }
0x17bd   :  { %v8313_v26 = vpop.trf.xlu0 }
0x17be   :  { %8329 = vst.msk [vmem:[%s14672_s14] sm:$0xff] %vm2403_vm4, %v8313_v26 }
0x17c1   :  { %v8314_v14 = vpop.trf.xlu0 }
0x17c2   :  { %8330 = vst.msk [vmem:[%s14672_s14 + $0x8] sm:$0xff] %vm2403_vm4, %v8314_v14 }
0x17dc   :  { %v8347_v33 = vpop.trf.xlu1 }
0x17dd   :  { %8937 = vst.msk [vmem:[%s14672_s14 + $0x10] sm:$0xff] %vm2403_vm4, %v8347_v33 }
0x17e0   :  { %v8348_v59 = vpop.trf.xlu1 }
0x17e1   :  { %8938 = vst.msk [vmem:[%s14672_s14 + $0x18] sm:$0xff] %vm2403_vm4, %v8348_v59 }

</bundles_post_ra>
